<compile_context>
chip_gen: v6e
topology: v6e:2x2x1
jax: 0.10.0
libtpu: 0.0.40
codegen_flags: <defaults>
</compile_context>

<pallas_src>
import functools

import numpy as np
import jax
import jax.numpy as jnp
from jax.experimental import pallas as pl
from jax.experimental.pallas import tpu as pltpu

_VMEM_LIMIT = 32 * 1024 * 1024


def _round_up(x, m):
    return ((x + m - 1) // m) * m


# ---------------------------------------------------------------------------
# Pallas kernels
# ---------------------------------------------------------------------------
def _mm_bias_act_kernel(a_ref, b_ref, bias_ref, o_ref, *, act):
    acc = jnp.dot(a_ref[...], b_ref[...], preferred_element_type=jnp.float32)
    acc = acc + bias_ref[...]
    if act == "relu":
        acc = jnp.maximum(acc, 0.0)
    elif act == "sigmoid":
        acc = jax.nn.sigmoid(acc)
    o_ref[...] = acc.astype(o_ref.dtype)


def matmul_bias_act(a, b, bias=None, act="none", out_dtype=jnp.bfloat16,
                    block_m=512):
    """o = act(a @ b + bias); a:(M,K)  b:(K,N)  bias:(N,).

    bf16 operands / f32 accumulation.  Output channels are padded to a
    multiple of 128 inside the kernel (lane-dense stores) and sliced outside.
    """
    M, K = a.shape
    K2, N = b.shape
    assert K == K2
    Np = _round_up(N, 128)

    a = a.astype(jnp.bfloat16)
    b = b.astype(jnp.bfloat16)
    if Np != N:
        b = jnp.pad(b, ((0, 0), (0, Np - N)))
    if bias is None:
        bias2 = jnp.zeros((1, Np), jnp.float32)
    else:
        bias2 = jnp.pad(bias.astype(jnp.float32), (0, Np - N)).reshape(1, Np)

    bm = min(block_m, _round_up(M, 8))
    grid_m = pl.cdiv(M, bm)

    out = pl.pallas_call(
        functools.partial(_mm_bias_act_kernel, act=act),
        out_shape=jax.ShapeDtypeStruct((M, Np), out_dtype),
        grid=(grid_m,),
        in_specs=[
            pl.BlockSpec((bm, K), lambda i: (i, 0)),
            pl.BlockSpec((K, Np), lambda i: (0, 0)),
            pl.BlockSpec((1, Np), lambda i: (0, 0)),
        ],
        out_specs=pl.BlockSpec((bm, Np), lambda i: (i, 0)),
        compiler_params=pltpu.CompilerParams(
            dimension_semantics=("parallel",),
            vmem_limit_bytes=_VMEM_LIMIT),
    )(a, b, bias2)
    return out if Np == N else out[:, :N]


def _blmm_kernel(u_ref, x_ref, o_ref):
    u = u_ref[...]
    x = x_ref[0]
    if u.shape[1] == 1:          # degenerate K=1 contraction -> broadcast mul
        res = u.astype(jnp.float32) * x.astype(jnp.float32)
    else:
        res = jnp.dot(u, x, preferred_element_type=jnp.float32)
    o_ref[0] = res.astype(o_ref.dtype)


def batched_left_matmul(u, x, out_dtype=jnp.bfloat16, block_d=2048):
    """out[b] = u @ x[b];  u:(P,K)  x:(B,K,D) -> (B,P,D).

    Used for H-axis bilinear interpolation and for global average pooling.
    The large D axis stays on lanes; no transposes.
    """
    B, K, D = x.shape
    P, K2 = u.shape
    assert K == K2
    u = u.astype(jnp.bfloat16)
    x = x.astype(jnp.bfloat16)
    bd = D if D <= block_d else block_d
    grid_d = pl.cdiv(D, bd)

    return pl.pallas_call(
        _blmm_kernel,
        out_shape=jax.ShapeDtypeStruct((B, P, D), out_dtype),
        grid=(B, grid_d),
        in_specs=[
            pl.BlockSpec((P, K), lambda b, d: (0, 0)),
            pl.BlockSpec((1, K, bd), lambda b, d: (b, 0, d)),
        ],
        out_specs=pl.BlockSpec((1, P, bd), lambda b, d: (b, 0, d)),
        compiler_params=pltpu.CompilerParams(
            dimension_semantics=("parallel", "parallel"),
            vmem_limit_bytes=_VMEM_LIMIT),
    )(u, x)


def _scale_kernel(x_ref, s_ref, o_ref):
    o_ref[...] = (x_ref[...] * s_ref[...]).astype(o_ref.dtype)


def channel_scale(x_nhwc, att):
    """FC-attention re-weighting: (N,H,W,C) * (N,C) broadcast over H,W."""
    N, H, W, C = x_nhwc.shape
    x3 = x_nhwc.reshape(N, H * W, C).astype(jnp.bfloat16)
    s3 = att.reshape(N, 1, C).astype(jnp.bfloat16)
    out = pl.pallas_call(
        _scale_kernel,
        out_shape=jax.ShapeDtypeStruct((N, H * W, C), jnp.bfloat16),
        grid=(N,),
        in_specs=[
            pl.BlockSpec((1, H * W, C), lambda n: (n, 0, 0)),
            pl.BlockSpec((1, 1, C), lambda n: (n, 0, 0)),
        ],
        out_specs=pl.BlockSpec((1, H * W, C), lambda n: (n, 0, 0)),
        compiler_params=pltpu.CompilerParams(
            dimension_semantics=("parallel",),
            vmem_limit_bytes=_VMEM_LIMIT),
    )(x3, s3)
    return out.reshape(N, H, W, C)


def _fuse_cls_kernel(b1, b2, b3, b4, b5, b6, w_ref, bias_ref, o_ref):
    s = (b1[...].astype(jnp.float32) + b2[...].astype(jnp.float32)
         + b3[...].astype(jnp.float32) + b4[...].astype(jnp.float32)
         + b5[...].astype(jnp.float32) + b6[...].astype(jnp.float32))
    s = jnp.maximum(s, 0.0).astype(jnp.bfloat16)
    acc = jnp.dot(s, w_ref[...], preferred_element_type=jnp.float32)
    acc = acc + bias_ref[...]
    o_ref[...] = acc.astype(o_ref.dtype)


def fused_sum_relu_cls(branches, w, bias, out_dtype=jnp.bfloat16, block_m=256):
    """logits = relu(sum(branches)) @ w + bias, fused in a single kernel.

    branches: 6 arrays of shape (M, C);  w:(C, n_cls);  bias:(n_cls,).
    Avoids materializing the stacked 6x feature map in HBM.
    """
    M, C = branches[0].shape
    C2, N = w.shape
    assert C == C2
    Np = _round_up(N, 128)
    w = w.astype(jnp.bfloat16)
    if Np != N:
        w = jnp.pad(w, ((0, 0), (0, Np - N)))
    bias2 = jnp.pad(bias.astype(jnp.float32), (0, Np - N)).reshape(1, Np)

    bm = min(block_m, _round_up(M, 8))
    grid_m = pl.cdiv(M, bm)
    branch_spec = pl.BlockSpec((bm, C), lambda i: (i, 0))

    out = pl.pallas_call(
        _fuse_cls_kernel,
        out_shape=jax.ShapeDtypeStruct((M, Np), out_dtype),
        grid=(grid_m,),
        in_specs=[branch_spec] * 6 + [
            pl.BlockSpec((C, Np), lambda i: (0, 0)),
            pl.BlockSpec((1, Np), lambda i: (0, 0)),
        ],
        out_specs=pl.BlockSpec((bm, Np), lambda i: (i, 0)),
        compiler_params=pltpu.CompilerParams(
            dimension_semantics=("parallel",),
            vmem_limit_bytes=_VMEM_LIMIT),
    )(*[b.astype(jnp.bfloat16) for b in branches], w, bias2)
    return out if Np == N else out[:, :N]


# ---------------------------------------------------------------------------
# Ops built on the kernels (NHWC everywhere; no transposes)
# ---------------------------------------------------------------------------
def conv2d(x, w, b, stride=1, act="relu"):
    """kxk conv, padding k//2, NHWC in/out.  w:(Cout,Cin,kh,kw)."""
    N, H, W, Cin = x.shape
    Cout, Cin2, kh, kw = w.shape
    assert Cin == Cin2
    pad = kh // 2
    xp = jnp.pad(x, ((0, 0), (pad, pad), (pad, pad), (0, 0)))
    Ho = (H + 2 * pad - kh) // stride + 1
    Wo = (W + 2 * pad - kw) // stride + 1
    cols = []
    for i in range(kh):
        for j in range(kw):
            cols.append(
                xp[:, i:i + stride * (Ho - 1) + 1:stride,
                       j:j + stride * (Wo - 1) + 1:stride, :])
    # TODO(synk): im2col still materializes the patch matrix in HBM; fuse it
    # into the GEMM kernel via manual overlapping-window DMA for large inputs.
    patches = jnp.concatenate(cols, axis=-1).reshape(N * Ho * Wo, kh * kw * Cin)
    wm = jnp.transpose(w, (2, 3, 1, 0)).reshape(kh * kw * Cin, Cout)
    out = matmul_bias_act(patches, wm, b, act=act)
    return out.reshape(N, Ho, Wo, Cout)


def conv1x1(x, w, b, act="none"):
    """1x1 conv, NHWC.  w:(Cout,Cin)."""
    N, H, W, C = x.shape
    Cout = w.shape[0]
    out = matmul_bias_act(x.reshape(N * H * W, C), jnp.transpose(w), b, act=act)
    return out.reshape(N, H, W, Cout)


def _interp_matrix(n_in, n_out):
    """align_corners=True bilinear interpolation matrix (n_out, n_in)."""
    if n_in == 1:
        return np.ones((n_out, 1), np.float32)
    if n_out == 1:
        m = np.zeros((1, n_in), np.float32)
        m[0, 0] = 1.0
        return m
    src = np.arange(n_out, dtype=np.float64) * (n_in - 1) / (n_out - 1)
    lo = np.floor(src).astype(np.int64)
    hi = np.minimum(lo + 1, n_in - 1)
    frac = (src - lo).astype(np.float32)
    m = np.zeros((n_out, n_in), np.float32)
    m[np.arange(n_out), lo] += 1.0 - frac
    m[np.arange(n_out), hi] += frac
    return m


def bilinear_up(x, scale):
    """nn.UpsamplingBilinear2d(scale_factor=scale), NHWC, no transposes.

    W axis: single GEMM with the Kronecker matrix (Uw ⊗ I_C).
    H axis: per-batch left-matmul kernel.
    """
    N, H, W, C = x.shape
    Ho, Wo = H * scale, W * scale
    Uw = _interp_matrix(W, Wo)                                    # (Wo, W)
    # TODO(synk): (Uw ⊗ I_C) is block-sparse; at large resolutions replace the
    # dense GEMM with an in-kernel lerp or fold it into the preceding 1x1 conv.
    Bw = np.kron(Uw.T, np.eye(C, dtype=np.float32))               # (W*C, Wo*C)
    t = matmul_bias_act(x.reshape(N * H, W * C), jnp.asarray(Bw), act="none")
    t = t.reshape(N, H, Wo * C)
    Uh = _interp_matrix(H, Ho)                                    # (Ho, H)
    t = batched_left_matmul(jnp.asarray(Uh), t)                   # (N, Ho, Wo*C)
    return t.reshape(N, Ho, Wo, C)


def global_avg_pool(x_nhwc):
    """(N,H,W,C) -> (N,C) mean over H,W with channels on the lane axis."""
    N, H, W, C = x_nhwc.shape
    u = jnp.asarray(np.full((1, H * W), 1.0 / (H * W), np.float32))
    pooled = batched_left_matmul(u, x_nhwc.reshape(N, H * W, C))  # (N,1,C)
    return pooled.reshape(N, C)


# ---------------------------------------------------------------------------
# Backbone (XceptionA-style, simplified; BN folded into conv) and Decoder
# ---------------------------------------------------------------------------
def fc_attention(enc4, p):
    pooled = global_avg_pool(enc4)                                       # (N, C)
    fc = matmul_bias_act(pooled, p["fc_w"], p["fc_b"], act="none")       # (N, fc_dim)
    att = matmul_bias_act(fc, p["att_w"], p["att_b"], act="sigmoid")     # (N, C)
    fca = channel_scale(enc4, att)
    return fc, fca


def backbone_forward(x, p):
    x1 = conv2d(x, *p["conv1"], stride=2)        # /2
    enc2 = conv2d(x1, *p["enc2"], stride=2)      # /4
    enc3 = conv2d(enc2, *p["enc3"], stride=2)    # /8
    enc4 = conv2d(enc3, *p["enc4"], stride=2)    # /16
    fc, fca = fc_attention(enc4, p)
    return enc2, enc3, enc4, fc, fca


def backbone_forward_concat(fca_up, e2p, e3p, e4p, p):
    enc2 = conv2d(jnp.concatenate([fca_up, e2p], axis=-1), *p["enc2c"], stride=2)
    enc3 = conv2d(jnp.concatenate([enc2, e3p], axis=-1), *p["enc3c"], stride=2)
    enc4 = conv2d(jnp.concatenate([enc3, e4p], axis=-1), *p["enc4c"], stride=2)
    fc, fca = fc_attention(enc4, p)
    return enc2, enc3, enc4, fc, fca


def decoder_forward(enc1_2, enc2_2, enc3_2, fca1, fca2, fca3, p):
    e1 = conv1x1(enc1_2, *p["enc_c1"])
    e2 = bilinear_up(conv1x1(enc2_2, *p["enc_c2"]), 2)
    e3 = bilinear_up(conv1x1(enc3_2, *p["enc_c3"]), 4)
    f1 = bilinear_up(conv1x1(fca1, *p["fca_c1"]), 4)
    f2 = bilinear_up(conv1x1(fca2, *p["fca_c2"]), 8)
    f3 = bilinear_up(conv1x1(fca3, *p["fca_c3"]), 16)
    N, H4, W4, dch = e1.shape
    M = N * H4 * W4
    branches = [t.reshape(M, dch) for t in (e1, e2, e3, f1, f2, f3)]
    cls_w, cls_b = p["cls"]                          # (n_classes, dch), (n_classes,)
    logits2d = fused_sum_relu_cls(branches, jnp.transpose(cls_w), cls_b)
    logits = logits2d.reshape(N, H4, W4, -1)
    return bilinear_up(logits, 4)


def dfanet_forward(x_nchw, params):
    # NCHW -> NHWC exactly once at the model boundary.
    x = jnp.transpose(x_nchw, (0, 2, 3, 1)).astype(jnp.bfloat16)
    e1_2, e1_3, e1_4, fc1, fca1 = backbone_forward(x, params["b1"])
    fca1_up = bilinear_up(fca1, 4)
    e2_2, e2_3, e2_4, fc2, fca2 = backbone_forward_concat(
        fca1_up, e1_2, e1_3, e1_4, params["b2"])
    fca2_up = bilinear_up(fca2, 4)
    e3_2, e3_3, e3_4, fc3, fca3 = backbone_forward_concat(
        fca2_up, e2_2, e2_3, e2_4, params["b3"])
    out = decoder_forward(e1_2, e2_2, e3_2, fca1, fca2, fca3, params["dec"])
    # NHWC -> NCHW once at the output boundary.
    return jnp.transpose(out, (0, 3, 1, 2)).astype(jnp.float32)


# ---------------------------------------------------------------------------
# Deterministic parameter init
# ---------------------------------------------------------------------------
def _init_conv(key, cout, cin, k):
    kw, kb = jax.random.split(key)
    w = jax.random.normal(kw, (cout, cin, k, k), jnp.float32) / jnp.sqrt(cin * k * k)
    b = 0.01 * jax.random.normal(kb, (cout,), jnp.float32)
    return (w, b)


def _init_1x1(key, cout, cin):
    kw, kb = jax.random.split(key)
    w = jax.random.normal(kw, (cout, cin), jnp.float32) / jnp.sqrt(cin)
    b = jnp.zeros((cout,), jnp.float32)
    return (w, b)


def _init_linear(key, cin, cout):
    w = jax.random.normal(key, (cin, cout), jnp.float32) / jnp.sqrt(cin)
    b = jnp.zeros((cout,), jnp.float32)
    return w, b


def init_backbone(key, cin, c1, c2, c3, c4, fc_dim):
    ks = jax.random.split(key, 9)
    fc_w, fc_b = _init_linear(ks[7], c4, fc_dim)
    att_w, att_b = _init_linear(ks[8], fc_dim, c4)
    return {
        "conv1": _init_conv(ks[0], c1, cin, 3),
        "enc2": _init_conv(ks[1], c2, c1, 3),
        "enc3": _init_conv(ks[2], c3, c2, 3),
        "enc4": _init_conv(ks[3], c4, c3, 3),
        "enc2c": _init_conv(ks[4], c2, c4 + c2, 3),
        "enc3c": _init_conv(ks[5], c3, c2 + c3, 3),
        "enc4c": _init_conv(ks[6], c4, c3 + c4, 3),
        "fc_w": fc_w, "fc_b": fc_b, "att_w": att_w, "att_b": att_b,
    }


def init_dfanet(key, n_classes, cin=3, c1=8, c2=16, c3=32, c4=48, fc_dim=64, dch=16):
    kb1, kb2, kb3, kd = jax.random.split(key, 4)
    kds = jax.random.split(kd, 7)
    dec = {
        "enc_c1": _init_1x1(kds[0], dch, c2),
        "enc_c2": _init_1x1(kds[1], dch, c2),
        "enc_c3": _init_1x1(kds[2], dch, c2),
        "fca_c1": _init_1x1(kds[3], dch, c4),
        "fca_c2": _init_1x1(kds[4], dch, c4),
        "fca_c3": _init_1x1(kds[5], dch, c4),
        "cls": _init_1x1(kds[6], n_classes, dch),
    }
    return {
        "b1": init_backbone(kb1, cin, c1, c2, c3, c4, fc_dim),
        "b2": init_backbone(kb2, cin, c1, c2, c3, c4, fc_dim),
        "b3": init_backbone(kb3, cin, c1, c2, c3, c4, fc_dim),
        "dec": dec,
    }


# ---------------------------------------------------------------------------
if __name__ == "__main__":
    N_CLASSES = 19
    key = jax.random.PRNGKey(0)
    kx, kp = jax.random.split(key)
    # Input must be divisible by 64 (three cascaded /16 backbones) -> 64x64.
    x = jax.random.normal(kx, (2, 3, 64, 64), jnp.float32)
    params = init_dfanet(kp, n_classes=N_CLASSES)

    fwd = jax.jit(dfanet_forward)
    out = fwd(x, params)
    out = jax.block_until_ready(out)

    assert out.shape == (2, N_CLASSES, 64, 64), out.shape
    assert bool(jnp.all(jnp.isfinite(out)))
    print("KERNEL_OK")
</pallas_src>

<mosaic_0001>
module attributes {stable_mosaic.version = 11 : i64} {
  func.func @_mm_bias_act_kernel(%arg0: i32, %arg1: memref<512x27xbf16, #tpu.memory_space<vmem>>, %arg2: memref<27x128xbf16, #tpu.memory_space<vmem>>, %arg3: memref<1x128xf32, #tpu.memory_space<vmem>>, %arg4: memref<512x128xbf16, #tpu.memory_space<vmem>>) attributes {dimension_semantics = [#tpu.dimension_semantics<parallel>], iteration_bounds = array<i64: 4>, scalar_prefetch = 0 : i64, scratch_operands = 0 : i64, tpu.core_type = #tpu.core_type<tc>, window_params = [{transform_indices = @transform_0, window_bounds = array<i64: 512, 27>}, {pipeline_mode = #tpu.pipeline_mode<synchronous>, transform_indices = @transform_1, window_bounds = array<i64: 27, 128>}, {pipeline_mode = #tpu.pipeline_mode<synchronous>, transform_indices = @transform_2, window_bounds = array<i64: 1, 128>}, {transform_indices = @transform_3, window_bounds = array<i64: 512, 128>}]} {
    %c0 = arith.constant 0 : index
    %c0_0 = arith.constant 0 : index
    %0 = vector.load %arg1[%c0, %c0_0] : memref<512x27xbf16, #tpu.memory_space<vmem>>, vector<512x27xbf16>
    %c0_1 = arith.constant 0 : index
    %c0_2 = arith.constant 0 : index
    %1 = vector.load %arg2[%c0_1, %c0_2] : memref<27x128xbf16, #tpu.memory_space<vmem>>, vector<27x128xbf16>
    %cst = arith.constant dense<0.000000e+00> : vector<512x128xf32>
    %2 = tpu.matmul %0, %1, %cst {dimension_numbers = #tpu.dot_dimension_numbers<[1], [0], [0], [1], [0, 0, 1, 1], [], []>} : vector<512x27xbf16>, vector<27x128xbf16>, vector<512x128xf32> -> vector<512x128xf32>
    %c0_3 = arith.constant 0 : index
    %c0_4 = arith.constant 0 : index
    %3 = vector.load %arg3[%c0_3, %c0_4] : memref<1x128xf32, #tpu.memory_space<vmem>>, vector<1x128xf32>
    %4 = vector.broadcast %3 : vector<1x128xf32> to vector<512x128xf32>
    %5 = arith.addf %2, %4 : vector<512x128xf32>
    %cst_5 = arith.constant 0.000000e+00 : f32
    %6 = vector.broadcast %cst_5 : f32 to vector<512x128xf32>
    %7 = arith.maximumf %5, %6 : vector<512x128xf32>
    %8 = arith.truncf %7 : vector<512x128xf32> to vector<512x128xbf16>
    %c0_6 = arith.constant 0 : index
    %c0_7 = arith.constant 0 : index
    %9 = vector.load %arg4[%c0_6, %c0_7] : memref<512x128xbf16, #tpu.memory_space<vmem>>, vector<512x128xbf16>
    tpu.vector_store %arg4[%c0_6, %c0_7], %8 {strides = array<i32>} : memref<512x128xbf16, #tpu.memory_space<vmem>>, vector<512x128xbf16>,
    return
  }
  func.func @transform_0(%arg0: i32) -> (i32, i32) {
    %c0_i32 = arith.constant 0 : i32
    %c0_i32_0 = arith.constant 0 : i32
    return %arg0, %c0_i32 : i32, i32
  }
  func.func @transform_1(%arg0: i32) -> (i32, i32) {
    %c0_i32 = arith.constant 0 : i32
    %c0_i32_0 = arith.constant 0 : i32
    %c0_i32_1 = arith.constant 0 : i32
    return %c0_i32, %c0_i32_0 : i32, i32
  }
  func.func @transform_2(%arg0: i32) -> (i32, i32) {
    %c0_i32 = arith.constant 0 : i32
    %c0_i32_0 = arith.constant 0 : i32
    %c0_i32_1 = arith.constant 0 : i32
    return %c0_i32, %c0_i32_0 : i32, i32
  }
  func.func @transform_3(%arg0: i32) -> (i32, i32) {
    %c0_i32 = arith.constant 0 : i32
    %c0_i32_0 = arith.constant 0 : i32
    return %arg0, %c0_i32 : i32, i32
  }
}

module attributes {stable_mosaic.version = 11 : i64} {
  func.func @_mm_bias_act_kernel(%arg0: i32, %arg1: memref<512x72xbf16, #tpu.memory_space<vmem>>, %arg2: memref<72x128xbf16, #tpu.memory_space<vmem>>, %arg3: memref<1x128xf32, #tpu.memory_space<vmem>>, %arg4: memref<512x128xbf16, #tpu.memory_space<vmem>>) attributes {dimension_semantics = [#tpu.dimension_semantics<parallel>], iteration_bounds = array<i64: 1>, scalar_prefetch = 0 : i64, scratch_operands = 0 : i64, tpu.core_type = #tpu.core_type<tc>, window_params = [{transform_indices = @transform_0, window_bounds = array<i64: 512, 72>}, {pipeline_mode = #tpu.pipeline_mode<synchronous>, transform_indices = @transform_1, window_bounds = array<i64: 72, 128>}, {pipeline_mode = #tpu.pipeline_mode<synchronous>, transform_indices = @transform_2, window_bounds = array<i64: 1, 128>}, {transform_indices = @transform_3, window_bounds = array<i64: 512, 128>}]} {
    %c0 = arith.constant 0 : index
    %c0_0 = arith.constant 0 : index
    %0 = vector.load %arg1[%c0, %c0_0] : memref<512x72xbf16, #tpu.memory_space<vmem>>, vector<512x72xbf16>
    %c0_1 = arith.constant 0 : index
    %c0_2 = arith.constant 0 : index
    %1 = vector.load %arg2[%c0_1, %c0_2] : memref<72x128xbf16, #tpu.memory_space<vmem>>, vector<72x128xbf16>
    %cst = arith.constant dense<0.000000e+00> : vector<512x128xf32>
    %2 = tpu.matmul %0, %1, %cst {dimension_numbers = #tpu.dot_dimension_numbers<[1], [0], [0], [1], [0, 0, 1, 1], [], []>} : vector<512x72xbf16>, vector<72x128xbf16>, vector<512x128xf32> -> vector<512x128xf32>
    %c0_3 = arith.constant 0 : index
    %c0_4 = arith.constant 0 : index
    %3 = vector.load %arg3[%c0_3, %c0_4] : memref<1x128xf32, #tpu.memory_space<vmem>>, vector<1x128xf32>
    %4 = vector.broadcast %3 : vector<1x128xf32> to vector<512x128xf32>
    %5 = arith.addf %2, %4 : vector<512x128xf32>
    %cst_5 = arith.constant 0.000000e+00 : f32
    %6 = vector.broadcast %cst_5 : f32 to vector<512x128xf32>
    %7 = arith.maximumf %5, %6 : vector<512x128xf32>
    %8 = arith.truncf %7 : vector<512x128xf32> to vector<512x128xbf16>
    %c0_6 = arith.constant 0 : index
    %c0_7 = arith.constant 0 : index
    %9 = vector.load %arg4[%c0_6, %c0_7] : memref<512x128xbf16, #tpu.memory_space<vmem>>, vector<512x128xbf16>
    tpu.vector_store %arg4[%c0_6, %c0_7], %8 {strides = array<i32>} : memref<512x128xbf16, #tpu.memory_space<vmem>>, vector<512x128xbf16>,
    return
  }
  func.func @transform_0(%arg0: i32) -> (i32, i32) {
    %c0_i32 = arith.constant 0 : i32
    %c0_i32_0 = arith.constant 0 : i32
    return %arg0, %c0_i32 : i32, i32
  }
  func.func @transform_1(%arg0: i32) -> (i32, i32) {
    %c0_i32 = arith.constant 0 : i32
    %c0_i32_0 = arith.constant 0 : i32
    %c0_i32_1 = arith.constant 0 : i32
    return %c0_i32, %c0_i32_0 : i32, i32
  }
  func.func @transform_2(%arg0: i32) -> (i32, i32) {
    %c0_i32 = arith.constant 0 : i32
    %c0_i32_0 = arith.constant 0 : i32
    %c0_i32_1 = arith.constant 0 : i32
    return %c0_i32, %c0_i32_0 : i32, i32
  }
  func.func @transform_3(%arg0: i32) -> (i32, i32) {
    %c0_i32 = arith.constant 0 : i32
    %c0_i32_0 = arith.constant 0 : i32
    return %arg0, %c0_i32 : i32, i32
  }
}

module attributes {stable_mosaic.version = 11 : i64} {
  func.func @_mm_bias_act_kernel(%arg0: i32, %arg1: memref<128x144xbf16, #tpu.memory_space<vmem>>, %arg2: memref<144x128xbf16, #tpu.memory_space<vmem>>, %arg3: memref<1x128xf32, #tpu.memory_space<vmem>>, %arg4: memref<128x128xbf16, #tpu.memory_space<vmem>>) attributes {dimension_semantics = [#tpu.dimension_semantics<parallel>], iteration_bounds = array<i64: 1>, scalar_prefetch = 0 : i64, scratch_operands = 0 : i64, tpu.core_type = #tpu.core_type<tc>, window_params = [{transform_indices = @transform_0, window_bounds = array<i64: 128, 144>}, {pipeline_mode = #tpu.pipeline_mode<synchronous>, transform_indices = @transform_1, window_bounds = array<i64: 144, 128>}, {pipeline_mode = #tpu.pipeline_mode<synchronous>, transform_indices = @transform_2, window_bounds = array<i64: 1, 128>}, {transform_indices = @transform_3, window_bounds = array<i64: 128, 128>}]} {
    %c0 = arith.constant 0 : index
    %c0_0 = arith.constant 0 : index
    %0 = vector.load %arg1[%c0, %c0_0] : memref<128x144xbf16, #tpu.memory_space<vmem>>, vector<128x144xbf16>
    %c0_1 = arith.constant 0 : index
    %c0_2 = arith.constant 0 : index
    %1 = vector.load %arg2[%c0_1, %c0_2] : memref<144x128xbf16, #tpu.memory_space<vmem>>, vector<144x128xbf16>
    %cst = arith.constant dense<0.000000e+00> : vector<128x128xf32>
    %2 = tpu.matmul %0, %1, %cst {dimension_numbers = #tpu.dot_dimension_numbers<[1], [0], [0], [1], [0, 0, 1, 1], [], []>} : vector<128x144xbf16>, vector<144x128xbf16>, vector<128x128xf32> -> vector<128x128xf32>
    %c0_3 = arith.constant 0 : index
    %c0_4 = arith.constant 0 : index
    %3 = vector.load %arg3[%c0_3, %c0_4] : memref<1x128xf32, #tpu.memory_space<vmem>>, vector<1x128xf32>
    %4 = vector.broadcast %3 : vector<1x128xf32> to vector<128x128xf32>
    %5 = arith.addf %2, %4 : vector<128x128xf32>
    %cst_5 = arith.constant 0.000000e+00 : f32
    %6 = vector.broadcast %cst_5 : f32 to vector<128x128xf32>
    %7 = arith.maximumf %5, %6 : vector<128x128xf32>
    %8 = arith.truncf %7 : vector<128x128xf32> to vector<128x128xbf16>
    %c0_6 = arith.constant 0 : index
    %c0_7 = arith.constant 0 : index
    %9 = vector.load %arg4[%c0_6, %c0_7] : memref<128x128xbf16, #tpu.memory_space<vmem>>, vector<128x128xbf16>
    tpu.vector_store %arg4[%c0_6, %c0_7], %8 {strides = array<i32>} : memref<128x128xbf16, #tpu.memory_space<vmem>>, vector<128x128xbf16>,
    return
  }
  func.func @transform_0(%arg0: i32) -> (i32, i32) {
    %c0_i32 = arith.constant 0 : i32
    %c0_i32_0 = arith.constant 0 : i32
    return %arg0, %c0_i32 : i32, i32
  }
  func.func @transform_1(%arg0: i32) -> (i32, i32) {
    %c0_i32 = arith.constant 0 : i32
    %c0_i32_0 = arith.constant 0 : i32
    %c0_i32_1 = arith.constant 0 : i32
    return %c0_i32, %c0_i32_0 : i32, i32
  }
  func.func @transform_2(%arg0: i32) -> (i32, i32) {
    %c0_i32 = arith.constant 0 : i32
    %c0_i32_0 = arith.constant 0 : i32
    %c0_i32_1 = arith.constant 0 : i32
    return %c0_i32, %c0_i32_0 : i32, i32
  }
  func.func @transform_3(%arg0: i32) -> (i32, i32) {
    %c0_i32 = arith.constant 0 : i32
    %c0_i32_0 = arith.constant 0 : i32
    return %arg0, %c0_i32 : i32, i32
  }
}

module attributes {stable_mosaic.version = 11 : i64} {
  func.func @_mm_bias_act_kernel(%arg0: i32, %arg1: memref<32x288xbf16, #tpu.memory_space<vmem>>, %arg2: memref<288x128xbf16, #tpu.memory_space<vmem>>, %arg3: memref<1x128xf32, #tpu.memory_space<vmem>>, %arg4: memref<32x128xbf16, #tpu.memory_space<vmem>>) attributes {dimension_semantics = [#tpu.dimension_semantics<parallel>], iteration_bounds = array<i64: 1>, scalar_prefetch = 0 : i64, scratch_operands = 0 : i64, tpu.core_type = #tpu.core_type<tc>, window_params = [{transform_indices = @transform_0, window_bounds = array<i64: 32, 288>}, {pipeline_mode = #tpu.pipeline_mode<synchronous>, transform_indices = @transform_1, window_bounds = array<i64: 288, 128>}, {pipeline_mode = #tpu.pipeline_mode<synchronous>, transform_indices = @transform_2, window_bounds = array<i64: 1, 128>}, {transform_indices = @transform_3, window_bounds = array<i64: 32, 128>}]} {
    %c0 = arith.constant 0 : index
    %c0_0 = arith.constant 0 : index
    %0 = vector.load %arg1[%c0, %c0_0] : memref<32x288xbf16, #tpu.memory_space<vmem>>, vector<32x288xbf16>
    %c0_1 = arith.constant 0 : index
    %c0_2 = arith.constant 0 : index
    %1 = vector.load %arg2[%c0_1, %c0_2] : memref<288x128xbf16, #tpu.memory_space<vmem>>, vector<288x128xbf16>
    %cst = arith.constant dense<0.000000e+00> : vector<32x128xf32>
    %2 = tpu.matmul %0, %1, %cst {dimension_numbers = #tpu.dot_dimension_numbers<[1], [0], [0], [1], [0, 0, 1, 1], [], []>} : vector<32x288xbf16>, vector<288x128xbf16>, vector<32x128xf32> -> vector<32x128xf32>
    %c0_3 = arith.constant 0 : index
    %c0_4 = arith.constant 0 : index
    %3 = vector.load %arg3[%c0_3, %c0_4] : memref<1x128xf32, #tpu.memory_space<vmem>>, vector<1x128xf32>
    %4 = vector.broadcast %3 : vector<1x128xf32> to vector<32x128xf32>
    %5 = arith.addf %2, %4 : vector<32x128xf32>
    %cst_5 = arith.constant 0.000000e+00 : f32
    %6 = vector.broadcast %cst_5 : f32 to vector<32x128xf32>
    %7 = arith.maximumf %5, %6 : vector<32x128xf32>
    %8 = arith.truncf %7 : vector<32x128xf32> to vector<32x128xbf16>
    %c0_6 = arith.constant 0 : index
    %c0_7 = arith.constant 0 : index
    %9 = vector.load %arg4[%c0_6, %c0_7] : memref<32x128xbf16, #tpu.memory_space<vmem>>, vector<32x128xbf16>
    tpu.vector_store %arg4[%c0_6, %c0_7], %8 {strides = array<i32>} : memref<32x128xbf16, #tpu.memory_space<vmem>>, vector<32x128xbf16>,
    return
  }
  func.func @transform_0(%arg0: i32) -> (i32, i32) {
    %c0_i32 = arith.constant 0 : i32
    %c0_i32_0 = arith.constant 0 : i32
    return %arg0, %c0_i32 : i32, i32
  }
  func.func @transform_1(%arg0: i32) -> (i32, i32) {
    %c0_i32 = arith.constant 0 : i32
    %c0_i32_0 = arith.constant 0 : i32
    %c0_i32_1 = arith.constant 0 : i32
    return %c0_i32, %c0_i32_0 : i32, i32
  }
  func.func @transform_2(%arg0: i32) -> (i32, i32) {
    %c0_i32 = arith.constant 0 : i32
    %c0_i32_0 = arith.constant 0 : i32
    %c0_i32_1 = arith.constant 0 : i32
    return %c0_i32, %c0_i32_0 : i32, i32
  }
  func.func @transform_3(%arg0: i32) -> (i32, i32) {
    %c0_i32 = arith.constant 0 : i32
    %c0_i32_0 = arith.constant 0 : i32
    return %arg0, %c0_i32 : i32, i32
  }
}

module attributes {stable_mosaic.version = 11 : i64} {
  func.func @_blmm_kernel(%arg0: i32, %arg1: i32, %arg2: memref<1x16xbf16, #tpu.memory_space<vmem>>, %arg3: memref<1x16x48xbf16, #tpu.memory_space<vmem>>, %arg4: memref<1x1x48xbf16, #tpu.memory_space<vmem>>) attributes {dimension_semantics = [#tpu.dimension_semantics<parallel>, #tpu.dimension_semantics<parallel>], iteration_bounds = array<i64: 2, 1>, scalar_prefetch = 0 : i64, scratch_operands = 0 : i64, tpu.core_type = #tpu.core_type<tc>, window_params = [{pipeline_mode = #tpu.pipeline_mode<synchronous>, transform_indices = @transform_0, window_bounds = array<i64: 1, 16>}, {transform_indices = @transform_1, window_bounds = array<i64: 1, 16, 48>}, {transform_indices = @transform_2, window_bounds = array<i64: 1, 1, 48>}]} {
    %c0 = arith.constant 0 : index
    %c0_0 = arith.constant 0 : index
    %0 = vector.load %arg2[%c0, %c0_0] : memref<1x16xbf16, #tpu.memory_space<vmem>>, vector<1x16xbf16>
    %c0_1 = arith.constant 0 : index
    %c0_2 = arith.constant 0 : index
    %c0_3 = arith.constant 0 : index
    %1 = vector.load %arg3[%c0_1, %c0_2, %c0_3] : memref<1x16x48xbf16, #tpu.memory_space<vmem>>, vector<1x16x48xbf16>
    %2 = vector.shape_cast %1 : vector<1x16x48xbf16> to vector<16x48xbf16>
    %cst = arith.constant dense<0.000000e+00> : vector<1x48xf32>
    %3 = tpu.matmul %0, %2, %cst {dimension_numbers = #tpu.dot_dimension_numbers<[1], [0], [0], [1], [0, 0, 1, 1], [], []>} : vector<1x16xbf16>, vector<16x48xbf16>, vector<1x48xf32> -> vector<1x48xf32>
    %4 = arith.truncf %3 : vector<1x48xf32> to vector<1x48xbf16>
    %c0_4 = arith.constant 0 : index
    %c0_5 = arith.constant 0 : index
    %c0_6 = arith.constant 0 : index
    %5 = vector.load %arg4[%c0_4, %c0_5, %c0_6] : memref<1x1x48xbf16, #tpu.memory_space<vmem>>, vector<1x1x48xbf16>
    %6 = vector.shape_cast %5 : vector<1x1x48xbf16> to vector<1x48xbf16>
    %7 = vector.shape_cast %4 : vector<1x48xbf16> to vector<1x1x48xbf16>
    tpu.vector_store %arg4[%c0_4, %c0_5, %c0_6], %7 {strides = array<i32>} : memref<1x1x48xbf16, #tpu.memory_space<vmem>>, vector<1x1x48xbf16>,
    return
  }
  func.func @transform_0(%arg0: i32, %arg1: i32) -> (i32, i32) {
    %c0_i32 = arith.constant 0 : i32
    %c0_i32_0 = arith.constant 0 : i32
    %c0_i32_1 = arith.constant 0 : i32
    return %c0_i32, %c0_i32_0 : i32, i32
  }
  func.func @transform_1(%arg0: i32, %arg1: i32) -> (i32, i32, i32) {
    %c0_i32 = arith.constant 0 : i32
    %c0_i32_0 = arith.constant 0 : i32
    return %arg0, %c0_i32, %arg1 : i32, i32, i32
  }
  func.func @transform_2(%arg0: i32, %arg1: i32) -> (i32, i32, i32) {
    %c0_i32 = arith.constant 0 : i32
    %c0_i32_0 = arith.constant 0 : i32
    return %arg0, %c0_i32, %arg1 : i32, i32, i32
  }
}

module attributes {stable_mosaic.version = 11 : i64} {
  func.func @_mm_bias_act_kernel(%arg0: i32, %arg1: memref<8x48xbf16, #tpu.memory_space<vmem>>, %arg2: memref<48x128xbf16, #tpu.memory_space<vmem>>, %arg3: memref<1x128xf32, #tpu.memory_space<vmem>>, %arg4: memref<8x128xbf16, #tpu.memory_space<vmem>>) attributes {dimension_semantics = [#tpu.dimension_semantics<parallel>], iteration_bounds = array<i64: 1>, scalar_prefetch = 0 : i64, scratch_operands = 0 : i64, tpu.core_type = #tpu.core_type<tc>, window_params = [{transform_indices = @transform_0, window_bounds = array<i64: 8, 48>}, {pipeline_mode = #tpu.pipeline_mode<synchronous>, transform_indices = @transform_1, window_bounds = array<i64: 48, 128>}, {pipeline_mode = #tpu.pipeline_mode<synchronous>, transform_indices = @transform_2, window_bounds = array<i64: 1, 128>}, {transform_indices = @transform_3, window_bounds = array<i64: 8, 128>}]} {
    %c0 = arith.constant 0 : index
    %c0_0 = arith.constant 0 : index
    %0 = vector.load %arg1[%c0, %c0_0] : memref<8x48xbf16, #tpu.memory_space<vmem>>, vector<8x48xbf16>
    %c0_1 = arith.constant 0 : index
    %c0_2 = arith.constant 0 : index
    %1 = vector.load %arg2[%c0_1, %c0_2] : memref<48x128xbf16, #tpu.memory_space<vmem>>, vector<48x128xbf16>
    %cst = arith.constant dense<0.000000e+00> : vector<8x128xf32>
    %2 = tpu.matmul %0, %1, %cst {dimension_numbers = #tpu.dot_dimension_numbers<[1], [0], [0], [1], [0, 0, 1, 1], [], []>} : vector<8x48xbf16>, vector<48x128xbf16>, vector<8x128xf32> -> vector<8x128xf32>
    %c0_3 = arith.constant 0 : index
    %c0_4 = arith.constant 0 : index
    %3 = vector.load %arg3[%c0_3, %c0_4] : memref<1x128xf32, #tpu.memory_space<vmem>>, vector<1x128xf32>
    %4 = vector.broadcast %3 : vector<1x128xf32> to vector<8x128xf32>
    %5 = arith.addf %2, %4 : vector<8x128xf32>
    %6 = arith.truncf %5 : vector<8x128xf32> to vector<8x128xbf16>
    %c0_5 = arith.constant 0 : index
    %c0_6 = arith.constant 0 : index
    %7 = vector.load %arg4[%c0_5, %c0_6] : memref<8x128xbf16, #tpu.memory_space<vmem>>, vector<8x128xbf16>
    tpu.vector_store %arg4[%c0_5, %c0_6], %6 {strides = array<i32>} : memref<8x128xbf16, #tpu.memory_space<vmem>>, vector<8x128xbf16>,
    return
  }
  func.func @transform_0(%arg0: i32) -> (i32, i32) {
    %c0_i32 = arith.constant 0 : i32
    %c0_i32_0 = arith.constant 0 : i32
    return %arg0, %c0_i32 : i32, i32
  }
  func.func @transform_1(%arg0: i32) -> (i32, i32) {
    %c0_i32 = arith.constant 0 : i32
    %c0_i32_0 = arith.constant 0 : i32
    %c0_i32_1 = arith.constant 0 : i32
    return %c0_i32, %c0_i32_0 : i32, i32
  }
  func.func @transform_2(%arg0: i32) -> (i32, i32) {
    %c0_i32 = arith.constant 0 : i32
    %c0_i32_0 = arith.constant 0 : i32
    %c0_i32_1 = arith.constant 0 : i32
    return %c0_i32, %c0_i32_0 : i32, i32
  }
  func.func @transform_3(%arg0: i32) -> (i32, i32) {
    %c0_i32 = arith.constant 0 : i32
    %c0_i32_0 = arith.constant 0 : i32
    return %arg0, %c0_i32 : i32, i32
  }
}

module attributes {stable_mosaic.version = 11 : i64} {
  func.func @_mm_bias_act_kernel(%arg0: i32, %arg1: memref<8x64xbf16, #tpu.memory_space<vmem>>, %arg2: memref<64x128xbf16, #tpu.memory_space<vmem>>, %arg3: memref<1x128xf32, #tpu.memory_space<vmem>>, %arg4: memref<8x128xbf16, #tpu.memory_space<vmem>>) attributes {dimension_semantics = [#tpu.dimension_semantics<parallel>], iteration_bounds = array<i64: 1>, scalar_prefetch = 0 : i64, scratch_operands = 0 : i64, tpu.core_type = #tpu.core_type<tc>, window_params = [{transform_indices = @transform_0, window_bounds = array<i64: 8, 64>}, {pipeline_mode = #tpu.pipeline_mode<synchronous>, transform_indices = @transform_1, window_bounds = array<i64: 64, 128>}, {pipeline_mode = #tpu.pipeline_mode<synchronous>, transform_indices = @transform_2, window_bounds = array<i64: 1, 128>}, {transform_indices = @transform_3, window_bounds = array<i64: 8, 128>}]} {
    %c0 = arith.constant 0 : index
    %c0_0 = arith.constant 0 : index
    %0 = vector.load %arg1[%c0, %c0_0] : memref<8x64xbf16, #tpu.memory_space<vmem>>, vector<8x64xbf16>
    %c0_1 = arith.constant 0 : index
    %c0_2 = arith.constant 0 : index
    %1 = vector.load %arg2[%c0_1, %c0_2] : memref<64x128xbf16, #tpu.memory_space<vmem>>, vector<64x128xbf16>
    %cst = arith.constant dense<0.000000e+00> : vector<8x128xf32>
    %2 = tpu.matmul %0, %1, %cst {dimension_numbers = #tpu.dot_dimension_numbers<[1], [0], [0], [1], [0, 0, 1, 1], [], []>} : vector<8x64xbf16>, vector<64x128xbf16>, vector<8x128xf32> -> vector<8x128xf32>
    %c0_3 = arith.constant 0 : index
    %c0_4 = arith.constant 0 : index
    %3 = vector.load %arg3[%c0_3, %c0_4] : memref<1x128xf32, #tpu.memory_space<vmem>>, vector<1x128xf32>
    %4 = vector.broadcast %3 : vector<1x128xf32> to vector<8x128xf32>
    %5 = arith.addf %2, %4 : vector<8x128xf32>
    %6 = arith.negf %5 : vector<8x128xf32>
    %7 = math.exp %6 : vector<8x128xf32>
    %cst_5 = arith.constant 1.000000e+00 : f32
    %8 = vector.broadcast %cst_5 : f32 to vector<8x128xf32>
    %9 = arith.addf %8, %7 : vector<8x128xf32>
    %10 = arith.divf %8, %9 : vector<8x128xf32>
    %11 = arith.truncf %10 : vector<8x128xf32> to vector<8x128xbf16>
    %c0_6 = arith.constant 0 : index
    %c0_7 = arith.constant 0 : index
    %12 = vector.load %arg4[%c0_6, %c0_7] : memref<8x128xbf16, #tpu.memory_space<vmem>>, vector<8x128xbf16>
    tpu.vector_store %arg4[%c0_6, %c0_7], %11 {strides = array<i32>} : memref<8x128xbf16, #tpu.memory_space<vmem>>, vector<8x128xbf16>,
    return
  }
  func.func @transform_0(%arg0: i32) -> (i32, i32) {
    %c0_i32 = arith.constant 0 : i32
    %c0_i32_0 = arith.constant 0 : i32
    return %arg0, %c0_i32 : i32, i32
  }
  func.func @transform_1(%arg0: i32) -> (i32, i32) {
    %c0_i32 = arith.constant 0 : i32
    %c0_i32_0 = arith.constant 0 : i32
    %c0_i32_1 = arith.constant 0 : i32
    return %c0_i32, %c0_i32_0 : i32, i32
  }
  func.func @transform_2(%arg0: i32) -> (i32, i32) {
    %c0_i32 = arith.constant 0 : i32
    %c0_i32_0 = arith.constant 0 : i32
    %c0_i32_1 = arith.constant 0 : i32
    return %c0_i32, %c0_i32_0 : i32, i32
  }
  func.func @transform_3(%arg0: i32) -> (i32, i32) {
    %c0_i32 = arith.constant 0 : i32
    %c0_i32_0 = arith.constant 0 : i32
    return %arg0, %c0_i32 : i32, i32
  }
}

module attributes {stable_mosaic.version = 11 : i64} {
  func.func @_scale_kernel(%arg0: i32, %arg1: memref<1x16x48xbf16, #tpu.memory_space<vmem>>, %arg2: memref<1x1x48xbf16, #tpu.memory_space<vmem>>, %arg3: memref<1x16x48xbf16, #tpu.memory_space<vmem>>) attributes {dimension_semantics = [#tpu.dimension_semantics<parallel>], iteration_bounds = array<i64: 2>, scalar_prefetch = 0 : i64, scratch_operands = 0 : i64, tpu.core_type = #tpu.core_type<tc>, window_params = [{transform_indices = @transform_0, window_bounds = array<i64: 1, 16, 48>}, {transform_indices = @transform_1, window_bounds = array<i64: 1, 1, 48>}, {transform_indices = @transform_2, window_bounds = array<i64: 1, 16, 48>}]} {
    %c0 = arith.constant 0 : index
    %c0_0 = arith.constant 0 : index
    %c0_1 = arith.constant 0 : index
    %0 = vector.load %arg1[%c0, %c0_0, %c0_1] : memref<1x16x48xbf16, #tpu.memory_space<vmem>>, vector<1x16x48xbf16>
    %c0_2 = arith.constant 0 : index
    %c0_3 = arith.constant 0 : index
    %c0_4 = arith.constant 0 : index
    %1 = vector.load %arg2[%c0_2, %c0_3, %c0_4] : memref<1x1x48xbf16, #tpu.memory_space<vmem>>, vector<1x1x48xbf16>
    %2 = vector.broadcast %1 : vector<1x1x48xbf16> to vector<1x16x48xbf16>
    %3 = arith.mulf %0, %2 : vector<1x16x48xbf16>
    %c0_5 = arith.constant 0 : index
    %c0_6 = arith.constant 0 : index
    %c0_7 = arith.constant 0 : index
    %4 = vector.load %arg3[%c0_5, %c0_6, %c0_7] : memref<1x16x48xbf16, #tpu.memory_space<vmem>>, vector<1x16x48xbf16>
    tpu.vector_store %arg3[%c0_5, %c0_6, %c0_7], %3 {strides = array<i32>} : memref<1x16x48xbf16, #tpu.memory_space<vmem>>, vector<1x16x48xbf16>,
    return
  }
  func.func @transform_0(%arg0: i32) -> (i32, i32, i32) {
    %c0_i32 = arith.constant 0 : i32
    %c0_i32_0 = arith.constant 0 : i32
    %c0_i32_1 = arith.constant 0 : i32
    return %arg0, %c0_i32, %c0_i32_0 : i32, i32, i32
  }
  func.func @transform_1(%arg0: i32) -> (i32, i32, i32) {
    %c0_i32 = arith.constant 0 : i32
    %c0_i32_0 = arith.constant 0 : i32
    %c0_i32_1 = arith.constant 0 : i32
    return %arg0, %c0_i32, %c0_i32_0 : i32, i32, i32
  }
  func.func @transform_2(%arg0: i32) -> (i32, i32, i32) {
    %c0_i32 = arith.constant 0 : i32
    %c0_i32_0 = arith.constant 0 : i32
    %c0_i32_1 = arith.constant 0 : i32
    return %arg0, %c0_i32, %c0_i32_0 : i32, i32, i32
  }
}

module attributes {stable_mosaic.version = 11 : i64} {
  func.func @_mm_bias_act_kernel(%arg0: i32, %arg1: memref<8x192xbf16, #tpu.memory_space<vmem>>, %arg2: memref<192x768xbf16, #tpu.memory_space<vmem>>, %arg3: memref<1x768xf32, #tpu.memory_space<vmem>>, %arg4: memref<8x768xbf16, #tpu.memory_space<vmem>>) attributes {dimension_semantics = [#tpu.dimension_semantics<parallel>], iteration_bounds = array<i64: 1>, scalar_prefetch = 0 : i64, scratch_operands = 0 : i64, tpu.core_type = #tpu.core_type<tc>, window_params = [{transform_indices = @transform_0, window_bounds = array<i64: 8, 192>}, {pipeline_mode = #tpu.pipeline_mode<synchronous>, transform_indices = @transform_1, window_bounds = array<i64: 192, 768>}, {pipeline_mode = #tpu.pipeline_mode<synchronous>, transform_indices = @transform_2, window_bounds = array<i64: 1, 768>}, {transform_indices = @transform_3, window_bounds = array<i64: 8, 768>}]} {
    %c0 = arith.constant 0 : index
    %c0_0 = arith.constant 0 : index
    %0 = vector.load %arg1[%c0, %c0_0] : memref<8x192xbf16, #tpu.memory_space<vmem>>, vector<8x192xbf16>
    %c0_1 = arith.constant 0 : index
    %c0_2 = arith.constant 0 : index
    %1 = vector.load %arg2[%c0_1, %c0_2] : memref<192x768xbf16, #tpu.memory_space<vmem>>, vector<192x768xbf16>
    %cst = arith.constant dense<0.000000e+00> : vector<8x768xf32>
    %2 = tpu.matmul %0, %1, %cst {dimension_numbers = #tpu.dot_dimension_numbers<[1], [0], [0], [1], [0, 0, 1, 1], [], []>} : vector<8x192xbf16>, vector<192x768xbf16>, vector<8x768xf32> -> vector<8x768xf32>
    %c0_3 = arith.constant 0 : index
    %c0_4 = arith.constant 0 : index
    %3 = vector.load %arg3[%c0_3, %c0_4] : memref<1x768xf32, #tpu.memory_space<vmem>>, vector<1x768xf32>
    %4 = vector.broadcast %3 : vector<1x768xf32> to vector<8x768xf32>
    %5 = arith.addf %2, %4 : vector<8x768xf32>
    %6 = arith.truncf %5 : vector<8x768xf32> to vector<8x768xbf16>
    %c0_5 = arith.constant 0 : index
    %c0_6 = arith.constant 0 : index
    %7 = vector.load %arg4[%c0_5, %c0_6] : memref<8x768xbf16, #tpu.memory_space<vmem>>, vector<8x768xbf16>
    tpu.vector_store %arg4[%c0_5, %c0_6], %6 {strides = array<i32>} : memref<8x768xbf16, #tpu.memory_space<vmem>>, vector<8x768xbf16>,
    return
  }
  func.func @transform_0(%arg0: i32) -> (i32, i32) {
    %c0_i32 = arith.constant 0 : i32
    %c0_i32_0 = arith.constant 0 : i32
    return %arg0, %c0_i32 : i32, i32
  }
  func.func @transform_1(%arg0: i32) -> (i32, i32) {
    %c0_i32 = arith.constant 0 : i32
    %c0_i32_0 = arith.constant 0 : i32
    %c0_i32_1 = arith.constant 0 : i32
    return %c0_i32, %c0_i32_0 : i32, i32
  }
  func.func @transform_2(%arg0: i32) -> (i32, i32) {
    %c0_i32 = arith.constant 0 : i32
    %c0_i32_0 = arith.constant 0 : i32
    %c0_i32_1 = arith.constant 0 : i32
    return %c0_i32, %c0_i32_0 : i32, i32
  }
  func.func @transform_3(%arg0: i32) -> (i32, i32) {
    %c0_i32 = arith.constant 0 : i32
    %c0_i32_0 = arith.constant 0 : i32
    return %arg0, %c0_i32 : i32, i32
  }
}

module attributes {stable_mosaic.version = 11 : i64} {
  func.func @_blmm_kernel(%arg0: i32, %arg1: i32, %arg2: memref<16x4xbf16, #tpu.memory_space<vmem>>, %arg3: memref<1x4x768xbf16, #tpu.memory_space<vmem>>, %arg4: memref<1x16x768xbf16, #tpu.memory_space<vmem>>) attributes {dimension_semantics = [#tpu.dimension_semantics<parallel>, #tpu.dimension_semantics<parallel>], iteration_bounds = array<i64: 2, 1>, scalar_prefetch = 0 : i64, scratch_operands = 0 : i64, tpu.core_type = #tpu.core_type<tc>, window_params = [{pipeline_mode = #tpu.pipeline_mode<synchronous>, transform_indices = @transform_0, window_bounds = array<i64: 16, 4>}, {transform_indices = @transform_1, window_bounds = array<i64: 1, 4, 768>}, {transform_indices = @transform_2, window_bounds = array<i64: 1, 16, 768>}]} {
    %c0 = arith.constant 0 : index
    %c0_0 = arith.constant 0 : index
    %0 = vector.load %arg2[%c0, %c0_0] : memref<16x4xbf16, #tpu.memory_space<vmem>>, vector<16x4xbf16>
    %c0_1 = arith.constant 0 : index
    %c0_2 = arith.constant 0 : index
    %c0_3 = arith.constant 0 : index
    %1 = vector.load %arg3[%c0_1, %c0_2, %c0_3] : memref<1x4x768xbf16, #tpu.memory_space<vmem>>, vector<1x4x768xbf16>
    %2 = vector.shape_cast %1 : vector<1x4x768xbf16> to vector<4x768xbf16>
    %cst = arith.constant dense<0.000000e+00> : vector<16x768xf32>
    %3 = tpu.matmul %0, %2, %cst {dimension_numbers = #tpu.dot_dimension_numbers<[1], [0], [0], [1], [0, 0, 1, 1], [], []>} : vector<16x4xbf16>, vector<4x768xbf16>, vector<16x768xf32> -> vector<16x768xf32>
    %4 = arith.truncf %3 : vector<16x768xf32> to vector<16x768xbf16>
    %c0_4 = arith.constant 0 : index
    %c0_5 = arith.constant 0 : index
    %c0_6 = arith.constant 0 : index
    %5 = vector.load %arg4[%c0_4, %c0_5, %c0_6] : memref<1x16x768xbf16, #tpu.memory_space<vmem>>, vector<1x16x768xbf16>
    %6 = vector.shape_cast %5 : vector<1x16x768xbf16> to vector<16x768xbf16>
    %7 = vector.shape_cast %4 : vector<16x768xbf16> to vector<1x16x768xbf16>
    tpu.vector_store %arg4[%c0_4, %c0_5, %c0_6], %7 {strides = array<i32>} : memref<1x16x768xbf16, #tpu.memory_space<vmem>>, vector<1x16x768xbf16>,
    return
  }
  func.func @transform_0(%arg0: i32, %arg1: i32) -> (i32, i32) {
    %c0_i32 = arith.constant 0 : i32
    %c0_i32_0 = arith.constant 0 : i32
    %c0_i32_1 = arith.constant 0 : i32
    return %c0_i32, %c0_i32_0 : i32, i32
  }
  func.func @transform_1(%arg0: i32, %arg1: i32) -> (i32, i32, i32) {
    %c0_i32 = arith.constant 0 : i32
    %c0_i32_0 = arith.constant 0 : i32
    return %arg0, %c0_i32, %arg1 : i32, i32, i32
  }
  func.func @transform_2(%arg0: i32, %arg1: i32) -> (i32, i32, i32) {
    %c0_i32 = arith.constant 0 : i32
    %c0_i32_0 = arith.constant 0 : i32
    return %arg0, %c0_i32, %arg1 : i32, i32, i32
  }
}

module attributes {stable_mosaic.version = 11 : i64} {
  func.func @_mm_bias_act_kernel(%arg0: i32, %arg1: memref<128x576xbf16, #tpu.memory_space<vmem>>, %arg2: memref<576x128xbf16, #tpu.memory_space<vmem>>, %arg3: memref<1x128xf32, #tpu.memory_space<vmem>>, %arg4: memref<128x128xbf16, #tpu.memory_space<vmem>>) attributes {dimension_semantics = [#tpu.dimension_semantics<parallel>], iteration_bounds = array<i64: 1>, scalar_prefetch = 0 : i64, scratch_operands = 0 : i64, tpu.core_type = #tpu.core_type<tc>, window_params = [{transform_indices = @transform_0, window_bounds = array<i64: 128, 576>}, {pipeline_mode = #tpu.pipeline_mode<synchronous>, transform_indices = @transform_1, window_bounds = array<i64: 576, 128>}, {pipeline_mode = #tpu.pipeline_mode<synchronous>, transform_indices = @transform_2, window_bounds = array<i64: 1, 128>}, {transform_indices = @transform_3, window_bounds = array<i64: 128, 128>}]} {
    %c0 = arith.constant 0 : index
    %c0_0 = arith.constant 0 : index
    %0 = vector.load %arg1[%c0, %c0_0] : memref<128x576xbf16, #tpu.memory_space<vmem>>, vector<128x576xbf16>
    %c0_1 = arith.constant 0 : index
    %c0_2 = arith.constant 0 : index
    %1 = vector.load %arg2[%c0_1, %c0_2] : memref<576x128xbf16, #tpu.memory_space<vmem>>, vector<576x128xbf16>
    %cst = arith.constant dense<0.000000e+00> : vector<128x128xf32>
    %2 = tpu.matmul %0, %1, %cst {dimension_numbers = #tpu.dot_dimension_numbers<[1], [0], [0], [1], [0, 0, 1, 1], [], []>} : vector<128x576xbf16>, vector<576x128xbf16>, vector<128x128xf32> -> vector<128x128xf32>
    %c0_3 = arith.constant 0 : index
    %c0_4 = arith.constant 0 : index
    %3 = vector.load %arg3[%c0_3, %c0_4] : memref<1x128xf32, #tpu.memory_space<vmem>>, vector<1x128xf32>
    %4 = vector.broadcast %3 : vector<1x128xf32> to vector<128x128xf32>
    %5 = arith.addf %2, %4 : vector<128x128xf32>
    %cst_5 = arith.constant 0.000000e+00 : f32
    %6 = vector.broadcast %cst_5 : f32 to vector<128x128xf32>
    %7 = arith.maximumf %5, %6 : vector<128x128xf32>
    %8 = arith.truncf %7 : vector<128x128xf32> to vector<128x128xbf16>
    %c0_6 = arith.constant 0 : index
    %c0_7 = arith.constant 0 : index
    %9 = vector.load %arg4[%c0_6, %c0_7] : memref<128x128xbf16, #tpu.memory_space<vmem>>, vector<128x128xbf16>
    tpu.vector_store %arg4[%c0_6, %c0_7], %8 {strides = array<i32>} : memref<128x128xbf16, #tpu.memory_space<vmem>>, vector<128x128xbf16>,
    return
  }
  func.func @transform_0(%arg0: i32) -> (i32, i32) {
    %c0_i32 = arith.constant 0 : i32
    %c0_i32_0 = arith.constant 0 : i32
    return %arg0, %c0_i32 : i32, i32
  }
  func.func @transform_1(%arg0: i32) -> (i32, i32) {
    %c0_i32 = arith.constant 0 : i32
    %c0_i32_0 = arith.constant 0 : i32
    %c0_i32_1 = arith.constant 0 : i32
    return %c0_i32, %c0_i32_0 : i32, i32
  }
  func.func @transform_2(%arg0: i32) -> (i32, i32) {
    %c0_i32 = arith.constant 0 : i32
    %c0_i32_0 = arith.constant 0 : i32
    %c0_i32_1 = arith.constant 0 : i32
    return %c0_i32, %c0_i32_0 : i32, i32
  }
  func.func @transform_3(%arg0: i32) -> (i32, i32) {
    %c0_i32 = arith.constant 0 : i32
    %c0_i32_0 = arith.constant 0 : i32
    return %arg0, %c0_i32 : i32, i32
  }
}

module attributes {stable_mosaic.version = 11 : i64} {
  func.func @_mm_bias_act_kernel(%arg0: i32, %arg1: memref<32x432xbf16, #tpu.memory_space<vmem>>, %arg2: memref<432x128xbf16, #tpu.memory_space<vmem>>, %arg3: memref<1x128xf32, #tpu.memory_space<vmem>>, %arg4: memref<32x128xbf16, #tpu.memory_space<vmem>>) attributes {dimension_semantics = [#tpu.dimension_semantics<parallel>], iteration_bounds = array<i64: 1>, scalar_prefetch = 0 : i64, scratch_operands = 0 : i64, tpu.core_type = #tpu.core_type<tc>, window_params = [{transform_indices = @transform_0, window_bounds = array<i64: 32, 432>}, {pipeline_mode = #tpu.pipeline_mode<synchronous>, transform_indices = @transform_1, window_bounds = array<i64: 432, 128>}, {pipeline_mode = #tpu.pipeline_mode<synchronous>, transform_indices = @transform_2, window_bounds = array<i64: 1, 128>}, {transform_indices = @transform_3, window_bounds = array<i64: 32, 128>}]} {
    %c0 = arith.constant 0 : index
    %c0_0 = arith.constant 0 : index
    %0 = vector.load %arg1[%c0, %c0_0] : memref<32x432xbf16, #tpu.memory_space<vmem>>, vector<32x432xbf16>
    %c0_1 = arith.constant 0 : index
    %c0_2 = arith.constant 0 : index
    %1 = vector.load %arg2[%c0_1, %c0_2] : memref<432x128xbf16, #tpu.memory_space<vmem>>, vector<432x128xbf16>
    %cst = arith.constant dense<0.000000e+00> : vector<32x128xf32>
    %2 = tpu.matmul %0, %1, %cst {dimension_numbers = #tpu.dot_dimension_numbers<[1], [0], [0], [1], [0, 0, 1, 1], [], []>} : vector<32x432xbf16>, vector<432x128xbf16>, vector<32x128xf32> -> vector<32x128xf32>
    %c0_3 = arith.constant 0 : index
    %c0_4 = arith.constant 0 : index
    %3 = vector.load %arg3[%c0_3, %c0_4] : memref<1x128xf32, #tpu.memory_space<vmem>>, vector<1x128xf32>
    %4 = vector.broadcast %3 : vector<1x128xf32> to vector<32x128xf32>
    %5 = arith.addf %2, %4 : vector<32x128xf32>
    %cst_5 = arith.constant 0.000000e+00 : f32
    %6 = vector.broadcast %cst_5 : f32 to vector<32x128xf32>
    %7 = arith.maximumf %5, %6 : vector<32x128xf32>
    %8 = arith.truncf %7 : vector<32x128xf32> to vector<32x128xbf16>
    %c0_6 = arith.constant 0 : index
    %c0_7 = arith.constant 0 : index
    %9 = vector.load %arg4[%c0_6, %c0_7] : memref<32x128xbf16, #tpu.memory_space<vmem>>, vector<32x128xbf16>
    tpu.vector_store %arg4[%c0_6, %c0_7], %8 {strides = array<i32>} : memref<32x128xbf16, #tpu.memory_space<vmem>>, vector<32x128xbf16>,
    return
  }
  func.func @transform_0(%arg0: i32) -> (i32, i32) {
    %c0_i32 = arith.constant 0 : i32
    %c0_i32_0 = arith.constant 0 : i32
    return %arg0, %c0_i32 : i32, i32
  }
  func.func @transform_1(%arg0: i32) -> (i32, i32) {
    %c0_i32 = arith.constant 0 : i32
    %c0_i32_0 = arith.constant 0 : i32
    %c0_i32_1 = arith.constant 0 : i32
    return %c0_i32, %c0_i32_0 : i32, i32
  }
  func.func @transform_2(%arg0: i32) -> (i32, i32) {
    %c0_i32 = arith.constant 0 : i32
    %c0_i32_0 = arith.constant 0 : i32
    %c0_i32_1 = arith.constant 0 : i32
    return %c0_i32, %c0_i32_0 : i32, i32
  }
  func.func @transform_3(%arg0: i32) -> (i32, i32) {
    %c0_i32 = arith.constant 0 : i32
    %c0_i32_0 = arith.constant 0 : i32
    return %arg0, %c0_i32 : i32, i32
  }
}

module attributes {stable_mosaic.version = 11 : i64} {
  func.func @_mm_bias_act_kernel(%arg0: i32, %arg1: memref<8x720xbf16, #tpu.memory_space<vmem>>, %arg2: memref<720x128xbf16, #tpu.memory_space<vmem>>, %arg3: memref<1x128xf32, #tpu.memory_space<vmem>>, %arg4: memref<8x128xbf16, #tpu.memory_space<vmem>>) attributes {dimension_semantics = [#tpu.dimension_semantics<parallel>], iteration_bounds = array<i64: 1>, scalar_prefetch = 0 : i64, scratch_operands = 0 : i64, tpu.core_type = #tpu.core_type<tc>, window_params = [{transform_indices = @transform_0, window_bounds = array<i64: 8, 720>}, {pipeline_mode = #tpu.pipeline_mode<synchronous>, transform_indices = @transform_1, window_bounds = array<i64: 720, 128>}, {pipeline_mode = #tpu.pipeline_mode<synchronous>, transform_indices = @transform_2, window_bounds = array<i64: 1, 128>}, {transform_indices = @transform_3, window_bounds = array<i64: 8, 128>}]} {
    %c0 = arith.constant 0 : index
    %c0_0 = arith.constant 0 : index
    %0 = vector.load %arg1[%c0, %c0_0] : memref<8x720xbf16, #tpu.memory_space<vmem>>, vector<8x720xbf16>
    %c0_1 = arith.constant 0 : index
    %c0_2 = arith.constant 0 : index
    %1 = vector.load %arg2[%c0_1, %c0_2] : memref<720x128xbf16, #tpu.memory_space<vmem>>, vector<720x128xbf16>
    %cst = arith.constant dense<0.000000e+00> : vector<8x128xf32>
    %2 = tpu.matmul %0, %1, %cst {dimension_numbers = #tpu.dot_dimension_numbers<[1], [0], [0], [1], [0, 0, 1, 1], [], []>} : vector<8x720xbf16>, vector<720x128xbf16>, vector<8x128xf32> -> vector<8x128xf32>
    %c0_3 = arith.constant 0 : index
    %c0_4 = arith.constant 0 : index
    %3 = vector.load %arg3[%c0_3, %c0_4] : memref<1x128xf32, #tpu.memory_space<vmem>>, vector<1x128xf32>
    %4 = vector.broadcast %3 : vector<1x128xf32> to vector<8x128xf32>
    %5 = arith.addf %2, %4 : vector<8x128xf32>
    %cst_5 = arith.constant 0.000000e+00 : f32
    %6 = vector.broadcast %cst_5 : f32 to vector<8x128xf32>
    %7 = arith.maximumf %5, %6 : vector<8x128xf32>
    %8 = arith.truncf %7 : vector<8x128xf32> to vector<8x128xbf16>
    %c0_6 = arith.constant 0 : index
    %c0_7 = arith.constant 0 : index
    %9 = vector.load %arg4[%c0_6, %c0_7] : memref<8x128xbf16, #tpu.memory_space<vmem>>, vector<8x128xbf16>
    tpu.vector_store %arg4[%c0_6, %c0_7], %8 {strides = array<i32>} : memref<8x128xbf16, #tpu.memory_space<vmem>>, vector<8x128xbf16>,
    return
  }
  func.func @transform_0(%arg0: i32) -> (i32, i32) {
    %c0_i32 = arith.constant 0 : i32
    %c0_i32_0 = arith.constant 0 : i32
    return %arg0, %c0_i32 : i32, i32
  }
  func.func @transform_1(%arg0: i32) -> (i32, i32) {
    %c0_i32 = arith.constant 0 : i32
    %c0_i32_0 = arith.constant 0 : i32
    %c0_i32_1 = arith.constant 0 : i32
    return %c0_i32, %c0_i32_0 : i32, i32
  }
  func.func @transform_2(%arg0: i32) -> (i32, i32) {
    %c0_i32 = arith.constant 0 : i32
    %c0_i32_0 = arith.constant 0 : i32
    %c0_i32_1 = arith.constant 0 : i32
    return %c0_i32, %c0_i32_0 : i32, i32
  }
  func.func @transform_3(%arg0: i32) -> (i32, i32) {
    %c0_i32 = arith.constant 0 : i32
    %c0_i32_0 = arith.constant 0 : i32
    return %arg0, %c0_i32 : i32, i32
  }
}

module attributes {stable_mosaic.version = 11 : i64} {
  func.func @_blmm_kernel(%arg0: i32, %arg1: i32, %arg2: memref<1x4xbf16, #tpu.memory_space<vmem>>, %arg3: memref<1x4x48xbf16, #tpu.memory_space<vmem>>, %arg4: memref<1x1x48xbf16, #tpu.memory_space<vmem>>) attributes {dimension_semantics = [#tpu.dimension_semantics<parallel>, #tpu.dimension_semantics<parallel>], iteration_bounds = array<i64: 2, 1>, scalar_prefetch = 0 : i64, scratch_operands = 0 : i64, tpu.core_type = #tpu.core_type<tc>, window_params = [{pipeline_mode = #tpu.pipeline_mode<synchronous>, transform_indices = @transform_0, window_bounds = array<i64: 1, 4>}, {transform_indices = @transform_1, window_bounds = array<i64: 1, 4, 48>}, {transform_indices = @transform_2, window_bounds = array<i64: 1, 1, 48>}]} {
    %c0 = arith.constant 0 : index
    %c0_0 = arith.constant 0 : index
    %0 = vector.load %arg2[%c0, %c0_0] : memref<1x4xbf16, #tpu.memory_space<vmem>>, vector<1x4xbf16>
    %c0_1 = arith.constant 0 : index
    %c0_2 = arith.constant 0 : index
    %c0_3 = arith.constant 0 : index
    %1 = vector.load %arg3[%c0_1, %c0_2, %c0_3] : memref<1x4x48xbf16, #tpu.memory_space<vmem>>, vector<1x4x48xbf16>
    %2 = vector.shape_cast %1 : vector<1x4x48xbf16> to vector<4x48xbf16>
    %cst = arith.constant dense<0.000000e+00> : vector<1x48xf32>
    %3 = tpu.matmul %0, %2, %cst {dimension_numbers = #tpu.dot_dimension_numbers<[1], [0], [0], [1], [0, 0, 1, 1], [], []>} : vector<1x4xbf16>, vector<4x48xbf16>, vector<1x48xf32> -> vector<1x48xf32>
    %4 = arith.truncf %3 : vector<1x48xf32> to vector<1x48xbf16>
    %c0_4 = arith.constant 0 : index
    %c0_5 = arith.constant 0 : index
    %c0_6 = arith.constant 0 : index
    %5 = vector.load %arg4[%c0_4, %c0_5, %c0_6] : memref<1x1x48xbf16, #tpu.memory_space<vmem>>, vector<1x1x48xbf16>
    %6 = vector.shape_cast %5 : vector<1x1x48xbf16> to vector<1x48xbf16>
    %7 = vector.shape_cast %4 : vector<1x48xbf16> to vector<1x1x48xbf16>
    tpu.vector_store %arg4[%c0_4, %c0_5, %c0_6], %7 {strides = array<i32>} : memref<1x1x48xbf16, #tpu.memory_space<vmem>>, vector<1x1x48xbf16>,
    return
  }
  func.func @transform_0(%arg0: i32, %arg1: i32) -> (i32, i32) {
    %c0_i32 = arith.constant 0 : i32
    %c0_i32_0 = arith.constant 0 : i32
    %c0_i32_1 = arith.constant 0 : i32
    return %c0_i32, %c0_i32_0 : i32, i32
  }
  func.func @transform_1(%arg0: i32, %arg1: i32) -> (i32, i32, i32) {
    %c0_i32 = arith.constant 0 : i32
    %c0_i32_0 = arith.constant 0 : i32
    return %arg0, %c0_i32, %arg1 : i32, i32, i32
  }
  func.func @transform_2(%arg0: i32, %arg1: i32) -> (i32, i32, i32) {
    %c0_i32 = arith.constant 0 : i32
    %c0_i32_0 = arith.constant 0 : i32
    return %arg0, %c0_i32, %arg1 : i32, i32, i32
  }
}

module attributes {stable_mosaic.version = 11 : i64} {
  func.func @_scale_kernel(%arg0: i32, %arg1: memref<1x4x48xbf16, #tpu.memory_space<vmem>>, %arg2: memref<1x1x48xbf16, #tpu.memory_space<vmem>>, %arg3: memref<1x4x48xbf16, #tpu.memory_space<vmem>>) attributes {dimension_semantics = [#tpu.dimension_semantics<parallel>], iteration_bounds = array<i64: 2>, scalar_prefetch = 0 : i64, scratch_operands = 0 : i64, tpu.core_type = #tpu.core_type<tc>, window_params = [{transform_indices = @transform_0, window_bounds = array<i64: 1, 4, 48>}, {transform_indices = @transform_1, window_bounds = array<i64: 1, 1, 48>}, {transform_indices = @transform_2, window_bounds = array<i64: 1, 4, 48>}]} {
    %c0 = arith.constant 0 : index
    %c0_0 = arith.constant 0 : index
    %c0_1 = arith.constant 0 : index
    %0 = vector.load %arg1[%c0, %c0_0, %c0_1] : memref<1x4x48xbf16, #tpu.memory_space<vmem>>, vector<1x4x48xbf16>
    %c0_2 = arith.constant 0 : index
    %c0_3 = arith.constant 0 : index
    %c0_4 = arith.constant 0 : index
    %1 = vector.load %arg2[%c0_2, %c0_3, %c0_4] : memref<1x1x48xbf16, #tpu.memory_space<vmem>>, vector<1x1x48xbf16>
    %2 = vector.broadcast %1 : vector<1x1x48xbf16> to vector<1x4x48xbf16>
    %3 = arith.mulf %0, %2 : vector<1x4x48xbf16>
    %c0_5 = arith.constant 0 : index
    %c0_6 = arith.constant 0 : index
    %c0_7 = arith.constant 0 : index
    %4 = vector.load %arg3[%c0_5, %c0_6, %c0_7] : memref<1x4x48xbf16, #tpu.memory_space<vmem>>, vector<1x4x48xbf16>
    tpu.vector_store %arg3[%c0_5, %c0_6, %c0_7], %3 {strides = array<i32>} : memref<1x4x48xbf16, #tpu.memory_space<vmem>>, vector<1x4x48xbf16>,
    return
  }
  func.func @transform_0(%arg0: i32) -> (i32, i32, i32) {
    %c0_i32 = arith.constant 0 : i32
    %c0_i32_0 = arith.constant 0 : i32
    %c0_i32_1 = arith.constant 0 : i32
    return %arg0, %c0_i32, %c0_i32_0 : i32, i32, i32
  }
  func.func @transform_1(%arg0: i32) -> (i32, i32, i32) {
    %c0_i32 = arith.constant 0 : i32
    %c0_i32_0 = arith.constant 0 : i32
    %c0_i32_1 = arith.constant 0 : i32
    return %arg0, %c0_i32, %c0_i32_0 : i32, i32, i32
  }
  func.func @transform_2(%arg0: i32) -> (i32, i32, i32) {
    %c0_i32 = arith.constant 0 : i32
    %c0_i32_0 = arith.constant 0 : i32
    %c0_i32_1 = arith.constant 0 : i32
    return %arg0, %c0_i32, %c0_i32_0 : i32, i32, i32
  }
}

module attributes {stable_mosaic.version = 11 : i64} {
  func.func @_mm_bias_act_kernel(%arg0: i32, %arg1: memref<8x96xbf16, #tpu.memory_space<vmem>>, %arg2: memref<96x384xbf16, #tpu.memory_space<vmem>>, %arg3: memref<1x384xf32, #tpu.memory_space<vmem>>, %arg4: memref<8x384xbf16, #tpu.memory_space<vmem>>) attributes {dimension_semantics = [#tpu.dimension_semantics<parallel>], iteration_bounds = array<i64: 1>, scalar_prefetch = 0 : i64, scratch_operands = 0 : i64, tpu.core_type = #tpu.core_type<tc>, window_params = [{transform_indices = @transform_0, window_bounds = array<i64: 8, 96>}, {pipeline_mode = #tpu.pipeline_mode<synchronous>, transform_indices = @transform_1, window_bounds = array<i64: 96, 384>}, {pipeline_mode = #tpu.pipeline_mode<synchronous>, transform_indices = @transform_2, window_bounds = array<i64: 1, 384>}, {transform_indices = @transform_3, window_bounds = array<i64: 8, 384>}]} {
    %c0 = arith.constant 0 : index
    %c0_0 = arith.constant 0 : index
    %0 = vector.load %arg1[%c0, %c0_0] : memref<8x96xbf16, #tpu.memory_space<vmem>>, vector<8x96xbf16>
    %c0_1 = arith.constant 0 : index
    %c0_2 = arith.constant 0 : index
    %1 = vector.load %arg2[%c0_1, %c0_2] : memref<96x384xbf16, #tpu.memory_space<vmem>>, vector<96x384xbf16>
    %cst = arith.constant dense<0.000000e+00> : vector<8x384xf32>
    %2 = tpu.matmul %0, %1, %cst {dimension_numbers = #tpu.dot_dimension_numbers<[1], [0], [0], [1], [0, 0, 1, 1], [], []>} : vector<8x96xbf16>, vector<96x384xbf16>, vector<8x384xf32> -> vector<8x384xf32>
    %c0_3 = arith.constant 0 : index
    %c0_4 = arith.constant 0 : index
    %3 = vector.load %arg3[%c0_3, %c0_4] : memref<1x384xf32, #tpu.memory_space<vmem>>, vector<1x384xf32>
    %4 = vector.broadcast %3 : vector<1x384xf32> to vector<8x384xf32>
    %5 = arith.addf %2, %4 : vector<8x384xf32>
    %6 = arith.truncf %5 : vector<8x384xf32> to vector<8x384xbf16>
    %c0_5 = arith.constant 0 : index
    %c0_6 = arith.constant 0 : index
    %7 = vector.load %arg4[%c0_5, %c0_6] : memref<8x384xbf16, #tpu.memory_space<vmem>>, vector<8x384xbf16>
    tpu.vector_store %arg4[%c0_5, %c0_6], %6 {strides = array<i32>} : memref<8x384xbf16, #tpu.memory_space<vmem>>, vector<8x384xbf16>,
    return
  }
  func.func @transform_0(%arg0: i32) -> (i32, i32) {
    %c0_i32 = arith.constant 0 : i32
    %c0_i32_0 = arith.constant 0 : i32
    return %arg0, %c0_i32 : i32, i32
  }
  func.func @transform_1(%arg0: i32) -> (i32, i32) {
    %c0_i32 = arith.constant 0 : i32
    %c0_i32_0 = arith.constant 0 : i32
    %c0_i32_1 = arith.constant 0 : i32
    return %c0_i32, %c0_i32_0 : i32, i32
  }
  func.func @transform_2(%arg0: i32) -> (i32, i32) {
    %c0_i32 = arith.constant 0 : i32
    %c0_i32_0 = arith.constant 0 : i32
    %c0_i32_1 = arith.constant 0 : i32
    return %c0_i32, %c0_i32_0 : i32, i32
  }
  func.func @transform_3(%arg0: i32) -> (i32, i32) {
    %c0_i32 = arith.constant 0 : i32
    %c0_i32_0 = arith.constant 0 : i32
    return %arg0, %c0_i32 : i32, i32
  }
}

module attributes {stable_mosaic.version = 11 : i64} {
  func.func @_blmm_kernel(%arg0: i32, %arg1: i32, %arg2: memref<8x2xbf16, #tpu.memory_space<vmem>>, %arg3: memref<1x2x384xbf16, #tpu.memory_space<vmem>>, %arg4: memref<1x8x384xbf16, #tpu.memory_space<vmem>>) attributes {dimension_semantics = [#tpu.dimension_semantics<parallel>, #tpu.dimension_semantics<parallel>], iteration_bounds = array<i64: 2, 1>, scalar_prefetch = 0 : i64, scratch_operands = 0 : i64, tpu.core_type = #tpu.core_type<tc>, window_params = [{pipeline_mode = #tpu.pipeline_mode<synchronous>, transform_indices = @transform_0, window_bounds = array<i64: 8, 2>}, {transform_indices = @transform_1, window_bounds = array<i64: 1, 2, 384>}, {transform_indices = @transform_2, window_bounds = array<i64: 1, 8, 384>}]} {
    %c0 = arith.constant 0 : index
    %c0_0 = arith.constant 0 : index
    %0 = vector.load %arg2[%c0, %c0_0] : memref<8x2xbf16, #tpu.memory_space<vmem>>, vector<8x2xbf16>
    %c0_1 = arith.constant 0 : index
    %c0_2 = arith.constant 0 : index
    %c0_3 = arith.constant 0 : index
    %1 = vector.load %arg3[%c0_1, %c0_2, %c0_3] : memref<1x2x384xbf16, #tpu.memory_space<vmem>>, vector<1x2x384xbf16>
    %2 = vector.shape_cast %1 : vector<1x2x384xbf16> to vector<2x384xbf16>
    %cst = arith.constant dense<0.000000e+00> : vector<8x384xf32>
    %3 = tpu.matmul %0, %2, %cst {dimension_numbers = #tpu.dot_dimension_numbers<[1], [0], [0], [1], [0, 0, 1, 1], [], []>} : vector<8x2xbf16>, vector<2x384xbf16>, vector<8x384xf32> -> vector<8x384xf32>
    %4 = arith.truncf %3 : vector<8x384xf32> to vector<8x384xbf16>
    %c0_4 = arith.constant 0 : index
    %c0_5 = arith.constant 0 : index
    %c0_6 = arith.constant 0 : index
    %5 = vector.load %arg4[%c0_4, %c0_5, %c0_6] : memref<1x8x384xbf16, #tpu.memory_space<vmem>>, vector<1x8x384xbf16>
    %6 = vector.shape_cast %5 : vector<1x8x384xbf16> to vector<8x384xbf16>
    %7 = vector.shape_cast %4 : vector<8x384xbf16> to vector<1x8x384xbf16>
    tpu.vector_store %arg4[%c0_4, %c0_5, %c0_6], %7 {strides = array<i32>} : memref<1x8x384xbf16, #tpu.memory_space<vmem>>, vector<1x8x384xbf16>,
    return
  }
  func.func @transform_0(%arg0: i32, %arg1: i32) -> (i32, i32) {
    %c0_i32 = arith.constant 0 : i32
    %c0_i32_0 = arith.constant 0 : i32
    %c0_i32_1 = arith.constant 0 : i32
    return %c0_i32, %c0_i32_0 : i32, i32
  }
  func.func @transform_1(%arg0: i32, %arg1: i32) -> (i32, i32, i32) {
    %c0_i32 = arith.constant 0 : i32
    %c0_i32_0 = arith.constant 0 : i32
    return %arg0, %c0_i32, %arg1 : i32, i32, i32
  }
  func.func @transform_2(%arg0: i32, %arg1: i32) -> (i32, i32, i32) {
    %c0_i32 = arith.constant 0 : i32
    %c0_i32_0 = arith.constant 0 : i32
    return %arg0, %c0_i32, %arg1 : i32, i32, i32
  }
}

module attributes {stable_mosaic.version = 11 : i64} {
  func.func @_mm_bias_act_kernel(%arg0: i32, %arg1: memref<32x576xbf16, #tpu.memory_space<vmem>>, %arg2: memref<576x128xbf16, #tpu.memory_space<vmem>>, %arg3: memref<1x128xf32, #tpu.memory_space<vmem>>, %arg4: memref<32x128xbf16, #tpu.memory_space<vmem>>) attributes {dimension_semantics = [#tpu.dimension_semantics<parallel>], iteration_bounds = array<i64: 1>, scalar_prefetch = 0 : i64, scratch_operands = 0 : i64, tpu.core_type = #tpu.core_type<tc>, window_params = [{transform_indices = @transform_0, window_bounds = array<i64: 32, 576>}, {pipeline_mode = #tpu.pipeline_mode<synchronous>, transform_indices = @transform_1, window_bounds = array<i64: 576, 128>}, {pipeline_mode = #tpu.pipeline_mode<synchronous>, transform_indices = @transform_2, window_bounds = array<i64: 1, 128>}, {transform_indices = @transform_3, window_bounds = array<i64: 32, 128>}]} {
    %c0 = arith.constant 0 : index
    %c0_0 = arith.constant 0 : index
    %0 = vector.load %arg1[%c0, %c0_0] : memref<32x576xbf16, #tpu.memory_space<vmem>>, vector<32x576xbf16>
    %c0_1 = arith.constant 0 : index
    %c0_2 = arith.constant 0 : index
    %1 = vector.load %arg2[%c0_1, %c0_2] : memref<576x128xbf16, #tpu.memory_space<vmem>>, vector<576x128xbf16>
    %cst = arith.constant dense<0.000000e+00> : vector<32x128xf32>
    %2 = tpu.matmul %0, %1, %cst {dimension_numbers = #tpu.dot_dimension_numbers<[1], [0], [0], [1], [0, 0, 1, 1], [], []>} : vector<32x576xbf16>, vector<576x128xbf16>, vector<32x128xf32> -> vector<32x128xf32>
    %c0_3 = arith.constant 0 : index
    %c0_4 = arith.constant 0 : index
    %3 = vector.load %arg3[%c0_3, %c0_4] : memref<1x128xf32, #tpu.memory_space<vmem>>, vector<1x128xf32>
    %4 = vector.broadcast %3 : vector<1x128xf32> to vector<32x128xf32>
    %5 = arith.addf %2, %4 : vector<32x128xf32>
    %cst_5 = arith.constant 0.000000e+00 : f32
    %6 = vector.broadcast %cst_5 : f32 to vector<32x128xf32>
    %7 = arith.maximumf %5, %6 : vector<32x128xf32>
    %8 = arith.truncf %7 : vector<32x128xf32> to vector<32x128xbf16>
    %c0_6 = arith.constant 0 : index
    %c0_7 = arith.constant 0 : index
    %9 = vector.load %arg4[%c0_6, %c0_7] : memref<32x128xbf16, #tpu.memory_space<vmem>>, vector<32x128xbf16>
    tpu.vector_store %arg4[%c0_6, %c0_7], %8 {strides = array<i32>} : memref<32x128xbf16, #tpu.memory_space<vmem>>, vector<32x128xbf16>,
    return
  }
  func.func @transform_0(%arg0: i32) -> (i32, i32) {
    %c0_i32 = arith.constant 0 : i32
    %c0_i32_0 = arith.constant 0 : i32
    return %arg0, %c0_i32 : i32, i32
  }
  func.func @transform_1(%arg0: i32) -> (i32, i32) {
    %c0_i32 = arith.constant 0 : i32
    %c0_i32_0 = arith.constant 0 : i32
    %c0_i32_1 = arith.constant 0 : i32
    return %c0_i32, %c0_i32_0 : i32, i32
  }
  func.func @transform_2(%arg0: i32) -> (i32, i32) {
    %c0_i32 = arith.constant 0 : i32
    %c0_i32_0 = arith.constant 0 : i32
    %c0_i32_1 = arith.constant 0 : i32
    return %c0_i32, %c0_i32_0 : i32, i32
  }
  func.func @transform_3(%arg0: i32) -> (i32, i32) {
    %c0_i32 = arith.constant 0 : i32
    %c0_i32_0 = arith.constant 0 : i32
    return %arg0, %c0_i32 : i32, i32
  }
}

module attributes {stable_mosaic.version = 11 : i64} {
  func.func @_mm_bias_act_kernel(%arg0: i32, %arg1: memref<8x432xbf16, #tpu.memory_space<vmem>>, %arg2: memref<432x128xbf16, #tpu.memory_space<vmem>>, %arg3: memref<1x128xf32, #tpu.memory_space<vmem>>, %arg4: memref<8x128xbf16, #tpu.memory_space<vmem>>) attributes {dimension_semantics = [#tpu.dimension_semantics<parallel>], iteration_bounds = array<i64: 1>, scalar_prefetch = 0 : i64, scratch_operands = 0 : i64, tpu.core_type = #tpu.core_type<tc>, window_params = [{transform_indices = @transform_0, window_bounds = array<i64: 8, 432>}, {pipeline_mode = #tpu.pipeline_mode<synchronous>, transform_indices = @transform_1, window_bounds = array<i64: 432, 128>}, {pipeline_mode = #tpu.pipeline_mode<synchronous>, transform_indices = @transform_2, window_bounds = array<i64: 1, 128>}, {transform_indices = @transform_3, window_bounds = array<i64: 8, 128>}]} {
    %c0 = arith.constant 0 : index
    %c0_0 = arith.constant 0 : index
    %0 = vector.load %arg1[%c0, %c0_0] : memref<8x432xbf16, #tpu.memory_space<vmem>>, vector<8x432xbf16>
    %c0_1 = arith.constant 0 : index
    %c0_2 = arith.constant 0 : index
    %1 = vector.load %arg2[%c0_1, %c0_2] : memref<432x128xbf16, #tpu.memory_space<vmem>>, vector<432x128xbf16>
    %cst = arith.constant dense<0.000000e+00> : vector<8x128xf32>
    %2 = tpu.matmul %0, %1, %cst {dimension_numbers = #tpu.dot_dimension_numbers<[1], [0], [0], [1], [0, 0, 1, 1], [], []>} : vector<8x432xbf16>, vector<432x128xbf16>, vector<8x128xf32> -> vector<8x128xf32>
    %c0_3 = arith.constant 0 : index
    %c0_4 = arith.constant 0 : index
    %3 = vector.load %arg3[%c0_3, %c0_4] : memref<1x128xf32, #tpu.memory_space<vmem>>, vector<1x128xf32>
    %4 = vector.broadcast %3 : vector<1x128xf32> to vector<8x128xf32>
    %5 = arith.addf %2, %4 : vector<8x128xf32>
    %cst_5 = arith.constant 0.000000e+00 : f32
    %6 = vector.broadcast %cst_5 : f32 to vector<8x128xf32>
    %7 = arith.maximumf %5, %6 : vector<8x128xf32>
    %8 = arith.truncf %7 : vector<8x128xf32> to vector<8x128xbf16>
    %c0_6 = arith.constant 0 : index
    %c0_7 = arith.constant 0 : index
    %9 = vector.load %arg4[%c0_6, %c0_7] : memref<8x128xbf16, #tpu.memory_space<vmem>>, vector<8x128xbf16>
    tpu.vector_store %arg4[%c0_6, %c0_7], %8 {strides = array<i32>} : memref<8x128xbf16, #tpu.memory_space<vmem>>, vector<8x128xbf16>,
    return
  }
  func.func @transform_0(%arg0: i32) -> (i32, i32) {
    %c0_i32 = arith.constant 0 : i32
    %c0_i32_0 = arith.constant 0 : i32
    return %arg0, %c0_i32 : i32, i32
  }
  func.func @transform_1(%arg0: i32) -> (i32, i32) {
    %c0_i32 = arith.constant 0 : i32
    %c0_i32_0 = arith.constant 0 : i32
    %c0_i32_1 = arith.constant 0 : i32
    return %c0_i32, %c0_i32_0 : i32, i32
  }
  func.func @transform_2(%arg0: i32) -> (i32, i32) {
    %c0_i32 = arith.constant 0 : i32
    %c0_i32_0 = arith.constant 0 : i32
    %c0_i32_1 = arith.constant 0 : i32
    return %c0_i32, %c0_i32_0 : i32, i32
  }
  func.func @transform_3(%arg0: i32) -> (i32, i32) {
    %c0_i32 = arith.constant 0 : i32
    %c0_i32_0 = arith.constant 0 : i32
    return %arg0, %c0_i32 : i32, i32
  }
}

module attributes {stable_mosaic.version = 11 : i64} {
  func.func @_scale_kernel(%arg0: i32, %arg1: memref<1x1x48xbf16, #tpu.memory_space<vmem>>, %arg2: memref<1x1x48xbf16, #tpu.memory_space<vmem>>, %arg3: memref<1x1x48xbf16, #tpu.memory_space<vmem>>) attributes {dimension_semantics = [#tpu.dimension_semantics<parallel>], iteration_bounds = array<i64: 2>, scalar_prefetch = 0 : i64, scratch_operands = 0 : i64, tpu.core_type = #tpu.core_type<tc>, window_params = [{transform_indices = @transform_0, window_bounds = array<i64: 1, 1, 48>}, {transform_indices = @transform_1, window_bounds = array<i64: 1, 1, 48>}, {transform_indices = @transform_2, window_bounds = array<i64: 1, 1, 48>}]} {
    %c0 = arith.constant 0 : index
    %c0_0 = arith.constant 0 : index
    %c0_1 = arith.constant 0 : index
    %0 = vector.load %arg1[%c0, %c0_0, %c0_1] : memref<1x1x48xbf16, #tpu.memory_space<vmem>>, vector<1x1x48xbf16>
    %c0_2 = arith.constant 0 : index
    %c0_3 = arith.constant 0 : index
    %c0_4 = arith.constant 0 : index
    %1 = vector.load %arg2[%c0_2, %c0_3, %c0_4] : memref<1x1x48xbf16, #tpu.memory_space<vmem>>, vector<1x1x48xbf16>
    %2 = arith.mulf %0, %1 : vector<1x1x48xbf16>
    %c0_5 = arith.constant 0 : index
    %c0_6 = arith.constant 0 : index
    %c0_7 = arith.constant 0 : index
    %3 = vector.load %arg3[%c0_5, %c0_6, %c0_7] : memref<1x1x48xbf16, #tpu.memory_space<vmem>>, vector<1x1x48xbf16>
    tpu.vector_store %arg3[%c0_5, %c0_6, %c0_7], %2 {strides = array<i32>} : memref<1x1x48xbf16, #tpu.memory_space<vmem>>, vector<1x1x48xbf16>,
    return
  }
  func.func @transform_0(%arg0: i32) -> (i32, i32, i32) {
    %c0_i32 = arith.constant 0 : i32
    %c0_i32_0 = arith.constant 0 : i32
    %c0_i32_1 = arith.constant 0 : i32
    return %arg0, %c0_i32, %c0_i32_0 : i32, i32, i32
  }
  func.func @transform_1(%arg0: i32) -> (i32, i32, i32) {
    %c0_i32 = arith.constant 0 : i32
    %c0_i32_0 = arith.constant 0 : i32
    %c0_i32_1 = arith.constant 0 : i32
    return %arg0, %c0_i32, %c0_i32_0 : i32, i32, i32
  }
  func.func @transform_2(%arg0: i32) -> (i32, i32, i32) {
    %c0_i32 = arith.constant 0 : i32
    %c0_i32_0 = arith.constant 0 : i32
    %c0_i32_1 = arith.constant 0 : i32
    return %arg0, %c0_i32, %c0_i32_0 : i32, i32, i32
  }
}

module attributes {stable_mosaic.version = 11 : i64} {
  func.func @_mm_bias_act_kernel(%arg0: i32, %arg1: memref<8x720xbf16, #tpu.memory_space<vmem>>, %arg2: memref<720x128xbf16, #tpu.memory_space<vmem>>, %arg3: memref<1x128xf32, #tpu.memory_space<vmem>>, %arg4: memref<8x128xbf16, #tpu.memory_space<vmem>>) attributes {dimension_semantics = [#tpu.dimension_semantics<parallel>], iteration_bounds = array<i64: 1>, scalar_prefetch = 0 : i64, scratch_operands = 0 : i64, tpu.core_type = #tpu.core_type<tc>, window_params = [{transform_indices = @transform_0, window_bounds = array<i64: 8, 720>}, {pipeline_mode = #tpu.pipeline_mode<synchronous>, transform_indices = @transform_1, window_bounds = array<i64: 720, 128>}, {pipeline_mode = #tpu.pipeline_mode<synchronous>, transform_indices = @transform_2, window_bounds = array<i64: 1, 128>}, {transform_indices = @transform_3, window_bounds = array<i64: 8, 128>}]} {
    %c0 = arith.constant 0 : index
    %c0_0 = arith.constant 0 : index
    %0 = vector.load %arg1[%c0, %c0_0] : memref<8x720xbf16, #tpu.memory_space<vmem>>, vector<8x720xbf16>
    %c0_1 = arith.constant 0 : index
    %c0_2 = arith.constant 0 : index
    %1 = vector.load %arg2[%c0_1, %c0_2] : memref<720x128xbf16, #tpu.memory_space<vmem>>, vector<720x128xbf16>
    %cst = arith.constant dense<0.000000e+00> : vector<8x128xf32>
    %2 = tpu.matmul %0, %1, %cst {dimension_numbers = #tpu.dot_dimension_numbers<[1], [0], [0], [1], [0, 0, 1, 1], [], []>} : vector<8x720xbf16>, vector<720x128xbf16>, vector<8x128xf32> -> vector<8x128xf32>
    %c0_3 = arith.constant 0 : index
    %c0_4 = arith.constant 0 : index
    %3 = vector.load %arg3[%c0_3, %c0_4] : memref<1x128xf32, #tpu.memory_space<vmem>>, vector<1x128xf32>
    %4 = vector.broadcast %3 : vector<1x128xf32> to vector<8x128xf32>
    %5 = arith.addf %2, %4 : vector<8x128xf32>
    %cst_5 = arith.constant 0.000000e+00 : f32
    %6 = vector.broadcast %cst_5 : f32 to vector<8x128xf32>
    %7 = arith.maximumf %5, %6 : vector<8x128xf32>
    %8 = arith.truncf %7 : vector<8x128xf32> to vector<8x128xbf16>
    %c0_6 = arith.constant 0 : index
    %c0_7 = arith.constant 0 : index
    %9 = vector.load %arg4[%c0_6, %c0_7] : memref<8x128xbf16, #tpu.memory_space<vmem>>, vector<8x128xbf16>
    tpu.vector_store %arg4[%c0_6, %c0_7], %8 {strides = array<i32>} : memref<8x128xbf16, #tpu.memory_space<vmem>>, vector<8x128xbf16>,
    return
  }
  func.func @transform_0(%arg0: i32) -> (i32, i32) {
    %c0_i32 = arith.constant 0 : i32
    %c0_i32_0 = arith.constant 0 : i32
    return %arg0, %c0_i32 : i32, i32
  }
  func.func @transform_1(%arg0: i32) -> (i32, i32) {
    %c0_i32 = arith.constant 0 : i32
    %c0_i32_0 = arith.constant 0 : i32
    %c0_i32_1 = arith.constant 0 : i32
    return %c0_i32, %c0_i32_0 : i32, i32
  }
  func.func @transform_2(%arg0: i32) -> (i32, i32) {
    %c0_i32 = arith.constant 0 : i32
    %c0_i32_0 = arith.constant 0 : i32
    %c0_i32_1 = arith.constant 0 : i32
    return %c0_i32, %c0_i32_0 : i32, i32
  }
  func.func @transform_3(%arg0: i32) -> (i32, i32) {
    %c0_i32 = arith.constant 0 : i32
    %c0_i32_0 = arith.constant 0 : i32
    return %arg0, %c0_i32 : i32, i32
  }
}

module attributes {stable_mosaic.version = 11 : i64} {
  func.func @_blmm_kernel(%arg0: i32, %arg1: i32, %arg2: memref<1x1xbf16, #tpu.memory_space<vmem>>, %arg3: memref<1x1x48xbf16, #tpu.memory_space<vmem>>, %arg4: memref<1x1x48xbf16, #tpu.memory_space<vmem>>) attributes {dimension_semantics = [#tpu.dimension_semantics<parallel>, #tpu.dimension_semantics<parallel>], iteration_bounds = array<i64: 2, 1>, scalar_prefetch = 0 : i64, scratch_operands = 0 : i64, tpu.core_type = #tpu.core_type<tc>, window_params = [{pipeline_mode = #tpu.pipeline_mode<synchronous>, transform_indices = @transform_0, window_bounds = array<i64: 1, 1>}, {transform_indices = @transform_1, window_bounds = array<i64: 1, 1, 48>}, {transform_indices = @transform_2, window_bounds = array<i64: 1, 1, 48>}]} {
    %c0 = arith.constant 0 : index
    %c0_0 = arith.constant 0 : index
    %0 = vector.load %arg2[%c0, %c0_0] : memref<1x1xbf16, #tpu.memory_space<vmem>>, vector<1x1xbf16>
    %c0_1 = arith.constant 0 : index
    %c0_2 = arith.constant 0 : index
    %c0_3 = arith.constant 0 : index
    %1 = vector.load %arg3[%c0_1, %c0_2, %c0_3] : memref<1x1x48xbf16, #tpu.memory_space<vmem>>, vector<1x1x48xbf16>
    %2 = vector.shape_cast %1 : vector<1x1x48xbf16> to vector<1x48xbf16>
    %3 = arith.extf %0 : vector<1x1xbf16> to vector<1x1xf32>
    %4 = arith.extf %2 : vector<1x48xbf16> to vector<1x48xf32>
    %5 = vector.broadcast %3 : vector<1x1xf32> to vector<1x48xf32>
    %6 = arith.mulf %5, %4 : vector<1x48xf32>
    %7 = arith.truncf %6 : vector<1x48xf32> to vector<1x48xbf16>
    %c0_4 = arith.constant 0 : index
    %c0_5 = arith.constant 0 : index
    %c0_6 = arith.constant 0 : index
    %8 = vector.load %arg4[%c0_4, %c0_5, %c0_6] : memref<1x1x48xbf16, #tpu.memory_space<vmem>>, vector<1x1x48xbf16>
    %9 = vector.shape_cast %8 : vector<1x1x48xbf16> to vector<1x48xbf16>
    %10 = vector.shape_cast %7 : vector<1x48xbf16> to vector<1x1x48xbf16>
    tpu.vector_store %arg4[%c0_4, %c0_5, %c0_6], %10 {strides = array<i32>} : memref<1x1x48xbf16, #tpu.memory_space<vmem>>, vector<1x1x48xbf16>,
    return
  }
  func.func @transform_0(%arg0: i32, %arg1: i32) -> (i32, i32) {
    %c0_i32 = arith.constant 0 : i32
    %c0_i32_0 = arith.constant 0 : i32
    %c0_i32_1 = arith.constant 0 : i32
    return %c0_i32, %c0_i32_0 : i32, i32
  }
  func.func @transform_1(%arg0: i32, %arg1: i32) -> (i32, i32, i32) {
    %c0_i32 = arith.constant 0 : i32
    %c0_i32_0 = arith.constant 0 : i32
    return %arg0, %c0_i32, %arg1 : i32, i32, i32
  }
  func.func @transform_2(%arg0: i32, %arg1: i32) -> (i32, i32, i32) {
    %c0_i32 = arith.constant 0 : i32
    %c0_i32_0 = arith.constant 0 : i32
    return %arg0, %c0_i32, %arg1 : i32, i32, i32
  }
}

module attributes {stable_mosaic.version = 11 : i64} {
  func.func @_mm_bias_act_kernel(%arg0: i32, %arg1: memref<8x16xbf16, #tpu.memory_space<vmem>>, %arg2: memref<16x256xbf16, #tpu.memory_space<vmem>>, %arg3: memref<1x256xf32, #tpu.memory_space<vmem>>, %arg4: memref<8x256xbf16, #tpu.memory_space<vmem>>) attributes {dimension_semantics = [#tpu.dimension_semantics<parallel>], iteration_bounds = array<i64: 1>, scalar_prefetch = 0 : i64, scratch_operands = 0 : i64, tpu.core_type = #tpu.core_type<tc>, window_params = [{transform_indices = @transform_0, window_bounds = array<i64: 8, 16>}, {pipeline_mode = #tpu.pipeline_mode<synchronous>, transform_indices = @transform_1, window_bounds = array<i64: 16, 256>}, {pipeline_mode = #tpu.pipeline_mode<synchronous>, transform_indices = @transform_2, window_bounds = array<i64: 1, 256>}, {transform_indices = @transform_3, window_bounds = array<i64: 8, 256>}]} {
    %c0 = arith.constant 0 : index
    %c0_0 = arith.constant 0 : index
    %0 = vector.load %arg1[%c0, %c0_0] : memref<8x16xbf16, #tpu.memory_space<vmem>>, vector<8x16xbf16>
    %c0_1 = arith.constant 0 : index
    %c0_2 = arith.constant 0 : index
    %1 = vector.load %arg2[%c0_1, %c0_2] : memref<16x256xbf16, #tpu.memory_space<vmem>>, vector<16x256xbf16>
    %cst = arith.constant dense<0.000000e+00> : vector<8x256xf32>
    %2 = tpu.matmul %0, %1, %cst {dimension_numbers = #tpu.dot_dimension_numbers<[1], [0], [0], [1], [0, 0, 1, 1], [], []>} : vector<8x16xbf16>, vector<16x256xbf16>, vector<8x256xf32> -> vector<8x256xf32>
    %c0_3 = arith.constant 0 : index
    %c0_4 = arith.constant 0 : index
    %3 = vector.load %arg3[%c0_3, %c0_4] : memref<1x256xf32, #tpu.memory_space<vmem>>, vector<1x256xf32>
    %4 = vector.broadcast %3 : vector<1x256xf32> to vector<8x256xf32>
    %5 = arith.addf %2, %4 : vector<8x256xf32>
    %6 = arith.truncf %5 : vector<8x256xf32> to vector<8x256xbf16>
    %c0_5 = arith.constant 0 : index
    %c0_6 = arith.constant 0 : index
    %7 = vector.load %arg4[%c0_5, %c0_6] : memref<8x256xbf16, #tpu.memory_space<vmem>>, vector<8x256xbf16>
    tpu.vector_store %arg4[%c0_5, %c0_6], %6 {strides = array<i32>} : memref<8x256xbf16, #tpu.memory_space<vmem>>, vector<8x256xbf16>,
    return
  }
  func.func @transform_0(%arg0: i32) -> (i32, i32) {
    %c0_i32 = arith.constant 0 : i32
    %c0_i32_0 = arith.constant 0 : i32
    return %arg0, %c0_i32 : i32, i32
  }
  func.func @transform_1(%arg0: i32) -> (i32, i32) {
    %c0_i32 = arith.constant 0 : i32
    %c0_i32_0 = arith.constant 0 : i32
    %c0_i32_1 = arith.constant 0 : i32
    return %c0_i32, %c0_i32_0 : i32, i32
  }
  func.func @transform_2(%arg0: i32) -> (i32, i32) {
    %c0_i32 = arith.constant 0 : i32
    %c0_i32_0 = arith.constant 0 : i32
    %c0_i32_1 = arith.constant 0 : i32
    return %c0_i32, %c0_i32_0 : i32, i32
  }
  func.func @transform_3(%arg0: i32) -> (i32, i32) {
    %c0_i32 = arith.constant 0 : i32
    %c0_i32_0 = arith.constant 0 : i32
    return %arg0, %c0_i32 : i32, i32
  }
}

module attributes {stable_mosaic.version = 11 : i64} {
  func.func @_blmm_kernel(%arg0: i32, %arg1: i32, %arg2: memref<16x1xbf16, #tpu.memory_space<vmem>>, %arg3: memref<1x1x256xbf16, #tpu.memory_space<vmem>>, %arg4: memref<1x16x256xbf16, #tpu.memory_space<vmem>>) attributes {dimension_semantics = [#tpu.dimension_semantics<parallel>, #tpu.dimension_semantics<parallel>], iteration_bounds = array<i64: 2, 1>, scalar_prefetch = 0 : i64, scratch_operands = 0 : i64, tpu.core_type = #tpu.core_type<tc>, window_params = [{pipeline_mode = #tpu.pipeline_mode<synchronous>, transform_indices = @transform_0, window_bounds = array<i64: 16, 1>}, {transform_indices = @transform_1, window_bounds = array<i64: 1, 1, 256>}, {transform_indices = @transform_2, window_bounds = array<i64: 1, 16, 256>}]} {
    %c0 = arith.constant 0 : index
    %c0_0 = arith.constant 0 : index
    %0 = vector.load %arg2[%c0, %c0_0] : memref<16x1xbf16, #tpu.memory_space<vmem>>, vector<16x1xbf16>
    %c0_1 = arith.constant 0 : index
    %c0_2 = arith.constant 0 : index
    %c0_3 = arith.constant 0 : index
    %1 = vector.load %arg3[%c0_1, %c0_2, %c0_3] : memref<1x1x256xbf16, #tpu.memory_space<vmem>>, vector<1x1x256xbf16>
    %2 = vector.shape_cast %1 : vector<1x1x256xbf16> to vector<1x256xbf16>
    %3 = arith.extf %0 : vector<16x1xbf16> to vector<16x1xf32>
    %4 = arith.extf %2 : vector<1x256xbf16> to vector<1x256xf32>
    %5 = vector.broadcast %3 : vector<16x1xf32> to vector<16x256xf32>
    %6 = vector.broadcast %4 : vector<1x256xf32> to vector<16x256xf32>
    %7 = arith.mulf %5, %6 : vector<16x256xf32>
    %8 = arith.truncf %7 : vector<16x256xf32> to vector<16x256xbf16>
    %c0_4 = arith.constant 0 : index
    %c0_5 = arith.constant 0 : index
    %c0_6 = arith.constant 0 : index
    %9 = vector.load %arg4[%c0_4, %c0_5, %c0_6] : memref<1x16x256xbf16, #tpu.memory_space<vmem>>, vector<1x16x256xbf16>
    %10 = vector.shape_cast %9 : vector<1x16x256xbf16> to vector<16x256xbf16>
    %11 = vector.shape_cast %8 : vector<16x256xbf16> to vector<1x16x256xbf16>
    tpu.vector_store %arg4[%c0_4, %c0_5, %c0_6], %11 {strides = array<i32>} : memref<1x16x256xbf16, #tpu.memory_space<vmem>>, vector<1x16x256xbf16>,
    return
  }
  func.func @transform_0(%arg0: i32, %arg1: i32) -> (i32, i32) {
    %c0_i32 = arith.constant 0 : i32
    %c0_i32_0 = arith.constant 0 : i32
    %c0_i32_1 = arith.constant 0 : i32
    return %c0_i32, %c0_i32_0 : i32, i32
  }
  func.func @transform_1(%arg0: i32, %arg1: i32) -> (i32, i32, i32) {
    %c0_i32 = arith.constant 0 : i32
    %c0_i32_0 = arith.constant 0 : i32
    return %arg0, %c0_i32, %arg1 : i32, i32, i32
  }
  func.func @transform_2(%arg0: i32, %arg1: i32) -> (i32, i32, i32) {
    %c0_i32 = arith.constant 0 : i32
    %c0_i32_0 = arith.constant 0 : i32
    return %arg0, %c0_i32, %arg1 : i32, i32, i32
  }
}

module attributes {stable_mosaic.version = 11 : i64} {
  func.func @_mm_bias_act_kernel(%arg0: i32, %arg1: memref<32x16xbf16, #tpu.memory_space<vmem>>, %arg2: memref<16x128xbf16, #tpu.memory_space<vmem>>, %arg3: memref<1x128xf32, #tpu.memory_space<vmem>>, %arg4: memref<32x128xbf16, #tpu.memory_space<vmem>>) attributes {dimension_semantics = [#tpu.dimension_semantics<parallel>], iteration_bounds = array<i64: 1>, scalar_prefetch = 0 : i64, scratch_operands = 0 : i64, tpu.core_type = #tpu.core_type<tc>, window_params = [{transform_indices = @transform_0, window_bounds = array<i64: 32, 16>}, {pipeline_mode = #tpu.pipeline_mode<synchronous>, transform_indices = @transform_1, window_bounds = array<i64: 16, 128>}, {pipeline_mode = #tpu.pipeline_mode<synchronous>, transform_indices = @transform_2, window_bounds = array<i64: 1, 128>}, {transform_indices = @transform_3, window_bounds = array<i64: 32, 128>}]} {
    %c0 = arith.constant 0 : index
    %c0_0 = arith.constant 0 : index
    %0 = vector.load %arg1[%c0, %c0_0] : memref<32x16xbf16, #tpu.memory_space<vmem>>, vector<32x16xbf16>
    %c0_1 = arith.constant 0 : index
    %c0_2 = arith.constant 0 : index
    %1 = vector.load %arg2[%c0_1, %c0_2] : memref<16x128xbf16, #tpu.memory_space<vmem>>, vector<16x128xbf16>
    %cst = arith.constant dense<0.000000e+00> : vector<32x128xf32>
    %2 = tpu.matmul %0, %1, %cst {dimension_numbers = #tpu.dot_dimension_numbers<[1], [0], [0], [1], [0, 0, 1, 1], [], []>} : vector<32x16xbf16>, vector<16x128xbf16>, vector<32x128xf32> -> vector<32x128xf32>
    %c0_3 = arith.constant 0 : index
    %c0_4 = arith.constant 0 : index
    %3 = vector.load %arg3[%c0_3, %c0_4] : memref<1x128xf32, #tpu.memory_space<vmem>>, vector<1x128xf32>
    %4 = vector.broadcast %3 : vector<1x128xf32> to vector<32x128xf32>
    %5 = arith.addf %2, %4 : vector<32x128xf32>
    %6 = arith.truncf %5 : vector<32x128xf32> to vector<32x128xbf16>
    %c0_5 = arith.constant 0 : index
    %c0_6 = arith.constant 0 : index
    %7 = vector.load %arg4[%c0_5, %c0_6] : memref<32x128xbf16, #tpu.memory_space<vmem>>, vector<32x128xbf16>
    tpu.vector_store %arg4[%c0_5, %c0_6], %6 {strides = array<i32>} : memref<32x128xbf16, #tpu.memory_space<vmem>>, vector<32x128xbf16>,
    return
  }
  func.func @transform_0(%arg0: i32) -> (i32, i32) {
    %c0_i32 = arith.constant 0 : i32
    %c0_i32_0 = arith.constant 0 : i32
    return %arg0, %c0_i32 : i32, i32
  }
  func.func @transform_1(%arg0: i32) -> (i32, i32) {
    %c0_i32 = arith.constant 0 : i32
    %c0_i32_0 = arith.constant 0 : i32
    %c0_i32_1 = arith.constant 0 : i32
    return %c0_i32, %c0_i32_0 : i32, i32
  }
  func.func @transform_2(%arg0: i32) -> (i32, i32) {
    %c0_i32 = arith.constant 0 : i32
    %c0_i32_0 = arith.constant 0 : i32
    %c0_i32_1 = arith.constant 0 : i32
    return %c0_i32, %c0_i32_0 : i32, i32
  }
  func.func @transform_3(%arg0: i32) -> (i32, i32) {
    %c0_i32 = arith.constant 0 : i32
    %c0_i32_0 = arith.constant 0 : i32
    return %arg0, %c0_i32 : i32, i32
  }
}

module attributes {stable_mosaic.version = 11 : i64} {
  func.func @_mm_bias_act_kernel(%arg0: i32, %arg1: memref<8x64xbf16, #tpu.memory_space<vmem>>, %arg2: memref<64x256xbf16, #tpu.memory_space<vmem>>, %arg3: memref<1x256xf32, #tpu.memory_space<vmem>>, %arg4: memref<8x256xbf16, #tpu.memory_space<vmem>>) attributes {dimension_semantics = [#tpu.dimension_semantics<parallel>], iteration_bounds = array<i64: 1>, scalar_prefetch = 0 : i64, scratch_operands = 0 : i64, tpu.core_type = #tpu.core_type<tc>, window_params = [{transform_indices = @transform_0, window_bounds = array<i64: 8, 64>}, {pipeline_mode = #tpu.pipeline_mode<synchronous>, transform_indices = @transform_1, window_bounds = array<i64: 64, 256>}, {pipeline_mode = #tpu.pipeline_mode<synchronous>, transform_indices = @transform_2, window_bounds = array<i64: 1, 256>}, {transform_indices = @transform_3, window_bounds = array<i64: 8, 256>}]} {
    %c0 = arith.constant 0 : index
    %c0_0 = arith.constant 0 : index
    %0 = vector.load %arg1[%c0, %c0_0] : memref<8x64xbf16, #tpu.memory_space<vmem>>, vector<8x64xbf16>
    %c0_1 = arith.constant 0 : index
    %c0_2 = arith.constant 0 : index
    %1 = vector.load %arg2[%c0_1, %c0_2] : memref<64x256xbf16, #tpu.memory_space<vmem>>, vector<64x256xbf16>
    %cst = arith.constant dense<0.000000e+00> : vector<8x256xf32>
    %2 = tpu.matmul %0, %1, %cst {dimension_numbers = #tpu.dot_dimension_numbers<[1], [0], [0], [1], [0, 0, 1, 1], [], []>} : vector<8x64xbf16>, vector<64x256xbf16>, vector<8x256xf32> -> vector<8x256xf32>
    %c0_3 = arith.constant 0 : index
    %c0_4 = arith.constant 0 : index
    %3 = vector.load %arg3[%c0_3, %c0_4] : memref<1x256xf32, #tpu.memory_space<vmem>>, vector<1x256xf32>
    %4 = vector.broadcast %3 : vector<1x256xf32> to vector<8x256xf32>
    %5 = arith.addf %2, %4 : vector<8x256xf32>
    %6 = arith.truncf %5 : vector<8x256xf32> to vector<8x256xbf16>
    %c0_5 = arith.constant 0 : index
    %c0_6 = arith.constant 0 : index
    %7 = vector.load %arg4[%c0_5, %c0_6] : memref<8x256xbf16, #tpu.memory_space<vmem>>, vector<8x256xbf16>
    tpu.vector_store %arg4[%c0_5, %c0_6], %6 {strides = array<i32>} : memref<8x256xbf16, #tpu.memory_space<vmem>>, vector<8x256xbf16>,
    return
  }
  func.func @transform_0(%arg0: i32) -> (i32, i32) {
    %c0_i32 = arith.constant 0 : i32
    %c0_i32_0 = arith.constant 0 : i32
    return %arg0, %c0_i32 : i32, i32
  }
  func.func @transform_1(%arg0: i32) -> (i32, i32) {
    %c0_i32 = arith.constant 0 : i32
    %c0_i32_0 = arith.constant 0 : i32
    %c0_i32_1 = arith.constant 0 : i32
    return %c0_i32, %c0_i32_0 : i32, i32
  }
  func.func @transform_2(%arg0: i32) -> (i32, i32) {
    %c0_i32 = arith.constant 0 : i32
    %c0_i32_0 = arith.constant 0 : i32
    %c0_i32_1 = arith.constant 0 : i32
    return %c0_i32, %c0_i32_0 : i32, i32
  }
  func.func @transform_3(%arg0: i32) -> (i32, i32) {
    %c0_i32 = arith.constant 0 : i32
    %c0_i32_0 = arith.constant 0 : i32
    return %arg0, %c0_i32 : i32, i32
  }
}

module attributes {stable_mosaic.version = 11 : i64} {
  func.func @_blmm_kernel(%arg0: i32, %arg1: i32, %arg2: memref<16x4xbf16, #tpu.memory_space<vmem>>, %arg3: memref<1x4x256xbf16, #tpu.memory_space<vmem>>, %arg4: memref<1x16x256xbf16, #tpu.memory_space<vmem>>) attributes {dimension_semantics = [#tpu.dimension_semantics<parallel>, #tpu.dimension_semantics<parallel>], iteration_bounds = array<i64: 2, 1>, scalar_prefetch = 0 : i64, scratch_operands = 0 : i64, tpu.core_type = #tpu.core_type<tc>, window_params = [{pipeline_mode = #tpu.pipeline_mode<synchronous>, transform_indices = @transform_0, window_bounds = array<i64: 16, 4>}, {transform_indices = @transform_1, window_bounds = array<i64: 1, 4, 256>}, {transform_indices = @transform_2, window_bounds = array<i64: 1, 16, 256>}]} {
    %c0 = arith.constant 0 : index
    %c0_0 = arith.constant 0 : index
    %0 = vector.load %arg2[%c0, %c0_0] : memref<16x4xbf16, #tpu.memory_space<vmem>>, vector<16x4xbf16>
    %c0_1 = arith.constant 0 : index
    %c0_2 = arith.constant 0 : index
    %c0_3 = arith.constant 0 : index
    %1 = vector.load %arg3[%c0_1, %c0_2, %c0_3] : memref<1x4x256xbf16, #tpu.memory_space<vmem>>, vector<1x4x256xbf16>
    %2 = vector.shape_cast %1 : vector<1x4x256xbf16> to vector<4x256xbf16>
    %cst = arith.constant dense<0.000000e+00> : vector<16x256xf32>
    %3 = tpu.matmul %0, %2, %cst {dimension_numbers = #tpu.dot_dimension_numbers<[1], [0], [0], [1], [0, 0, 1, 1], [], []>} : vector<16x4xbf16>, vector<4x256xbf16>, vector<16x256xf32> -> vector<16x256xf32>
    %4 = arith.truncf %3 : vector<16x256xf32> to vector<16x256xbf16>
    %c0_4 = arith.constant 0 : index
    %c0_5 = arith.constant 0 : index
    %c0_6 = arith.constant 0 : index
    %5 = vector.load %arg4[%c0_4, %c0_5, %c0_6] : memref<1x16x256xbf16, #tpu.memory_space<vmem>>, vector<1x16x256xbf16>
    %6 = vector.shape_cast %5 : vector<1x16x256xbf16> to vector<16x256xbf16>
    %7 = vector.shape_cast %4 : vector<16x256xbf16> to vector<1x16x256xbf16>
    tpu.vector_store %arg4[%c0_4, %c0_5, %c0_6], %7 {strides = array<i32>} : memref<1x16x256xbf16, #tpu.memory_space<vmem>>, vector<1x16x256xbf16>,
    return
  }
  func.func @transform_0(%arg0: i32, %arg1: i32) -> (i32, i32) {
    %c0_i32 = arith.constant 0 : i32
    %c0_i32_0 = arith.constant 0 : i32
    %c0_i32_1 = arith.constant 0 : i32
    return %c0_i32, %c0_i32_0 : i32, i32
  }
  func.func @transform_1(%arg0: i32, %arg1: i32) -> (i32, i32, i32) {
    %c0_i32 = arith.constant 0 : i32
    %c0_i32_0 = arith.constant 0 : i32
    return %arg0, %c0_i32, %arg1 : i32, i32, i32
  }
  func.func @transform_2(%arg0: i32, %arg1: i32) -> (i32, i32, i32) {
    %c0_i32 = arith.constant 0 : i32
    %c0_i32_0 = arith.constant 0 : i32
    return %arg0, %c0_i32, %arg1 : i32, i32, i32
  }
}

module attributes {stable_mosaic.version = 11 : i64} {
  func.func @_mm_bias_act_kernel(%arg0: i32, %arg1: memref<8x48xbf16, #tpu.memory_space<vmem>>, %arg2: memref<48x128xbf16, #tpu.memory_space<vmem>>, %arg3: memref<1x128xf32, #tpu.memory_space<vmem>>, %arg4: memref<8x128xbf16, #tpu.memory_space<vmem>>) attributes {dimension_semantics = [#tpu.dimension_semantics<parallel>], iteration_bounds = array<i64: 1>, scalar_prefetch = 0 : i64, scratch_operands = 0 : i64, tpu.core_type = #tpu.core_type<tc>, window_params = [{transform_indices = @transform_0, window_bounds = array<i64: 8, 48>}, {pipeline_mode = #tpu.pipeline_mode<synchronous>, transform_indices = @transform_1, window_bounds = array<i64: 48, 128>}, {pipeline_mode = #tpu.pipeline_mode<synchronous>, transform_indices = @transform_2, window_bounds = array<i64: 1, 128>}, {transform_indices = @transform_3, window_bounds = array<i64: 8, 128>}]} {
    %c0 = arith.constant 0 : index
    %c0_0 = arith.constant 0 : index
    %0 = vector.load %arg1[%c0, %c0_0] : memref<8x48xbf16, #tpu.memory_space<vmem>>, vector<8x48xbf16>
    %c0_1 = arith.constant 0 : index
    %c0_2 = arith.constant 0 : index
    %1 = vector.load %arg2[%c0_1, %c0_2] : memref<48x128xbf16, #tpu.memory_space<vmem>>, vector<48x128xbf16>
    %cst = arith.constant dense<0.000000e+00> : vector<8x128xf32>
    %2 = tpu.matmul %0, %1, %cst {dimension_numbers = #tpu.dot_dimension_numbers<[1], [0], [0], [1], [0, 0, 1, 1], [], []>} : vector<8x48xbf16>, vector<48x128xbf16>, vector<8x128xf32> -> vector<8x128xf32>
    %c0_3 = arith.constant 0 : index
    %c0_4 = arith.constant 0 : index
    %3 = vector.load %arg3[%c0_3, %c0_4] : memref<1x128xf32, #tpu.memory_space<vmem>>, vector<1x128xf32>
    %4 = vector.broadcast %3 : vector<1x128xf32> to vector<8x128xf32>
    %5 = arith.addf %2, %4 : vector<8x128xf32>
    %6 = arith.truncf %5 : vector<8x128xf32> to vector<8x128xbf16>
    %c0_5 = arith.constant 0 : index
    %c0_6 = arith.constant 0 : index
    %7 = vector.load %arg4[%c0_5, %c0_6] : memref<8x128xbf16, #tpu.memory_space<vmem>>, vector<8x128xbf16>
    tpu.vector_store %arg4[%c0_5, %c0_6], %6 {strides = array<i32>} : memref<8x128xbf16, #tpu.memory_space<vmem>>, vector<8x128xbf16>,
    return
  }
  func.func @transform_0(%arg0: i32) -> (i32, i32) {
    %c0_i32 = arith.constant 0 : i32
    %c0_i32_0 = arith.constant 0 : i32
    return %arg0, %c0_i32 : i32, i32
  }
  func.func @transform_1(%arg0: i32) -> (i32, i32) {
    %c0_i32 = arith.constant 0 : i32
    %c0_i32_0 = arith.constant 0 : i32
    %c0_i32_1 = arith.constant 0 : i32
    return %c0_i32, %c0_i32_0 : i32, i32
  }
  func.func @transform_2(%arg0: i32) -> (i32, i32) {
    %c0_i32 = arith.constant 0 : i32
    %c0_i32_0 = arith.constant 0 : i32
    %c0_i32_1 = arith.constant 0 : i32
    return %c0_i32, %c0_i32_0 : i32, i32
  }
  func.func @transform_3(%arg0: i32) -> (i32, i32) {
    %c0_i32 = arith.constant 0 : i32
    %c0_i32_0 = arith.constant 0 : i32
    return %arg0, %c0_i32 : i32, i32
  }
}

module attributes {stable_mosaic.version = 11 : i64} {
  func.func @_mm_bias_act_kernel(%arg0: i32, %arg1: memref<8x32xbf16, #tpu.memory_space<vmem>>, %arg2: memref<32x256xbf16, #tpu.memory_space<vmem>>, %arg3: memref<1x256xf32, #tpu.memory_space<vmem>>, %arg4: memref<8x256xbf16, #tpu.memory_space<vmem>>) attributes {dimension_semantics = [#tpu.dimension_semantics<parallel>], iteration_bounds = array<i64: 1>, scalar_prefetch = 0 : i64, scratch_operands = 0 : i64, tpu.core_type = #tpu.core_type<tc>, window_params = [{transform_indices = @transform_0, window_bounds = array<i64: 8, 32>}, {pipeline_mode = #tpu.pipeline_mode<synchronous>, transform_indices = @transform_1, window_bounds = array<i64: 32, 256>}, {pipeline_mode = #tpu.pipeline_mode<synchronous>, transform_indices = @transform_2, window_bounds = array<i64: 1, 256>}, {transform_indices = @transform_3, window_bounds = array<i64: 8, 256>}]} {
    %c0 = arith.constant 0 : index
    %c0_0 = arith.constant 0 : index
    %0 = vector.load %arg1[%c0, %c0_0] : memref<8x32xbf16, #tpu.memory_space<vmem>>, vector<8x32xbf16>
    %c0_1 = arith.constant 0 : index
    %c0_2 = arith.constant 0 : index
    %1 = vector.load %arg2[%c0_1, %c0_2] : memref<32x256xbf16, #tpu.memory_space<vmem>>, vector<32x256xbf16>
    %cst = arith.constant dense<0.000000e+00> : vector<8x256xf32>
    %2 = tpu.matmul %0, %1, %cst {dimension_numbers = #tpu.dot_dimension_numbers<[1], [0], [0], [1], [0, 0, 1, 1], [], []>} : vector<8x32xbf16>, vector<32x256xbf16>, vector<8x256xf32> -> vector<8x256xf32>
    %c0_3 = arith.constant 0 : index
    %c0_4 = arith.constant 0 : index
    %3 = vector.load %arg3[%c0_3, %c0_4] : memref<1x256xf32, #tpu.memory_space<vmem>>, vector<1x256xf32>
    %4 = vector.broadcast %3 : vector<1x256xf32> to vector<8x256xf32>
    %5 = arith.addf %2, %4 : vector<8x256xf32>
    %6 = arith.truncf %5 : vector<8x256xf32> to vector<8x256xbf16>
    %c0_5 = arith.constant 0 : index
    %c0_6 = arith.constant 0 : index
    %7 = vector.load %arg4[%c0_5, %c0_6] : memref<8x256xbf16, #tpu.memory_space<vmem>>, vector<8x256xbf16>
    tpu.vector_store %arg4[%c0_5, %c0_6], %6 {strides = array<i32>} : memref<8x256xbf16, #tpu.memory_space<vmem>>, vector<8x256xbf16>,
    return
  }
  func.func @transform_0(%arg0: i32) -> (i32, i32) {
    %c0_i32 = arith.constant 0 : i32
    %c0_i32_0 = arith.constant 0 : i32
    return %arg0, %c0_i32 : i32, i32
  }
  func.func @transform_1(%arg0: i32) -> (i32, i32) {
    %c0_i32 = arith.constant 0 : i32
    %c0_i32_0 = arith.constant 0 : i32
    %c0_i32_1 = arith.constant 0 : i32
    return %c0_i32, %c0_i32_0 : i32, i32
  }
  func.func @transform_2(%arg0: i32) -> (i32, i32) {
    %c0_i32 = arith.constant 0 : i32
    %c0_i32_0 = arith.constant 0 : i32
    %c0_i32_1 = arith.constant 0 : i32
    return %c0_i32, %c0_i32_0 : i32, i32
  }
  func.func @transform_3(%arg0: i32) -> (i32, i32) {
    %c0_i32 = arith.constant 0 : i32
    %c0_i32_0 = arith.constant 0 : i32
    return %arg0, %c0_i32 : i32, i32
  }
}

module attributes {stable_mosaic.version = 11 : i64} {
  func.func @_blmm_kernel(%arg0: i32, %arg1: i32, %arg2: memref<16x2xbf16, #tpu.memory_space<vmem>>, %arg3: memref<1x2x256xbf16, #tpu.memory_space<vmem>>, %arg4: memref<1x16x256xbf16, #tpu.memory_space<vmem>>) attributes {dimension_semantics = [#tpu.dimension_semantics<parallel>, #tpu.dimension_semantics<parallel>], iteration_bounds = array<i64: 2, 1>, scalar_prefetch = 0 : i64, scratch_operands = 0 : i64, tpu.core_type = #tpu.core_type<tc>, window_params = [{pipeline_mode = #tpu.pipeline_mode<synchronous>, transform_indices = @transform_0, window_bounds = array<i64: 16, 2>}, {transform_indices = @transform_1, window_bounds = array<i64: 1, 2, 256>}, {transform_indices = @transform_2, window_bounds = array<i64: 1, 16, 256>}]} {
    %c0 = arith.constant 0 : index
    %c0_0 = arith.constant 0 : index
    %0 = vector.load %arg2[%c0, %c0_0] : memref<16x2xbf16, #tpu.memory_space<vmem>>, vector<16x2xbf16>
    %c0_1 = arith.constant 0 : index
    %c0_2 = arith.constant 0 : index
    %c0_3 = arith.constant 0 : index
    %1 = vector.load %arg3[%c0_1, %c0_2, %c0_3] : memref<1x2x256xbf16, #tpu.memory_space<vmem>>, vector<1x2x256xbf16>
    %2 = vector.shape_cast %1 : vector<1x2x256xbf16> to vector<2x256xbf16>
    %cst = arith.constant dense<0.000000e+00> : vector<16x256xf32>
    %3 = tpu.matmul %0, %2, %cst {dimension_numbers = #tpu.dot_dimension_numbers<[1], [0], [0], [1], [0, 0, 1, 1], [], []>} : vector<16x2xbf16>, vector<2x256xbf16>, vector<16x256xf32> -> vector<16x256xf32>
    %4 = arith.truncf %3 : vector<16x256xf32> to vector<16x256xbf16>
    %c0_4 = arith.constant 0 : index
    %c0_5 = arith.constant 0 : index
    %c0_6 = arith.constant 0 : index
    %5 = vector.load %arg4[%c0_4, %c0_5, %c0_6] : memref<1x16x256xbf16, #tpu.memory_space<vmem>>, vector<1x16x256xbf16>
    %6 = vector.shape_cast %5 : vector<1x16x256xbf16> to vector<16x256xbf16>
    %7 = vector.shape_cast %4 : vector<16x256xbf16> to vector<1x16x256xbf16>
    tpu.vector_store %arg4[%c0_4, %c0_5, %c0_6], %7 {strides = array<i32>} : memref<1x16x256xbf16, #tpu.memory_space<vmem>>, vector<1x16x256xbf16>,
    return
  }
  func.func @transform_0(%arg0: i32, %arg1: i32) -> (i32, i32) {
    %c0_i32 = arith.constant 0 : i32
    %c0_i32_0 = arith.constant 0 : i32
    %c0_i32_1 = arith.constant 0 : i32
    return %c0_i32, %c0_i32_0 : i32, i32
  }
  func.func @transform_1(%arg0: i32, %arg1: i32) -> (i32, i32, i32) {
    %c0_i32 = arith.constant 0 : i32
    %c0_i32_0 = arith.constant 0 : i32
    return %arg0, %c0_i32, %arg1 : i32, i32, i32
  }
  func.func @transform_2(%arg0: i32, %arg1: i32) -> (i32, i32, i32) {
    %c0_i32 = arith.constant 0 : i32
    %c0_i32_0 = arith.constant 0 : i32
    return %arg0, %c0_i32, %arg1 : i32, i32, i32
  }
}

module attributes {stable_mosaic.version = 11 : i64} {
  func.func @_mm_bias_act_kernel(%arg0: i32, %arg1: memref<128x16xbf16, #tpu.memory_space<vmem>>, %arg2: memref<16x128xbf16, #tpu.memory_space<vmem>>, %arg3: memref<1x128xf32, #tpu.memory_space<vmem>>, %arg4: memref<128x128xbf16, #tpu.memory_space<vmem>>) attributes {dimension_semantics = [#tpu.dimension_semantics<parallel>], iteration_bounds = array<i64: 1>, scalar_prefetch = 0 : i64, scratch_operands = 0 : i64, tpu.core_type = #tpu.core_type<tc>, window_params = [{transform_indices = @transform_0, window_bounds = array<i64: 128, 16>}, {pipeline_mode = #tpu.pipeline_mode<synchronous>, transform_indices = @transform_1, window_bounds = array<i64: 16, 128>}, {pipeline_mode = #tpu.pipeline_mode<synchronous>, transform_indices = @transform_2, window_bounds = array<i64: 1, 128>}, {transform_indices = @transform_3, window_bounds = array<i64: 128, 128>}]} {
    %c0 = arith.constant 0 : index
    %c0_0 = arith.constant 0 : index
    %0 = vector.load %arg1[%c0, %c0_0] : memref<128x16xbf16, #tpu.memory_space<vmem>>, vector<128x16xbf16>
    %c0_1 = arith.constant 0 : index
    %c0_2 = arith.constant 0 : index
    %1 = vector.load %arg2[%c0_1, %c0_2] : memref<16x128xbf16, #tpu.memory_space<vmem>>, vector<16x128xbf16>
    %cst = arith.constant dense<0.000000e+00> : vector<128x128xf32>
    %2 = tpu.matmul %0, %1, %cst {dimension_numbers = #tpu.dot_dimension_numbers<[1], [0], [0], [1], [0, 0, 1, 1], [], []>} : vector<128x16xbf16>, vector<16x128xbf16>, vector<128x128xf32> -> vector<128x128xf32>
    %c0_3 = arith.constant 0 : index
    %c0_4 = arith.constant 0 : index
    %3 = vector.load %arg3[%c0_3, %c0_4] : memref<1x128xf32, #tpu.memory_space<vmem>>, vector<1x128xf32>
    %4 = vector.broadcast %3 : vector<1x128xf32> to vector<128x128xf32>
    %5 = arith.addf %2, %4 : vector<128x128xf32>
    %6 = arith.truncf %5 : vector<128x128xf32> to vector<128x128xbf16>
    %c0_5 = arith.constant 0 : index
    %c0_6 = arith.constant 0 : index
    %7 = vector.load %arg4[%c0_5, %c0_6] : memref<128x128xbf16, #tpu.memory_space<vmem>>, vector<128x128xbf16>
    tpu.vector_store %arg4[%c0_5, %c0_6], %6 {strides = array<i32>} : memref<128x128xbf16, #tpu.memory_space<vmem>>, vector<128x128xbf16>,
    return
  }
  func.func @transform_0(%arg0: i32) -> (i32, i32) {
    %c0_i32 = arith.constant 0 : i32
    %c0_i32_0 = arith.constant 0 : i32
    return %arg0, %c0_i32 : i32, i32
  }
  func.func @transform_1(%arg0: i32) -> (i32, i32) {
    %c0_i32 = arith.constant 0 : i32
    %c0_i32_0 = arith.constant 0 : i32
    %c0_i32_1 = arith.constant 0 : i32
    return %c0_i32, %c0_i32_0 : i32, i32
  }
  func.func @transform_2(%arg0: i32) -> (i32, i32) {
    %c0_i32 = arith.constant 0 : i32
    %c0_i32_0 = arith.constant 0 : i32
    %c0_i32_1 = arith.constant 0 : i32
    return %c0_i32, %c0_i32_0 : i32, i32
  }
  func.func @transform_3(%arg0: i32) -> (i32, i32) {
    %c0_i32 = arith.constant 0 : i32
    %c0_i32_0 = arith.constant 0 : i32
    return %arg0, %c0_i32 : i32, i32
  }
}

module attributes {stable_mosaic.version = 11 : i64} {
  func.func @_blmm_kernel(%arg0: i32, %arg1: i32, %arg2: memref<16x8xbf16, #tpu.memory_space<vmem>>, %arg3: memref<1x8x256xbf16, #tpu.memory_space<vmem>>, %arg4: memref<1x16x256xbf16, #tpu.memory_space<vmem>>) attributes {dimension_semantics = [#tpu.dimension_semantics<parallel>, #tpu.dimension_semantics<parallel>], iteration_bounds = array<i64: 2, 1>, scalar_prefetch = 0 : i64, scratch_operands = 0 : i64, tpu.core_type = #tpu.core_type<tc>, window_params = [{pipeline_mode = #tpu.pipeline_mode<synchronous>, transform_indices = @transform_0, window_bounds = array<i64: 16, 8>}, {transform_indices = @transform_1, window_bounds = array<i64: 1, 8, 256>}, {transform_indices = @transform_2, window_bounds = array<i64: 1, 16, 256>}]} {
    %c0 = arith.constant 0 : index
    %c0_0 = arith.constant 0 : index
    %0 = vector.load %arg2[%c0, %c0_0] : memref<16x8xbf16, #tpu.memory_space<vmem>>, vector<16x8xbf16>
    %c0_1 = arith.constant 0 : index
    %c0_2 = arith.constant 0 : index
    %c0_3 = arith.constant 0 : index
    %1 = vector.load %arg3[%c0_1, %c0_2, %c0_3] : memref<1x8x256xbf16, #tpu.memory_space<vmem>>, vector<1x8x256xbf16>
    %2 = vector.shape_cast %1 : vector<1x8x256xbf16> to vector<8x256xbf16>
    %cst = arith.constant dense<0.000000e+00> : vector<16x256xf32>
    %3 = tpu.matmul %0, %2, %cst {dimension_numbers = #tpu.dot_dimension_numbers<[1], [0], [0], [1], [0, 0, 1, 1], [], []>} : vector<16x8xbf16>, vector<8x256xbf16>, vector<16x256xf32> -> vector<16x256xf32>
    %4 = arith.truncf %3 : vector<16x256xf32> to vector<16x256xbf16>
    %c0_4 = arith.constant 0 : index
    %c0_5 = arith.constant 0 : index
    %c0_6 = arith.constant 0 : index
    %5 = vector.load %arg4[%c0_4, %c0_5, %c0_6] : memref<1x16x256xbf16, #tpu.memory_space<vmem>>, vector<1x16x256xbf16>
    %6 = vector.shape_cast %5 : vector<1x16x256xbf16> to vector<16x256xbf16>
    %7 = vector.shape_cast %4 : vector<16x256xbf16> to vector<1x16x256xbf16>
    tpu.vector_store %arg4[%c0_4, %c0_5, %c0_6], %7 {strides = array<i32>} : memref<1x16x256xbf16, #tpu.memory_space<vmem>>, vector<1x16x256xbf16>,
    return
  }
  func.func @transform_0(%arg0: i32, %arg1: i32) -> (i32, i32) {
    %c0_i32 = arith.constant 0 : i32
    %c0_i32_0 = arith.constant 0 : i32
    %c0_i32_1 = arith.constant 0 : i32
    return %c0_i32, %c0_i32_0 : i32, i32
  }
  func.func @transform_1(%arg0: i32, %arg1: i32) -> (i32, i32, i32) {
    %c0_i32 = arith.constant 0 : i32
    %c0_i32_0 = arith.constant 0 : i32
    return %arg0, %c0_i32, %arg1 : i32, i32, i32
  }
  func.func @transform_2(%arg0: i32, %arg1: i32) -> (i32, i32, i32) {
    %c0_i32 = arith.constant 0 : i32
    %c0_i32_0 = arith.constant 0 : i32
    return %arg0, %c0_i32, %arg1 : i32, i32, i32
  }
}

module attributes {stable_mosaic.version = 11 : i64} {
  func.func @_mm_bias_act_kernel(%arg0: i32, %arg1: memref<16x128xbf16, #tpu.memory_space<vmem>>, %arg2: memref<128x256xbf16, #tpu.memory_space<vmem>>, %arg3: memref<1x256xf32, #tpu.memory_space<vmem>>, %arg4: memref<16x256xbf16, #tpu.memory_space<vmem>>) attributes {dimension_semantics = [#tpu.dimension_semantics<parallel>], iteration_bounds = array<i64: 1>, scalar_prefetch = 0 : i64, scratch_operands = 0 : i64, tpu.core_type = #tpu.core_type<tc>, window_params = [{transform_indices = @transform_0, window_bounds = array<i64: 16, 128>}, {pipeline_mode = #tpu.pipeline_mode<synchronous>, transform_indices = @transform_1, window_bounds = array<i64: 128, 256>}, {pipeline_mode = #tpu.pipeline_mode<synchronous>, transform_indices = @transform_2, window_bounds = array<i64: 1, 256>}, {transform_indices = @transform_3, window_bounds = array<i64: 16, 256>}]} {
    %c0 = arith.constant 0 : index
    %c0_0 = arith.constant 0 : index
    %0 = vector.load %arg1[%c0, %c0_0] : memref<16x128xbf16, #tpu.memory_space<vmem>>, vector<16x128xbf16>
    %c0_1 = arith.constant 0 : index
    %c0_2 = arith.constant 0 : index
    %1 = vector.load %arg2[%c0_1, %c0_2] : memref<128x256xbf16, #tpu.memory_space<vmem>>, vector<128x256xbf16>
    %cst = arith.constant dense<0.000000e+00> : vector<16x256xf32>
    %2 = tpu.matmul %0, %1, %cst {dimension_numbers = #tpu.dot_dimension_numbers<[1], [0], [0], [1], [0, 0, 1, 1], [], []>} : vector<16x128xbf16>, vector<128x256xbf16>, vector<16x256xf32> -> vector<16x256xf32>
    %c0_3 = arith.constant 0 : index
    %c0_4 = arith.constant 0 : index
    %3 = vector.load %arg3[%c0_3, %c0_4] : memref<1x256xf32, #tpu.memory_space<vmem>>, vector<1x256xf32>
    %4 = vector.broadcast %3 : vector<1x256xf32> to vector<16x256xf32>
    %5 = arith.addf %2, %4 : vector<16x256xf32>
    %6 = arith.truncf %5 : vector<16x256xf32> to vector<16x256xbf16>
    %c0_5 = arith.constant 0 : index
    %c0_6 = arith.constant 0 : index
    %7 = vector.load %arg4[%c0_5, %c0_6] : memref<16x256xbf16, #tpu.memory_space<vmem>>, vector<16x256xbf16>
    tpu.vector_store %arg4[%c0_5, %c0_6], %6 {strides = array<i32>} : memref<16x256xbf16, #tpu.memory_space<vmem>>, vector<16x256xbf16>,
    return
  }
  func.func @transform_0(%arg0: i32) -> (i32, i32) {
    %c0_i32 = arith.constant 0 : i32
    %c0_i32_0 = arith.constant 0 : i32
    return %arg0, %c0_i32 : i32, i32
  }
  func.func @transform_1(%arg0: i32) -> (i32, i32) {
    %c0_i32 = arith.constant 0 : i32
    %c0_i32_0 = arith.constant 0 : i32
    %c0_i32_1 = arith.constant 0 : i32
    return %c0_i32, %c0_i32_0 : i32, i32
  }
  func.func @transform_2(%arg0: i32) -> (i32, i32) {
    %c0_i32 = arith.constant 0 : i32
    %c0_i32_0 = arith.constant 0 : i32
    %c0_i32_1 = arith.constant 0 : i32
    return %c0_i32, %c0_i32_0 : i32, i32
  }
  func.func @transform_3(%arg0: i32) -> (i32, i32) {
    %c0_i32 = arith.constant 0 : i32
    %c0_i32_0 = arith.constant 0 : i32
    return %arg0, %c0_i32 : i32, i32
  }
}

module attributes {stable_mosaic.version = 11 : i64} {
  func.func @_mm_bias_act_kernel(%arg0: i32, %arg1: memref<32x48xbf16, #tpu.memory_space<vmem>>, %arg2: memref<48x128xbf16, #tpu.memory_space<vmem>>, %arg3: memref<1x128xf32, #tpu.memory_space<vmem>>, %arg4: memref<32x128xbf16, #tpu.memory_space<vmem>>) attributes {dimension_semantics = [#tpu.dimension_semantics<parallel>], iteration_bounds = array<i64: 1>, scalar_prefetch = 0 : i64, scratch_operands = 0 : i64, tpu.core_type = #tpu.core_type<tc>, window_params = [{transform_indices = @transform_0, window_bounds = array<i64: 32, 48>}, {pipeline_mode = #tpu.pipeline_mode<synchronous>, transform_indices = @transform_1, window_bounds = array<i64: 48, 128>}, {pipeline_mode = #tpu.pipeline_mode<synchronous>, transform_indices = @transform_2, window_bounds = array<i64: 1, 128>}, {transform_indices = @transform_3, window_bounds = array<i64: 32, 128>}]} {
    %c0 = arith.constant 0 : index
    %c0_0 = arith.constant 0 : index
    %0 = vector.load %arg1[%c0, %c0_0] : memref<32x48xbf16, #tpu.memory_space<vmem>>, vector<32x48xbf16>
    %c0_1 = arith.constant 0 : index
    %c0_2 = arith.constant 0 : index
    %1 = vector.load %arg2[%c0_1, %c0_2] : memref<48x128xbf16, #tpu.memory_space<vmem>>, vector<48x128xbf16>
    %cst = arith.constant dense<0.000000e+00> : vector<32x128xf32>
    %2 = tpu.matmul %0, %1, %cst {dimension_numbers = #tpu.dot_dimension_numbers<[1], [0], [0], [1], [0, 0, 1, 1], [], []>} : vector<32x48xbf16>, vector<48x128xbf16>, vector<32x128xf32> -> vector<32x128xf32>
    %c0_3 = arith.constant 0 : index
    %c0_4 = arith.constant 0 : index
    %3 = vector.load %arg3[%c0_3, %c0_4] : memref<1x128xf32, #tpu.memory_space<vmem>>, vector<1x128xf32>
    %4 = vector.broadcast %3 : vector<1x128xf32> to vector<32x128xf32>
    %5 = arith.addf %2, %4 : vector<32x128xf32>
    %6 = arith.truncf %5 : vector<32x128xf32> to vector<32x128xbf16>
    %c0_5 = arith.constant 0 : index
    %c0_6 = arith.constant 0 : index
    %7 = vector.load %arg4[%c0_5, %c0_6] : memref<32x128xbf16, #tpu.memory_space<vmem>>, vector<32x128xbf16>
    tpu.vector_store %arg4[%c0_5, %c0_6], %6 {strides = array<i32>} : memref<32x128xbf16, #tpu.memory_space<vmem>>, vector<32x128xbf16>,
    return
  }
  func.func @transform_0(%arg0: i32) -> (i32, i32) {
    %c0_i32 = arith.constant 0 : i32
    %c0_i32_0 = arith.constant 0 : i32
    return %arg0, %c0_i32 : i32, i32
  }
  func.func @transform_1(%arg0: i32) -> (i32, i32) {
    %c0_i32 = arith.constant 0 : i32
    %c0_i32_0 = arith.constant 0 : i32
    %c0_i32_1 = arith.constant 0 : i32
    return %c0_i32, %c0_i32_0 : i32, i32
  }
  func.func @transform_2(%arg0: i32) -> (i32, i32) {
    %c0_i32 = arith.constant 0 : i32
    %c0_i32_0 = arith.constant 0 : i32
    %c0_i32_1 = arith.constant 0 : i32
    return %c0_i32, %c0_i32_0 : i32, i32
  }
  func.func @transform_3(%arg0: i32) -> (i32, i32) {
    %c0_i32 = arith.constant 0 : i32
    %c0_i32_0 = arith.constant 0 : i32
    return %arg0, %c0_i32 : i32, i32
  }
}

module attributes {stable_mosaic.version = 11 : i64} {
  func.func @_mm_bias_act_kernel(%arg0: i32, %arg1: memref<512x16xbf16, #tpu.memory_space<vmem>>, %arg2: memref<16x128xbf16, #tpu.memory_space<vmem>>, %arg3: memref<1x128xf32, #tpu.memory_space<vmem>>, %arg4: memref<512x128xbf16, #tpu.memory_space<vmem>>) attributes {dimension_semantics = [#tpu.dimension_semantics<parallel>], iteration_bounds = array<i64: 1>, scalar_prefetch = 0 : i64, scratch_operands = 0 : i64, tpu.core_type = #tpu.core_type<tc>, window_params = [{transform_indices = @transform_0, window_bounds = array<i64: 512, 16>}, {pipeline_mode = #tpu.pipeline_mode<synchronous>, transform_indices = @transform_1, window_bounds = array<i64: 16, 128>}, {pipeline_mode = #tpu.pipeline_mode<synchronous>, transform_indices = @transform_2, window_bounds = array<i64: 1, 128>}, {transform_indices = @transform_3, window_bounds = array<i64: 512, 128>}]} {
    %c0 = arith.constant 0 : index
    %c0_0 = arith.constant 0 : index
    %0 = vector.load %arg1[%c0, %c0_0] : memref<512x16xbf16, #tpu.memory_space<vmem>>, vector<512x16xbf16>
    %c0_1 = arith.constant 0 : index
    %c0_2 = arith.constant 0 : index
    %1 = vector.load %arg2[%c0_1, %c0_2] : memref<16x128xbf16, #tpu.memory_space<vmem>>, vector<16x128xbf16>
    %cst = arith.constant dense<0.000000e+00> : vector<512x128xf32>
    %2 = tpu.matmul %0, %1, %cst {dimension_numbers = #tpu.dot_dimension_numbers<[1], [0], [0], [1], [0, 0, 1, 1], [], []>} : vector<512x16xbf16>, vector<16x128xbf16>, vector<512x128xf32> -> vector<512x128xf32>
    %c0_3 = arith.constant 0 : index
    %c0_4 = arith.constant 0 : index
    %3 = vector.load %arg3[%c0_3, %c0_4] : memref<1x128xf32, #tpu.memory_space<vmem>>, vector<1x128xf32>
    %4 = vector.broadcast %3 : vector<1x128xf32> to vector<512x128xf32>
    %5 = arith.addf %2, %4 : vector<512x128xf32>
    %6 = arith.truncf %5 : vector<512x128xf32> to vector<512x128xbf16>
    %c0_5 = arith.constant 0 : index
    %c0_6 = arith.constant 0 : index
    %7 = vector.load %arg4[%c0_5, %c0_6] : memref<512x128xbf16, #tpu.memory_space<vmem>>, vector<512x128xbf16>
    tpu.vector_store %arg4[%c0_5, %c0_6], %6 {strides = array<i32>} : memref<512x128xbf16, #tpu.memory_space<vmem>>, vector<512x128xbf16>,
    return
  }
  func.func @transform_0(%arg0: i32) -> (i32, i32) {
    %c0_i32 = arith.constant 0 : i32
    %c0_i32_0 = arith.constant 0 : i32
    return %arg0, %c0_i32 : i32, i32
  }
  func.func @transform_1(%arg0: i32) -> (i32, i32) {
    %c0_i32 = arith.constant 0 : i32
    %c0_i32_0 = arith.constant 0 : i32
    %c0_i32_1 = arith.constant 0 : i32
    return %c0_i32, %c0_i32_0 : i32, i32
  }
  func.func @transform_2(%arg0: i32) -> (i32, i32) {
    %c0_i32 = arith.constant 0 : i32
    %c0_i32_0 = arith.constant 0 : i32
    %c0_i32_1 = arith.constant 0 : i32
    return %c0_i32, %c0_i32_0 : i32, i32
  }
  func.func @transform_3(%arg0: i32) -> (i32, i32) {
    %c0_i32 = arith.constant 0 : i32
    %c0_i32_0 = arith.constant 0 : i32
    return %arg0, %c0_i32 : i32, i32
  }
}

module attributes {stable_mosaic.version = 11 : i64} {
  func.func @_fuse_cls_kernel(%arg0: i32, %arg1: memref<256x16xbf16, #tpu.memory_space<vmem>>, %arg2: memref<256x16xbf16, #tpu.memory_space<vmem>>, %arg3: memref<256x16xbf16, #tpu.memory_space<vmem>>, %arg4: memref<256x16xbf16, #tpu.memory_space<vmem>>, %arg5: memref<256x16xbf16, #tpu.memory_space<vmem>>, %arg6: memref<256x16xbf16, #tpu.memory_space<vmem>>, %arg7: memref<16x128xbf16, #tpu.memory_space<vmem>>, %arg8: memref<1x128xf32, #tpu.memory_space<vmem>>, %arg9: memref<256x128xbf16, #tpu.memory_space<vmem>>) attributes {dimension_semantics = [#tpu.dimension_semantics<parallel>], iteration_bounds = array<i64: 2>, scalar_prefetch = 0 : i64, scratch_operands = 0 : i64, tpu.core_type = #tpu.core_type<tc>, window_params = [{transform_indices = @transform_0, window_bounds = array<i64: 256, 16>}, {transform_indices = @transform_1, window_bounds = array<i64: 256, 16>}, {transform_indices = @transform_2, window_bounds = array<i64: 256, 16>}, {transform_indices = @transform_3, window_bounds = array<i64: 256, 16>}, {transform_indices = @transform_4, window_bounds = array<i64: 256, 16>}, {transform_indices = @transform_5, window_bounds = array<i64: 256, 16>}, {pipeline_mode = #tpu.pipeline_mode<synchronous>, transform_indices = @transform_6, window_bounds = array<i64: 16, 128>}, {pipeline_mode = #tpu.pipeline_mode<synchronous>, transform_indices = @transform_7, window_bounds = array<i64: 1, 128>}, {transform_indices = @transform_8, window_bounds = array<i64: 256, 128>}]} {
    %c0 = arith.constant 0 : index
    %c0_0 = arith.constant 0 : index
    %0 = vector.load %arg1[%c0, %c0_0] : memref<256x16xbf16, #tpu.memory_space<vmem>>, vector<256x16xbf16>
    %1 = arith.extf %0 : vector<256x16xbf16> to vector<256x16xf32>
    %c0_1 = arith.constant 0 : index
    %c0_2 = arith.constant 0 : index
    %2 = vector.load %arg2[%c0_1, %c0_2] : memref<256x16xbf16, #tpu.memory_space<vmem>>, vector<256x16xbf16>
    %3 = arith.extf %2 : vector<256x16xbf16> to vector<256x16xf32>
    %4 = arith.addf %1, %3 : vector<256x16xf32>
    %c0_3 = arith.constant 0 : index
    %c0_4 = arith.constant 0 : index
    %5 = vector.load %arg3[%c0_3, %c0_4] : memref<256x16xbf16, #tpu.memory_space<vmem>>, vector<256x16xbf16>
    %6 = arith.extf %5 : vector<256x16xbf16> to vector<256x16xf32>
    %7 = arith.addf %4, %6 : vector<256x16xf32>
    %c0_5 = arith.constant 0 : index
    %c0_6 = arith.constant 0 : index
    %8 = vector.load %arg4[%c0_5, %c0_6] : memref<256x16xbf16, #tpu.memory_space<vmem>>, vector<256x16xbf16>
    %9 = arith.extf %8 : vector<256x16xbf16> to vector<256x16xf32>
    %10 = arith.addf %7, %9 : vector<256x16xf32>
    %c0_7 = arith.constant 0 : index
    %c0_8 = arith.constant 0 : index
    %11 = vector.load %arg5[%c0_7, %c0_8] : memref<256x16xbf16, #tpu.memory_space<vmem>>, vector<256x16xbf16>
    %12 = arith.extf %11 : vector<256x16xbf16> to vector<256x16xf32>
    %13 = arith.addf %10, %12 : vector<256x16xf32>
    %c0_9 = arith.constant 0 : index
    %c0_10 = arith.constant 0 : index
    %14 = vector.load %arg6[%c0_9, %c0_10] : memref<256x16xbf16, #tpu.memory_space<vmem>>, vector<256x16xbf16>
    %15 = arith.extf %14 : vector<256x16xbf16> to vector<256x16xf32>
    %16 = arith.addf %13, %15 : vector<256x16xf32>
    %cst = arith.constant 0.000000e+00 : f32
    %17 = vector.broadcast %cst : f32 to vector<256x16xf32>
    %18 = arith.maximumf %16, %17 : vector<256x16xf32>
    %19 = arith.truncf %18 : vector<256x16xf32> to vector<256x16xbf16>
    %c0_11 = arith.constant 0 : index
    %c0_12 = arith.constant 0 : index
    %20 = vector.load %arg7[%c0_11, %c0_12] : memref<16x128xbf16, #tpu.memory_space<vmem>>, vector<16x128xbf16>
    %cst_13 = arith.constant dense<0.000000e+00> : vector<256x128xf32>
    %21 = tpu.matmul %19, %20, %cst_13 {dimension_numbers = #tpu.dot_dimension_numbers<[1], [0], [0], [1], [0, 0, 1, 1], [], []>} : vector<256x16xbf16>, vector<16x128xbf16>, vector<256x128xf32> -> vector<256x128xf32>
    %c0_14 = arith.constant 0 : index
    %c0_15 = arith.constant 0 : index
    %22 = vector.load %arg8[%c0_14, %c0_15] : memref<1x128xf32, #tpu.memory_space<vmem>>, vector<1x128xf32>
    %23 = vector.broadcast %22 : vector<1x128xf32> to vector<256x128xf32>
    %24 = arith.addf %21, %23 : vector<256x128xf32>
    %25 = arith.truncf %24 : vector<256x128xf32> to vector<256x128xbf16>
    %c0_16 = arith.constant 0 : index
    %c0_17 = arith.constant 0 : index
    %26 = vector.load %arg9[%c0_16, %c0_17] : memref<256x128xbf16, #tpu.memory_space<vmem>>, vector<256x128xbf16>
    tpu.vector_store %arg9[%c0_16, %c0_17], %25 {strides = array<i32>} : memref<256x128xbf16, #tpu.memory_space<vmem>>, vector<256x128xbf16>,
    return
  }
  func.func @transform_0(%arg0: i32) -> (i32, i32) {
    %c0_i32 = arith.constant 0 : i32
    %c0_i32_0 = arith.constant 0 : i32
    return %arg0, %c0_i32 : i32, i32
  }
  func.func @transform_1(%arg0: i32) -> (i32, i32) {
    %c0_i32 = arith.constant 0 : i32
    %c0_i32_0 = arith.constant 0 : i32
    return %arg0, %c0_i32 : i32, i32
  }
  func.func @transform_2(%arg0: i32) -> (i32, i32) {
    %c0_i32 = arith.constant 0 : i32
    %c0_i32_0 = arith.constant 0 : i32
    return %arg0, %c0_i32 : i32, i32
  }
  func.func @transform_3(%arg0: i32) -> (i32, i32) {
    %c0_i32 = arith.constant 0 : i32
    %c0_i32_0 = arith.constant 0 : i32
    return %arg0, %c0_i32 : i32, i32
  }
  func.func @transform_4(%arg0: i32) -> (i32, i32) {
    %c0_i32 = arith.constant 0 : i32
    %c0_i32_0 = arith.constant 0 : i32
    return %arg0, %c0_i32 : i32, i32
  }
  func.func @transform_5(%arg0: i32) -> (i32, i32) {
    %c0_i32 = arith.constant 0 : i32
    %c0_i32_0 = arith.constant 0 : i32
    return %arg0, %c0_i32 : i32, i32
  }
  func.func @transform_6(%arg0: i32) -> (i32, i32) {
    %c0_i32 = arith.constant 0 : i32
    %c0_i32_0 = arith.constant 0 : i32
    %c0_i32_1 = arith.constant 0 : i32
    return %c0_i32, %c0_i32_0 : i32, i32
  }
  func.func @transform_7(%arg0: i32) -> (i32, i32) {
    %c0_i32 = arith.constant 0 : i32
    %c0_i32_0 = arith.constant 0 : i32
    %c0_i32_1 = arith.constant 0 : i32
    return %c0_i32, %c0_i32_0 : i32, i32
  }
  func.func @transform_8(%arg0: i32) -> (i32, i32) {
    %c0_i32 = arith.constant 0 : i32
    %c0_i32_0 = arith.constant 0 : i32
    return %arg0, %c0_i32 : i32, i32
  }
}

module attributes {stable_mosaic.version = 11 : i64} {
  func.func @_mm_bias_act_kernel(%arg0: i32, %arg1: memref<32x304xbf16, #tpu.memory_space<vmem>>, %arg2: memref<304x1280xbf16, #tpu.memory_space<vmem>>, %arg3: memref<1x1280xf32, #tpu.memory_space<vmem>>, %arg4: memref<32x1280xbf16, #tpu.memory_space<vmem>>) attributes {dimension_semantics = [#tpu.dimension_semantics<parallel>], iteration_bounds = array<i64: 1>, scalar_prefetch = 0 : i64, scratch_operands = 0 : i64, tpu.core_type = #tpu.core_type<tc>, window_params = [{transform_indices = @transform_0, window_bounds = array<i64: 32, 304>}, {pipeline_mode = #tpu.pipeline_mode<synchronous>, transform_indices = @transform_1, window_bounds = array<i64: 304, 1280>}, {pipeline_mode = #tpu.pipeline_mode<synchronous>, transform_indices = @transform_2, window_bounds = array<i64: 1, 1280>}, {transform_indices = @transform_3, window_bounds = array<i64: 32, 1280>}]} {
    %c0 = arith.constant 0 : index
    %c0_0 = arith.constant 0 : index
    %0 = vector.load %arg1[%c0, %c0_0] : memref<32x304xbf16, #tpu.memory_space<vmem>>, vector<32x304xbf16>
    %c0_1 = arith.constant 0 : index
    %c0_2 = arith.constant 0 : index
    %1 = vector.load %arg2[%c0_1, %c0_2] : memref<304x1280xbf16, #tpu.memory_space<vmem>>, vector<304x1280xbf16>
    %cst = arith.constant dense<0.000000e+00> : vector<32x1280xf32>
    %2 = tpu.matmul %0, %1, %cst {dimension_numbers = #tpu.dot_dimension_numbers<[1], [0], [0], [1], [0, 0, 1, 1], [], []>} : vector<32x304xbf16>, vector<304x1280xbf16>, vector<32x1280xf32> -> vector<32x1280xf32>
    %c0_3 = arith.constant 0 : index
    %c0_4 = arith.constant 0 : index
    %3 = vector.load %arg3[%c0_3, %c0_4] : memref<1x1280xf32, #tpu.memory_space<vmem>>, vector<1x1280xf32>
    %4 = vector.broadcast %3 : vector<1x1280xf32> to vector<32x1280xf32>
    %5 = arith.addf %2, %4 : vector<32x1280xf32>
    %6 = arith.truncf %5 : vector<32x1280xf32> to vector<32x1280xbf16>
    %c0_5 = arith.constant 0 : index
    %c0_6 = arith.constant 0 : index
    %7 = vector.load %arg4[%c0_5, %c0_6] : memref<32x1280xbf16, #tpu.memory_space<vmem>>, vector<32x1280xbf16>
    tpu.vector_store %arg4[%c0_5, %c0_6], %6 {strides = array<i32>} : memref<32x1280xbf16, #tpu.memory_space<vmem>>, vector<32x1280xbf16>,
    return
  }
  func.func @transform_0(%arg0: i32) -> (i32, i32) {
    %c0_i32 = arith.constant 0 : i32
    %c0_i32_0 = arith.constant 0 : i32
    return %arg0, %c0_i32 : i32, i32
  }
  func.func @transform_1(%arg0: i32) -> (i32, i32) {
    %c0_i32 = arith.constant 0 : i32
    %c0_i32_0 = arith.constant 0 : i32
    %c0_i32_1 = arith.constant 0 : i32
    return %c0_i32, %c0_i32_0 : i32, i32
  }
  func.func @transform_2(%arg0: i32) -> (i32, i32) {
    %c0_i32 = arith.constant 0 : i32
    %c0_i32_0 = arith.constant 0 : i32
    %c0_i32_1 = arith.constant 0 : i32
    return %c0_i32, %c0_i32_0 : i32, i32
  }
  func.func @transform_3(%arg0: i32) -> (i32, i32) {
    %c0_i32 = arith.constant 0 : i32
    %c0_i32_0 = arith.constant 0 : i32
    return %arg0, %c0_i32 : i32, i32
  }
}

module attributes {stable_mosaic.version = 11 : i64} {
  func.func @_blmm_kernel(%arg0: i32, %arg1: i32, %arg2: memref<64x16xbf16, #tpu.memory_space<vmem>>, %arg3: memref<1x16x1216xbf16, #tpu.memory_space<vmem>>, %arg4: memref<1x64x1216xbf16, #tpu.memory_space<vmem>>) attributes {dimension_semantics = [#tpu.dimension_semantics<parallel>, #tpu.dimension_semantics<parallel>], iteration_bounds = array<i64: 2, 1>, scalar_prefetch = 0 : i64, scratch_operands = 0 : i64, tpu.core_type = #tpu.core_type<tc>, window_params = [{pipeline_mode = #tpu.pipeline_mode<synchronous>, transform_indices = @transform_0, window_bounds = array<i64: 64, 16>}, {transform_indices = @transform_1, window_bounds = array<i64: 1, 16, 1216>}, {transform_indices = @transform_2, window_bounds = array<i64: 1, 64, 1216>}]} {
    %c0 = arith.constant 0 : index
    %c0_0 = arith.constant 0 : index
    %0 = vector.load %arg2[%c0, %c0_0] : memref<64x16xbf16, #tpu.memory_space<vmem>>, vector<64x16xbf16>
    %c0_1 = arith.constant 0 : index
    %c0_2 = arith.constant 0 : index
    %c0_3 = arith.constant 0 : index
    %1 = vector.load %arg3[%c0_1, %c0_2, %c0_3] : memref<1x16x1216xbf16, #tpu.memory_space<vmem>>, vector<1x16x1216xbf16>
    %2 = vector.shape_cast %1 : vector<1x16x1216xbf16> to vector<16x1216xbf16>
    %cst = arith.constant dense<0.000000e+00> : vector<64x1216xf32>
    %3 = tpu.matmul %0, %2, %cst {dimension_numbers = #tpu.dot_dimension_numbers<[1], [0], [0], [1], [0, 0, 1, 1], [], []>} : vector<64x16xbf16>, vector<16x1216xbf16>, vector<64x1216xf32> -> vector<64x1216xf32>
    %4 = arith.truncf %3 : vector<64x1216xf32> to vector<64x1216xbf16>
    %c0_4 = arith.constant 0 : index
    %c0_5 = arith.constant 0 : index
    %c0_6 = arith.constant 0 : index
    %5 = vector.load %arg4[%c0_4, %c0_5, %c0_6] : memref<1x64x1216xbf16, #tpu.memory_space<vmem>>, vector<1x64x1216xbf16>
    %6 = vector.shape_cast %5 : vector<1x64x1216xbf16> to vector<64x1216xbf16>
    %7 = vector.shape_cast %4 : vector<64x1216xbf16> to vector<1x64x1216xbf16>
    tpu.vector_store %arg4[%c0_4, %c0_5, %c0_6], %7 {strides = array<i32>} : memref<1x64x1216xbf16, #tpu.memory_space<vmem>>, vector<1x64x1216xbf16>,
    return
  }
  func.func @transform_0(%arg0: i32, %arg1: i32) -> (i32, i32) {
    %c0_i32 = arith.constant 0 : i32
    %c0_i32_0 = arith.constant 0 : i32
    %c0_i32_1 = arith.constant 0 : i32
    return %c0_i32, %c0_i32_0 : i32, i32
  }
  func.func @transform_1(%arg0: i32, %arg1: i32) -> (i32, i32, i32) {
    %c0_i32 = arith.constant 0 : i32
    %c0_i32_0 = arith.constant 0 : i32
    return %arg0, %c0_i32, %arg1 : i32, i32, i32
  }
  func.func @transform_2(%arg0: i32, %arg1: i32) -> (i32, i32, i32) {
    %c0_i32 = arith.constant 0 : i32
    %c0_i32_0 = arith.constant 0 : i32
    return %arg0, %c0_i32, %arg1 : i32, i32, i32
  }
}

</mosaic_0001>

<bundles_post_ra>
// kernel: dfanet_forward.45
= control target key start
LH: loop header
LB: loop body
LE: loop exit
PB: predicated region body
PF: predicated region fallthrough
CT: control target
= control target key end

     0   :  { %s1829_s12 = smov 0   ;;  %s2028_s0 = inlined_call_operand.vmem [shape: bf16[2048,27], index: 0, kind: input, shape index: {}]   ;;  %s2029_s1 = inlined_call_operand.vmem [shape: bf16[27,128], index: 1, kind: input, shape index: {}]   ;;  %s2030_s2 = inlined_call_operand.vmem [shape: f32[1,128], index: 2, kind: input, shape index: {}]   ;;  %s2031_s3 = inlined_call_operand.vmem [shape: bf16[2048,128], index: 3, kind: output, shape index: {}]  }
   0x1 LB: > { %s1254_s13 = sadd.s32 4294967295, %s1806_s12   ;;  %p1258_p0 = scmp.ge.s32.totalorder %s1806_s12, 1  ;;  %s1806_s12 = sphi %s1829_s12, %s13_s12  }
   0x2   : > { %p138_p1 = scmp.lt.s32.totalorder %s1806_s12, 5 }
   0x4   : > { %p139_p2 = pnand %p1258_p0, %p138_p1 }
   0x5   : > { %s1259_s16 = sshll.u32 (!%p139_p2), %s1254_s13, 6 }
   0x6   : > { %142 = sbr.rel (%p139_p2) target bundleno = 286 (0x11e), region = 32  ;;  %p163_p3 = scmp.lt.s32.totalorder (!%p139_p2), %s1259_s16, 255 }
   0xb   : > { %v1766_v0 = vld [vmem:[%s2029_s1 + $0x8] sm:$0x3f]   ;;  %vm518_vm0 = vcmask 1044480   ;;  %vm519_vm1 = vcmask 1045504   ;;  %v1808_v1 = vmov 65535   ;;  %v1767_v5 = vld [vmem:[%s2029_s1] sm:$0xff]  }
   0xc   : > { %v520_v2 = vsel %vm518_vm0, 4294967295, %v1808_v1  ;;  %s2033_s16 = smov (!%p163_p3, %s1259_s16), 255  ;;  %vm421_vm2 = vcmask 220160   ;;  %v1920_v38 = vld [vmem:[%s2030_s2] ss:$0 sm:$0xff] }
   0xd   : > { %v521_v3 = vsel %vm519_vm1, %v520_v2, 0  ;;  %s1260_s19 = sshll.u32 %s2033_s16, 2 }
   0xe   : > { %v523_v4 = vand.u32 %v1766_v0, %v521_v3  ;;  %s1851_s22 = scalar_lea.vmem %s2028_s0, %s1260_s19  ;;  %s1935_s27 = scalar_lea.vmem %s2031_s3, %s1260_s19 }
   0xf   : > { %v1768_v6 = vld [vmem:[%s1851_s22] sm:$0xff]   ;;  %v1770_v8 = vld [vmem:[%s1851_s22 + $0x8] sm:$0xff]   ;;  %v1772_v10 = vld [vmem:[%s1851_s22 + $0x10] sm:$0xff]  }
  0x10   : > { %1685 = vmatprep.subr.bf16.mxu0 %v523_v4  ;;  %1753 = vmatprep.subr.bf16.mxu1 %v523_v4  ;;  %v1769_v7 = vld [vmem:[%s1851_s22 + $0x80] sm:$0xff]   ;;  %v1771_v9 = vld [vmem:[%s1851_s22 + $0x88] sm:$0xff]   ;;  %v1773_v11 = vld [vmem:[%s1851_s22 + $0x90] sm:$0xff]  }
  0x11   : > { %1686 = vmatpush3.bf16.msra.mxu0 %v523_v4  ;;  %1755 = vmatpush3.bf16.msra.mxu1 %v523_v4  ;;  %v1774_v12 = vld [vmem:[%s1851_s22 + $0x18] sm:$0xff]   ;;  %v1776_v14 = vld [vmem:[%s1851_s22 + $0x20] sm:$0xff]   ;;  %v1778_v16 = vld [vmem:[%s1851_s22 + $0x28] sm:$0xff]  }
  0x12   : > { %1687 = vmatprep.subr.bf16.mxu0 %v1767_v5  ;;  %1754 = vmatprep.subr.bf16.mxu1 %v1767_v5  ;;  %v1775_v13 = vld [vmem:[%s1851_s22 + $0x98] sm:$0xff]   ;;  %v1777_v15 = vld [vmem:[%s1851_s22 + $0xa0] sm:$0xff]   ;;  %v1779_v17 = vld [vmem:[%s1851_s22 + $0xa8] sm:$0xff]  }
  0x13   : > { %1689 = vmatprep.mubr.msk.bf16.mxu0 %vm421_vm2, %v1768_v6  ;;  %1721 = vmatprep.mubr.msk.bf16.mxu1 %vm421_vm2, %v1769_v7  ;;  %v1780_v18 = vld [vmem:[%s1851_s22 + $0x30] sm:$0xff]   ;;  %v1782_v20 = vld [vmem:[%s1851_s22 + $0x38] sm:$0xff]   ;;  %v1784_v22 = vld [vmem:[%s1851_s22 + $0x40] sm:$0xff]  }
  0x14   : > { %v1781_v19 = vld [vmem:[%s1851_s22 + $0xb0] sm:$0xff]   ;;  %v1783_v21 = vld [vmem:[%s1851_s22 + $0xb8] sm:$0xff]   ;;  %v1785_v23 = vld [vmem:[%s1851_s22 + $0xc0] sm:$0xff]  }
  0x15   : > { %1688 = vmatpush3.bf16.msra.mxu0 %v1767_v5  ;;  %1756 = vmatpush3.bf16.msra.mxu1 %v1767_v5  ;;  %v1786_v24 = vld [vmem:[%s1851_s22 + $0x48] sm:$0xff]   ;;  %v1788_v26 = vld [vmem:[%s1851_s22 + $0x50] sm:$0xff]   ;;  %v1790_v28 = vld [vmem:[%s1851_s22 + $0x58] sm:$0xff]  }
  0x16   : > { %v1787_v25 = vld [vmem:[%s1851_s22 + $0xc8] sm:$0xff]   ;;  %v1789_v27 = vld [vmem:[%s1851_s22 + $0xd0] sm:$0xff]   ;;  %v1791_v29 = vld [vmem:[%s1851_s22 + $0xd8] sm:$0xff]  }
  0x17   : > { %v1792_v30 = vld [vmem:[%s1851_s22 + $0x60] sm:$0xff]   ;;  %v1794_v32 = vld [vmem:[%s1851_s22 + $0x68] sm:$0xff]   ;;  %v1796_v34 = vld [vmem:[%s1851_s22 + $0x70] sm:$0xff]  }
  0x18   : > { %1690 = vmatmul.mubr.msk.bf16.vlgmr.msra.gmra.mxu0 %vm421_vm2, %v1770_v8  ;;  %1722 = vmatmul.mubr.msk.bf16.vlgmr.msra.gmra.mxu1 %vm421_vm2, %v1771_v9  ;;  %v1793_v31 = vld [vmem:[%s1851_s22 + $0xe0] sm:$0xff]   ;;  %v1795_v33 = vld [vmem:[%s1851_s22 + $0xe8] sm:$0xff]   ;;  %v1797_v35 = vld [vmem:[%s1851_s22 + $0xf0] sm:$0xff]  }
  0x19   : > { %1693 = vmatprep.mubr.msk.bf16.mxu0 %vm421_vm2, %v1772_v10  ;;  %1725 = vmatprep.mubr.msk.bf16.mxu1 %vm421_vm2, %v1773_v11  ;;  %v1798_v36 = vld [vmem:[%s1851_s22 + $0x78] sm:$0xff]  }
  0x1a   : > { %v1799_v37 = vld [vmem:[%s1851_s22 + $0xf8] sm:$0xff]  }
  0x20   : > { %1694 = vmatmul.mubr.msk.bf16.gmra.mxu0 %vm421_vm2, %v1774_v12  ;;  %1726 = vmatmul.mubr.msk.bf16.gmra.mxu1 %vm421_vm2, %v1775_v13 }
  0x21   : > { %1697 = vmatprep.mubr.msk.bf16.mxu0 %vm421_vm2, %v1776_v14  ;;  %1729 = vmatprep.mubr.msk.bf16.mxu1 %vm421_vm2, %v1777_v15 }
  0x28   : > { %1698 = vmatmul.mubr.msk.bf16.gmra.mxu0 %vm421_vm2, %v1778_v16  ;;  %1730 = vmatmul.mubr.msk.bf16.gmra.mxu1 %vm421_vm2, %v1779_v17 }
  0x29   : > { %1701 = vmatprep.mubr.msk.bf16.mxu0 %vm421_vm2, %v1780_v18  ;;  %1733 = vmatprep.mubr.msk.bf16.mxu1 %vm421_vm2, %v1781_v19 }
  0x30   : > { %1702 = vmatmul.mubr.msk.bf16.gmra.mxu0 %vm421_vm2, %v1782_v20  ;;  %1734 = vmatmul.mubr.msk.bf16.gmra.mxu1 %vm421_vm2, %v1783_v21 }
  0x31   : > { %1705 = vmatprep.mubr.msk.bf16.mxu0 %vm421_vm2, %v1784_v22  ;;  %1737 = vmatprep.mubr.msk.bf16.mxu1 %vm421_vm2, %v1785_v23 }
  0x38   : > { %1706 = vmatmul.mubr.msk.bf16.gmra.mxu0 %vm421_vm2, %v1786_v24  ;;  %1738 = vmatmul.mubr.msk.bf16.gmra.mxu1 %vm421_vm2, %v1787_v25 }
  0x39   : > { %1709 = vmatprep.mubr.msk.bf16.mxu0 %vm421_vm2, %v1788_v26  ;;  %1741 = vmatprep.mubr.msk.bf16.mxu1 %vm421_vm2, %v1789_v27 }
  0x40   : > { %1710 = vmatmul.mubr.msk.bf16.gmra.mxu0 %vm421_vm2, %v1790_v28  ;;  %1742 = vmatmul.mubr.msk.bf16.gmra.mxu1 %vm421_vm2, %v1791_v29 }
  0x41   : > { %1713 = vmatprep.mubr.msk.bf16.mxu0 %vm421_vm2, %v1792_v30  ;;  %1745 = vmatprep.mubr.msk.bf16.mxu1 %vm421_vm2, %v1793_v31 }
  0x48   : > { %1714 = vmatmul.mubr.msk.bf16.gmra.mxu0 %vm421_vm2, %v1794_v32  ;;  %1746 = vmatmul.mubr.msk.bf16.gmra.mxu1 %vm421_vm2, %v1795_v33 }
  0x49   : > { %1717 = vmatprep.mubr.msk.bf16.mxu0 %vm421_vm2, %v1796_v34  ;;  %1749 = vmatprep.mubr.msk.bf16.mxu1 %vm421_vm2, %v1797_v35 }
  0x50   : > { %1718 = vmatmul.mubr.msk.bf16.gmra.mxu0 %vm421_vm2, %v1798_v36  ;;  %1750 = vmatmul.mubr.msk.bf16.gmra.mxu1 %vm421_vm2, %v1799_v37 }
  0xd8   : > { %v1691_v39 = vpop.f32.mrf.mxu0  ;;  %v1723_v40 = vpop.f32.mrf.mxu1 }
  0xd9   : > { %v568_v41 = vadd.f32 %v1691_v39, %v1920_v38  ;;  %v696_v42 = vadd.f32 %v1723_v40, %v1920_v38 }
  0xda   : > { %v559_v43 = vpop.f32.mrf.mxu0  ;;  %v687_v44 = vpop.f32.mrf.mxu1 }
  0xdb   : > { %v560_v45 = vadd.f32 %v1920_v38, %v559_v43  ;;  %v688_v46 = vadd.f32 %v1920_v38, %v687_v44  ;;  %v816_v51 = vmax.f32 %v568_v41, 0.0  ;;  %v848_v52 = vmax.f32 %v696_v42, 0.0 }
  0xdc   : > { %v1692_v47 = vpop.f32.mrf.mxu0  ;;  %v1724_v48 = vpop.f32.mrf.mxu1 }
  0xdd   : > { %v571_v49 = vadd.f32 %v1692_v47, %v1920_v38  ;;  %v699_v50 = vadd.f32 %v1724_v48, %v1920_v38  ;;  %v814_v59 = vmax.f32 %v560_v45, 0.0  ;;  %v846_v60 = vmax.f32 %v688_v46, 0.0 }
  0xde   : > { %v562_v53 = vpop.f32.mrf.mxu0  ;;  %v690_v54 = vpop.f32.mrf.mxu1 }
  0xdf   : > { %v817_v55 = vmax.f32 %v571_v49, 0.0  ;;  %v849_v56 = vmax.f32 %v699_v50, 0.0  ;;  %v563_v57 = vadd.f32 %v1920_v38, %v562_v53  ;;  %v691_v58 = vadd.f32 %v1920_v38, %v690_v54 }
  0xe0   : > { %v1695_v61 = vpop.f32.mrf.mxu0  ;;  %v1727_v62 = vpop.f32.mrf.mxu1 }
  0xe1   : > { %v1468_v63 = vpack.c.bf16 %v817_v55, %v816_v51  ;;  %v1548_v0 = vpack.c.bf16 %v849_v56, %v848_v52  ;;  %v815_v1 = vmax.f32 %v563_v57, 0.0  ;;  %v847_v2 = vmax.f32 %v691_v58, 0.0 }
  0xe2   : > { %v584_v3 = vadd.f32 %v1695_v61, %v1920_v38  ;;  %v712_v4 = vadd.f32 %v1727_v62, %v1920_v38  ;;  %v575_v5 = vpop.f32.mrf.mxu0  ;;  %v703_v6 = vpop.f32.mrf.mxu1 }
  0xe3   : > { %1620 = vst [vmem:[%s1935_s27 + $0x8] sm:$0xff] %v1468_v63   ;;  %1636 = vst [vmem:[%s1935_s27 + $0x88] sm:$0xff] %v1548_v0   ;;  %v1463_v7 = vpack.c.bf16 %v815_v1, %v814_v59  ;;  %v1543_v8 = vpack.c.bf16 %v847_v2, %v846_v60  ;;  %v576_v9 = vadd.f32 %v1920_v38, %v575_v5 }
  0xe4   : > { %v704_v10 = vadd.f32 %v1920_v38, %v703_v6  ;;  %v1696_v11 = vpop.f32.mrf.mxu0  ;;  %v1728_v12 = vpop.f32.mrf.mxu1  ;;  %v820_v15 = vmax.f32 %v584_v3, 0.0  ;;  %v852_v16 = vmax.f32 %v712_v4, 0.0 }
  0xe5   : > { %1464 = vst [vmem:[%s1935_s27] sm:$0xff] %v1463_v7   ;;  %1635 = vst [vmem:[%s1935_s27 + $0x80] sm:$0xff] %v1543_v8   ;;  %v587_v13 = vadd.f32 %v1696_v11, %v1920_v38  ;;  %v715_v14 = vadd.f32 %v1728_v12, %v1920_v38  ;;  %v818_v23 = vmax.f32 %v576_v9, 0.0 }
  0xe6   : > { %v578_v17 = vpop.f32.mrf.mxu0  ;;  %v706_v18 = vpop.f32.mrf.mxu1  ;;  %v850_v24 = vmax.f32 %v704_v10, 0.0 }
  0xe7   : > { %v821_v19 = vmax.f32 %v587_v13, 0.0  ;;  %v853_v20 = vmax.f32 %v715_v14, 0.0  ;;  %v579_v21 = vadd.f32 %v1920_v38, %v578_v17  ;;  %v707_v22 = vadd.f32 %v1920_v38, %v706_v18 }
  0xe8   : > { %v1699_v25 = vpop.f32.mrf.mxu0  ;;  %v1731_v26 = vpop.f32.mrf.mxu1 }
  0xe9   : > { %v1478_v27 = vpack.c.bf16 %v821_v19, %v820_v15  ;;  %v1558_v28 = vpack.c.bf16 %v853_v20, %v852_v16  ;;  %v819_v29 = vmax.f32 %v579_v21, 0.0  ;;  %v851_v30 = vmax.f32 %v707_v22, 0.0 }
  0xea   : > { %v600_v31 = vadd.f32 %v1699_v25, %v1920_v38  ;;  %v728_v32 = vadd.f32 %v1731_v26, %v1920_v38  ;;  %v591_v33 = vpop.f32.mrf.mxu0  ;;  %v719_v34 = vpop.f32.mrf.mxu1 }
  0xeb   : > { %1622 = vst [vmem:[%s1935_s27 + $0x18] sm:$0xff] %v1478_v27   ;;  %1638 = vst [vmem:[%s1935_s27 + $0x98] sm:$0xff] %v1558_v28   ;;  %v1473_v35 = vpack.c.bf16 %v819_v29, %v818_v23  ;;  %v1553_v36 = vpack.c.bf16 %v851_v30, %v850_v24  ;;  %v592_v37 = vadd.f32 %v1920_v38, %v591_v33 }
  0xec   : > { %v720_v39 = vadd.f32 %v1920_v38, %v719_v34  ;;  %v1700_v40 = vpop.f32.mrf.mxu0  ;;  %v1732_v41 = vpop.f32.mrf.mxu1  ;;  %v824_v44 = vmax.f32 %v600_v31, 0.0  ;;  %v856_v45 = vmax.f32 %v728_v32, 0.0 }
  0xed   : > { %1621 = vst [vmem:[%s1935_s27 + $0x10] sm:$0xff] %v1473_v35   ;;  %1637 = vst [vmem:[%s1935_s27 + $0x90] sm:$0xff] %v1553_v36   ;;  %v603_v42 = vadd.f32 %v1700_v40, %v1920_v38  ;;  %v731_v43 = vadd.f32 %v1732_v41, %v1920_v38  ;;  %v822_v52 = vmax.f32 %v592_v37, 0.0 }
  0xee   : > { %v594_v46 = vpop.f32.mrf.mxu0  ;;  %v722_v47 = vpop.f32.mrf.mxu1  ;;  %v854_v53 = vmax.f32 %v720_v39, 0.0 }
  0xef   : > { %v825_v48 = vmax.f32 %v603_v42, 0.0  ;;  %v857_v49 = vmax.f32 %v731_v43, 0.0  ;;  %v595_v50 = vadd.f32 %v1920_v38, %v594_v46  ;;  %v723_v51 = vadd.f32 %v1920_v38, %v722_v47 }
  0xf0   : > { %v1703_v54 = vpop.f32.mrf.mxu0  ;;  %v1735_v55 = vpop.f32.mrf.mxu1 }
  0xf1   : > { %v1488_v56 = vpack.c.bf16 %v825_v48, %v824_v44  ;;  %v1568_v57 = vpack.c.bf16 %v857_v49, %v856_v45  ;;  %v823_v58 = vmax.f32 %v595_v50, 0.0  ;;  %v855_v59 = vmax.f32 %v723_v51, 0.0 }
  0xf2   : > { %v616_v60 = vadd.f32 %v1703_v54, %v1920_v38  ;;  %v744_v61 = vadd.f32 %v1735_v55, %v1920_v38  ;;  %v607_v62 = vpop.f32.mrf.mxu0  ;;  %v735_v63 = vpop.f32.mrf.mxu1 }
  0xf3   : > { %1624 = vst [vmem:[%s1935_s27 + $0x28] sm:$0xff] %v1488_v56   ;;  %1640 = vst [vmem:[%s1935_s27 + $0xa8] sm:$0xff] %v1568_v57   ;;  %v1483_v0 = vpack.c.bf16 %v823_v58, %v822_v52  ;;  %v1563_v1 = vpack.c.bf16 %v855_v59, %v854_v53  ;;  %v608_v2 = vadd.f32 %v1920_v38, %v607_v62 }
  0xf4   : > { %v736_v3 = vadd.f32 %v1920_v38, %v735_v63  ;;  %v1704_v4 = vpop.f32.mrf.mxu0  ;;  %v1736_v5 = vpop.f32.mrf.mxu1  ;;  %v828_v8 = vmax.f32 %v616_v60, 0.0  ;;  %v860_v9 = vmax.f32 %v744_v61, 0.0 }
  0xf5   : > { %1623 = vst [vmem:[%s1935_s27 + $0x20] sm:$0xff] %v1483_v0   ;;  %1639 = vst [vmem:[%s1935_s27 + $0xa0] sm:$0xff] %v1563_v1   ;;  %v619_v6 = vadd.f32 %v1704_v4, %v1920_v38  ;;  %v747_v7 = vadd.f32 %v1736_v5, %v1920_v38  ;;  %v826_v16 = vmax.f32 %v608_v2, 0.0 }
  0xf6   : > { %v610_v10 = vpop.f32.mrf.mxu0  ;;  %v738_v11 = vpop.f32.mrf.mxu1  ;;  %v858_v17 = vmax.f32 %v736_v3, 0.0 }
  0xf7   : > { %v829_v12 = vmax.f32 %v619_v6, 0.0  ;;  %v861_v13 = vmax.f32 %v747_v7, 0.0  ;;  %v611_v14 = vadd.f32 %v1920_v38, %v610_v10  ;;  %v739_v15 = vadd.f32 %v1920_v38, %v738_v11 }
  0xf8   : > { %v1707_v18 = vpop.f32.mrf.mxu0  ;;  %v1739_v19 = vpop.f32.mrf.mxu1 }
  0xf9   : > { %v1498_v20 = vpack.c.bf16 %v829_v12, %v828_v8  ;;  %v1578_v21 = vpack.c.bf16 %v861_v13, %v860_v9  ;;  %v827_v22 = vmax.f32 %v611_v14, 0.0  ;;  %v859_v23 = vmax.f32 %v739_v15, 0.0 }
  0xfa   : > { %v632_v24 = vadd.f32 %v1707_v18, %v1920_v38  ;;  %v760_v25 = vadd.f32 %v1739_v19, %v1920_v38  ;;  %v623_v26 = vpop.f32.mrf.mxu0  ;;  %v751_v27 = vpop.f32.mrf.mxu1 }
  0xfb   : > { %1626 = vst [vmem:[%s1935_s27 + $0x38] sm:$0xff] %v1498_v20   ;;  %1642 = vst [vmem:[%s1935_s27 + $0xb8] sm:$0xff] %v1578_v21   ;;  %v1493_v28 = vpack.c.bf16 %v827_v22, %v826_v16  ;;  %v1573_v29 = vpack.c.bf16 %v859_v23, %v858_v17  ;;  %v624_v30 = vadd.f32 %v1920_v38, %v623_v26 }
  0xfc   : > { %v752_v31 = vadd.f32 %v1920_v38, %v751_v27  ;;  %v1708_v32 = vpop.f32.mrf.mxu0  ;;  %v1740_v33 = vpop.f32.mrf.mxu1  ;;  %v832_v36 = vmax.f32 %v632_v24, 0.0  ;;  %v864_v37 = vmax.f32 %v760_v25, 0.0 }
  0xfd   : > { %1625 = vst [vmem:[%s1935_s27 + $0x30] sm:$0xff] %v1493_v28   ;;  %1641 = vst [vmem:[%s1935_s27 + $0xb0] sm:$0xff] %v1573_v29   ;;  %v635_v34 = vadd.f32 %v1708_v32, %v1920_v38  ;;  %v763_v35 = vadd.f32 %v1740_v33, %v1920_v38  ;;  %v830_v45 = vmax.f32 %v624_v30, 0.0 }
  0xfe   : > { %v626_v39 = vpop.f32.mrf.mxu0  ;;  %v754_v40 = vpop.f32.mrf.mxu1  ;;  %v862_v46 = vmax.f32 %v752_v31, 0.0 }
  0xff   : > { %v833_v41 = vmax.f32 %v635_v34, 0.0  ;;  %v865_v42 = vmax.f32 %v763_v35, 0.0  ;;  %v627_v43 = vadd.f32 %v1920_v38, %v626_v39  ;;  %v755_v44 = vadd.f32 %v1920_v38, %v754_v40 }
 0x100   : > { %v1711_v47 = vpop.f32.mrf.mxu0  ;;  %v1743_v48 = vpop.f32.mrf.mxu1 }
 0x101   : > { %v1508_v49 = vpack.c.bf16 %v833_v41, %v832_v36  ;;  %v1588_v50 = vpack.c.bf16 %v865_v42, %v864_v37  ;;  %v831_v51 = vmax.f32 %v627_v43, 0.0  ;;  %v863_v52 = vmax.f32 %v755_v44, 0.0 }
 0x102   : > { %v648_v53 = vadd.f32 %v1711_v47, %v1920_v38  ;;  %v776_v54 = vadd.f32 %v1743_v48, %v1920_v38  ;;  %v639_v55 = vpop.f32.mrf.mxu0  ;;  %v767_v56 = vpop.f32.mrf.mxu1 }
 0x103   : > { %1628 = vst [vmem:[%s1935_s27 + $0x48] sm:$0xff] %v1508_v49   ;;  %1644 = vst [vmem:[%s1935_s27 + $0xc8] sm:$0xff] %v1588_v50   ;;  %v1503_v57 = vpack.c.bf16 %v831_v51, %v830_v45  ;;  %v1583_v58 = vpack.c.bf16 %v863_v52, %v862_v46  ;;  %v640_v59 = vadd.f32 %v1920_v38, %v639_v55 }
 0x104   : > { %v768_v60 = vadd.f32 %v1920_v38, %v767_v56  ;;  %v1712_v61 = vpop.f32.mrf.mxu0  ;;  %v1744_v62 = vpop.f32.mrf.mxu1  ;;  %v836_v1 = vmax.f32 %v648_v53, 0.0  ;;  %v868_v2 = vmax.f32 %v776_v54, 0.0 }
 0x105   : > { %1627 = vst [vmem:[%s1935_s27 + $0x40] sm:$0xff] %v1503_v57   ;;  %1643 = vst [vmem:[%s1935_s27 + $0xc0] sm:$0xff] %v1583_v58   ;;  %v651_v63 = vadd.f32 %v1712_v61, %v1920_v38  ;;  %v779_v0 = vadd.f32 %v1744_v62, %v1920_v38  ;;  %v834_v9 = vmax.f32 %v640_v59, 0.0 }
 0x106   : > { %v642_v3 = vpop.f32.mrf.mxu0  ;;  %v770_v4 = vpop.f32.mrf.mxu1  ;;  %v866_v10 = vmax.f32 %v768_v60, 0.0 }
 0x107   : > { %v837_v5 = vmax.f32 %v651_v63, 0.0  ;;  %v869_v6 = vmax.f32 %v779_v0, 0.0  ;;  %v643_v7 = vadd.f32 %v1920_v38, %v642_v3  ;;  %v771_v8 = vadd.f32 %v1920_v38, %v770_v4 }
 0x108   : > { %v1715_v11 = vpop.f32.mrf.mxu0  ;;  %v1747_v12 = vpop.f32.mrf.mxu1 }
 0x109   : > { %v1518_v13 = vpack.c.bf16 %v837_v5, %v836_v1  ;;  %v1598_v14 = vpack.c.bf16 %v869_v6, %v868_v2  ;;  %v835_v15 = vmax.f32 %v643_v7, 0.0  ;;  %v867_v16 = vmax.f32 %v771_v8, 0.0 }
 0x10a   : > { %v664_v17 = vadd.f32 %v1715_v11, %v1920_v38  ;;  %v792_v18 = vadd.f32 %v1747_v12, %v1920_v38  ;;  %v655_v19 = vpop.f32.mrf.mxu0  ;;  %v783_v20 = vpop.f32.mrf.mxu1 }
 0x10b   : > { %1630 = vst [vmem:[%s1935_s27 + $0x58] sm:$0xff] %v1518_v13   ;;  %1646 = vst [vmem:[%s1935_s27 + $0xd8] sm:$0xff] %v1598_v14   ;;  %v1513_v21 = vpack.c.bf16 %v835_v15, %v834_v9  ;;  %v1593_v22 = vpack.c.bf16 %v867_v16, %v866_v10  ;;  %v656_v23 = vadd.f32 %v1920_v38, %v655_v19 }
 0x10c   : > { %v784_v24 = vadd.f32 %v1920_v38, %v783_v20  ;;  %v1716_v25 = vpop.f32.mrf.mxu0  ;;  %v1748_v26 = vpop.f32.mrf.mxu1  ;;  %v840_v29 = vmax.f32 %v664_v17, 0.0  ;;  %v872_v30 = vmax.f32 %v792_v18, 0.0 }
 0x10d   : > { %1629 = vst [vmem:[%s1935_s27 + $0x50] sm:$0xff] %v1513_v21   ;;  %1645 = vst [vmem:[%s1935_s27 + $0xd0] sm:$0xff] %v1593_v22   ;;  %v667_v27 = vadd.f32 %v1716_v25, %v1920_v38  ;;  %v795_v28 = vadd.f32 %v1748_v26, %v1920_v38  ;;  %v838_v37 = vmax.f32 %v656_v23, 0.0 }
 0x10e   : > { %v658_v31 = vpop.f32.mrf.mxu0  ;;  %v786_v32 = vpop.f32.mrf.mxu1  ;;  %v870_v39 = vmax.f32 %v784_v24, 0.0 }
 0x10f   : > { %v841_v33 = vmax.f32 %v667_v27, 0.0  ;;  %v873_v34 = vmax.f32 %v795_v28, 0.0  ;;  %v659_v35 = vadd.f32 %v1920_v38, %v658_v31  ;;  %v787_v36 = vadd.f32 %v1920_v38, %v786_v32 }
 0x110   : > { %v1719_v40 = vpop.f32.mrf.mxu0  ;;  %v1751_v41 = vpop.f32.mrf.mxu1 }
 0x111   : > { %v1528_v42 = vpack.c.bf16 %v841_v33, %v840_v29  ;;  %v1608_v43 = vpack.c.bf16 %v873_v34, %v872_v30  ;;  %v839_v44 = vmax.f32 %v659_v35, 0.0  ;;  %v871_v45 = vmax.f32 %v787_v36, 0.0 }
 0x112   : > { %v680_v46 = vadd.f32 %v1719_v40, %v1920_v38  ;;  %v808_v47 = vadd.f32 %v1751_v41, %v1920_v38  ;;  %v671_v48 = vpop.f32.mrf.mxu0  ;;  %v799_v49 = vpop.f32.mrf.mxu1 }
 0x113   : > { %1632 = vst [vmem:[%s1935_s27 + $0x68] sm:$0xff] %v1528_v42   ;;  %1648 = vst [vmem:[%s1935_s27 + $0xe8] sm:$0xff] %v1608_v43   ;;  %v1523_v50 = vpack.c.bf16 %v839_v44, %v838_v37  ;;  %v1603_v51 = vpack.c.bf16 %v871_v45, %v870_v39  ;;  %v672_v52 = vadd.f32 %v1920_v38, %v671_v48 }
 0x114   : > { %v800_v53 = vadd.f32 %v1920_v38, %v799_v49  ;;  %v1720_v54 = vpop.f32.mrf.mxu0  ;;  %v1752_v55 = vpop.f32.mrf.mxu1  ;;  %v844_v58 = vmax.f32 %v680_v46, 0.0  ;;  %v876_v59 = vmax.f32 %v808_v47, 0.0 }
 0x115   : > { %1631 = vst [vmem:[%s1935_s27 + $0x60] sm:$0xff] %v1523_v50   ;;  %1647 = vst [vmem:[%s1935_s27 + $0xe0] sm:$0xff] %v1603_v51   ;;  %v683_v56 = vadd.f32 %v1720_v54, %v1920_v38  ;;  %v811_v57 = vadd.f32 %v1752_v55, %v1920_v38  ;;  %v842_v2 = vmax.f32 %v672_v52, 0.0 }
 0x116   : > { %v674_v60 = vpop.f32.mrf.mxu0  ;;  %v802_v61 = vpop.f32.mrf.mxu1  ;;  %v874_v3 = vmax.f32 %v800_v53, 0.0 }
 0x117   : > { %v845_v62 = vmax.f32 %v683_v56, 0.0  ;;  %v877_v63 = vmax.f32 %v811_v57, 0.0  ;;  %v675_v0 = vadd.f32 %v1920_v38, %v674_v60  ;;  %v803_v1 = vadd.f32 %v1920_v38, %v802_v61 }
 0x119   : > { %v1538_v4 = vpack.c.bf16 %v845_v62, %v844_v58  ;;  %v1618_v5 = vpack.c.bf16 %v877_v63, %v876_v59  ;;  %v843_v6 = vmax.f32 %v675_v0, 0.0  ;;  %v875_v7 = vmax.f32 %v803_v1, 0.0 }
 0x11b   : > { %1634 = vst [vmem:[%s1935_s27 + $0x78] sm:$0xff] %v1538_v4   ;;  %1650 = vst [vmem:[%s1935_s27 + $0xf8] sm:$0xff] %v1618_v5   ;;  %v1533_v8 = vpack.c.bf16 %v843_v6, %v842_v2  ;;  %v1613_v9 = vpack.c.bf16 %v875_v7, %v874_v3 }
 0x11d   : > { %1633 = vst [vmem:[%s1935_s27 + $0x70] sm:$0xff] %v1533_v8   ;;  %1649 = vst [vmem:[%s1935_s27 + $0xf0] sm:$0xff] %v1613_v9  }
 0x11e PF: > { %s13_s12 = sadd.s32 1, %s1806_s12  }
 0x11f   : > { %p10_p4 = scmp.ge.s32.totalorder %s13_s12, 6  }
 0x121   :  { %12 = sbr.rel (!%p10_p4) target bundleno = 1 (0x1), region = 62 }

// kernel: dfanet_forward.46
= control target key start
LH: loop header
LB: loop body
LE: loop exit
PB: predicated region body
PF: predicated region fallthrough
CT: control target
= control target key end

     0   :  { %vm379_vm0 = vcmask 1043456   ;;  %vm282_vm1 = vcmask 588800   ;;  %s1937_s1 = inlined_call_operand.vmem [shape: bf16[72,128], index: 1, kind: input, shape index: {}]   ;;  %s1938_s0 = inlined_call_operand.vmem [shape: bf16[512,72], index: 0, kind: input, shape index: {}]   ;;  %s1939_s2 = inlined_call_operand.vmem [shape: f32[1,128], index: 2, kind: input, shape index: {}]   ;;  %s1940_s3 = inlined_call_operand.vmem [shape: bf16[512,128], index: 3, kind: output, shape index: {}]  }
   0x1   :  { %v1572_v0 = vld [vmem:[%s1937_s1 + $0x20] ss:$0 sps:$4 sm:$0xff]   ;;  %v1573_v1 = vld [vmem:[%s1937_s1 + $0x18] sm:$0xff]   ;;  %v1574_v3 = vld [vmem:[%s1937_s1 + $0x10] sm:$0xff]  }
   0x2   :  { %1570 = vmatprep.subr.msk.bf16.mxu0 %vm379_vm0, %v1572_v0  ;;  %1571 = vmatprep.subr.msk.bf16.mxu1 %vm379_vm0, %v1572_v0  ;;  %v381_v2 = vsel %vm379_vm0, %v1572_v0, 0  ;;  %v1577_v4 = vld [vmem:[%s1938_s0] sm:$0xff]   ;;  %v1575_v6 = vld [vmem:[%s1937_s1 + $0x8] sm:$0xff]   ;;  %v1581_v10 = vld [vmem:[%s1938_s0 + $0x10] sm:$0xff]  }
   0x3   :  { %1487 = vmatpush3.bf16.msra.mxu0 %v381_v2  ;;  %1565 = vmatpush3.bf16.msra.mxu1 %v381_v2  ;;  %v1578_v5 = vld [vmem:[%s1938_s0 + $0x80] sm:$0xff]   ;;  %v1579_v8 = vld [vmem:[%s1938_s0 + $0x8] sm:$0xff]   ;;  %v1582_v11 = vld [vmem:[%s1938_s0 + $0x90] sm:$0xff]  }
   0x4   :  { %1488 = vmatprep.subr.bf16.mxu0 %v1573_v1  ;;  %1561 = vmatprep.subr.bf16.mxu1 %v1573_v1  ;;  %v1576_v7 = vld [vmem:[%s1937_s1] sm:$0xff]   ;;  %v1580_v9 = vld [vmem:[%s1938_s0 + $0x88] sm:$0xff]   ;;  %v1583_v12 = vld [vmem:[%s1938_s0 + $0x18] sm:$0xff]  }
   0x5   :  { %1496 = vmatprep.mubr.msk.bf16.mxu0 %vm282_vm1, %v1577_v4  ;;  %1528 = vmatprep.mubr.msk.bf16.mxu1 %vm282_vm1, %v1578_v5  ;;  %v1584_v13 = vld [vmem:[%s1938_s0 + $0x98] sm:$0xff]   ;;  %v1585_v14 = vld [vmem:[%s1938_s0 + $0x20] sm:$0xff]   ;;  %v1587_v16 = vld [vmem:[%s1938_s0 + $0x28] sm:$0xff]  }
   0x6   :  { %v1586_v15 = vld [vmem:[%s1938_s0 + $0xa0] sm:$0xff]   ;;  %v1588_v17 = vld [vmem:[%s1938_s0 + $0xa8] sm:$0xff]   ;;  %v1589_v18 = vld [vmem:[%s1938_s0 + $0x30] sm:$0xff]  }
   0x7   :  { %1489 = vmatpush3.bf16.msra.mxu0 %v1573_v1  ;;  %1566 = vmatpush3.bf16.msra.mxu1 %v1573_v1  ;;  %v1590_v19 = vld [vmem:[%s1938_s0 + $0xb0] sm:$0xff]   ;;  %v1591_v20 = vld [vmem:[%s1938_s0 + $0x38] sm:$0xff]   ;;  %v1593_v22 = vld [vmem:[%s1938_s0 + $0x40] sm:$0xff]  }
   0x8   :  { %1490 = vmatprep.subr.bf16.mxu0 %v1574_v3  ;;  %1562 = vmatprep.subr.bf16.mxu1 %v1574_v3  ;;  %v1592_v21 = vld [vmem:[%s1938_s0 + $0xb8] sm:$0xff]   ;;  %v1594_v23 = vld [vmem:[%s1938_s0 + $0xc0] sm:$0xff]   ;;  %v1595_v24 = vld [vmem:[%s1938_s0 + $0x48] sm:$0xff]  }
   0x9   :  { %v1596_v25 = vld [vmem:[%s1938_s0 + $0xc8] sm:$0xff]   ;;  %v1597_v26 = vld [vmem:[%s1938_s0 + $0x50] sm:$0xff]   ;;  %v1599_v28 = vld [vmem:[%s1938_s0 + $0x58] sm:$0xff]  }
   0xa   :  { %v1598_v27 = vld [vmem:[%s1938_s0 + $0xd0] sm:$0xff]   ;;  %v1600_v29 = vld [vmem:[%s1938_s0 + $0xd8] sm:$0xff]   ;;  %v1601_v30 = vld [vmem:[%s1938_s0 + $0x60] sm:$0xff]  }
   0xb   :  { %1491 = vmatpush3.bf16.msra.mxu0 %v1574_v3  ;;  %1567 = vmatpush3.bf16.msra.mxu1 %v1574_v3  ;;  %v1602_v31 = vld [vmem:[%s1938_s0 + $0xe0] sm:$0xff]   ;;  %v1603_v32 = vld [vmem:[%s1938_s0 + $0x68] sm:$0xff]   ;;  %v1605_v34 = vld [vmem:[%s1938_s0 + $0x70] sm:$0xff]  }
   0xc   :  { %1492 = vmatprep.subr.bf16.mxu0 %v1575_v6  ;;  %1563 = vmatprep.subr.bf16.mxu1 %v1575_v6  ;;  %v1604_v33 = vld [vmem:[%s1938_s0 + $0xe8] sm:$0xff]   ;;  %v1606_v35 = vld [vmem:[%s1938_s0 + $0xf0] sm:$0xff]   ;;  %v1607_v36 = vld [vmem:[%s1938_s0 + $0x78] sm:$0xff]  }
   0xd   :  { %v1608_v37 = vld [vmem:[%s1938_s0 + $0xf8] sm:$0xff]   ;;  %v1775_v38 = vld [vmem:[%s1939_s2] ss:$0 sm:$0xff] }
   0xf   :  { %1493 = vmatpush3.bf16.msra.mxu0 %v1575_v6  ;;  %1568 = vmatpush3.bf16.msra.mxu1 %v1575_v6 }
  0x10   :  { %1494 = vmatprep.subr.bf16.mxu0 %v1576_v7  ;;  %1564 = vmatprep.subr.bf16.mxu1 %v1576_v7 }
  0x13   :  { %1495 = vmatpush3.bf16.msra.mxu0 %v1576_v7  ;;  %1569 = vmatpush3.bf16.msra.mxu1 %v1576_v7 }
  0x16   :  { %1497 = vmatmul.mubr.msk.bf16.vlgmr.msra.gmra.mxu0 %vm282_vm1, %v1579_v8  ;;  %1529 = vmatmul.mubr.msk.bf16.vlgmr.msra.gmra.mxu1 %vm282_vm1, %v1580_v9 }
  0x17   :  { %1500 = vmatprep.mubr.msk.bf16.mxu0 %vm282_vm1, %v1581_v10  ;;  %1532 = vmatprep.mubr.msk.bf16.mxu1 %vm282_vm1, %v1582_v11 }
  0x1e   :  { %1501 = vmatmul.mubr.msk.bf16.gmra.mxu0 %vm282_vm1, %v1583_v12  ;;  %1533 = vmatmul.mubr.msk.bf16.gmra.mxu1 %vm282_vm1, %v1584_v13 }
  0x1f   :  { %1504 = vmatprep.mubr.msk.bf16.mxu0 %vm282_vm1, %v1585_v14  ;;  %1536 = vmatprep.mubr.msk.bf16.mxu1 %vm282_vm1, %v1586_v15 }
  0x26   :  { %1505 = vmatmul.mubr.msk.bf16.gmra.mxu0 %vm282_vm1, %v1587_v16  ;;  %1537 = vmatmul.mubr.msk.bf16.gmra.mxu1 %vm282_vm1, %v1588_v17 }
  0x27   :  { %1508 = vmatprep.mubr.msk.bf16.mxu0 %vm282_vm1, %v1589_v18  ;;  %1540 = vmatprep.mubr.msk.bf16.mxu1 %vm282_vm1, %v1590_v19 }
  0x2e   :  { %1509 = vmatmul.mubr.msk.bf16.gmra.mxu0 %vm282_vm1, %v1591_v20  ;;  %1541 = vmatmul.mubr.msk.bf16.gmra.mxu1 %vm282_vm1, %v1592_v21 }
  0x2f   :  { %1512 = vmatprep.mubr.msk.bf16.mxu0 %vm282_vm1, %v1593_v22  ;;  %1544 = vmatprep.mubr.msk.bf16.mxu1 %vm282_vm1, %v1594_v23 }
  0x36   :  { %1513 = vmatmul.mubr.msk.bf16.gmra.mxu0 %vm282_vm1, %v1595_v24  ;;  %1545 = vmatmul.mubr.msk.bf16.gmra.mxu1 %vm282_vm1, %v1596_v25 }
  0x37   :  { %1516 = vmatprep.mubr.msk.bf16.mxu0 %vm282_vm1, %v1597_v26  ;;  %1548 = vmatprep.mubr.msk.bf16.mxu1 %vm282_vm1, %v1598_v27 }
  0x3e   :  { %1517 = vmatmul.mubr.msk.bf16.gmra.mxu0 %vm282_vm1, %v1599_v28  ;;  %1549 = vmatmul.mubr.msk.bf16.gmra.mxu1 %vm282_vm1, %v1600_v29 }
  0x3f   :  { %1520 = vmatprep.mubr.msk.bf16.mxu0 %vm282_vm1, %v1601_v30  ;;  %1552 = vmatprep.mubr.msk.bf16.mxu1 %vm282_vm1, %v1602_v31 }
  0x46   :  { %1521 = vmatmul.mubr.msk.bf16.gmra.mxu0 %vm282_vm1, %v1603_v32  ;;  %1553 = vmatmul.mubr.msk.bf16.gmra.mxu1 %vm282_vm1, %v1604_v33 }
  0x47   :  { %1524 = vmatprep.mubr.msk.bf16.mxu0 %vm282_vm1, %v1605_v34  ;;  %1556 = vmatprep.mubr.msk.bf16.mxu1 %vm282_vm1, %v1606_v35 }
  0x4e   :  { %1525 = vmatmul.mubr.msk.bf16.gmra.mxu0 %vm282_vm1, %v1607_v36  ;;  %1557 = vmatmul.mubr.msk.bf16.gmra.mxu1 %vm282_vm1, %v1608_v37 }
  0xd6   :  { %v1498_v39 = vpop.f32.mrf.mxu0  ;;  %v1530_v40 = vpop.f32.mrf.mxu1 }
  0xd7   :  { %v426_v41 = vadd.f32 %v1498_v39, %v1775_v38  ;;  %v554_v42 = vadd.f32 %v1530_v40, %v1775_v38 }
  0xd8   :  { %v417_v43 = vpop.f32.mrf.mxu0  ;;  %v545_v44 = vpop.f32.mrf.mxu1 }
  0xd9   :  { %v418_v45 = vadd.f32 %v1775_v38, %v417_v43  ;;  %v546_v46 = vadd.f32 %v1775_v38, %v545_v44  ;;  %v674_v51 = vmax.f32 %v426_v41, 0.0  ;;  %v706_v52 = vmax.f32 %v554_v42, 0.0 }
  0xda   :  { %v1499_v47 = vpop.f32.mrf.mxu0  ;;  %v1531_v48 = vpop.f32.mrf.mxu1 }
  0xdb   :  { %v429_v49 = vadd.f32 %v1499_v47, %v1775_v38  ;;  %v557_v50 = vadd.f32 %v1531_v48, %v1775_v38  ;;  %v672_v59 = vmax.f32 %v418_v45, 0.0  ;;  %v704_v60 = vmax.f32 %v546_v46, 0.0 }
  0xdc   :  { %v420_v53 = vpop.f32.mrf.mxu0  ;;  %v548_v54 = vpop.f32.mrf.mxu1 }
  0xdd   :  { %v675_v55 = vmax.f32 %v429_v49, 0.0  ;;  %v707_v56 = vmax.f32 %v557_v50, 0.0  ;;  %v421_v57 = vadd.f32 %v1775_v38, %v420_v53  ;;  %v549_v58 = vadd.f32 %v1775_v38, %v548_v54 }
  0xde   :  { %v1502_v61 = vpop.f32.mrf.mxu0  ;;  %v1534_v62 = vpop.f32.mrf.mxu1 }
  0xdf   :  { %v1266_v63 = vpack.c.bf16 %v675_v55, %v674_v51  ;;  %v1346_v0 = vpack.c.bf16 %v707_v56, %v706_v52  ;;  %v673_v1 = vmax.f32 %v421_v57, 0.0  ;;  %v705_v2 = vmax.f32 %v549_v58, 0.0 }
  0xe0   :  { %v442_v3 = vadd.f32 %v1502_v61, %v1775_v38  ;;  %v570_v4 = vadd.f32 %v1534_v62, %v1775_v38  ;;  %v433_v5 = vpop.f32.mrf.mxu0  ;;  %v561_v6 = vpop.f32.mrf.mxu1 }
  0xe1   :  { %1418 = vst [vmem:[%s1940_s3 + $0x8] sm:$0xff] %v1266_v63   ;;  %1434 = vst [vmem:[%s1940_s3 + $0x88] sm:$0xff] %v1346_v0   ;;  %v1261_v7 = vpack.c.bf16 %v673_v1, %v672_v59  ;;  %v1341_v8 = vpack.c.bf16 %v705_v2, %v704_v60  ;;  %v434_v9 = vadd.f32 %v1775_v38, %v433_v5 }
  0xe2   :  { %v562_v10 = vadd.f32 %v1775_v38, %v561_v6  ;;  %v1503_v11 = vpop.f32.mrf.mxu0  ;;  %v1535_v12 = vpop.f32.mrf.mxu1  ;;  %v678_v15 = vmax.f32 %v442_v3, 0.0  ;;  %v710_v16 = vmax.f32 %v570_v4, 0.0 }
  0xe3   :  { %1262 = vst [vmem:[%s1940_s3] sm:$0xff] %v1261_v7   ;;  %1433 = vst [vmem:[%s1940_s3 + $0x80] sm:$0xff] %v1341_v8   ;;  %v445_v13 = vadd.f32 %v1503_v11, %v1775_v38  ;;  %v573_v14 = vadd.f32 %v1535_v12, %v1775_v38  ;;  %v676_v23 = vmax.f32 %v434_v9, 0.0 }
  0xe4   :  { %v436_v17 = vpop.f32.mrf.mxu0  ;;  %v564_v18 = vpop.f32.mrf.mxu1  ;;  %v708_v24 = vmax.f32 %v562_v10, 0.0 }
  0xe5   :  { %v679_v19 = vmax.f32 %v445_v13, 0.0  ;;  %v711_v20 = vmax.f32 %v573_v14, 0.0  ;;  %v437_v21 = vadd.f32 %v1775_v38, %v436_v17  ;;  %v565_v22 = vadd.f32 %v1775_v38, %v564_v18 }
  0xe6   :  { %v1506_v25 = vpop.f32.mrf.mxu0  ;;  %v1538_v26 = vpop.f32.mrf.mxu1 }
  0xe7   :  { %v1276_v27 = vpack.c.bf16 %v679_v19, %v678_v15  ;;  %v1356_v28 = vpack.c.bf16 %v711_v20, %v710_v16  ;;  %v677_v29 = vmax.f32 %v437_v21, 0.0  ;;  %v709_v30 = vmax.f32 %v565_v22, 0.0 }
  0xe8   :  { %v458_v31 = vadd.f32 %v1506_v25, %v1775_v38  ;;  %v586_v32 = vadd.f32 %v1538_v26, %v1775_v38  ;;  %v449_v33 = vpop.f32.mrf.mxu0  ;;  %v577_v34 = vpop.f32.mrf.mxu1 }
  0xe9   :  { %1420 = vst [vmem:[%s1940_s3 + $0x18] sm:$0xff] %v1276_v27   ;;  %1436 = vst [vmem:[%s1940_s3 + $0x98] sm:$0xff] %v1356_v28   ;;  %v1271_v35 = vpack.c.bf16 %v677_v29, %v676_v23  ;;  %v1351_v36 = vpack.c.bf16 %v709_v30, %v708_v24  ;;  %v450_v37 = vadd.f32 %v1775_v38, %v449_v33 }
  0xea   :  { %v578_v39 = vadd.f32 %v1775_v38, %v577_v34  ;;  %v1507_v40 = vpop.f32.mrf.mxu0  ;;  %v1539_v41 = vpop.f32.mrf.mxu1  ;;  %v682_v44 = vmax.f32 %v458_v31, 0.0  ;;  %v714_v45 = vmax.f32 %v586_v32, 0.0 }
  0xeb   :  { %1419 = vst [vmem:[%s1940_s3 + $0x10] sm:$0xff] %v1271_v35   ;;  %1435 = vst [vmem:[%s1940_s3 + $0x90] sm:$0xff] %v1351_v36   ;;  %v461_v42 = vadd.f32 %v1507_v40, %v1775_v38  ;;  %v589_v43 = vadd.f32 %v1539_v41, %v1775_v38  ;;  %v680_v52 = vmax.f32 %v450_v37, 0.0 }
  0xec   :  { %v452_v46 = vpop.f32.mrf.mxu0  ;;  %v580_v47 = vpop.f32.mrf.mxu1  ;;  %v712_v53 = vmax.f32 %v578_v39, 0.0 }
  0xed   :  { %v683_v48 = vmax.f32 %v461_v42, 0.0  ;;  %v715_v49 = vmax.f32 %v589_v43, 0.0  ;;  %v453_v50 = vadd.f32 %v1775_v38, %v452_v46  ;;  %v581_v51 = vadd.f32 %v1775_v38, %v580_v47 }
  0xee   :  { %v1510_v54 = vpop.f32.mrf.mxu0  ;;  %v1542_v55 = vpop.f32.mrf.mxu1 }
  0xef   :  { %v1286_v56 = vpack.c.bf16 %v683_v48, %v682_v44  ;;  %v1366_v57 = vpack.c.bf16 %v715_v49, %v714_v45  ;;  %v681_v58 = vmax.f32 %v453_v50, 0.0  ;;  %v713_v59 = vmax.f32 %v581_v51, 0.0 }
  0xf0   :  { %v474_v60 = vadd.f32 %v1510_v54, %v1775_v38  ;;  %v602_v61 = vadd.f32 %v1542_v55, %v1775_v38  ;;  %v465_v62 = vpop.f32.mrf.mxu0  ;;  %v593_v63 = vpop.f32.mrf.mxu1 }
  0xf1   :  { %1422 = vst [vmem:[%s1940_s3 + $0x28] sm:$0xff] %v1286_v56   ;;  %1438 = vst [vmem:[%s1940_s3 + $0xa8] sm:$0xff] %v1366_v57   ;;  %v1281_v0 = vpack.c.bf16 %v681_v58, %v680_v52  ;;  %v1361_v1 = vpack.c.bf16 %v713_v59, %v712_v53  ;;  %v466_v2 = vadd.f32 %v1775_v38, %v465_v62 }
  0xf2   :  { %v594_v3 = vadd.f32 %v1775_v38, %v593_v63  ;;  %v1511_v4 = vpop.f32.mrf.mxu0  ;;  %v1543_v5 = vpop.f32.mrf.mxu1  ;;  %v686_v8 = vmax.f32 %v474_v60, 0.0  ;;  %v718_v9 = vmax.f32 %v602_v61, 0.0 }
  0xf3   :  { %1421 = vst [vmem:[%s1940_s3 + $0x20] sm:$0xff] %v1281_v0   ;;  %1437 = vst [vmem:[%s1940_s3 + $0xa0] sm:$0xff] %v1361_v1   ;;  %v477_v6 = vadd.f32 %v1511_v4, %v1775_v38  ;;  %v605_v7 = vadd.f32 %v1543_v5, %v1775_v38  ;;  %v684_v16 = vmax.f32 %v466_v2, 0.0 }
  0xf4   :  { %v468_v10 = vpop.f32.mrf.mxu0  ;;  %v596_v11 = vpop.f32.mrf.mxu1  ;;  %v716_v17 = vmax.f32 %v594_v3, 0.0 }
  0xf5   :  { %v687_v12 = vmax.f32 %v477_v6, 0.0  ;;  %v719_v13 = vmax.f32 %v605_v7, 0.0  ;;  %v469_v14 = vadd.f32 %v1775_v38, %v468_v10  ;;  %v597_v15 = vadd.f32 %v1775_v38, %v596_v11 }
  0xf6   :  { %v1514_v18 = vpop.f32.mrf.mxu0  ;;  %v1546_v19 = vpop.f32.mrf.mxu1 }
  0xf7   :  { %v1296_v20 = vpack.c.bf16 %v687_v12, %v686_v8  ;;  %v1376_v21 = vpack.c.bf16 %v719_v13, %v718_v9  ;;  %v685_v22 = vmax.f32 %v469_v14, 0.0  ;;  %v717_v23 = vmax.f32 %v597_v15, 0.0 }
  0xf8   :  { %v490_v24 = vadd.f32 %v1514_v18, %v1775_v38  ;;  %v618_v25 = vadd.f32 %v1546_v19, %v1775_v38  ;;  %v481_v26 = vpop.f32.mrf.mxu0  ;;  %v609_v27 = vpop.f32.mrf.mxu1 }
  0xf9   :  { %1424 = vst [vmem:[%s1940_s3 + $0x38] sm:$0xff] %v1296_v20   ;;  %1440 = vst [vmem:[%s1940_s3 + $0xb8] sm:$0xff] %v1376_v21   ;;  %v1291_v28 = vpack.c.bf16 %v685_v22, %v684_v16  ;;  %v1371_v29 = vpack.c.bf16 %v717_v23, %v716_v17  ;;  %v482_v30 = vadd.f32 %v1775_v38, %v481_v26 }
  0xfa   :  { %v610_v31 = vadd.f32 %v1775_v38, %v609_v27  ;;  %v1515_v32 = vpop.f32.mrf.mxu0  ;;  %v1547_v33 = vpop.f32.mrf.mxu1  ;;  %v690_v36 = vmax.f32 %v490_v24, 0.0  ;;  %v722_v37 = vmax.f32 %v618_v25, 0.0 }
  0xfb   :  { %1423 = vst [vmem:[%s1940_s3 + $0x30] sm:$0xff] %v1291_v28   ;;  %1439 = vst [vmem:[%s1940_s3 + $0xb0] sm:$0xff] %v1371_v29   ;;  %v493_v34 = vadd.f32 %v1515_v32, %v1775_v38  ;;  %v621_v35 = vadd.f32 %v1547_v33, %v1775_v38  ;;  %v688_v45 = vmax.f32 %v482_v30, 0.0 }
  0xfc   :  { %v484_v39 = vpop.f32.mrf.mxu0  ;;  %v612_v40 = vpop.f32.mrf.mxu1  ;;  %v720_v46 = vmax.f32 %v610_v31, 0.0 }
  0xfd   :  { %v691_v41 = vmax.f32 %v493_v34, 0.0  ;;  %v723_v42 = vmax.f32 %v621_v35, 0.0  ;;  %v485_v43 = vadd.f32 %v1775_v38, %v484_v39  ;;  %v613_v44 = vadd.f32 %v1775_v38, %v612_v40 }
  0xfe   :  { %v1518_v47 = vpop.f32.mrf.mxu0  ;;  %v1550_v48 = vpop.f32.mrf.mxu1 }
  0xff   :  { %v1306_v49 = vpack.c.bf16 %v691_v41, %v690_v36  ;;  %v1386_v50 = vpack.c.bf16 %v723_v42, %v722_v37  ;;  %v689_v51 = vmax.f32 %v485_v43, 0.0  ;;  %v721_v52 = vmax.f32 %v613_v44, 0.0 }
 0x100   :  { %v506_v53 = vadd.f32 %v1518_v47, %v1775_v38  ;;  %v634_v54 = vadd.f32 %v1550_v48, %v1775_v38  ;;  %v497_v55 = vpop.f32.mrf.mxu0  ;;  %v625_v56 = vpop.f32.mrf.mxu1 }
 0x101   :  { %1426 = vst [vmem:[%s1940_s3 + $0x48] sm:$0xff] %v1306_v49   ;;  %1442 = vst [vmem:[%s1940_s3 + $0xc8] sm:$0xff] %v1386_v50   ;;  %v1301_v57 = vpack.c.bf16 %v689_v51, %v688_v45  ;;  %v1381_v58 = vpack.c.bf16 %v721_v52, %v720_v46  ;;  %v498_v59 = vadd.f32 %v1775_v38, %v497_v55 }
 0x102   :  { %v626_v60 = vadd.f32 %v1775_v38, %v625_v56  ;;  %v1519_v61 = vpop.f32.mrf.mxu0  ;;  %v1551_v62 = vpop.f32.mrf.mxu1  ;;  %v694_v1 = vmax.f32 %v506_v53, 0.0  ;;  %v726_v2 = vmax.f32 %v634_v54, 0.0 }
 0x103   :  { %1425 = vst [vmem:[%s1940_s3 + $0x40] sm:$0xff] %v1301_v57   ;;  %1441 = vst [vmem:[%s1940_s3 + $0xc0] sm:$0xff] %v1381_v58   ;;  %v509_v63 = vadd.f32 %v1519_v61, %v1775_v38  ;;  %v637_v0 = vadd.f32 %v1551_v62, %v1775_v38  ;;  %v692_v9 = vmax.f32 %v498_v59, 0.0 }
 0x104   :  { %v500_v3 = vpop.f32.mrf.mxu0  ;;  %v628_v4 = vpop.f32.mrf.mxu1  ;;  %v724_v10 = vmax.f32 %v626_v60, 0.0 }
 0x105   :  { %v695_v5 = vmax.f32 %v509_v63, 0.0  ;;  %v727_v6 = vmax.f32 %v637_v0, 0.0  ;;  %v501_v7 = vadd.f32 %v1775_v38, %v500_v3  ;;  %v629_v8 = vadd.f32 %v1775_v38, %v628_v4 }
 0x106   :  { %v1522_v11 = vpop.f32.mrf.mxu0  ;;  %v1554_v12 = vpop.f32.mrf.mxu1 }
 0x107   :  { %v1316_v13 = vpack.c.bf16 %v695_v5, %v694_v1  ;;  %v1396_v14 = vpack.c.bf16 %v727_v6, %v726_v2  ;;  %v693_v15 = vmax.f32 %v501_v7, 0.0  ;;  %v725_v16 = vmax.f32 %v629_v8, 0.0 }
 0x108   :  { %v522_v17 = vadd.f32 %v1522_v11, %v1775_v38  ;;  %v650_v18 = vadd.f32 %v1554_v12, %v1775_v38  ;;  %v513_v19 = vpop.f32.mrf.mxu0  ;;  %v641_v20 = vpop.f32.mrf.mxu1 }
 0x109   :  { %1428 = vst [vmem:[%s1940_s3 + $0x58] sm:$0xff] %v1316_v13   ;;  %1444 = vst [vmem:[%s1940_s3 + $0xd8] sm:$0xff] %v1396_v14   ;;  %v1311_v21 = vpack.c.bf16 %v693_v15, %v692_v9  ;;  %v1391_v22 = vpack.c.bf16 %v725_v16, %v724_v10  ;;  %v514_v23 = vadd.f32 %v1775_v38, %v513_v19 }
 0x10a   :  { %v642_v24 = vadd.f32 %v1775_v38, %v641_v20  ;;  %v1523_v25 = vpop.f32.mrf.mxu0  ;;  %v1555_v26 = vpop.f32.mrf.mxu1  ;;  %v698_v29 = vmax.f32 %v522_v17, 0.0  ;;  %v730_v30 = vmax.f32 %v650_v18, 0.0 }
 0x10b   :  { %1427 = vst [vmem:[%s1940_s3 + $0x50] sm:$0xff] %v1311_v21   ;;  %1443 = vst [vmem:[%s1940_s3 + $0xd0] sm:$0xff] %v1391_v22   ;;  %v525_v27 = vadd.f32 %v1523_v25, %v1775_v38  ;;  %v653_v28 = vadd.f32 %v1555_v26, %v1775_v38  ;;  %v696_v37 = vmax.f32 %v514_v23, 0.0 }
 0x10c   :  { %v516_v31 = vpop.f32.mrf.mxu0  ;;  %v644_v32 = vpop.f32.mrf.mxu1  ;;  %v728_v39 = vmax.f32 %v642_v24, 0.0 }
 0x10d   :  { %v699_v33 = vmax.f32 %v525_v27, 0.0  ;;  %v731_v34 = vmax.f32 %v653_v28, 0.0  ;;  %v517_v35 = vadd.f32 %v1775_v38, %v516_v31  ;;  %v645_v36 = vadd.f32 %v1775_v38, %v644_v32 }
 0x10e   :  { %v1526_v40 = vpop.f32.mrf.mxu0  ;;  %v1558_v41 = vpop.f32.mrf.mxu1 }
 0x10f   :  { %v1326_v42 = vpack.c.bf16 %v699_v33, %v698_v29  ;;  %v1406_v43 = vpack.c.bf16 %v731_v34, %v730_v30  ;;  %v697_v44 = vmax.f32 %v517_v35, 0.0  ;;  %v729_v45 = vmax.f32 %v645_v36, 0.0 }
 0x110   :  { %v538_v46 = vadd.f32 %v1526_v40, %v1775_v38  ;;  %v666_v47 = vadd.f32 %v1558_v41, %v1775_v38  ;;  %v529_v48 = vpop.f32.mrf.mxu0  ;;  %v657_v49 = vpop.f32.mrf.mxu1 }
 0x111   :  { %1430 = vst [vmem:[%s1940_s3 + $0x68] sm:$0xff] %v1326_v42   ;;  %1446 = vst [vmem:[%s1940_s3 + $0xe8] sm:$0xff] %v1406_v43   ;;  %v1321_v50 = vpack.c.bf16 %v697_v44, %v696_v37  ;;  %v1401_v51 = vpack.c.bf16 %v729_v45, %v728_v39  ;;  %v530_v52 = vadd.f32 %v1775_v38, %v529_v48 }
 0x112   :  { %v658_v53 = vadd.f32 %v1775_v38, %v657_v49  ;;  %v1527_v54 = vpop.f32.mrf.mxu0  ;;  %v1559_v55 = vpop.f32.mrf.mxu1  ;;  %v702_v58 = vmax.f32 %v538_v46, 0.0  ;;  %v734_v59 = vmax.f32 %v666_v47, 0.0 }
 0x113   :  { %1429 = vst [vmem:[%s1940_s3 + $0x60] sm:$0xff] %v1321_v50   ;;  %1445 = vst [vmem:[%s1940_s3 + $0xe0] sm:$0xff] %v1401_v51   ;;  %v541_v56 = vadd.f32 %v1527_v54, %v1775_v38  ;;  %v669_v57 = vadd.f32 %v1559_v55, %v1775_v38  ;;  %v700_v2 = vmax.f32 %v530_v52, 0.0 }
 0x114   :  { %v532_v60 = vpop.f32.mrf.mxu0  ;;  %v660_v61 = vpop.f32.mrf.mxu1  ;;  %v732_v3 = vmax.f32 %v658_v53, 0.0 }
 0x115   :  { %v703_v62 = vmax.f32 %v541_v56, 0.0  ;;  %v735_v63 = vmax.f32 %v669_v57, 0.0  ;;  %v533_v0 = vadd.f32 %v1775_v38, %v532_v60  ;;  %v661_v1 = vadd.f32 %v1775_v38, %v660_v61 }
 0x117   :  { %v1336_v4 = vpack.c.bf16 %v703_v62, %v702_v58  ;;  %v1416_v5 = vpack.c.bf16 %v735_v63, %v734_v59  ;;  %v701_v6 = vmax.f32 %v533_v0, 0.0  ;;  %v733_v7 = vmax.f32 %v661_v1, 0.0 }
 0x119   :  { %1432 = vst [vmem:[%s1940_s3 + $0x78] sm:$0xff] %v1336_v4   ;;  %1448 = vst [vmem:[%s1940_s3 + $0xf8] sm:$0xff] %v1416_v5   ;;  %v1331_v8 = vpack.c.bf16 %v701_v6, %v700_v2  ;;  %v1411_v9 = vpack.c.bf16 %v733_v7, %v732_v3 }
 0x11b   :  { %1431 = vst [vmem:[%s1940_s3 + $0x70] sm:$0xff] %v1331_v8   ;;  %1447 = vst [vmem:[%s1940_s3 + $0xf0] sm:$0xff] %v1411_v9  }

// kernel: dfanet_forward.47
= control target key start
LH: loop header
LB: loop body
LE: loop exit
PB: predicated region body
PF: predicated region fallthrough
CT: control target
= control target key end

     0   :  { %v569_v0 = vmov 0   ;;  %vm182_vm0 = vcmask 130048   ;;  %s718_s1 = inlined_call_operand.vmem [shape: bf16[144,128], index: 1, kind: input, shape index: {}]   ;;  %s719_s0 = inlined_call_operand.vmem [shape: bf16[128,144], index: 0, kind: input, shape index: {}]   ;;  %s720_s2 = inlined_call_operand.vmem [shape: f32[1,128], index: 2, kind: input, shape index: {}]   ;;  %s721_s3 = inlined_call_operand.vmem [shape: bf16[128,128], index: 3, kind: output, shape index: {}]  }
   0x1   :  { %207 = vmatprep.subr.bf16.mxu0 %v569_v0  ;;  %517 = vmatprep.subr.bf16.mxu1 %v569_v0  ;;  %v536_v1 = vld [vmem:[%s718_s1 + $0x38] sm:$0xff]   ;;  %v537_v2 = vld [vmem:[%s718_s1 + $0x30] sm:$0xff]   ;;  %v538_v3 = vld [vmem:[%s718_s1 + $0x28] sm:$0xff]  }
   0x2   :  { %208 = vmatpush1.bf16.msra.mxu0 %v536_v1  ;;  %526 = vmatpush1.bf16.msra.mxu1 %v536_v1  ;;  %v539_v4 = vld [vmem:[%s718_s1 + $0x20] sm:$0xff]   ;;  %v540_v7 = vld [vmem:[%s718_s1 + $0x18] sm:$0xff]   ;;  %v541_v8 = vld [vmem:[%s718_s1 + $0x10] sm:$0xff]  }
   0x3   :  { %209 = vmatprep.subr.bf16.mxu0 %v569_v0  ;;  %518 = vmatprep.subr.bf16.mxu1 %v569_v0  ;;  %v547_v5 = vld [vmem:[%s719_s0 + $0x4] ss:$8 sps:$4 sm:$0xff]   ;;  %v545_v12 = vld [vmem:[%s719_s0] ss:$8 sps:$4 sm:$0xff]   ;;  %v551_v14 = vld [vmem:[%s719_s0 + $0x14] ss:$8 sps:$4 sm:$0xff]  }
   0x4   :  { %v550_v6 = vld [vmem:[%s719_s0 + $0x44] ss:$8 sps:$4 sm:$0xff]   ;;  %430 = vmatprep.mubr.msk.bf16.mxu0 %vm182_vm0, %v547_v5  ;;  %v548_v13 = vld [vmem:[%s719_s0 + $0x40] ss:$8 sps:$4 sm:$0xff]   ;;  %v553_v15 = vld [vmem:[%s719_s0 + $0x54] ss:$8 sps:$4 sm:$0xff]  }
   0x5   :  { %434 = vmatprep.mubr.msk.bf16.mxu1 %vm182_vm0, %v550_v6  ;;  %v542_v9 = vld [vmem:[%s718_s1 + $0x8] sm:$0xff]   ;;  %v543_v10 = vld [vmem:[%s718_s1] sm:$0xff]   ;;  %v555_v16 = vld [vmem:[%s719_s0 + $0x10] ss:$8 sps:$4 sm:$0xff]  }
   0x6   :  { %210 = vmatpush1.bf16.msra.mxu0 %v537_v2  ;;  %527 = vmatpush1.bf16.msra.mxu1 %v537_v2  ;;  %v544_v11 = vld [vmem:[%s718_s1 + $0x40] sm:$0xff]   ;;  %v556_v17 = vld [vmem:[%s719_s0 + $0x50] ss:$8 sps:$4 sm:$0xff]   ;;  %v563_v22 = vld [vmem:[%s719_s0 + $0x34] ss:$8 sps:$4 sm:$0xff]  }
   0x7   :  { %211 = vmatprep.subr.bf16.mxu0 %v569_v0  ;;  %519 = vmatprep.subr.bf16.mxu1 %v569_v0  ;;  %v557_v18 = vld [vmem:[%s719_s0 + $0x24] ss:$8 sps:$4 sm:$0xff]   ;;  %v561_v20 = vld [vmem:[%s719_s0 + $0x20] ss:$8 sps:$4 sm:$0xff]   ;;  %v565_v23 = vld [vmem:[%s719_s0 + $0x74] ss:$8 sps:$4 sm:$0xff]  }
   0x8   :  { %v559_v19 = vld [vmem:[%s719_s0 + $0x64] ss:$8 sps:$4 sm:$0xff]   ;;  %v562_v21 = vld [vmem:[%s719_s0 + $0x60] ss:$8 sps:$4 sm:$0xff]   ;;  %v567_v24 = vld [vmem:[%s719_s0 + $0x30] ss:$8 sps:$4 sm:$0xff]  }
   0x9   :  { %v568_v25 = vld [vmem:[%s719_s0 + $0x70] ss:$8 sps:$4 sm:$0xff]   ;;  %v676_v26 = vld [vmem:[%s720_s2] ss:$0 sm:$0xff] }
   0xa   :  { %212 = vmatpush1.bf16.msra.mxu0 %v538_v3  ;;  %528 = vmatpush1.bf16.msra.mxu1 %v538_v3 }
   0xb   :  { %213 = vmatprep.subr.bf16.mxu0 %v569_v0  ;;  %520 = vmatprep.subr.bf16.mxu1 %v569_v0 }
   0xe   :  { %214 = vmatpush1.bf16.msra.mxu0 %v539_v4  ;;  %529 = vmatpush1.bf16.msra.mxu1 %v539_v4 }
   0xf   :  { %215 = vmatprep.subr.bf16.mxu0 %v569_v0  ;;  %521 = vmatprep.subr.bf16.mxu1 %v569_v0 }
  0x12   :  { %216 = vmatpush1.bf16.msra.mxu0 %v540_v7  ;;  %530 = vmatpush1.bf16.msra.mxu1 %v540_v7 }
  0x13   :  { %217 = vmatprep.subr.bf16.mxu0 %v569_v0  ;;  %522 = vmatprep.subr.bf16.mxu1 %v569_v0 }
  0x16   :  { %218 = vmatpush1.bf16.msra.mxu0 %v541_v8  ;;  %531 = vmatpush1.bf16.msra.mxu1 %v541_v8 }
  0x17   :  { %219 = vmatprep.subr.bf16.mxu0 %v569_v0  ;;  %523 = vmatprep.subr.bf16.mxu1 %v569_v0 }
  0x1a   :  { %220 = vmatpush1.bf16.msra.mxu0 %v542_v9  ;;  %532 = vmatpush1.bf16.msra.mxu1 %v542_v9 }
  0x1b   :  { %221 = vmatprep.subr.bf16.mxu0 %v569_v0  ;;  %524 = vmatprep.subr.bf16.mxu1 %v569_v0 }
  0x1e   :  { %222 = vmatpush1.bf16.msra.mxu0 %v543_v10  ;;  %533 = vmatpush1.bf16.msra.mxu1 %v543_v10 }
  0x1f   :  { %237 = vmatprep.subr.bf16.mxu0 %v569_v0  ;;  %525 = vmatprep.subr.bf16.mxu1 %v569_v0 }
  0x22   :  { %238 = vmatpush2.bf16.msra.mxu0 %v544_v11  ;;  %534 = vmatpush2.bf16.msra.mxu1 %v544_v11 }
  0x25   :  { %240 = vmatmul.mubr.bf16.vlgmr.msra.gmra.mxu0 %v545_v12  ;;  %272 = vmatmul.mubr.bf16.vlgmr.msra.gmra.mxu1 %v548_v13 }
  0x26   :  { %431 = vmatprep.mubr.msk.bf16.mxu0 %vm182_vm0, %v551_v14  ;;  %435 = vmatprep.mubr.msk.bf16.mxu1 %vm182_vm0, %v553_v15 }
  0x2d   :  { %248 = vmatmul.mubr.bf16.gmra.mxu0 %v555_v16  ;;  %280 = vmatmul.mubr.bf16.gmra.mxu1 %v556_v17 }
  0x2e   :  { %432 = vmatprep.mubr.msk.bf16.mxu0 %vm182_vm0, %v557_v18  ;;  %436 = vmatprep.mubr.msk.bf16.mxu1 %vm182_vm0, %v559_v19 }
  0x35   :  { %256 = vmatmul.mubr.bf16.gmra.mxu0 %v561_v20  ;;  %288 = vmatmul.mubr.bf16.gmra.mxu1 %v562_v21 }
  0x36   :  { %433 = vmatprep.mubr.msk.bf16.mxu0 %vm182_vm0, %v563_v22  ;;  %437 = vmatprep.mubr.msk.bf16.mxu1 %vm182_vm0, %v565_v23 }
  0x3d   :  { %264 = vmatmul.mubr.bf16.gmra.mxu0 %v567_v24  ;;  %296 = vmatmul.mubr.bf16.gmra.mxu1 %v568_v25 }
  0xe5   :  { %v241_v27 = vpop.f32.mrf.mxu0  ;;  %v273_v28 = vpop.f32.mrf.mxu1 }
  0xe6   :  { %v242_v31 = vadd.f32 %v676_v26, %v241_v27  ;;  %v274_v32 = vadd.f32 %v676_v26, %v273_v28 }
  0xe7   :  { %v243_v29 = vpop.f32.mrf.mxu0  ;;  %v275_v30 = vpop.f32.mrf.mxu1 }
  0xe8   :  { %v304_v39 = vmax.f32 %v242_v31, 0.0  ;;  %v312_v40 = vmax.f32 %v274_v32, 0.0 }
  0xe9   :  { %v244_v33 = vpop.f32.mrf.mxu0  ;;  %v276_v34 = vpop.f32.mrf.mxu1 }
  0xea   :  { %v245_v35 = vadd.f32 %v676_v26, %v244_v33  ;;  %v277_v36 = vadd.f32 %v676_v26, %v276_v34 }
  0xeb   :  { %v246_v37 = vpop.f32.mrf.mxu0  ;;  %v278_v38 = vpop.f32.mrf.mxu1 }
  0xec   :  { %v305_v41 = vmax.f32 %v245_v35, 0.0  ;;  %v313_v42 = vmax.f32 %v277_v36, 0.0 }
  0xed   :  { %v249_v43 = vpop.f32.mrf.mxu0  ;;  %v281_v44 = vpop.f32.mrf.mxu1 }
  0xee   :  { %v473_v45 = vpack.c.bf16 %v305_v41, %v304_v39  ;;  %v493_v46 = vpack.c.bf16 %v313_v42, %v312_v40  ;;  %v250_v49 = vadd.f32 %v676_v26, %v249_v43  ;;  %v282_v50 = vadd.f32 %v676_v26, %v281_v44 }
  0xef   :  { %v251_v47 = vpop.f32.mrf.mxu0  ;;  %v283_v48 = vpop.f32.mrf.mxu1 }
  0xf0   :  { %474 = vst [vmem:[%s721_s3] sm:$0xff] %v473_v45   ;;  %513 = vst [vmem:[%s721_s3 + $0x20] sm:$0xff] %v493_v46   ;;  %v306_v57 = vmax.f32 %v250_v49, 0.0  ;;  %v314_v58 = vmax.f32 %v282_v50, 0.0 }
  0xf1   :  { %v252_v51 = vpop.f32.mrf.mxu0  ;;  %v284_v52 = vpop.f32.mrf.mxu1 }
  0xf2   :  { %v253_v53 = vadd.f32 %v676_v26, %v252_v51  ;;  %v285_v54 = vadd.f32 %v676_v26, %v284_v52 }
  0xf3   :  { %v254_v55 = vpop.f32.mrf.mxu0  ;;  %v286_v56 = vpop.f32.mrf.mxu1 }
  0xf4   :  { %v307_v59 = vmax.f32 %v253_v53, 0.0  ;;  %v315_v60 = vmax.f32 %v285_v54, 0.0 }
  0xf5   :  { %v257_v61 = vpop.f32.mrf.mxu0  ;;  %v289_v62 = vpop.f32.mrf.mxu1 }
  0xf6   :  { %v478_v63 = vpack.c.bf16 %v307_v59, %v306_v57  ;;  %v498_v0 = vpack.c.bf16 %v315_v60, %v314_v58  ;;  %v258_v3 = vadd.f32 %v676_v26, %v257_v61  ;;  %v290_v4 = vadd.f32 %v676_v26, %v289_v62 }
  0xf7   :  { %v259_v1 = vpop.f32.mrf.mxu0  ;;  %v291_v2 = vpop.f32.mrf.mxu1 }
  0xf8   :  { %510 = vst [vmem:[%s721_s3 + $0x8] sm:$0xff] %v478_v63   ;;  %514 = vst [vmem:[%s721_s3 + $0x28] sm:$0xff] %v498_v0   ;;  %v308_v11 = vmax.f32 %v258_v3, 0.0  ;;  %v316_v12 = vmax.f32 %v290_v4, 0.0 }
  0xf9   :  { %v260_v5 = vpop.f32.mrf.mxu0  ;;  %v292_v6 = vpop.f32.mrf.mxu1 }
  0xfa   :  { %v261_v7 = vadd.f32 %v676_v26, %v260_v5  ;;  %v293_v8 = vadd.f32 %v676_v26, %v292_v6 }
  0xfb   :  { %v262_v9 = vpop.f32.mrf.mxu0  ;;  %v294_v10 = vpop.f32.mrf.mxu1 }
  0xfc   :  { %v309_v13 = vmax.f32 %v261_v7, 0.0  ;;  %v317_v14 = vmax.f32 %v293_v8, 0.0 }
  0xfd   :  { %v265_v15 = vpop.f32.mrf.mxu0  ;;  %v297_v16 = vpop.f32.mrf.mxu1 }
  0xfe   :  { %v483_v17 = vpack.c.bf16 %v309_v13, %v308_v11  ;;  %v503_v18 = vpack.c.bf16 %v317_v14, %v316_v12  ;;  %v266_v21 = vadd.f32 %v676_v26, %v265_v15  ;;  %v298_v22 = vadd.f32 %v676_v26, %v297_v16 }
  0xff   :  { %v267_v19 = vpop.f32.mrf.mxu0  ;;  %v299_v20 = vpop.f32.mrf.mxu1 }
 0x100   :  { %511 = vst [vmem:[%s721_s3 + $0x10] sm:$0xff] %v483_v17   ;;  %515 = vst [vmem:[%s721_s3 + $0x30] sm:$0xff] %v503_v18   ;;  %v310_v30 = vmax.f32 %v266_v21, 0.0  ;;  %v318_v31 = vmax.f32 %v298_v22, 0.0 }
 0x101   :  { %v268_v23 = vpop.f32.mrf.mxu0  ;;  %v300_v24 = vpop.f32.mrf.mxu1 }
 0x102   :  { %v269_v25 = vadd.f32 %v676_v26, %v268_v23  ;;  %v301_v27 = vadd.f32 %v676_v26, %v300_v24 }
 0x103   :  { %v270_v28 = vpop.f32.mrf.mxu0  ;;  %v302_v29 = vpop.f32.mrf.mxu1 }
 0x104   :  { %v311_v32 = vmax.f32 %v269_v25, 0.0  ;;  %v319_v33 = vmax.f32 %v301_v27, 0.0 }
 0x106   :  { %v488_v34 = vpack.c.bf16 %v311_v32, %v310_v30  ;;  %v508_v35 = vpack.c.bf16 %v319_v33, %v318_v31 }
 0x108   :  { %512 = vst [vmem:[%s721_s3 + $0x18] sm:$0xff] %v488_v34   ;;  %516 = vst [vmem:[%s721_s3 + $0x38] sm:$0xff] %v508_v35  }

// kernel: dfanet_forward.48
= control target key start
LH: loop header
LB: loop body
LE: loop exit
PB: predicated region body
PF: predicated region fallthrough
CT: control target
= control target key end

     0   :  { %vm204_vm0 = vcmask 261120   ;;  %s550_s1 = inlined_call_operand.vmem [shape: bf16[288,128], index: 1, kind: input, shape index: {}]   ;;  %s551_s0 = inlined_call_operand.vmem [shape: bf16[32,288], index: 0, kind: input, shape index: {}]   ;;  %s552_s2 = inlined_call_operand.vmem [shape: f32[1,128], index: 2, kind: input, shape index: {}]   ;;  %s553_s3 = inlined_call_operand.vmem [shape: bf16[32,128], index: 3, kind: output, shape index: {}]  }
   0x1   :  { %v423_v0 = vld [vmem:[%s550_s1 + $0x78] sm:$0xff]   ;;  %v425_v2 = vld [vmem:[%s550_s1 + $0x70] sm:$0xff]   ;;  %v427_v4 = vld [vmem:[%s550_s1 + $0x68] sm:$0xff]  }
   0x2   :  { %v424_v1 = vld [vmem:[%s550_s1 + $0x38] sm:$0xff]   ;;  %383 = vmatprep.subr.bf16.mxu0 %v423_v0  ;;  %v426_v3 = vld [vmem:[%s550_s1 + $0x30] sm:$0xff]   ;;  %v428_v5 = vld [vmem:[%s550_s1 + $0x28] sm:$0xff]  }
   0x3   :  { %384 = vmatpush3.bf16.msra.mxu0 %v424_v1  ;;  %v429_v6 = vld [vmem:[%s550_s1 + $0x60] sm:$0xff]   ;;  %v431_v8 = vld [vmem:[%s550_s1 + $0x58] sm:$0xff]   ;;  %v438_v10 = vld [vmem:[%s550_s1 + $0x88] sm:$0xff]  }
   0x4   :  { %385 = vmatprep.subr.bf16.mxu0 %v425_v2  ;;  %v430_v7 = vld [vmem:[%s550_s1 + $0x20] sm:$0xff]   ;;  %v432_v9 = vld [vmem:[%s550_s1 + $0x18] sm:$0xff]   ;;  %v433_v11 = vld [vmem:[%s550_s1 + $0x50] sm:$0xff]   ;;  %415 = vmatprep.subr.bf16.mxu1 %v438_v10 }
   0x5   :  { %v434_v12 = vld [vmem:[%s550_s1 + $0x10] sm:$0xff]   ;;  %v435_v13 = vld [vmem:[%s550_s1 + $0x48] sm:$0xff]   ;;  %416 = vmatpush3.bf16.msra.mxu1 %v438_v10  ;;  %v443_v15 = vld [vmem:[%s550_s1 + $0x80] sm:$0xff]  }
   0x6   :  { %v442_v14 = vld [vmem:[%s551_s0 + $0x4] ss:$12 sps:$4 sm:$0xff]   ;;  %v444_v16 = vld [vmem:[%s551_s0 + $0x8] ss:$12 sps:$4 sm:$0xff]   ;;  %417 = vmatprep.subr.bf16.mxu1 %v443_v15  ;;  %v445_v17 = vld [vmem:[%s551_s0 + $0x20] ss:$12 sps:$4 sm:$0xff]  }
   0x7   :  { %386 = vmatpush3.bf16.msra.mxu0 %v426_v3  ;;  %243 = vmatprep.mubr.bf16.mxu0 %v442_v14  ;;  %v436_v18 = vld [vmem:[%s550_s1 + $0x8] sm:$0xff]   ;;  %v437_v19 = vld [vmem:[%s550_s1 + $0x40] sm:$0xff]  }
   0x8   :  { %387 = vmatprep.subr.bf16.mxu0 %v427_v4  ;;  %419 = vmatprep.mubr.msk.bf16.mxu1 %vm204_vm0, %v444_v16  ;;  %v439_v20 = vld [vmem:[%s550_s1] sm:$0xff]   ;;  %v446_v22 = vld [vmem:[%s551_s0 + $0x1c] ss:$12 sps:$4 sm:$0xff]  }
   0x9   :  { %418 = vmatpush3.bf16.msra.mxu1 %v443_v15  ;;  %v440_v21 = vld [vmem:[%s551_s0] ss:$12 sps:$4 sm:$0xff]   ;;  %v448_v23 = vld [vmem:[%s551_s0 + $0x18] ss:$12 sps:$4 sm:$0xff]  }
   0xa   :  { %v337_v28 = vld [vmem:[%s552_s2] ss:$0 sm:$0xff] }
   0xb   :  { %388 = vmatpush3.bf16.msra.mxu0 %v428_v5 }
   0xc   :  { %389 = vmatprep.subr.bf16.mxu0 %v429_v6  ;;  %420 = vmatmul.mubr.msk.bf16.vlgmr.msra.gmra.mxu1 %vm204_vm0, %v445_v17 }
   0xf   :  { %390 = vmatpush3.bf16.msra.mxu0 %v430_v7 }
  0x10   :  { %391 = vmatprep.subr.bf16.mxu0 %v431_v8 }
  0x13   :  { %392 = vmatpush3.bf16.msra.mxu0 %v432_v9 }
  0x14   :  { %393 = vmatprep.subr.bf16.mxu0 %v433_v11 }
  0x17   :  { %394 = vmatpush3.bf16.msra.mxu0 %v434_v12 }
  0x18   :  { %395 = vmatprep.subr.bf16.mxu0 %v435_v13 }
  0x1b   :  { %396 = vmatpush3.bf16.msra.mxu0 %v436_v18 }
  0x1c   :  { %397 = vmatprep.subr.bf16.mxu0 %v437_v19 }
  0x1f   :  { %398 = vmatpush3.bf16.msra.mxu0 %v439_v20 }
  0x22   :  { %244 = vmatmul.mubr.bf16.vlgmr.msra.gmra.mxu0 %v440_v21 }
  0x23   :  { %251 = vmatprep.mubr.bf16.mxu0 %v446_v22 }
  0x2a   :  { %252 = vmatmul.mubr.bf16.gmra.mxu0 %v448_v23 }
  0xcc   :  { %v421_v24 = vpop.f32.mrf.mxu1 }
  0xce   :  { %v294_v26 = vpop.f32.mrf.mxu1 }
  0xd0   :  { %v422_v31 = vpop.f32.mrf.mxu1 }
  0xd2   :  { %v297_v36 = vpop.f32.mrf.mxu1 }
  0xe2   :  { %v399_v25 = vpop.f32.mrf.mxu0 }
  0xe4   :  { %v400_v27 = vpop.f32.mrf.mxu0 }
  0xe5   :  { %v401_v29 = vadd.f32 %v400_v27, %v399_v25 }
  0xe6   :  { %v402_v30 = vpop.f32.mrf.mxu0 }
  0xe7   :  { %v246_v32 = vadd.f32 %v401_v29, %v337_v28 }
  0xe8   :  { %v403_v33 = vpop.f32.mrf.mxu0 }
  0xe9   :  { %v404_v34 = vadd.f32 %v403_v33, %v402_v30  ;;  %v295_v37 = vadd.f32 %v294_v26, %v246_v32 }
  0xea   :  { %v405_v35 = vpop.f32.mrf.mxu0 }
  0xeb   :  { %v249_v38 = vadd.f32 %v404_v34, %v337_v28  ;;  %v309_v43 = vmax.f32 %v295_v37, 0.0 }
  0xec   :  { %v406_v39 = vpop.f32.mrf.mxu0 }
  0xed   :  { %v407_v40 = vadd.f32 %v406_v39, %v405_v35  ;;  %v298_v41 = vadd.f32 %v297_v36, %v249_v38 }
  0xee   :  { %v408_v42 = vpop.f32.mrf.mxu0 }
  0xef   :  { %v254_v44 = vadd.f32 %v407_v40, %v337_v28  ;;  %v310_v45 = vmax.f32 %v298_v41, 0.0 }
  0xf0   :  { %v409_v46 = vpop.f32.mrf.mxu0 }
  0xf1   :  { %v375_v47 = vpack.c.bf16 %v310_v45, %v309_v43  ;;  %v410_v48 = vadd.f32 %v409_v46, %v408_v42  ;;  %v303_v49 = vadd.f32 %v421_v24, %v254_v44 }
  0xf3   :  { %376 = vst [vmem:[%s553_s3] sm:$0xff] %v375_v47   ;;  %v257_v50 = vadd.f32 %v410_v48, %v337_v28  ;;  %v311_v52 = vmax.f32 %v303_v49, 0.0 }
  0xf5   :  { %v306_v51 = vadd.f32 %v422_v31, %v257_v50 }
  0xf7   :  { %v312_v53 = vmax.f32 %v306_v51, 0.0 }
  0xf9   :  { %v380_v54 = vpack.c.bf16 %v312_v53, %v311_v52 }
  0xfb   :  { %382 = vst [vmem:[%s553_s3 + $0x8] sm:$0xff] %v380_v54  }

// kernel: dfanet_forward.49
= control target key start
LH: loop header
LB: loop body
LE: loop exit
PB: predicated region body
PF: predicated region fallthrough
CT: control target
= control target key end

     0   :  { %s391_s9 = smov 0   ;;  %s393_s10 = smov 0   ;;  %s427_s0 = inlined_call_operand.vmem [shape: bf16[1,16], index: 0, kind: input, shape index: {}]   ;;  %s428_s1 = inlined_call_operand.vmem [shape: bf16[2,16,48], index: 1, kind: input, shape index: {}]   ;;  %s429_s2 = inlined_call_operand.vmem [shape: bf16[2,1,48], index: 2, kind: output, shape index: {}]  }
   0x1   :  { %s395_s11 = smov 0  }
   0x2 LB: > { %s24_s12 = sadd.s32 1, %s368_s10  ;;  %p307_p0 = scmp.ge.s32.totalorder %s372_s11, 1  ;;  %s372_s11 = sphi %s395_s11, %s12_s11   ;;  %s368_s10 = sphi %s393_s10, %s431_s10   ;;  %s364_s9 = sphi %s391_s9, %s430_s9  }
   0x3   : > { %p26_p1 = scmp.ge.s32.totalorder %s24_s12, 2  ;;  %p131_p2 = scmp.lt.s32.totalorder %s372_s11, 3 }
   0x5   : > { %s433_s12 = smov (%p26_p1, %s24_s12), 0  ;;  %p132_p3 = pnand %p307_p0, %p131_p2 }
   0x6   : > { %p157_p4 = scmp.lt.s32.totalorder (!%p132_p3), %s364_s9, 1 }
   0x7   : > { %135 = sbr.rel (%p132_p3) target bundleno = 218 (0xda), region = 28 }
   0xc   : > { %v374_v0 = vmov 0.0   ;;  %vm375_vm0 = vmmov 0   ;;  %s435_s9 = smov (!%p157_p4, %s364_s9), 1  ;;  %v172_v2 = vld [vmem:[%s427_s0] sm:$0x1]  ;;  %vm181_vm1 = vcmask 130048  }
   0xd   : > { %317 = vmatprep.subr.bf16.mxu0 %v374_v0  ;;  %319 = vmatprep.mubr.msk.bf16.mxu0 %vm375_vm0, %v374_v0  ;;  %s314_s13 = sshll.u32 %s435_s9, 3  ;;  %s170_s21 = scalar_lea.vmem %s429_s2, %s435_s9  ;;  %vm226_vm2 = vcmask 385024   ;;  %vm227_vm3 = vsmask.f32 256 }
   0xe   : > { %s164_s16 = scalar_lea.vmem %s428_s1, %s314_s13  ;;  %vm228_vm4 = vmand %vm226_vm2, %vm227_vm3  ;;  %v229_v4 = vld [vmem:[%s170_s21] sm:$0x1] }
   0xf   : > { %v349_v1 = vld [vmem:[%s164_s16] sm:$0xff]  }
  0x10   : > { %318 = vmatpush3.bf16.msra.mxu0 %v349_v1 }
  0x13   : > { %320 = vmatmul.mubr.msk.bf16.vlgmr.msra.gmra.mxu0 %vm181_vm1, %v172_v2 }
  0xd3   : > { %v219_v3 = vpop.f32.mrf.mxu0 }
  0xd4   : > { %v225_v5 = vpack.c.bf16 %v219_v3, %v219_v3 }
  0xd5   : > { %v321_v6 = vpop.f32.mrf.mxu0 }
  0xd6   : > { %v230_v7 = vsel %vm228_vm4, %v225_v5, %v229_v4 }
  0xd7   : > { %231 = vst [vmem:[%s170_s21] sm:$0x1] %v230_v7  ;;  %v222_v8 = vpop.f32.mrf.mxu0 }
  0xd9   : > { %v322_v9 = vpop.f32.mrf.mxu0 }
  0xda PF: > { %s12_s11 = sadd.s32 1, %s372_s11   ;;  %s430_s9 = smov %s368_s10 }
  0xdb   : > { %p9_p5 = scmp.ge.s32.totalorder %s12_s11, 4   ;;  %s431_s10 = smov %s433_s12 }
  0xdd   :  { %11 = sbr.rel (!%p9_p5) target bundleno = 2 (0x2), region = 58 }

// kernel: dfanet_forward.50
= control target key start
LH: loop header
LB: loop body
LE: loop exit
PB: predicated region body
PF: predicated region fallthrough
CT: control target
= control target key end

     0   :  { %v224_v1 = vmov 0.0   ;;  %v41_v2 = vlaneseq  ;;  %vm225_vm0 = vmmov 0   ;;  %v226_v8 = vmov 1966171168   ;;  %s274_s0 = inlined_call_operand.vmem [shape: bf16[2,48], index: 0, kind: input, shape index: {}]   ;;  %s275_s1 = inlined_call_operand.vmem [shape: bf16[48,128], index: 1, kind: input, shape index: {}]   ;;  %s276_s2 = inlined_call_operand.vmem [shape: f32[1,128], index: 2, kind: input, shape index: {}]   ;;  %s277_s3 = inlined_call_operand.vmem [shape: bf16[2,128], index: 3, kind: output, shape index: {}]  }
   0x1   :  { %v221_v0 = vld [vmem:[%s275_s1 + $0x10] sm:$0xff]   ;;  %208 = vmatprep.subr.bf16.mxu0 %v224_v1  ;;  %v222_v3 = vld [vmem:[%s275_s1 + $0x8] sm:$0xff]   ;;  %214 = vmatprep.mubr.msk.bf16.mxu0 %vm225_vm0, %v224_v1  ;;  %v15_v4 = vld [vmem:[%s274_s0] sm:$0x1]  ;;  %v39_v9 = vunpack.c.l.s4 %v226_v8  ;;  %vm78_vm1 = vcmask 392192  }
   0x2   :  { %209 = vmatpush3.bf16.msra.mxu0 %v221_v0  ;;  %v16_v5 = vld [vmem:[%s274_s0 + $0x1] sm:$0x1]  ;;  %v17_v6 = vld [vmem:[%s274_s0 + $0x2] sm:$0x1]  ;;  %v18_v7 = vld [vmem:[%s274_s0 + $0x3] sm:$0x1] }
   0x3   :  { %210 = vmatprep.subr.bf16.mxu0 %v224_v1  ;;  %v42_v10 = vshrl.u32 %v41_v2, 7  ;;  %v223_v11 = vld [vmem:[%s275_s1] sm:$0xff]   ;;  %v36_v12 = vcombine.low %v15_v4, %v16_v5  ;;  %v37_v13 = vcombine.low %v17_v6, %v18_v7  ;;  %v40_v14 = vunpack.c.0.s8 %v39_v9 }
   0x4   :  { %v197_v20 = vld [vmem:[%s276_s2] ss:$0 sm:$0xff] }
   0x5   :  { %v43_v15 = vsub.s32 %v40_v14, %v42_v10 }
   0x6   :  { %211 = vmatpush3.bf16.msra.mxu0 %v222_v3 }
   0x7   :  { %212 = vmatprep.subr.bf16.mxu0 %v224_v1  ;;  %v44_v16 = vrot.slane %v36_v12, %v43_v15  ;;  %v51_v17 = vrot.slane %v37_v13, %v43_v15 }
   0x9   :  { %v52_v18 = vcombine.low %v44_v16, %v51_v17 }
   0xa   :  { %213 = vmatpush3.bf16.msra.mxu0 %v223_v11 }
   0xb   :  { %v59_v19 = vrot.slane %v52_v18, %v43_v15 }
   0xd   :  { %215 = vmatmul.mubr.msk.bf16.vlgmr.msra.gmra.mxu0 %vm78_vm1, %v59_v19 }
  0xcd   :  { %v116_v21 = vpop.f32.mrf.mxu0 }
  0xce   :  { %v117_v22 = vadd.f32 %v197_v20, %v116_v21 }
  0xcf   :  { %v216_v23 = vpop.f32.mrf.mxu0 }
  0xd0   :  { %v122_v24 = vpack.c.bf16 %v117_v22, %v117_v22 }
  0xd1   :  { %v119_v25 = vpop.f32.mrf.mxu0 }
  0xd2   :  { %v130_v26 = vrot.slane %v122_v24, %v43_v15 }
  0xd3   :  { %v217_v27 = vpop.f32.mrf.mxu0 }
  0xd4   :  { %202 = vst.sshfl [vmem:[#allocation2] sm:$0x1 pattern:$0x73625140] %v130_v26 }
  0xdb   :  { %v174_v28 = vld [vmem:[#allocation2] sm:$0x1] }
  0xdc   :  { %175 = vst [vmem:[%s277_s3] sm:$0x1] %v174_v28 }

// kernel: dfanet_forward.51
= control target key start
LH: loop header
LB: loop body
LE: loop exit
PB: predicated region body
PF: predicated region fallthrough
CT: control target
= control target key end

     0   :  { %v248_v1 = vmov 0.0   ;;  %vm249_vm0 = vmmov 0   ;;  %v43_v3 = vlaneseq  ;;  %v250_v9 = vmov 1966171168   ;;  %s301_s0 = inlined_call_operand.vmem [shape: bf16[2,64], index: 0, kind: input, shape index: {}]   ;;  %s302_s1 = inlined_call_operand.vmem [shape: bf16[64,128], index: 1, kind: input, shape index: {}]   ;;  %s303_s2 = inlined_call_operand.vmem [shape: f32[1,128], index: 2, kind: input, shape index: {}]   ;;  %s304_s3 = inlined_call_operand.vmem [shape: bf16[2,128], index: 3, kind: output, shape index: {}]  }
   0x1   :  { %v240_v0 = vld [vmem:[%s302_s1 + $0x18] sm:$0xff]   ;;  %225 = vmatprep.subr.bf16.mxu0 %v248_v1  ;;  %v241_v2 = vld [vmem:[%s302_s1 + $0x10] sm:$0xff]   ;;  %233 = vmatprep.mubr.msk.bf16.mxu0 %vm249_vm0, %v248_v1  ;;  %v15_v4 = vld [vmem:[%s301_s0] sm:$0x1]  ;;  %v41_v10 = vunpack.c.l.s4 %v250_v9  ;;  %vm86_vm1 = vcmask 523264  }
   0x2   :  { %226 = vmatpush3.bf16.msra.mxu0 %v240_v0  ;;  %v16_v5 = vld [vmem:[%s301_s0 + $0x1] sm:$0x1]  ;;  %v17_v6 = vld [vmem:[%s301_s0 + $0x2] sm:$0x1]  ;;  %v18_v7 = vld [vmem:[%s301_s0 + $0x3] sm:$0x1] }
   0x3   :  { %227 = vmatprep.subr.bf16.mxu0 %v248_v1  ;;  %v242_v8 = vld [vmem:[%s302_s1 + $0x8] sm:$0xff]   ;;  %v44_v11 = vshrl.u32 %v43_v3, 7  ;;  %v38_v12 = vcombine.low %v15_v4, %v16_v5  ;;  %v39_v13 = vcombine.low %v17_v6, %v18_v7  ;;  %v42_v14 = vunpack.c.0.s8 %v41_v10  ;;  %v243_v15 = vld [vmem:[%s302_s1] sm:$0xff]  }
   0x4   :  { %v211_v21 = vld [vmem:[%s303_s2] ss:$0 sm:$0xff] }
   0x5   :  { %v45_v16 = vsub.s32 %v42_v14, %v44_v11 }
   0x6   :  { %228 = vmatpush3.bf16.msra.mxu0 %v241_v2 }
   0x7   :  { %229 = vmatprep.subr.bf16.mxu0 %v248_v1  ;;  %v46_v17 = vrot.slane %v38_v12, %v45_v16  ;;  %v53_v18 = vrot.slane %v39_v13, %v45_v16 }
   0x9   :  { %v54_v19 = vcombine.low %v46_v17, %v53_v18 }
   0xa   :  { %230 = vmatpush3.bf16.msra.mxu0 %v242_v8 }
   0xb   :  { %231 = vmatprep.subr.bf16.mxu0 %v248_v1  ;;  %v61_v20 = vrot.slane %v54_v19, %v45_v16 }
   0xe   :  { %232 = vmatpush3.bf16.msra.mxu0 %v243_v15 }
  0x11   :  { %234 = vmatmul.mubr.msk.bf16.vlgmr.msra.gmra.mxu0 %vm86_vm1, %v61_v20 }
  0xd1   :  { %v124_v22 = vpop.f32.mrf.mxu0 }
  0xd2   :  { %v125_v23 = vadd.f32 %v211_v21, %v124_v22 }
  0xd3   :  { %v235_v24 = vpop.f32.mrf.mxu0 }
  0xd4   :  { %v217_v25 = vmul.f32 -1.442695, %v125_v23 }
  0xd5   :  { %v127_v26 = vpop.f32.mrf.mxu0 }
  0xd6   :  { %244 = vpow2.f32 %v217_v25 }
  0xd7   :  { %v236_v27 = vpop.f32.mrf.mxu0 }
  0xe3   :  { %v245_v28 = vpop.eup %244 }
  0xe4   :  { %v133_v29 = vadd.f32 1.0, %v245_v28 }
  0xe6   :  { %246 = vrcp.f32 %v133_v29 }
  0xf3   :  { %v247_v30 = vpop.eup %246 }
  0xf4   :  { %v136_v31 = vpack.c.bf16 %v247_v30, %v247_v30 }
  0xf6   :  { %v144_v32 = vrot.slane %v136_v31, %v45_v16 }
  0xf8   :  { %218 = vst.sshfl [vmem:[#allocation2] sm:$0x1 pattern:$0x73625140] %v144_v32 }
  0xff   :  { %v188_v33 = vld [vmem:[#allocation2] sm:$0x1] }
 0x100   :  { %189 = vst [vmem:[%s304_s3] sm:$0x1] %v188_v33 }

// kernel: dfanet_forward.52
= control target key start
LH: loop header
LB: loop body
LE: loop exit
PB: predicated region body
PF: predicated region fallthrough
CT: control target
= control target key end

     0   :  { %s286_s9 = smov 0   ;;  %s306_s0 = inlined_call_operand.vmem [shape: bf16[2,16,48], index: 0, kind: input, shape index: {}]   ;;  %s307_s1 = inlined_call_operand.vmem [shape: bf16[2,1,48], index: 1, kind: input, shape index: {}]   ;;  %s308_s2 = inlined_call_operand.vmem [shape: bf16[2,16,48], index: 2, kind: output, shape index: {}]  }
   0x1 LB: > { %s241_s10 = sadd.s32 4294967295, %s269_s9   ;;  %p245_p0 = scmp.ge.s32.totalorder %s269_s9, 1  ;;  %s269_s9 = sphi %s286_s9, %s12_s9  }
   0x2   : > { %p120_p1 = scmp.lt.s32.totalorder %s269_s9, 3 }
   0x4   : > { %p121_p2 = pnand %p245_p0, %p120_p1 }
   0x5   : > { %p145_p3 = scmp.lt.s32.totalorder (!%p121_p2), %s241_s10, 1 }
   0x6   : > { %124 = sbr.rel (%p121_p2) target bundleno = 24 (0x18), region = 28 }
   0xb   : > { %v164_v0 = vlaneseq  ;;  %s310_s10 = smov (!%p145_p3, %s241_s10), 1  ;;  %vm174_vm0 = vcmask 388096  }
   0xc   : > { %s253_s11 = sshll.u32 %s310_s10, 3  ;;  %s152_s14 = scalar_lea.vmem %s307_s1, %s310_s10 }
   0xd   : > { %v165_v1 = vshrl.u32 %v164_v0, 7  ;;  %v160_v3 = vld [vmem:[%s152_s14] sm:$0x1]  ;;  %s149_s17 = scalar_lea.vmem %s306_s0, %s253_s11  ;;  %s157_s20 = scalar_lea.vmem %s308_s2, %s253_s11 }
   0xe   : > { %v162_v4 = vpack.i.b16 %v160_v3, %v160_v3  ;;  %v158_v6 = vld [vmem:[%s149_s17] sm:$0xf]  ;;  %v159_v7 = vld [vmem:[%s149_s17 + $0x4] sm:$0xf] }
   0xf   : > { %v166_v2 = vsub.s32 0, %v165_v1 }
  0x11   : > { %v167_v5 = vrot.slane %v162_v4, %v166_v2 }
  0x13   : > { %v250_v8 = vcombine.low %v167_v5, %v167_v5 }
  0x15   : > { %v172_v9 = vmul.bf16 %v250_v8, %v158_v6  ;;  %v173_v10 = vmul.bf16 %v250_v8, %v159_v7 }
  0x17   : > { %175 = vst.msk [vmem:[%s157_s20] sm:$0xf] %vm174_vm0, %v172_v9  ;;  %176 = vst.msk [vmem:[%s157_s20 + $0x4] sm:$0xf] %vm174_vm0, %v173_v10 }
  0x18 PF: > { %s12_s9 = sadd.s32 1, %s269_s9  }
  0x19   : > { %p9_p4 = scmp.ge.s32.totalorder %s12_s9, 4  }
  0x1b   :  { %11 = sbr.rel (!%p9_p4) target bundleno = 1 (0x1), region = 61 }

// kernel: dfanet_forward.54
= control target key start
LH: loop header
LB: loop body
LE: loop exit
PB: predicated region body
PF: predicated region fallthrough
CT: control target
= control target key end

     0   :  { %s601_s9 = smov 0   ;;  %s603_s10 = smov 0   ;;  %s641_s0 = inlined_call_operand.vmem [shape: bf16[16,4], index: 0, kind: input, shape index: {}]   ;;  %s642_s1 = inlined_call_operand.vmem [shape: bf16[2,4,768], index: 1, kind: input, shape index: {}]   ;;  %s643_s2 = inlined_call_operand.vmem [shape: bf16[2,16,768], index: 2, kind: output, shape index: {}]  }
   0x1   :  { %s605_s11 = smov 0  }
   0x2 LB: > { %s24_s12 = sadd.s32 1, %s578_s10  ;;  %p505_p0 = scmp.ge.s32.totalorder %s582_s11, 1  ;;  %s582_s11 = sphi %s605_s11, %s12_s11   ;;  %s578_s10 = sphi %s603_s10, %s645_s10   ;;  %s574_s9 = sphi %s601_s9, %s644_s9  }
   0x3   : > { %p26_p1 = scmp.ge.s32.totalorder %s24_s12, 2  ;;  %p133_p2 = scmp.lt.s32.totalorder %s582_s11, 3 }
   0x5   : > { %s647_s12 = smov (%p26_p1, %s24_s12), 0  ;;  %p134_p3 = pnand %p505_p0, %p133_p2 }
   0x6   : > { %p164_p4 = scmp.lt.s32.totalorder (!%p134_p3), %s574_s9, 1 }
   0x7   : > { %137 = sbr.rel (%p134_p3) target bundleno = 237 (0xed), region = 28 }
   0xc   : > { %v199_v0 = vlaneseq  ;;  %v584_v1 = vmov 1983009808   ;;  %v585_v3 = vmov 0   ;;  %s649_s9 = smov (!%p164_p4, %s574_s9), 1  ;;  %vm224_vm0 = vcmask 1041408   ;;  %v559_v16 = vld [vmem:[%s641_s0] sm:$0xff]  }
   0xd   : > { %v197_v2 = vunpack.c.l.s4 %v584_v1  ;;  %275 = vmatprep.mubr.bf16.mxu0 %v585_v3  ;;  %318 = vmatprep.mubr.bf16.mxu1 %v585_v3  ;;  %s530_s13 = smul.u32 12, %s649_s9  ;;  %vm220_vm1 = vcmask 31744  }
   0xe   : > { %v200_v4 = vshrl.u32 %v199_v0, 7  ;;  %s531_s19 = smul.u32 48, %s649_s9 }
   0xf   : > { %v198_v5 = vunpack.c.0.s8 %v197_v2  ;;  %s171_s16 = scalar_lea.vmem %s642_s1, %s530_s13 }
  0x10   : > { %v186_v7 = vld [vmem:[%s171_s16] sm:$0xff]  ;;  %v509_v8 = vld.sshfl [vmem:[%s171_s16 + $0x8] sm:$0x33 pattern:$0x76325410]  ;;  %s181_s22 = scalar_lea.vmem %s643_s2, %s531_s19 }
  0x11   : > { %v201_v6 = vsub.s32 %v198_v5, %v200_v4  ;;  %v195_v10 = vcombine.high %v186_v7, %v186_v7  ;;  %v219_v14 = vcombine.high %v509_v8, %v509_v8  ;;  %v238_v18 = vsel %vm224_vm0, %v509_v8, 0 }
  0x13   : > { %v202_v9 = vrot.slane %v186_v7, %v201_v6  ;;  %v209_v13 = vrot.slane %v195_v10, %v201_v6 }
  0x15   : > { %v210_v11 = vcombine.high %v202_v9, %v202_v9  ;;  %v226_v12 = vsel %vm224_vm0, %v202_v9, 0  ;;  %v211_v15 = vcombine.high %v209_v13, %v209_v13  ;;  %v232_v17 = vsel %vm224_vm0, %v209_v13, 0 }
  0x17   : > { %510 = vmatprep.subr.msk.bf16.mxu0 %vm224_vm0, %v210_v11  ;;  %512 = vmatprep.subr.msk.bf16.mxu1 %vm224_vm0, %v211_v15 }
  0x18   : > { %258 = vmatpush1.bf16.msra.mxu0 %v226_v12  ;;  %301 = vmatpush1.bf16.msra.mxu1 %v232_v17 }
  0x19   : > { %514 = vmatprep.subr.msk.bf16.mxu0 %vm224_vm0, %v219_v14 }
  0x1b   : > { %511 = vmatmul.mubr.msk.bf16.vlgmr.msra.gmra.mxu0 %vm220_vm1, %v559_v16  ;;  %513 = vmatmul.mubr.msk.bf16.vlgmr.msra.gmra.mxu1 %vm220_vm1, %v559_v16 }
  0x1c   : > { %344 = vmatpush1.bf16.msra.mxu0 %v238_v18  ;;  %361 = vmatprep.mubr.bf16.mxu0 %v585_v3 }
  0x23   : > { %515 = vmatmul.mubr.msk.bf16.vlgmr.msra.gmra.mxu0 %vm220_vm1, %v559_v16 }
  0xdb   : > { %v277_v19 = vpop.f32.mrf.mxu0  ;;  %v320_v21 = vpop.f32.mrf.mxu1 }
  0xdd   : > { %v279_v20 = vpop.f32.mrf.mxu0  ;;  %v322_v24 = vpop.f32.mrf.mxu1 }
  0xde   : > { %v524_v22 = vpack.c.bf16 %v279_v20, %v277_v19  ;;  %v525_v25 = vpack.c.bf16 %v322_v24, %v320_v21 }
  0xdf   : > { %v281_v23 = vpop.f32.mrf.mxu0  ;;  %v324_v27 = vpop.f32.mrf.mxu1 }
  0xe0   : > { %408 = vst [vmem:[%s181_s22] sm:$0xff] %v524_v22  ;;  %409 = vst [vmem:[%s181_s22 + $0x8] sm:$0xff] %v525_v25 }
  0xe1   : > { %v283_v26 = vpop.f32.mrf.mxu0  ;;  %v326_v30 = vpop.f32.mrf.mxu1 }
  0xe2   : > { %v527_v28 = vpack.c.bf16 %v283_v26, %v281_v23  ;;  %v528_v31 = vpack.c.bf16 %v326_v30, %v324_v27 }
  0xe3   : > { %v363_v29 = vpop.f32.mrf.mxu0 }
  0xe4   : > { %411 = vst [vmem:[%s181_s22 + $0x18] sm:$0xff] %v527_v28  ;;  %412 = vst [vmem:[%s181_s22 + $0x20] sm:$0xff] %v528_v31 }
  0xe5   : > { %v365_v32 = vpop.f32.mrf.mxu0 }
  0xe6   : > { %v526_v33 = vpack.c.bf16 %v365_v32, %v363_v29 }
  0xe7   : > { %v367_v34 = vpop.f32.mrf.mxu0 }
  0xe8   : > { %410 = vst [vmem:[%s181_s22 + $0x10] sm:$0xff] %v526_v33 }
  0xe9   : > { %v369_v35 = vpop.f32.mrf.mxu0 }
  0xea   : > { %v529_v36 = vpack.c.bf16 %v369_v35, %v367_v34 }
  0xec   : > { %413 = vst [vmem:[%s181_s22 + $0x28] sm:$0xff] %v529_v36 }
  0xed PF: > { %s12_s11 = sadd.s32 1, %s582_s11   ;;  %s644_s9 = smov %s578_s10 }
  0xee   : > { %p9_p5 = scmp.ge.s32.totalorder %s12_s11, 4   ;;  %s645_s10 = smov %s647_s12 }
  0xf0   :  { %11 = sbr.rel (!%p9_p5) target bundleno = 2 (0x2), region = 58 }

// kernel: dfanet_forward.53
= control target key start
LH: loop header
LB: loop body
LE: loop exit
PB: predicated region body
PF: predicated region fallthrough
CT: control target
= control target key end

     0   :  { %vm486_vm0 = vcmask 523264   ;;  %s1101_s1 = inlined_call_operand.vmem [shape: bf16[192,768], index: 1, kind: input, shape index: {}]   ;;  %s1102_s0 = inlined_call_operand.vmem [shape: bf16[8,192], index: 0, kind: input, shape index: {}]   ;;  %s1103_s2 = inlined_call_operand.vmem [shape: f32[1,768], index: 2, kind: input, shape index: {}]   ;;  %s1104_s3 = inlined_call_operand.vmem [shape: bf16[8,768], index: 3, kind: output, shape index: {}]  }
   0x1   :  { %v727_v0 = vld [vmem:[%s1101_s1 + $0x154] ss:$24 sps:$4 sm:$0xff]   ;;  %v729_v1 = vld [vmem:[%s1101_s1 + $0x150] ss:$24 sps:$4 sm:$0xff]   ;;  %v730_v2 = vld [vmem:[%s1101_s1 + $0x124] ss:$24 sps:$4 sm:$0xff]  }
   0x2   :  { %490 = vmatprep.subr.bf16.mxu0 %v727_v0  ;;  %v732_v3 = vld [vmem:[%s1101_s1 + $0x120] ss:$24 sps:$4 sm:$0xff]   ;;  %v733_v4 = vld [vmem:[%s1101_s1 + $0xf4] ss:$24 sps:$4 sm:$0xff]   ;;  %v735_v5 = vld [vmem:[%s1101_s1 + $0xf0] ss:$24 sps:$4 sm:$0xff]  }
   0x3   :  { %491 = vmatpush1.bf16.msra.mxu0 %v729_v1  ;;  %v736_v6 = vld [vmem:[%s1101_s1 + $0xc4] ss:$24 sps:$4 sm:$0xff]   ;;  %v738_v7 = vld [vmem:[%s1101_s1 + $0xc0] ss:$24 sps:$4 sm:$0xff]   ;;  %v739_v8 = vld [vmem:[%s1101_s1 + $0x94] ss:$24 sps:$4 sm:$0xff]  }
   0x4   :  { %492 = vmatprep.subr.bf16.mxu0 %v730_v2  ;;  %v741_v9 = vld [vmem:[%s1101_s1 + $0x90] ss:$24 sps:$4 sm:$0xff]   ;;  %v760_v10 = vld [vmem:[%s1101_s1 + $0x15c] ss:$24 sps:$4 sm:$0xff]   ;;  %v766_v13 = vld [vmem:[%s1101_s1 + $0x12c] ss:$24 sps:$4 sm:$0xff]  }
   0x5   :  { %v762_v11 = vld [vmem:[%s1101_s1 + $0x158] ss:$24 sps:$4 sm:$0xff]   ;;  %v742_v12 = vld [vmem:[%s1101_s1 + $0x64] ss:$24 sps:$4 sm:$0xff]   ;;  %531 = vmatprep.subr.bf16.mxu1 %v760_v10  ;;  %v769_v15 = vld [vmem:[%s1101_s1 + $0x128] ss:$24 sps:$4 sm:$0xff]  }
   0x6   :  { %532 = vmatpush1.bf16.msra.mxu1 %v762_v11  ;;  %v15_v14 = vld [vmem:[%s1102_s0] sm:$0xff]  ;;  %v745_v18 = vld [vmem:[%s1101_s1 + $0x34] ss:$24 sps:$4 sm:$0xff]   ;;  %v747_v20 = vld [vmem:[%s1101_s1 + $0x30] ss:$24 sps:$4 sm:$0xff]   ;;  %v90_v11 = vlaneseq }
   0x7   :  { %493 = vmatpush1.bf16.msra.mxu0 %v732_v3  ;;  %v744_v16 = vld [vmem:[%s1101_s1 + $0x60] ss:$24 sps:$4 sm:$0xff]   ;;  %v908_v17 = vcombine.high %v15_v14, %v15_v14  ;;  %533 = vmatprep.subr.bf16.mxu1 %v766_v13  ;;  %v774_v19 = vld [vmem:[%s1101_s1 + $0xfc] ss:$24 sps:$4 sm:$0xff]   ;;  %v780_v22 = vld [vmem:[%s1101_s1 + $0xcc] ss:$24 sps:$4 sm:$0xff]   ;;  %v992_v44 = vcombine.low %v15_v14, %v15_v14 }
   0x8   :  { %494 = vmatprep.subr.bf16.mxu0 %v733_v4  ;;  %v776_v21 = vld [vmem:[%s1101_s1 + $0xf8] ss:$24 sps:$4 sm:$0xff]   ;;  %v748_v23 = vld [vmem:[%s1101_s1 + $0x4] ss:$24 sps:$4 sm:$0xff]   ;;  %v782_v25 = vld [vmem:[%s1101_s1 + $0xc8] ss:$24 sps:$4 sm:$0xff]  }
   0x9   :  { %718 = vmatprep.mubr.msk.bf16.mxu0 %vm486_vm0, %v908_v17  ;;  %719 = vmatprep.mubr.msk.bf16.mxu1 %vm486_vm0, %v908_v17  ;;  %v750_v24 = vld [vmem:[%s1101_s1] ss:$24 sps:$4 sm:$0xff]   ;;  %v786_v26 = vld [vmem:[%s1101_s1 + $0x9c] ss:$24 sps:$4 sm:$0xff]   ;;  %v753_v28 = vld [vmem:[%s1101_s1 + $0x210] ss:$24 sps:$4 sm:$0xff]  }
   0xa   :  { %534 = vmatpush1.bf16.msra.mxu1 %v769_v15  ;;  %v751_v27 = vld [vmem:[%s1101_s1 + $0x214] ss:$24 sps:$4 sm:$0xff]   ;;  %v788_v29 = vld [vmem:[%s1101_s1 + $0x98] ss:$24 sps:$4 sm:$0xff]   ;;  %v754_v31 = vld [vmem:[%s1101_s1 + $0x1e4] ss:$24 sps:$4 sm:$0xff]  }
   0xb   :  { %495 = vmatpush1.bf16.msra.mxu0 %v735_v5  ;;  %535 = vmatprep.subr.bf16.mxu1 %v774_v19  ;;  %v792_v30 = vld [vmem:[%s1101_s1 + $0x6c] ss:$24 sps:$4 sm:$0xff]   ;;  %v756_v32 = vld [vmem:[%s1101_s1 + $0x1e0] ss:$24 sps:$4 sm:$0xff]   ;;  %v798_v34 = vld [vmem:[%s1101_s1 + $0x3c] ss:$24 sps:$4 sm:$0xff]  }
   0xc   :  { %496 = vmatprep.subr.bf16.mxu0 %v736_v6  ;;  %v794_v33 = vld [vmem:[%s1101_s1 + $0x68] ss:$24 sps:$4 sm:$0xff]   ;;  %v757_v35 = vld [vmem:[%s1101_s1 + $0x1b4] ss:$24 sps:$4 sm:$0xff]   ;;  %v800_v37 = vld [vmem:[%s1101_s1 + $0x38] ss:$24 sps:$4 sm:$0xff]  }
   0xd   :  { %v759_v36 = vld [vmem:[%s1101_s1 + $0x1b0] ss:$24 sps:$4 sm:$0xff]   ;;  %v804_v38 = vld [vmem:[%s1101_s1 + $0xc] ss:$24 sps:$4 sm:$0xff]   ;;  %v765_v40 = vld [vmem:[%s1101_s1 + $0x180] ss:$24 sps:$4 sm:$0xff]  }
   0xe   :  { %536 = vmatpush1.bf16.msra.mxu1 %v776_v21  ;;  %v763_v39 = vld [vmem:[%s1101_s1 + $0x184] ss:$24 sps:$4 sm:$0xff]   ;;  %v806_v41 = vld [vmem:[%s1101_s1 + $0x8] ss:$24 sps:$4 sm:$0xff]   ;;  %v812_v46 = vld [vmem:[%s1101_s1 + $0x218] ss:$24 sps:$4 sm:$0xff]  }
   0xf   :  { %497 = vmatpush1.bf16.msra.mxu0 %v738_v7  ;;  %537 = vmatprep.subr.bf16.mxu1 %v780_v22  ;;  %v810_v42 = vld [vmem:[%s1101_s1 + $0x21c] ss:$24 sps:$4 sm:$0xff]   ;;  %v771_v45 = vld [vmem:[%s1101_s1 + $0x160] ss:$24 sps:$4 sm:$0xff]   ;;  %v816_v47 = vld [vmem:[%s1101_s1 + $0x1ec] ss:$24 sps:$4 sm:$0xff]  }
  0x10   :  { %498 = vmatprep.subr.bf16.mxu0 %v739_v8  ;;  %v773_v43 = vld [vmem:[%s1101_s1 + $0x164] ss:$24 sps:$4 sm:$0xff]   ;;  %v779_v48 = vld [vmem:[%s1101_s1 + $0x134] ss:$24 sps:$4 sm:$0xff]   ;;  %v818_v49 = vld [vmem:[%s1101_s1 + $0x1e8] ss:$24 sps:$4 sm:$0xff]  }
  0x11   :  { %v777_v50 = vld [vmem:[%s1101_s1 + $0x130] ss:$24 sps:$4 sm:$0xff]   ;;  %v822_v51 = vld [vmem:[%s1101_s1 + $0x1bc] ss:$24 sps:$4 sm:$0xff]   ;;  %v783_v54 = vld [vmem:[%s1101_s1 + $0x100] ss:$24 sps:$4 sm:$0xff]  }
  0x12   :  { %538 = vmatpush1.bf16.msra.mxu1 %v782_v25  ;;  %v785_v52 = vld [vmem:[%s1101_s1 + $0x104] ss:$24 sps:$4 sm:$0xff]   ;;  %v824_v53 = vld [vmem:[%s1101_s1 + $0x1b8] ss:$24 sps:$4 sm:$0xff]   ;;  %v791_v56 = vld [vmem:[%s1101_s1 + $0xd4] ss:$24 sps:$4 sm:$0xff]  }
  0x13   :  { %499 = vmatpush1.bf16.msra.mxu0 %v741_v9  ;;  %539 = vmatprep.subr.bf16.mxu1 %v786_v26  ;;  %v828_v55 = vld [vmem:[%s1101_s1 + $0x18c] ss:$24 sps:$4 sm:$0xff]   ;;  %v830_v57 = vld [vmem:[%s1101_s1 + $0x188] ss:$24 sps:$4 sm:$0xff]  }
  0x14   :  { %500 = vmatprep.subr.bf16.mxu0 %v742_v12  ;;  %v789_v58 = vld [vmem:[%s1101_s1 + $0xd0] ss:$24 sps:$4 sm:$0xff]   ;;  %v797_v59 = vld [vmem:[%s1101_s1 + $0xa4] ss:$24 sps:$4 sm:$0xff]   ;;  %v795_v60 = vld [vmem:[%s1101_s1 + $0xa0] ss:$24 sps:$4 sm:$0xff]  }
  0x15   :  { %v803_v61 = vld [vmem:[%s1101_s1 + $0x74] ss:$24 sps:$4 sm:$0xff]   ;;  %v801_v62 = vld [vmem:[%s1101_s1 + $0x70] ss:$24 sps:$4 sm:$0xff]   ;;  %v809_v63 = vld [vmem:[%s1101_s1 + $0x44] ss:$24 sps:$4 sm:$0xff]  }
  0x16   :  { %540 = vmatpush1.bf16.msra.mxu1 %v788_v29  ;;  %v807_v0 = vld [vmem:[%s1101_s1 + $0x40] ss:$24 sps:$4 sm:$0xff]   ;;  %v815_v1 = vld [vmem:[%s1101_s1 + $0x14] ss:$24 sps:$4 sm:$0xff]   ;;  %v813_v2 = vld [vmem:[%s1101_s1 + $0x10] ss:$24 sps:$4 sm:$0xff]  }
  0x17   :  { %501 = vmatpush1.bf16.msra.mxu0 %v744_v16  ;;  %541 = vmatprep.subr.bf16.mxu1 %v792_v30  ;;  %v821_v3 = vld [vmem:[%s1101_s1 + $0x224] ss:$24 sps:$4 sm:$0xff]   ;;  %v819_v4 = vld [vmem:[%s1101_s1 + $0x220] ss:$24 sps:$4 sm:$0xff]   ;;  %v827_v5 = vld [vmem:[%s1101_s1 + $0x1f4] ss:$24 sps:$4 sm:$0xff]  }
  0x18   :  { %502 = vmatprep.subr.bf16.mxu0 %v745_v18  ;;  %v825_v6 = vld [vmem:[%s1101_s1 + $0x1f0] ss:$24 sps:$4 sm:$0xff]   ;;  %v833_v7 = vld [vmem:[%s1101_s1 + $0x1c4] ss:$24 sps:$4 sm:$0xff]   ;;  %v831_v8 = vld [vmem:[%s1101_s1 + $0x1c0] ss:$24 sps:$4 sm:$0xff]  }
  0x19   :  { %v836_v9 = vld [vmem:[%s1101_s1 + $0x194] ss:$24 sps:$4 sm:$0xff]   ;;  %v834_v10 = vld [vmem:[%s1101_s1 + $0x190] ss:$24 sps:$4 sm:$0xff]   ;;  %v91_v12 = vshrl.u32 %v90_v11, 7 }
  0x1a   :  { %542 = vmatpush1.bf16.msra.mxu1 %v794_v33  ;;  %v88_v14 = vld [vmem:[%s1103_s2] sm:$0x3f] }
  0x1b   :  { %503 = vmatpush1.bf16.msra.mxu0 %v747_v20  ;;  %543 = vmatprep.subr.bf16.mxu1 %v798_v34  ;;  %v92_v13 = vsub.s32 0, %v91_v12  ;;  %v96_v15 = vsub.s32 1, %v91_v12  ;;  %v100_v25 = vsub.s32 2, %v91_v12  ;;  %v104_v26 = vsub.s32 3, %v91_v12 }
  0x1c   :  { %504 = vmatprep.subr.bf16.mxu0 %v748_v23 }
  0x1d   :  { %v93_v16 = vrot.slane %v88_v14, %v92_v13 }
  0x1e   :  { %544 = vmatpush1.bf16.msra.mxu1 %v800_v37  ;;  %v112_v37 = vsub.s32 5, %v91_v12 }
  0x1f   :  { %505 = vmatpush1.bf16.msra.mxu0 %v750_v24  ;;  %545 = vmatprep.subr.bf16.mxu1 %v804_v38 }
  0x20   :  { %514 = vmatprep.subr.bf16.mxu0 %v751_v27  ;;  %v101_v27 = vrot.slane %v88_v14, %v100_v25 }
  0x22   :  { %546 = vmatpush1.bf16.msra.mxu1 %v806_v41 }
  0x23   :  { %515 = vmatpush2.bf16.msra.mxu0 %v753_v28  ;;  %555 = vmatprep.subr.bf16.mxu1 %v810_v42  ;;  %v105_v28 = vrot.slane %v88_v14, %v104_v26 }
  0x24   :  { %516 = vmatprep.subr.bf16.mxu0 %v754_v31 }
  0x26   :  { %556 = vmatpush2.bf16.msra.mxu1 %v812_v46 }
  0x27   :  { %517 = vmatpush2.bf16.msra.mxu0 %v756_v32  ;;  %557 = vmatprep.subr.bf16.mxu1 %v816_v47 }
  0x28   :  { %518 = vmatprep.subr.bf16.mxu0 %v757_v35 }
  0x2a   :  { %558 = vmatpush2.bf16.msra.mxu1 %v818_v49 }
  0x2b   :  { %519 = vmatpush2.bf16.msra.mxu0 %v759_v36  ;;  %559 = vmatprep.subr.bf16.mxu1 %v822_v51  ;;  %v108_v36 = vsub.s32 4, %v91_v12 }
  0x2c   :  { %520 = vmatprep.subr.bf16.mxu0 %v763_v39  ;;  %v113_v39 = vrot.slane %v88_v14, %v112_v37 }
  0x2d   :  { %v109_v38 = vrot.slane %v88_v14, %v108_v36 }
  0x2e   :  { %560 = vmatpush2.bf16.msra.mxu1 %v824_v53 }
  0x2f   :  { %521 = vmatpush2.bf16.msra.mxu0 %v765_v40  ;;  %561 = vmatprep.subr.bf16.mxu1 %v828_v55 }
  0x30   :  { %572 = vmatprep.subr.bf16.mxu0 %v773_v43 }
  0x32   :  { %523 = vmatmul.mubr.bf16.vlgmr.msra.gmra.mxu0 %v992_v44  ;;  %562 = vmatpush2.bf16.msra.mxu1 %v830_v57 }
  0x33   :  { %573 = vmatpush1.bf16.msra.mxu0 %v771_v45  ;;  %720 = vmatprep.mubr.msk.bf16.mxu0 %vm486_vm0, %v908_v17  ;;  %v97_v17 = vrot.slane %v88_v14, %v96_v15 }
  0x34   :  { %574 = vmatprep.subr.bf16.mxu0 %v779_v48 }
  0x35   :  { %564 = vmatmul.mubr.bf16.vlgmr.msra.gmra.mxu1 %v992_v44 }
  0x37   :  { %575 = vmatpush1.bf16.msra.mxu0 %v777_v50 }
  0x38   :  { %576 = vmatprep.subr.bf16.mxu0 %v785_v52 }
  0x3b   :  { %577 = vmatpush1.bf16.msra.mxu0 %v783_v54 }
  0x3c   :  { %578 = vmatprep.subr.bf16.mxu0 %v791_v56 }
  0x3f   :  { %579 = vmatpush1.bf16.msra.mxu0 %v789_v58 }
  0x40   :  { %580 = vmatprep.subr.bf16.mxu0 %v797_v59 }
  0x43   :  { %581 = vmatpush1.bf16.msra.mxu0 %v795_v60 }
  0x44   :  { %582 = vmatprep.subr.bf16.mxu0 %v803_v61 }
  0x47   :  { %583 = vmatpush1.bf16.msra.mxu0 %v801_v62 }
  0x48   :  { %584 = vmatprep.subr.bf16.mxu0 %v809_v63 }
  0x4b   :  { %585 = vmatpush1.bf16.msra.mxu0 %v807_v0 }
  0x4c   :  { %586 = vmatprep.subr.bf16.mxu0 %v815_v1 }
  0x4f   :  { %587 = vmatpush1.bf16.msra.mxu0 %v813_v2 }
  0x50   :  { %596 = vmatprep.subr.bf16.mxu0 %v821_v3 }
  0x53   :  { %597 = vmatpush2.bf16.msra.mxu0 %v819_v4 }
  0x54   :  { %598 = vmatprep.subr.bf16.mxu0 %v827_v5 }
  0x57   :  { %599 = vmatpush2.bf16.msra.mxu0 %v825_v6 }
  0x58   :  { %600 = vmatprep.subr.bf16.mxu0 %v833_v7 }
  0x5b   :  { %601 = vmatpush2.bf16.msra.mxu0 %v831_v8 }
  0x5c   :  { %602 = vmatprep.subr.bf16.mxu0 %v836_v9 }
  0x5f   :  { %603 = vmatpush2.bf16.msra.mxu0 %v834_v10 }
  0x62   :  { %605 = vmatmul.mubr.bf16.vlgmr.msra.gmra.mxu0 %v992_v44 }
  0xf2   :  { %v524_v18 = vpop.f32.mrf.mxu0 }
  0xf3   :  { %v525_v19 = vadd.f32 %v524_v18, %v93_v16 }
  0xf4   :  { %v526_v20 = vpop.f32.mrf.mxu0 }
  0xf5   :  { %v527_v21 = vadd.f32 %v526_v20, %v97_v17  ;;  %v565_v29 = vpop.f32.mrf.mxu1 }
  0xf6   :  { %v528_v22 = vpop.f32.mrf.mxu0  ;;  %v566_v30 = vadd.f32 %v565_v29, %v101_v27 }
  0xf7   :  { %v724_v23 = vpack.c.bf16 %v527_v21, %v525_v19  ;;  %v567_v31 = vpop.f32.mrf.mxu1 }
  0xf8   :  { %v529_v24 = vpop.f32.mrf.mxu0  ;;  %v568_v32 = vadd.f32 %v567_v31, %v105_v28 }
  0xf9   :  { %637 = vst [vmem:[%s1104_s3] sm:$0xff] %v724_v23  ;;  %v569_v33 = vpop.f32.mrf.mxu1 }
  0xfa   :  { %v725_v34 = vpack.c.bf16 %v568_v32, %v566_v30 }
  0xfb   :  { %v570_v35 = vpop.f32.mrf.mxu1 }
  0xfc   :  { %638 = vst [vmem:[%s1104_s3 + $0x8] sm:$0xff] %v725_v34 }
 0x122   :  { %v606_v40 = vpop.f32.mrf.mxu0 }
 0x123   :  { %v607_v42 = vadd.f32 %v606_v40, %v109_v38 }
 0x124   :  { %v608_v41 = vpop.f32.mrf.mxu0 }
 0x125   :  { %v609_v43 = vadd.f32 %v608_v41, %v113_v39 }
 0x126   :  { %v610_v44 = vpop.f32.mrf.mxu0 }
 0x127   :  { %v726_v45 = vpack.c.bf16 %v609_v43, %v607_v42 }
 0x128   :  { %v611_v46 = vpop.f32.mrf.mxu0 }
 0x129   :  { %639 = vst [vmem:[%s1104_s3 + $0x10] sm:$0xff] %v726_v45 }

// kernel: dfanet_forward.55
= control target key start
LH: loop header
LB: loop body
LE: loop exit
PB: predicated region body
PF: predicated region fallthrough
CT: control target
= control target key end

     0   :  { %vm558_vm0 = vcmask 523264   ;;  %s1757_s1 = inlined_call_operand.vmem [shape: bf16[576,128], index: 1, kind: input, shape index: {}]   ;;  %s1758_s0 = inlined_call_operand.vmem [shape: bf16[128,576], index: 0, kind: input, shape index: {}]   ;;  %s1759_s2 = inlined_call_operand.vmem [shape: f32[1,128], index: 2, kind: input, shape index: {}]   ;;  %s1760_s3 = inlined_call_operand.vmem [shape: bf16[128,128], index: 3, kind: output, shape index: {}]  }
   0x1   :  { %v1310_v0 = vld [vmem:[%s1757_s1 + $0x78] sm:$0xff]   ;;  %v1314_v4 = vld [vmem:[%s1757_s1 + $0x70] sm:$0xff]   ;;  %v1318_v8 = vld [vmem:[%s1757_s1 + $0x68] sm:$0xff]  }
   0x2   :  { %v1311_v1 = vld [vmem:[%s1757_s1 + $0xf8] sm:$0xff]   ;;  %1138 = vmatprep.subr.bf16.mxu0 %v1310_v0  ;;  %v1315_v5 = vld [vmem:[%s1757_s1 + $0xf0] sm:$0xff]   ;;  %v1319_v9 = vld [vmem:[%s1757_s1 + $0xe8] sm:$0xff]  }
   0x3   :  { %v1312_v2 = vld [vmem:[%s1757_s1 + $0x38] sm:$0xff]   ;;  %1202 = vmatprep.subr.bf16.mxu1 %v1311_v1  ;;  %v1316_v6 = vld [vmem:[%s1757_s1 + $0x30] sm:$0xff]   ;;  %v1320_v10 = vld [vmem:[%s1757_s1 + $0x28] sm:$0xff]  }
   0x4   :  { %v1313_v3 = vld [vmem:[%s1757_s1 + $0xb8] sm:$0xff]   ;;  %1139 = vmatpush3.bf16.msra.mxu0 %v1312_v2  ;;  %v1317_v7 = vld [vmem:[%s1757_s1 + $0xb0] sm:$0xff]   ;;  %v1321_v11 = vld [vmem:[%s1757_s1 + $0xa8] sm:$0xff]  }
   0x5   :  { %1203 = vmatpush3.bf16.msra.mxu1 %v1313_v3  ;;  %1140 = vmatprep.subr.bf16.mxu0 %v1314_v4  ;;  %v1322_v12 = vld [vmem:[%s1757_s1 + $0x60] sm:$0xff]   ;;  %v1326_v16 = vld [vmem:[%s1757_s1 + $0x58] sm:$0xff]   ;;  %v1330_v20 = vld [vmem:[%s1757_s1 + $0x50] sm:$0xff]  }
   0x6   :  { %1204 = vmatprep.subr.bf16.mxu1 %v1315_v5  ;;  %v1323_v13 = vld [vmem:[%s1757_s1 + $0xe0] sm:$0xff]   ;;  %v1327_v17 = vld [vmem:[%s1757_s1 + $0xd8] sm:$0xff]   ;;  %v1331_v21 = vld [vmem:[%s1757_s1 + $0xd0] sm:$0xff]  }
   0x7   :  { %v1324_v14 = vld [vmem:[%s1757_s1 + $0x20] sm:$0xff]   ;;  %v1328_v18 = vld [vmem:[%s1757_s1 + $0x18] sm:$0xff]   ;;  %v1332_v22 = vld [vmem:[%s1757_s1 + $0x10] sm:$0xff]  }
   0x8   :  { %1141 = vmatpush3.bf16.msra.mxu0 %v1316_v6  ;;  %v1325_v15 = vld [vmem:[%s1757_s1 + $0xa0] sm:$0xff]   ;;  %v1329_v19 = vld [vmem:[%s1757_s1 + $0x98] sm:$0xff]   ;;  %v1333_v23 = vld [vmem:[%s1757_s1 + $0x90] sm:$0xff]  }
   0x9   :  { %1205 = vmatpush3.bf16.msra.mxu1 %v1317_v7  ;;  %1142 = vmatprep.subr.bf16.mxu0 %v1318_v8  ;;  %v1334_v24 = vld [vmem:[%s1757_s1 + $0x48] sm:$0xff]   ;;  %v1338_v28 = vld [vmem:[%s1757_s1 + $0x40] sm:$0xff]   ;;  %v1348_v36 = vld [vmem:[%s1757_s1 + $0x118] sm:$0xff]  }
   0xa   :  { %1206 = vmatprep.subr.bf16.mxu1 %v1319_v9  ;;  %v1335_v25 = vld [vmem:[%s1757_s1 + $0xc8] sm:$0xff]   ;;  %v1339_v29 = vld [vmem:[%s1757_s1 + $0xc0] sm:$0xff]   ;;  %v1361_v42 = vld [vmem:[%s1757_s1 + $0x110] sm:$0xff]  }
   0xb   :  { %v1336_v26 = vld [vmem:[%s1757_s1 + $0x8] sm:$0xff]   ;;  %v1340_v30 = vld [vmem:[%s1757_s1] sm:$0xff]   ;;  %v1357_v43 = vld [vmem:[%s1758_s0 + $0x5c] ss:$20 sps:$4 sm:$0xff]  }
   0xc   :  { %1143 = vmatpush3.bf16.msra.mxu0 %v1320_v10  ;;  %v1337_v27 = vld [vmem:[%s1757_s1 + $0x88] sm:$0xff]   ;;  %v1341_v31 = vld [vmem:[%s1757_s1 + $0x80] sm:$0xff]   ;;  %v1362_v47 = vld [vmem:[%s1758_s0 + $0x7c] ss:$20 sps:$4 sm:$0xff]  }
   0xd   :  { %1207 = vmatpush3.bf16.msra.mxu1 %v1321_v11  ;;  %1144 = vmatprep.subr.bf16.mxu0 %v1322_v12  ;;  %v1342_v32 = vld [vmem:[%s1758_s0] ss:$20 sps:$4 sm:$0xff]   ;;  %v1344_v33 = vld [vmem:[%s1758_s0 + $0x4] ss:$20 sps:$4 sm:$0xff]   ;;  %v1345_v34 = vld [vmem:[%s1758_s0 + $0x8] ss:$20 sps:$4 sm:$0xff]  }
   0xe   :  { %1208 = vmatprep.subr.bf16.mxu1 %v1323_v13  ;;  %v1347_v35 = vld [vmem:[%s1758_s0 + $0xc] ss:$20 sps:$4 sm:$0xff]   ;;  %615 = vmatprep.mubr.bf16.mxu0 %v1344_v33  ;;  %v1351_v38 = vld [vmem:[%s1758_s0 + $0x34] ss:$20 sps:$4 sm:$0xff]   ;;  %v1354_v40 = vld [vmem:[%s1758_s0 + $0x30] ss:$20 sps:$4 sm:$0xff]  }
   0xf   :  { %712 = vmatprep.mubr.bf16.mxu1 %v1347_v35  ;;  %v1349_v37 = vld [vmem:[%s1758_s0 + $0x2c] ss:$20 sps:$4 sm:$0xff]   ;;  %v1353_v39 = vld [vmem:[%s1758_s0 + $0x28] ss:$20 sps:$4 sm:$0xff]   ;;  %v1359_v44 = vld [vmem:[%s1758_s0 + $0x50] ss:$20 sps:$4 sm:$0xff]  }
  0x10   :  { %1145 = vmatpush3.bf16.msra.mxu0 %v1324_v14  ;;  %v1355_v41 = vld [vmem:[%s1758_s0 + $0x54] ss:$20 sps:$4 sm:$0xff]   ;;  %v1360_v45 = vld [vmem:[%s1758_s0 + $0x58] ss:$20 sps:$4 sm:$0xff]   ;;  %v1387_v49 = vld [vmem:[%s1757_s1 + $0x100] sm:$0xff]  }
  0x11   :  { %1209 = vmatpush3.bf16.msra.mxu1 %v1325_v15  ;;  %1146 = vmatprep.subr.bf16.mxu0 %v1326_v16  ;;  %v1374_v46 = vld [vmem:[%s1757_s1 + $0x108] sm:$0xff]   ;;  %v1364_v48 = vld [vmem:[%s1758_s0 + $0x84] ss:$20 sps:$4 sm:$0xff]   ;;  %v1367_v51 = vld [vmem:[%s1758_s0 + $0x80] ss:$20 sps:$4 sm:$0xff]  }
  0x12   :  { %1210 = vmatprep.subr.bf16.mxu1 %v1327_v17  ;;  %v1366_v50 = vld [vmem:[%s1758_s0 + $0x78] ss:$20 sps:$4 sm:$0xff]   ;;  %v1372_v54 = vld [vmem:[%s1758_s0 + $0xa0] ss:$20 sps:$4 sm:$0xff]   ;;  %v1373_v55 = vld [vmem:[%s1758_s0 + $0xa8] ss:$20 sps:$4 sm:$0xff]  }
  0x13   :  { %v1368_v52 = vld [vmem:[%s1758_s0 + $0xa4] ss:$20 sps:$4 sm:$0xff]   ;;  %v1370_v53 = vld [vmem:[%s1758_s0 + $0xac] ss:$20 sps:$4 sm:$0xff]   ;;  %v1377_v57 = vld [vmem:[%s1758_s0 + $0xd4] ss:$20 sps:$4 sm:$0xff]  }
  0x14   :  { %1147 = vmatpush3.bf16.msra.mxu0 %v1328_v18  ;;  %v1375_v56 = vld [vmem:[%s1758_s0 + $0xcc] ss:$20 sps:$4 sm:$0xff]   ;;  %v1379_v58 = vld [vmem:[%s1758_s0 + $0xc8] ss:$20 sps:$4 sm:$0xff]   ;;  %v1380_v59 = vld [vmem:[%s1758_s0 + $0xd0] ss:$20 sps:$4 sm:$0xff]  }
  0x15   :  { %1211 = vmatpush3.bf16.msra.mxu1 %v1329_v19  ;;  %1148 = vmatprep.subr.bf16.mxu0 %v1330_v20  ;;  %v1381_v60 = vld [vmem:[%s1758_s0 + $0xf4] ss:$20 sps:$4 sm:$0xff]   ;;  %v1383_v61 = vld [vmem:[%s1758_s0 + $0xfc] ss:$20 sps:$4 sm:$0xff]   ;;  %v1386_v63 = vld [vmem:[%s1758_s0 + $0xf8] ss:$20 sps:$4 sm:$0xff]  }
  0x16   :  { %1212 = vmatprep.subr.bf16.mxu1 %v1331_v21  ;;  %v1385_v62 = vld [vmem:[%s1758_s0 + $0xf0] ss:$20 sps:$4 sm:$0xff]   ;;  %v1392_v2 = vld [vmem:[%s1758_s0 + $0x118] ss:$20 sps:$4 sm:$0xff]   ;;  %v1393_v3 = vld [vmem:[%s1758_s0 + $0x120] ss:$20 sps:$4 sm:$0xff]  }
  0x17   :  { %v1388_v0 = vld [vmem:[%s1758_s0 + $0x11c] ss:$20 sps:$4 sm:$0xff]   ;;  %v1390_v1 = vld [vmem:[%s1758_s0 + $0x124] ss:$20 sps:$4 sm:$0xff]   ;;  %v1398_v8 = vld [vmem:[%s1758_s0 + $0x60] ss:$20 sps:$4 sm:$0xff]  }
  0x18   :  { %1149 = vmatpush3.bf16.msra.mxu0 %v1332_v22  ;;  %v1394_v4 = vld [vmem:[%s1758_s0 + $0x10] ss:$20 sps:$4 sm:$0xff]   ;;  %v1396_v6 = vld [vmem:[%s1758_s0 + $0x38] ss:$20 sps:$4 sm:$0xff]   ;;  %v1399_v9 = vld [vmem:[%s1758_s0 + $0x100] ss:$20 sps:$4 sm:$0xff]  }
  0x19   :  { %1213 = vmatpush3.bf16.msra.mxu1 %v1333_v23  ;;  %1150 = vmatprep.subr.bf16.mxu0 %v1334_v24  ;;  %v1395_v5 = vld [vmem:[%s1758_s0 + $0xb0] ss:$20 sps:$4 sm:$0xff]   ;;  %v1397_v7 = vld [vmem:[%s1758_s0 + $0xd8] ss:$20 sps:$4 sm:$0xff]   ;;  %v1400_v10 = vld [vmem:[%s1758_s0 + $0x88] ss:$20 sps:$4 sm:$0xff]  }
  0x1a   :  { %1214 = vmatprep.subr.bf16.mxu1 %v1335_v25  ;;  %v1401_v11 = vld [vmem:[%s1758_s0 + $0x128] ss:$20 sps:$4 sm:$0xff]   ;;  %v1661_v14 = vld [vmem:[%s1759_s2] ss:$0 sm:$0xff] }
  0x1c   :  { %1151 = vmatpush3.bf16.msra.mxu0 %v1336_v26 }
  0x1d   :  { %1215 = vmatpush3.bf16.msra.mxu1 %v1337_v27  ;;  %1152 = vmatprep.subr.bf16.mxu0 %v1338_v28 }
  0x1e   :  { %1216 = vmatprep.subr.bf16.mxu1 %v1339_v29 }
  0x20   :  { %1153 = vmatpush3.bf16.msra.mxu0 %v1340_v30 }
  0x21   :  { %1217 = vmatpush3.bf16.msra.mxu1 %v1341_v31  ;;  %1278 = vmatprep.subr.bf16.mxu0 %v1348_v36 }
  0x22   :  { %1302 = vmatprep.subr.bf16.mxu1 %v1348_v36 }
  0x23   :  { %616 = vmatmul.mubr.bf16.vlgmr.msra.gmra.mxu0 %v1342_v32 }
  0x24   :  { %713 = vmatmul.mubr.bf16.vlgmr.msra.gmra.mxu1 %v1345_v34  ;;  %1279 = vmatpush3.bf16.msra.mxu0 %v1348_v36 }
  0x25   :  { %1306 = vmatpush3.bf16.msra.mxu1 %v1348_v36  ;;  %623 = vmatprep.mubr.bf16.mxu0 %v1349_v37 }
  0x26   :  { %720 = vmatprep.mubr.bf16.mxu1 %v1351_v38  ;;  %1280 = vmatprep.subr.bf16.mxu0 %v1361_v42 }
  0x27   :  { %1303 = vmatprep.subr.bf16.mxu1 %v1361_v42 }
  0x28   :  { %1281 = vmatpush3.bf16.msra.mxu0 %v1361_v42 }
  0x29   :  { %1307 = vmatpush3.bf16.msra.mxu1 %v1361_v42  ;;  %1282 = vmatprep.subr.bf16.mxu0 %v1374_v46 }
  0x2a   :  { %1304 = vmatprep.subr.bf16.mxu1 %v1374_v46 }
  0x2b   :  { %624 = vmatmul.mubr.bf16.gmra.mxu0 %v1353_v39 }
  0x2c   :  { %721 = vmatmul.mubr.bf16.gmra.mxu1 %v1354_v40  ;;  %631 = vmatprep.mubr.bf16.mxu0 %v1355_v41 }
  0x2d   :  { %728 = vmatprep.mubr.bf16.mxu1 %v1357_v43  ;;  %1283 = vmatpush3.bf16.msra.mxu0 %v1374_v46 }
  0x2e   :  { %1308 = vmatpush3.bf16.msra.mxu1 %v1374_v46  ;;  %1284 = vmatprep.subr.bf16.mxu0 %v1387_v49 }
  0x2f   :  { %1305 = vmatprep.subr.bf16.mxu1 %v1387_v49 }
  0x31   :  { %1285 = vmatpush3.bf16.msra.mxu0 %v1387_v49 }
  0x32   :  { %1309 = vmatpush3.bf16.msra.mxu1 %v1387_v49 }
  0x33   :  { %632 = vmatmul.mubr.bf16.gmra.mxu0 %v1359_v44 }
  0x34   :  { %729 = vmatmul.mubr.bf16.gmra.mxu1 %v1360_v45  ;;  %639 = vmatprep.mubr.bf16.mxu0 %v1362_v47 }
  0x35   :  { %736 = vmatprep.mubr.bf16.mxu1 %v1364_v48 }
  0x3b   :  { %640 = vmatmul.mubr.bf16.gmra.mxu0 %v1366_v50 }
  0x3c   :  { %737 = vmatmul.mubr.bf16.gmra.mxu1 %v1367_v51  ;;  %647 = vmatprep.mubr.bf16.mxu0 %v1368_v52 }
  0x3d   :  { %744 = vmatprep.mubr.bf16.mxu1 %v1370_v53 }
  0x43   :  { %648 = vmatmul.mubr.bf16.gmra.mxu0 %v1372_v54 }
  0x44   :  { %745 = vmatmul.mubr.bf16.gmra.mxu1 %v1373_v55  ;;  %655 = vmatprep.mubr.bf16.mxu0 %v1375_v56 }
  0x45   :  { %752 = vmatprep.mubr.bf16.mxu1 %v1377_v57 }
  0x4b   :  { %656 = vmatmul.mubr.bf16.gmra.mxu0 %v1379_v58 }
  0x4c   :  { %753 = vmatmul.mubr.bf16.gmra.mxu1 %v1380_v59  ;;  %663 = vmatprep.mubr.bf16.mxu0 %v1381_v60 }
  0x4d   :  { %760 = vmatprep.mubr.bf16.mxu1 %v1383_v61 }
  0x53   :  { %664 = vmatmul.mubr.bf16.gmra.mxu0 %v1385_v62 }
  0x54   :  { %761 = vmatmul.mubr.bf16.gmra.mxu1 %v1386_v63  ;;  %671 = vmatprep.mubr.bf16.mxu0 %v1388_v0 }
  0x55   :  { %768 = vmatprep.mubr.bf16.mxu1 %v1390_v1 }
  0x5b   :  { %672 = vmatmul.mubr.bf16.gmra.mxu0 %v1392_v2 }
  0x5c   :  { %769 = vmatmul.mubr.bf16.gmra.mxu1 %v1393_v3  ;;  %1286 = vmatprep.mubr.msk.bf16.mxu0 %vm558_vm0, %v1394_v4 }
  0x5d   :  { %1294 = vmatprep.mubr.msk.bf16.mxu1 %vm558_vm0, %v1395_v5 }
  0x63   :  { %1287 = vmatmul.mubr.msk.bf16.vlgmr.msra.gmra.mxu0 %vm558_vm0, %v1396_v6 }
  0x64   :  { %1295 = vmatmul.mubr.msk.bf16.vlgmr.msra.gmra.mxu1 %vm558_vm0, %v1397_v7  ;;  %1290 = vmatprep.mubr.msk.bf16.mxu0 %vm558_vm0, %v1398_v8 }
  0x65   :  { %1298 = vmatprep.mubr.msk.bf16.mxu1 %vm558_vm0, %v1399_v9 }
  0x6b   :  { %1291 = vmatmul.mubr.msk.bf16.gmra.mxu0 %vm558_vm0, %v1400_v10 }
  0x6c   :  { %1299 = vmatmul.mubr.msk.bf16.gmra.mxu1 %vm558_vm0, %v1401_v11 }
  0xe3   :  { %v1154_v12 = vpop.f32.mrf.mxu0 }
  0xe4   :  { %v1218_v13 = vpop.f32.mrf.mxu1 }
  0xe5   :  { %v1155_v15 = vpop.f32.mrf.mxu0 }
  0xe6   :  { %v1156_v16 = vadd.f32 %v1155_v15, %v1154_v12  ;;  %v1219_v17 = vpop.f32.mrf.mxu1 }
  0xe7   :  { %v1157_v18 = vpop.f32.mrf.mxu0  ;;  %v1220_v20 = vadd.f32 %v1219_v17, %v1218_v13 }
  0xe8   :  { %v618_v19 = vadd.f32 %v1156_v16, %v1661_v14  ;;  %v1664_v21 = vpop.f32.mrf.mxu1 }
  0xe9   :  { %v1158_v22 = vpop.f32.mrf.mxu0 }
  0xea   :  { %v1666_v23 = vpop.f32.mrf.mxu1  ;;  %v1668_v24 = vadd.f32 %v1220_v20, %v618_v19  ;;  %v1159_v6 = vadd.f32 %v1158_v22, %v1157_v18 }
  0xeb   :  { %v1160_v25 = vpop.f32.mrf.mxu0 }
  0xec   :  { %1761 = vst [vmem:[#allocation2_spill] sm:$0xff] %v1668_v24  ;;  %v1224_v26 = vpop.f32.mrf.mxu1  ;;  %v621_v15 = vadd.f32 %v1159_v6, %v1661_v14 }
  0xed   :  { %v1161_v27 = vpop.f32.mrf.mxu0 }
  0xee   :  { %v1225_v28 = vpop.f32.mrf.mxu1  ;;  %v1162_v8 = vadd.f32 %v1161_v27, %v1160_v25  ;;  %v1223_v25 = vadd.f32 %v1666_v23, %v1664_v21 }
  0xef   :  { %v1163_v29 = vpop.f32.mrf.mxu0  ;;  %v1226_v27 = vadd.f32 %v1225_v28, %v1224_v26 }
  0xf0   :  { %v1227_v30 = vpop.f32.mrf.mxu1  ;;  %v626_v19 = vadd.f32 %v1162_v8, %v1661_v14 }
  0xf1   :  { %v1164_v31 = vpop.f32.mrf.mxu0 }
  0xf2   :  { %v1228_v32 = vpop.f32.mrf.mxu1  ;;  %v1165_v9 = vadd.f32 %v1164_v31, %v1163_v29 }
  0xf3   :  { %v1166_v33 = vpop.f32.mrf.mxu0  ;;  %v1229_v29 = vadd.f32 %v1228_v32, %v1227_v30 }
  0xf4   :  { %v1230_v34 = vpop.f32.mrf.mxu1  ;;  %v629_v20 = vadd.f32 %v1165_v9, %v1661_v14  ;;  %v718_v9 = vadd.f32 %v1223_v25, %v621_v15 }
  0xf5   :  { %v1167_v35 = vpop.f32.mrf.mxu0 }
  0xf6   :  { %v1231_v36 = vpop.f32.mrf.mxu1  ;;  %v1168_v10 = vadd.f32 %v1167_v35, %v1166_v33  ;;  %v726_v24 = vadd.f32 %v1229_v29, %v629_v20 }
  0xf7   :  { %v1169_v37 = vpop.f32.mrf.mxu0  ;;  %v1232_v35 = vadd.f32 %v1231_v36, %v1230_v34 }
  0xf8   :  { %v1670_v38 = vpop.f32.mrf.mxu1  ;;  %v634_v18 = vadd.f32 %v1168_v10, %v1661_v14  ;;  %v723_v10 = vadd.f32 %v1226_v27, %v626_v19 }
  0xf9   :  { %v1170_v39 = vpop.f32.mrf.mxu0 }
  0xfa   :  { %v1672_v40 = vpop.f32.mrf.mxu1  ;;  %v1171_v6 = vadd.f32 %v1170_v39, %v1169_v37  ;;  %v1702_v21 = vadd.f32 %v1232_v35, %v634_v18 }
  0xfb   :  { %v1172_v41 = vpop.f32.mrf.mxu0  ;;  %v1706_v23 = vadd.f32 %v1672_v40, %v1670_v38 }
  0xfc   :  { %v1674_v42 = vpop.f32.mrf.mxu1  ;;  %v1711_v34 = vadd.f32 %v1171_v6, %v1661_v14 }
  0xfd   :  { %v1173_v43 = vpop.f32.mrf.mxu0 }
  0xfe   :  { %v1237_v44 = vpop.f32.mrf.mxu1  ;;  %v1174_v16 = vadd.f32 %v1173_v43, %v1172_v41 }
  0xff   :  { %v1175_v45 = vpop.f32.mrf.mxu0  ;;  %v1238_v26 = vadd.f32 %v1237_v44, %v1674_v42 }
 0x100   :  { %v1676_v46 = vpop.f32.mrf.mxu1  ;;  %v642_v8 = vadd.f32 %v1174_v16, %v1661_v14 }
 0x101   :  { %v1176_v47 = vpop.f32.mrf.mxu0 }
 0x102   :  { %v1678_v48 = vpop.f32.mrf.mxu1  ;;  %v1177_v28 = vadd.f32 %v1176_v47, %v1175_v45 }
 0x103   :  { %v1178_v49 = vpop.f32.mrf.mxu0  ;;  %v1241_v15 = vadd.f32 %v1678_v48, %v1676_v46 }
 0x104   :  { %v1680_v50 = vpop.f32.mrf.mxu1 }
 0x105   :  { %v1179_v51 = vpop.f32.mrf.mxu0 }
 0x106   :  { %v1243_v52 = vpop.f32.mrf.mxu1  ;;  %v1180_v31 = vadd.f32 %v1179_v51, %v1178_v49 }
 0x107   :  { %v1181_v53 = vpop.f32.mrf.mxu0  ;;  %v1244_v51 = vadd.f32 %v1243_v52, %v1680_v50 }
 0x108   :  { %v1245_v54 = vpop.f32.mrf.mxu1  ;;  %v650_v30 = vadd.f32 %v1180_v31, %v1661_v14 }
 0x109   :  { %v1182_v55 = vpop.f32.mrf.mxu0 }
 0x10a   :  { %v1246_v56 = vpop.f32.mrf.mxu1  ;;  %v1183_v41 = vadd.f32 %v1182_v55, %v1181_v53  ;;  %v739_v55 = vadd.f32 %v1238_v26, %v642_v8 }
 0x10b   :  { %v1184_v57 = vpop.f32.mrf.mxu0  ;;  %v1247_v53 = vadd.f32 %v1246_v56, %v1245_v54 }
 0x10c   :  { %v1248_v58 = vpop.f32.mrf.mxu1  ;;  %v653_v36 = vadd.f32 %v1183_v41, %v1661_v14 }
 0x10d   :  { %v1185_v59 = vpop.f32.mrf.mxu0 }
 0x10e   :  { %v1249_v60 = vpop.f32.mrf.mxu1  ;;  %v1186_v22 = vadd.f32 %v1185_v59, %v1184_v57  ;;  %v750_v54 = vadd.f32 %v1247_v53, %v653_v36 }
 0x10f   :  { %v1187_v61 = vpop.f32.mrf.mxu0  ;;  %v1250_v37 = vadd.f32 %v1249_v60, %v1248_v58  ;;  %v747_v60 = vadd.f32 %v1244_v51, %v650_v30 }
 0x110   :  { %v1251_v62 = vpop.f32.mrf.mxu1  ;;  %v658_v57 = vadd.f32 %v1186_v22, %v1661_v14 }
 0x111   :  { %v1188_v63 = vpop.f32.mrf.mxu0 }
 0x112   :  { %v1252_v0 = vpop.f32.mrf.mxu1  ;;  %v1189_v43 = vadd.f32 %v1188_v63, %v1187_v61  ;;  %v755_v47 = vadd.f32 %v1250_v37, %v658_v57  ;;  %v645_v63 = vadd.f32 %v1177_v28, %v1661_v14 }
 0x113   :  { %v1190_v1 = vpop.f32.mrf.mxu0  ;;  %v1253_v42 = vadd.f32 %v1252_v0, %v1251_v62  ;;  %v1765_v0 = vld [vmem:[#allocation2_spill] sm:$0xff] }
 0x114   :  { %v1682_v2 = vpop.f32.mrf.mxu1  ;;  %v661_v39 = vadd.f32 %v1189_v43, %v1661_v14  ;;  %v742_v37 = vadd.f32 %v1241_v15, %v645_v63 }
 0x115   :  { %v1191_v3 = vpop.f32.mrf.mxu0 }
 0x116   :  { %v1684_v4 = vpop.f32.mrf.mxu1  ;;  %v1192_v44 = vadd.f32 %v1191_v3, %v1190_v1  ;;  %v758_v52 = vadd.f32 %v1253_v42, %v661_v39 }
 0x117   :  { %v1193_v5 = vpop.f32.mrf.mxu0  ;;  %v1256_v56 = vadd.f32 %v1684_v4, %v1682_v2 }
 0x118   :  { %v1686_v7 = vpop.f32.mrf.mxu1 }
 0x119   :  { %1762 = vst [vmem:[#allocation3_spill] sm:$0xff] %v1686_v7  ;;  %v1194_v11 = vpop.f32.mrf.mxu0 }
 0x11a   :  { %v1688_v12 = vpop.f32.mrf.mxu1  ;;  %v1195_v45 = vadd.f32 %v1194_v11, %v1193_v5 }
 0x11b   :  { %1763 = vst [vmem:[#allocation4_spill] sm:$0xff] %v1688_v12  ;;  %v1196_v13 = vpop.f32.mrf.mxu0 }
 0x11c   :  { %v1691_v17 = vpop.f32.mrf.mxu1  ;;  %v669_v46 = vadd.f32 %v1195_v45, %v1661_v14 }
 0x11d   :  { %1764 = vst [vmem:[#allocation5_spill] sm:$0xff] %v1691_v17  ;;  %v1197_v7 = vpop.f32.mrf.mxu0 }
 0x11e   :  { %v1261_v33 = vpop.f32.mrf.mxu1  ;;  %v1198_v38 = vadd.f32 %v1197_v7, %v1196_v13  ;;  %v666_v7 = vadd.f32 %v1192_v44, %v1661_v14  ;;  %v734_v44 = vadd.f32 %v1706_v23, %v1711_v34 }
 0x11f   :  { %v1199_v12 = vpop.f32.mrf.mxu0 }
 0x120   :  { %v1699_v17 = vpop.f32.mrf.mxu1  ;;  %v674_v62 = vadd.f32 %v1198_v38, %v1661_v14  ;;  %v763_v30 = vadd.f32 %v1256_v56, %v666_v7  ;;  %v1767_v39 = vld [vmem:[#allocation3_spill] sm:$0xff] }
 0x121   :  { %v1200_v59 = vpop.f32.mrf.mxu0 }
 0x122   :  { %v1264_v32 = vpop.f32.mrf.mxu1  ;;  %v1201_v19 = vadd.f32 %v1200_v59, %v1199_v12 }
 0x123   :  { %v1288_v49 = vpop.f32.mrf.mxu0  ;;  %v1265_v59 = vadd.f32 %v1264_v32, %v1699_v17 }
 0x124   :  { %v1296_v40 = vpop.f32.mrf.mxu1  ;;  %v820_v58 = vadd.f32 %v1288_v49, %v723_v10  ;;  %v1766_v13 = vld [vmem:[#allocation5_spill] sm:$0xff]  ;;  %v677_v2 = vadd.f32 %v1201_v19, %v1661_v14  ;;  %v1768_v49 = vld [vmem:[#allocation4_spill] sm:$0xff] }
 0x125   :  { %v811_v61 = vpop.f32.mrf.mxu0  ;;  %v852_v20 = vadd.f32 %v1296_v40, %v755_v47  ;;  %v1262_v18 = vadd.f32 %v1261_v33, %v1766_v13  ;;  %v1259_v51 = vadd.f32 %v1768_v49, %v1767_v39 }
 0x126   :  { %v843_v16 = vpop.f32.mrf.mxu1  ;;  %v812_v1 = vadd.f32 %v811_v61, %v1765_v0  ;;  %v876_v22 = vmax.f32 %v820_v58, 0.0  ;;  %v774_v38 = vadd.f32 %v1265_v59, %v677_v2 }
 0x127   :  { %v1289_v50 = vpop.f32.mrf.mxu0  ;;  %v844_v48 = vadd.f32 %v843_v16, %v747_v60  ;;  %v884_v4 = vmax.f32 %v852_v20, 0.0  ;;  %v771_v8 = vadd.f32 %v1262_v18, %v674_v62  ;;  %v766_v63 = vadd.f32 %v1259_v51, %v669_v46 }
 0x128   :  { %v823_v3 = vadd.f32 %v1289_v50, %v726_v24  ;;  %v1297_v5 = vpop.f32.mrf.mxu1  ;;  %v874_v6 = vmax.f32 %v812_v1, 0.0 }
 0x129   :  { %v855_v11 = vadd.f32 %v1297_v5, %v758_v52  ;;  %v814_v12 = vpop.f32.mrf.mxu0  ;;  %v882_v10 = vmax.f32 %v844_v48, 0.0 }
 0x12a   :  { %v877_v25 = vmax.f32 %v823_v3, 0.0  ;;  %v815_v27 = vadd.f32 %v814_v12, %v718_v9  ;;  %v846_v29 = vpop.f32.mrf.mxu1 }
 0x12b   :  { %v885_v31 = vmax.f32 %v855_v11, 0.0  ;;  %v847_v35 = vadd.f32 %v846_v29, %v750_v54  ;;  %v1292_v24 = vpop.f32.mrf.mxu0 }
 0x12c   :  { %v1099_v41 = vpack.c.bf16 %v877_v25, %v876_v22  ;;  %v875_v43 = vmax.f32 %v815_v27, 0.0  ;;  %v1300_v57 = vpop.f32.mrf.mxu1  ;;  %v836_v9 = vadd.f32 %v1292_v24, %v739_v55 }
 0x12d   :  { %v1119_v26 = vpack.c.bf16 %v885_v31, %v884_v4  ;;  %v883_v33 = vmax.f32 %v847_v35, 0.0  ;;  %v827_v28 = vpop.f32.mrf.mxu0  ;;  %v868_v32 = vadd.f32 %v1300_v57, %v771_v8 }
 0x12e   :  { %1131 = vst [vmem:[%s1760_s3 + $0x8] sm:$0xff] %v1099_v41   ;;  %v1094_v14 = vpack.c.bf16 %v875_v43, %v874_v6  ;;  %v859_v36 = vpop.f32.mrf.mxu1  ;;  %v828_v40 = vadd.f32 %v827_v28, %v1702_v21  ;;  %v880_v15 = vmax.f32 %v836_v9, 0.0 }
 0x12f   :  { %1135 = vst [vmem:[%s1760_s3 + $0x28] sm:$0xff] %v1119_v26   ;;  %v1114_v17 = vpack.c.bf16 %v883_v33, %v882_v10  ;;  %v1293_v53 = vpop.f32.mrf.mxu0  ;;  %v860_v45 = vadd.f32 %v859_v36, %v763_v30  ;;  %v888_v19 = vmax.f32 %v868_v32, 0.0 }
 0x130   :  { %1095 = vst [vmem:[%s1760_s3] sm:$0xff] %v1094_v14   ;;  %v839_v55 = vadd.f32 %v1293_v53, %v742_v37  ;;  %v1301_v42 = vpop.f32.mrf.mxu1  ;;  %v878_v50 = vmax.f32 %v828_v40, 0.0 }
 0x131   :  { %1134 = vst [vmem:[%s1760_s3 + $0x20] sm:$0xff] %v1114_v17   ;;  %v871_v47 = vadd.f32 %v1301_v42, %v774_v38  ;;  %v830_v61 = vpop.f32.mrf.mxu0  ;;  %v886_v56 = vmax.f32 %v860_v45, 0.0 }
 0x132   :  { %v881_v58 = vmax.f32 %v839_v55, 0.0  ;;  %v831_v60 = vadd.f32 %v830_v61, %v734_v44  ;;  %v862_v16 = vpop.f32.mrf.mxu1 }
 0x133   :  { %v889_v20 = vmax.f32 %v871_v47, 0.0  ;;  %v863_v21 = vadd.f32 %v862_v16, %v766_v63 }
 0x134   :  { %v1109_v52 = vpack.c.bf16 %v881_v58, %v880_v15  ;;  %v879_v54 = vmax.f32 %v831_v60, 0.0 }
 0x135   :  { %v1129_v23 = vpack.c.bf16 %v889_v20, %v888_v19  ;;  %v887_v34 = vmax.f32 %v863_v21, 0.0 }
 0x136   :  { %1133 = vst [vmem:[%s1760_s3 + $0x18] sm:$0xff] %v1109_v52   ;;  %v1104_v62 = vpack.c.bf16 %v879_v54, %v878_v50 }
 0x137   :  { %1137 = vst [vmem:[%s1760_s3 + $0x38] sm:$0xff] %v1129_v23   ;;  %v1124_v0 = vpack.c.bf16 %v887_v34, %v886_v56 }
 0x138   :  { %1132 = vst [vmem:[%s1760_s3 + $0x10] sm:$0xff] %v1104_v62  }
 0x139   :  { %1136 = vst [vmem:[%s1760_s3 + $0x30] sm:$0xff] %v1124_v0  }

// kernel: dfanet_forward.56
= control target key start
LH: loop header
LB: loop body
LE: loop exit
PB: predicated region body
PF: predicated region fallthrough
CT: control target
= control target key end

     0   :  { %v542_v0 = vmov 0   ;;  %vm284_vm0 = vcmask 392192   ;;  %s690_s1 = inlined_call_operand.vmem [shape: bf16[432,128], index: 1, kind: input, shape index: {}]   ;;  %s691_s0 = inlined_call_operand.vmem [shape: bf16[32,432], index: 0, kind: input, shape index: {}]   ;;  %s692_s2 = inlined_call_operand.vmem [shape: f32[1,128], index: 2, kind: input, shape index: {}]   ;;  %s693_s3 = inlined_call_operand.vmem [shape: bf16[32,128], index: 3, kind: output, shape index: {}]  }
   0x1   :  { %340 = vmatprep.subr.bf16.mxu1 %v542_v0  ;;  %v503_v1 = vld [vmem:[%s690_s1 + $0x78] sm:$0xff]   ;;  %v506_v4 = vld [vmem:[%s690_s1 + $0x70] sm:$0xff]   ;;  %v509_v7 = vld [vmem:[%s690_s1 + $0x68] sm:$0xff]  }
   0x2   :  { %v504_v2 = vld [vmem:[%s690_s1 + $0xb8] sm:$0xff]   ;;  %474 = vmatprep.subr.bf16.mxu0 %v503_v1  ;;  %v507_v5 = vld [vmem:[%s690_s1 + $0xb0] sm:$0xff]   ;;  %v510_v8 = vld [vmem:[%s690_s1 + $0xa8] sm:$0xff]  }
   0x3   :  { %v505_v3 = vld [vmem:[%s690_s1 + $0x38] sm:$0xff]   ;;  %341 = vmatpush1.bf16.msra.mxu1 %v504_v2  ;;  %v508_v6 = vld [vmem:[%s690_s1 + $0x30] sm:$0xff]   ;;  %v511_v9 = vld [vmem:[%s690_s1 + $0x28] sm:$0xff]  }
   0x4   :  { %475 = vmatpush3.bf16.msra.mxu0 %v505_v3  ;;  %342 = vmatprep.subr.bf16.mxu1 %v542_v0  ;;  %v512_v10 = vld [vmem:[%s690_s1 + $0x60] sm:$0xff]   ;;  %v515_v13 = vld [vmem:[%s690_s1 + $0x58] sm:$0xff]   ;;  %v518_v16 = vld [vmem:[%s690_s1 + $0x50] sm:$0xff]  }
   0x5   :  { %476 = vmatprep.subr.bf16.mxu0 %v506_v4  ;;  %v513_v11 = vld [vmem:[%s690_s1 + $0xa0] sm:$0xff]   ;;  %v516_v14 = vld [vmem:[%s690_s1 + $0x98] sm:$0xff]   ;;  %v519_v17 = vld [vmem:[%s690_s1 + $0x90] sm:$0xff]  }
   0x6   :  { %v514_v12 = vld [vmem:[%s690_s1 + $0x20] sm:$0xff]   ;;  %v517_v15 = vld [vmem:[%s690_s1 + $0x18] sm:$0xff]   ;;  %v520_v18 = vld [vmem:[%s690_s1 + $0x10] sm:$0xff]  }
   0x7   :  { %343 = vmatpush1.bf16.msra.mxu1 %v507_v5  ;;  %v521_v19 = vld [vmem:[%s690_s1 + $0x48] sm:$0xff]   ;;  %v524_v22 = vld [vmem:[%s690_s1 + $0x40] sm:$0xff]   ;;  %v530_v28 = vld [vmem:[%s690_s1 + $0xd0] sm:$0xff]  }
   0x8   :  { %477 = vmatpush3.bf16.msra.mxu0 %v508_v6  ;;  %344 = vmatprep.subr.bf16.mxu1 %v542_v0  ;;  %v522_v20 = vld [vmem:[%s690_s1 + $0x88] sm:$0xff]   ;;  %v529_v23 = vld [vmem:[%s691_s0 + $0x4] ss:$16 sps:$4 sm:$0xff]   ;;  %v527_v26 = vld [vmem:[%s691_s0] ss:$16 sps:$4 sm:$0xff]  }
   0x9   :  { %478 = vmatprep.subr.bf16.mxu0 %v509_v7  ;;  %v523_v21 = vld [vmem:[%s690_s1 + $0x8] sm:$0xff]   ;;  %v525_v24 = vld [vmem:[%s690_s1 + $0x80] sm:$0xff]   ;;  %323 = vmatprep.mubr.bf16.mxu0 %v529_v23 }
   0xa   :  { %v526_v25 = vld [vmem:[%s690_s1] sm:$0xff]   ;;  %v538_v27 = vld [vmem:[%s691_s0 + $0xc] ss:$16 sps:$4 sm:$0xff]   ;;  %v536_v33 = vld [vmem:[%s691_s0 + $0x8] ss:$16 sps:$4 sm:$0xff]  }
   0xb   :  { %345 = vmatpush1.bf16.msra.mxu1 %v510_v8  ;;  %v532_v29 = vld [vmem:[%s691_s0 + $0x24] ss:$16 sps:$4 sm:$0xff]   ;;  %453 = vmatprep.mubr.msk.bf16.mxu1 %vm284_vm0, %v538_v27  ;;  %v531_v30 = vld [vmem:[%s690_s1 + $0xc8] sm:$0xff]   ;;  %v534_v31 = vld [vmem:[%s691_s0 + $0x20] ss:$16 sps:$4 sm:$0xff]  }
   0xc   :  { %479 = vmatpush3.bf16.msra.mxu0 %v511_v9  ;;  %346 = vmatprep.subr.bf16.mxu1 %v542_v0  ;;  %v535_v32 = vld [vmem:[%s690_s1 + $0xc0] sm:$0xff]   ;;  %v539_v34 = vld [vmem:[%s691_s0 + $0x2c] ss:$16 sps:$4 sm:$0xff]   ;;  %v541_v35 = vld [vmem:[%s691_s0 + $0x28] ss:$16 sps:$4 sm:$0xff]  }
   0xd   :  { %480 = vmatprep.subr.bf16.mxu0 %v512_v10  ;;  %v417_v42 = vld [vmem:[%s692_s2] ss:$0 sm:$0xff] }
   0xf   :  { %347 = vmatpush1.bf16.msra.mxu1 %v513_v11 }
  0x10   :  { %481 = vmatpush3.bf16.msra.mxu0 %v514_v12  ;;  %348 = vmatprep.subr.bf16.mxu1 %v542_v0 }
  0x11   :  { %482 = vmatprep.subr.bf16.mxu0 %v515_v13 }
  0x13   :  { %349 = vmatpush1.bf16.msra.mxu1 %v516_v14 }
  0x14   :  { %483 = vmatpush3.bf16.msra.mxu0 %v517_v15  ;;  %350 = vmatprep.subr.bf16.mxu1 %v542_v0 }
  0x15   :  { %484 = vmatprep.subr.bf16.mxu0 %v518_v16 }
  0x17   :  { %351 = vmatpush1.bf16.msra.mxu1 %v519_v17 }
  0x18   :  { %485 = vmatpush3.bf16.msra.mxu0 %v520_v18  ;;  %352 = vmatprep.subr.bf16.mxu1 %v542_v0 }
  0x19   :  { %486 = vmatprep.subr.bf16.mxu0 %v521_v19 }
  0x1b   :  { %353 = vmatpush1.bf16.msra.mxu1 %v522_v20 }
  0x1c   :  { %487 = vmatpush3.bf16.msra.mxu0 %v523_v21  ;;  %354 = vmatprep.subr.bf16.mxu1 %v542_v0 }
  0x1d   :  { %488 = vmatprep.subr.bf16.mxu0 %v524_v22 }
  0x1f   :  { %355 = vmatpush1.bf16.msra.mxu1 %v525_v24 }
  0x20   :  { %489 = vmatpush3.bf16.msra.mxu0 %v526_v25  ;;  %366 = vmatprep.subr.bf16.mxu1 %v542_v0 }
  0x23   :  { %324 = vmatmul.mubr.bf16.vlgmr.msra.gmra.mxu0 %v527_v26  ;;  %367 = vmatpush2.bf16.msra.mxu1 %v530_v28 }
  0x24   :  { %368 = vmatprep.subr.bf16.mxu1 %v542_v0  ;;  %331 = vmatprep.mubr.bf16.mxu0 %v532_v29 }
  0x27   :  { %369 = vmatpush2.bf16.msra.mxu1 %v531_v30 }
  0x28   :  { %370 = vmatprep.subr.bf16.mxu1 %v542_v0 }
  0x2b   :  { %332 = vmatmul.mubr.bf16.gmra.mxu0 %v534_v31  ;;  %371 = vmatpush2.bf16.msra.mxu1 %v535_v32 }
  0x2e   :  { %373 = vmatmul.mubr.bf16.vlgmr.msra.gmra.mxu1 %v536_v33 }
  0x2f   :  { %454 = vmatprep.mubr.msk.bf16.mxu1 %vm284_vm0, %v539_v34 }
  0x36   :  { %381 = vmatmul.mubr.bf16.gmra.mxu1 %v541_v35 }
  0xe3   :  { %v490_v36 = vpop.f32.mrf.mxu0 }
  0xe5   :  { %v491_v37 = vpop.f32.mrf.mxu0 }
  0xe6   :  { %v492_v40 = vadd.f32 %v491_v37, %v490_v36 }
  0xe7   :  { %v493_v38 = vpop.f32.mrf.mxu0 }
  0xe8   :  { %v326_v46 = vadd.f32 %v492_v40, %v417_v42 }
  0xe9   :  { %v494_v39 = vpop.f32.mrf.mxu0 }
  0xea   :  { %v495_v43 = vadd.f32 %v494_v39, %v493_v38 }
  0xeb   :  { %v496_v41 = vpop.f32.mrf.mxu0 }
  0xec   :  { %v329_v50 = vadd.f32 %v495_v43, %v417_v42 }
  0xed   :  { %v497_v44 = vpop.f32.mrf.mxu0 }
  0xee   :  { %v374_v45 = vpop.f32.mrf.mxu1  ;;  %v498_v53 = vadd.f32 %v497_v44, %v496_v41 }
  0xef   :  { %v499_v47 = vpop.f32.mrf.mxu0  ;;  %v375_v49 = vadd.f32 %v374_v45, %v326_v46 }
  0xf0   :  { %v376_v48 = vpop.f32.mrf.mxu1  ;;  %v334_v61 = vadd.f32 %v498_v53, %v417_v42 }
  0xf1   :  { %v500_v51 = vpop.f32.mrf.mxu0  ;;  %v389_v56 = vmax.f32 %v375_v49, 0.0 }
  0xf2   :  { %v377_v52 = vpop.f32.mrf.mxu1  ;;  %v501_v57 = vadd.f32 %v500_v51, %v499_v47 }
  0xf3   :  { %v378_v54 = vadd.f32 %v377_v52, %v329_v50 }
  0xf4   :  { %v379_v55 = vpop.f32.mrf.mxu1  ;;  %v337_v0 = vadd.f32 %v501_v57, %v417_v42 }
  0xf5   :  { %v390_v58 = vmax.f32 %v378_v54, 0.0 }
  0xf6   :  { %v382_v59 = vpop.f32.mrf.mxu1 }
  0xf7   :  { %v466_v60 = vpack.c.bf16 %v390_v58, %v389_v56  ;;  %v383_v63 = vadd.f32 %v382_v59, %v334_v61 }
  0xf8   :  { %v384_v62 = vpop.f32.mrf.mxu1 }
  0xf9   :  { %467 = vst [vmem:[%s693_s3] sm:$0xff] %v466_v60   ;;  %v391_v4 = vmax.f32 %v383_v63, 0.0 }
  0xfa   :  { %v385_v1 = vpop.f32.mrf.mxu1 }
  0xfb   :  { %v386_v2 = vadd.f32 %v385_v1, %v337_v0 }
  0xfc   :  { %v387_v3 = vpop.f32.mrf.mxu1 }
  0xfd   :  { %v392_v5 = vmax.f32 %v386_v2, 0.0 }
  0xff   :  { %v471_v6 = vpack.c.bf16 %v392_v5, %v391_v4 }
 0x101   :  { %473 = vst [vmem:[%s693_s3 + $0x8] sm:$0xff] %v471_v6  }

// kernel: dfanet_forward.58
= control target key start
LH: loop header
LB: loop body
LE: loop exit
PB: predicated region body
PF: predicated region fallthrough
CT: control target
= control target key end

     0   :  { %s378_s9 = smov 0   ;;  %s380_s10 = smov 0   ;;  %s414_s0 = inlined_call_operand.vmem [shape: bf16[1,4], index: 0, kind: input, shape index: {}]   ;;  %s415_s1 = inlined_call_operand.vmem [shape: bf16[2,4,48], index: 1, kind: input, shape index: {}]   ;;  %s416_s2 = inlined_call_operand.vmem [shape: bf16[2,1,48], index: 2, kind: output, shape index: {}]  }
   0x1   :  { %s382_s11 = smov 0  }
   0x2 LB: > { %s24_s12 = sadd.s32 1, %s355_s10  ;;  %p298_p0 = scmp.ge.s32.totalorder %s359_s11, 1  ;;  %s359_s11 = sphi %s382_s11, %s12_s11   ;;  %s355_s10 = sphi %s380_s10, %s418_s10   ;;  %s351_s9 = sphi %s378_s9, %s417_s9  }
   0x3   : > { %p26_p1 = scmp.ge.s32.totalorder %s24_s12, 2  ;;  %p130_p2 = scmp.lt.s32.totalorder %s359_s11, 3 }
   0x5   : > { %s420_s12 = smov (%p26_p1, %s24_s12), 0  ;;  %p131_p3 = pnand %p298_p0, %p130_p2 }
   0x6   : > { %p155_p4 = scmp.lt.s32.totalorder (!%p131_p3), %s351_s9, 1 }
   0x7   : > { %134 = sbr.rel (%p131_p3) target bundleno = 219 (0xdb), region = 28 }
   0xc   : > { %v361_v0 = vmov 0.0   ;;  %vm362_vm0 = vmmov 0   ;;  %s422_s9 = smov (!%p155_p4, %s351_s9), 1  ;;  %vm175_vm1 = vcmask 1041408   ;;  %v169_v3 = vld [vmem:[%s414_s0] sm:$0x1] }
   0xd   : > { %305 = vmatprep.subr.bf16.mxu0 %v361_v0  ;;  %307 = vmatprep.mubr.msk.bf16.mxu0 %vm362_vm0, %v361_v0  ;;  %s299_s13 = sshll.u32 %s422_s9, 1  ;;  %vm171_vm2 = vcmask 31744   ;;  %s167_s21 = scalar_lea.vmem %s416_s2, %s422_s9  ;;  %vm220_vm3 = vcmask 385024   ;;  %vm221_vm4 = vsmask.f32 256 }
   0xe   : > { %s161_s16 = scalar_lea.vmem %s415_s1, %s299_s13  ;;  %v223_v4 = vld [vmem:[%s167_s21] sm:$0x1]  ;;  %vm222_vm5 = vmand %vm220_vm3, %vm221_vm4 }
   0xf   : > { %v170_v1 = vld [vmem:[%s161_s16] sm:$0x3] }
  0x10   : > { %v177_v2 = vsel %vm175_vm1, %v170_v1, 0 }
  0x11   : > { %306 = vmatpush3.bf16.msra.mxu0 %v177_v2 }
  0x14   : > { %308 = vmatmul.mubr.msk.bf16.vlgmr.msra.gmra.mxu0 %vm171_vm2, %v169_v3 }
  0xd4   : > { %v213_v5 = vpop.f32.mrf.mxu0 }
  0xd5   : > { %v219_v6 = vpack.c.bf16 %v213_v5, %v213_v5 }
  0xd6   : > { %v309_v7 = vpop.f32.mrf.mxu0 }
  0xd7   : > { %v224_v8 = vsel %vm222_vm5, %v219_v6, %v223_v4 }
  0xd8   : > { %225 = vst [vmem:[%s167_s21] sm:$0x1] %v224_v8  ;;  %v216_v9 = vpop.f32.mrf.mxu0 }
  0xda   : > { %v310_v10 = vpop.f32.mrf.mxu0 }
  0xdb PF: > { %s12_s11 = sadd.s32 1, %s359_s11   ;;  %s417_s9 = smov %s355_s10 }
  0xdc   : > { %p9_p5 = scmp.ge.s32.totalorder %s12_s11, 4   ;;  %s418_s10 = smov %s420_s12 }
  0xde   :  { %11 = sbr.rel (!%p9_p5) target bundleno = 2 (0x2), region = 58 }

// kernel: dfanet_forward.61
= control target key start
LH: loop header
LB: loop body
LE: loop exit
PB: predicated region body
PF: predicated region fallthrough
CT: control target
= control target key end

     0   :  { %s248_s9 = smov 0   ;;  %s276_s0 = inlined_call_operand.vmem [shape: bf16[2,4,48], index: 0, kind: input, shape index: {}]   ;;  %s277_s1 = inlined_call_operand.vmem [shape: bf16[2,1,48], index: 1, kind: input, shape index: {}]   ;;  %s278_s2 = inlined_call_operand.vmem [shape: bf16[2,4,48], index: 2, kind: output, shape index: {}]  }
   0x1 LB: > { %s227_s10 = sadd.s32 4294967295, %s250_s9   ;;  %p231_p0 = scmp.ge.s32.totalorder %s250_s9, 1  ;;  %s250_s9 = sphi %s248_s9, %s12_s9  }
   0x2   : > { %p119_p1 = scmp.lt.s32.totalorder %s250_s9, 3 }
   0x4   : > { %p120_p2 = pnand %p231_p0, %p119_p1 }
   0x5   : > { %p142_p3 = scmp.lt.s32.totalorder (!%p120_p2), %s227_s10, 1 }
   0x6   : > { %123 = sbr.rel (%p120_p2) target bundleno = 22 (0x16), region = 28 }
   0xb   : > { %v158_v0 = vlaneseq  ;;  %s280_s10 = smov (!%p142_p3, %s227_s10), 1  ;;  %vm163_vm0 = vcmask 386048  }
   0xc   : > { %s232_s11 = sshll.u32 %s280_s10, 1  ;;  %s148_s14 = scalar_lea.vmem %s277_s1, %s280_s10 }
   0xd   : > { %v159_v1 = vshrl.u32 %v158_v0, 7  ;;  %s145_s17 = scalar_lea.vmem %s276_s0, %s232_s11  ;;  %v154_v3 = vld [vmem:[%s148_s14] sm:$0x1]  ;;  %s152_s20 = scalar_lea.vmem %s278_s2, %s232_s11 }
   0xe   : > { %v156_v4 = vpack.i.b16 %v154_v3, %v154_v3  ;;  %v153_v5 = vld [vmem:[%s145_s17] sm:$0x3] }
   0xf   : > { %v160_v2 = vsub.s32 0, %v159_v1 }
  0x11   : > { %v161_v6 = vrot.slane %v156_v4, %v160_v2 }
  0x13   : > { %v162_v7 = vmul.bf16 %v161_v6, %v153_v5 }
  0x15   : > { %164 = vst.msk [vmem:[%s152_s20] sm:$0x3] %vm163_vm0, %v162_v7 }
  0x16 PF: > { %s12_s9 = sadd.s32 1, %s250_s9  }
  0x17   : > { %p9_p4 = scmp.ge.s32.totalorder %s12_s9, 4  }
  0x19   :  { %11 = sbr.rel (!%p9_p4) target bundleno = 1 (0x1), region = 61 }

// kernel: dfanet_forward.57
= control target key start
LH: loop header
LB: loop body
LE: loop exit
PB: predicated region body
PF: predicated region fallthrough
CT: control target
= control target key end

     0   :  { %v685_v1 = vmov 0   ;;  %vm405_vm0 = vcmask 654336   ;;  %s869_s1 = inlined_call_operand.vmem [shape: bf16[720,128], index: 1, kind: input, shape index: {}]   ;;  %s870_s0 = inlined_call_operand.vmem [shape: bf16[8,720], index: 0, kind: input, shape index: {}]   ;;  %s871_s2 = inlined_call_operand.vmem [shape: f32[1,128], index: 2, kind: input, shape index: {}]   ;;  %s872_s3 = inlined_call_operand.vmem [shape: bf16[8,128], index: 3, kind: output, shape index: {}]  }
   0x1   :  { %v634_v0 = vld [vmem:[%s869_s1 + $0x78] sm:$0xff]   ;;  %489 = vmatprep.subr.bf16.mxu0 %v685_v1  ;;  %v636_v3 = vld [vmem:[%s869_s1 + $0x70] sm:$0xff]   ;;  %v638_v5 = vld [vmem:[%s869_s1 + $0x68] sm:$0xff]  }
   0x2   :  { %v635_v2 = vld [vmem:[%s869_s1 + $0x38] sm:$0xff]   ;;  %589 = vmatprep.subr.bf16.mxu1 %v634_v0  ;;  %v637_v4 = vld [vmem:[%s869_s1 + $0x30] sm:$0xff]   ;;  %v639_v6 = vld [vmem:[%s869_s1 + $0x28] sm:$0xff]  }
   0x3   :  { %590 = vmatpush3.bf16.msra.mxu1 %v635_v2  ;;  %v640_v7 = vld [vmem:[%s869_s1 + $0x60] sm:$0xff]   ;;  %v642_v8 = vld [vmem:[%s869_s1 + $0x138] sm:$0xff]   ;;  %v645_v10 = vld [vmem:[%s869_s1 + $0x130] sm:$0xff]  }
   0x4   :  { %591 = vmatprep.subr.bf16.mxu1 %v636_v3  ;;  %v641_v9 = vld [vmem:[%s869_s1 + $0x20] sm:$0xff]   ;;  %490 = vmatpush1.bf16.msra.mxu0 %v642_v8  ;;  %v643_v11 = vld [vmem:[%s869_s1 + $0x58] sm:$0xff]   ;;  %v648_v12 = vld [vmem:[%s869_s1 + $0x128] sm:$0xff]  }
   0x5   :  { %491 = vmatprep.subr.bf16.mxu0 %v685_v1  ;;  %v644_v13 = vld [vmem:[%s869_s1 + $0x18] sm:$0xff]   ;;  %v646_v14 = vld [vmem:[%s869_s1 + $0x50] sm:$0xff]   ;;  %v651_v15 = vld [vmem:[%s869_s1 + $0x120] sm:$0xff]  }
   0x6   :  { %v647_v16 = vld [vmem:[%s869_s1 + $0x10] sm:$0xff]   ;;  %v649_v17 = vld [vmem:[%s869_s1 + $0x48] sm:$0xff]   ;;  %v15_v18 = vld [vmem:[%s870_s0] sm:$0xff] }
   0x7   :  { %592 = vmatpush3.bf16.msra.mxu1 %v637_v4  ;;  %v654_v19 = vld [vmem:[%s869_s1 + $0x118] sm:$0xff]   ;;  %v538_v20 = vcombine.high %v15_v18, %v15_v18  ;;  %v650_v21 = vld [vmem:[%s869_s1 + $0x8] sm:$0xff]   ;;  %v652_v22 = vld [vmem:[%s869_s1 + $0x40] sm:$0xff]   ;;  %v537_v26 = vcombine.low %v15_v18, %v15_v18 }
   0x8   :  { %593 = vmatprep.subr.bf16.mxu1 %v638_v5  ;;  %492 = vmatpush1.bf16.msra.mxu0 %v645_v10  ;;  %v659_v23 = vld [vmem:[%s869_s1 + $0x110] sm:$0xff]   ;;  %v653_v24 = vld [vmem:[%s869_s1] sm:$0xff]   ;;  %v657_v25 = vld [vmem:[%s869_s1 + $0xf8] sm:$0xff]  }
   0x9   :  { %493 = vmatprep.subr.bf16.mxu0 %v685_v1  ;;  %441 = vmatprep.mubr.bf16.mxu1 %v538_v20  ;;  %v662_v27 = vld [vmem:[%s869_s1 + $0x108] sm:$0xff]   ;;  %v658_v28 = vld [vmem:[%s869_s1 + $0xb8] sm:$0xff]   ;;  %v660_v29 = vld [vmem:[%s869_s1 + $0xf0] sm:$0xff]  }
   0xa   :  { %v665_v30 = vld [vmem:[%s869_s1 + $0x100] sm:$0xff]   ;;  %v661_v31 = vld [vmem:[%s869_s1 + $0xb0] sm:$0xff]   ;;  %v663_v32 = vld [vmem:[%s869_s1 + $0xe8] sm:$0xff]  }
   0xb   :  { %594 = vmatpush3.bf16.msra.mxu1 %v639_v6  ;;  %v668_v33 = vld [vmem:[%s869_s1 + $0x160] sm:$0xff]   ;;  %v664_v34 = vld [vmem:[%s869_s1 + $0xa8] sm:$0xff]   ;;  %v671_v36 = vld [vmem:[%s869_s1 + $0x158] sm:$0xff]  }
   0xc   :  { %595 = vmatprep.subr.bf16.mxu1 %v640_v7  ;;  %494 = vmatpush1.bf16.msra.mxu0 %v648_v12  ;;  %v666_v35 = vld [vmem:[%s869_s1 + $0xe0] sm:$0xff]   ;;  %v669_v38 = vld [vmem:[%s869_s1 + $0xd8] sm:$0xff]   ;;  %v16_v39 = vld [vmem:[%s870_s0 + $0x8] sm:$0xff] }
   0xd   :  { %495 = vmatprep.subr.bf16.mxu0 %v685_v1  ;;  %v667_v37 = vld [vmem:[%s869_s1 + $0xa0] sm:$0xff]   ;;  %v17_v40 = vld [vmem:[%s870_s0 + $0x10] sm:$0xff]  ;;  %v540_v42 = vcombine.high %v16_v39, %v16_v39  ;;  %v670_v44 = vld [vmem:[%s869_s1 + $0x98] sm:$0xff]   ;;  %v539_v54 = vcombine.low %v16_v39, %v16_v39 }
   0xe   :  { %v674_v41 = vld [vmem:[%s869_s1 + $0x150] sm:$0xff]   ;;  %v542_v43 = vcombine.high %v17_v40, %v17_v40  ;;  %v677_v46 = vld [vmem:[%s869_s1 + $0x148] sm:$0xff]   ;;  %v680_v49 = vld [vmem:[%s869_s1 + $0x140] sm:$0xff]   ;;  %v541_v52 = vcombine.low %v17_v40, %v17_v40 }
   0xf   :  { %596 = vmatpush3.bf16.msra.mxu1 %v641_v9  ;;  %v672_v45 = vld [vmem:[%s869_s1 + $0xd0] sm:$0xff]   ;;  %v675_v48 = vld [vmem:[%s869_s1 + $0xc8] sm:$0xff]   ;;  %v678_v51 = vld [vmem:[%s869_s1 + $0xc0] sm:$0xff]  }
  0x10   :  { %597 = vmatprep.subr.bf16.mxu1 %v643_v11  ;;  %496 = vmatpush1.bf16.msra.mxu0 %v651_v15  ;;  %v673_v47 = vld [vmem:[%s869_s1 + $0x90] sm:$0xff]   ;;  %v676_v50 = vld [vmem:[%s869_s1 + $0x88] sm:$0xff]   ;;  %v679_v53 = vld [vmem:[%s869_s1 + $0x80] sm:$0xff]  }
  0x11   :  { %497 = vmatprep.subr.bf16.mxu0 %v685_v1  ;;  %588 = vmatprep.mubr.msk.bf16.mxu0 %vm405_vm0, %v542_v43  ;;  %v536_v63 = vld [vmem:[%s871_s2] ss:$0 sm:$0xff] }
  0x13   :  { %598 = vmatpush3.bf16.msra.mxu1 %v644_v13 }
  0x14   :  { %599 = vmatprep.subr.bf16.mxu1 %v646_v14  ;;  %498 = vmatpush1.bf16.msra.mxu0 %v654_v19 }
  0x15   :  { %499 = vmatprep.subr.bf16.mxu0 %v685_v1 }
  0x17   :  { %600 = vmatpush3.bf16.msra.mxu1 %v647_v16 }
  0x18   :  { %601 = vmatprep.subr.bf16.mxu1 %v649_v17  ;;  %500 = vmatpush1.bf16.msra.mxu0 %v659_v23 }
  0x19   :  { %501 = vmatprep.subr.bf16.mxu0 %v685_v1 }
  0x1b   :  { %602 = vmatpush3.bf16.msra.mxu1 %v650_v21 }
  0x1c   :  { %603 = vmatprep.subr.bf16.mxu1 %v652_v22  ;;  %502 = vmatpush1.bf16.msra.mxu0 %v662_v27 }
  0x1d   :  { %503 = vmatprep.subr.bf16.mxu0 %v685_v1 }
  0x1f   :  { %604 = vmatpush3.bf16.msra.mxu1 %v653_v24 }
  0x20   :  { %611 = vmatprep.subr.bf16.mxu1 %v657_v25  ;;  %504 = vmatpush1.bf16.msra.mxu0 %v665_v30 }
  0x21   :  { %511 = vmatprep.subr.bf16.mxu0 %v685_v1 }
  0x22   :  { %442 = vmatmul.mubr.bf16.vlgmr.msra.gmra.mxu1 %v537_v26 }
  0x23   :  { %612 = vmatpush3.bf16.msra.mxu1 %v658_v28  ;;  %481 = vmatprep.mubr.bf16.mxu1 %v540_v42 }
  0x24   :  { %613 = vmatprep.subr.bf16.mxu1 %v660_v29  ;;  %512 = vmatpush2.bf16.msra.mxu0 %v668_v33 }
  0x25   :  { %513 = vmatprep.subr.bf16.mxu0 %v685_v1 }
  0x27   :  { %614 = vmatpush3.bf16.msra.mxu1 %v661_v31 }
  0x28   :  { %615 = vmatprep.subr.bf16.mxu1 %v663_v32  ;;  %514 = vmatpush2.bf16.msra.mxu0 %v671_v36 }
  0x29   :  { %515 = vmatprep.subr.bf16.mxu0 %v685_v1 }
  0x2b   :  { %616 = vmatpush3.bf16.msra.mxu1 %v664_v34 }
  0x2c   :  { %617 = vmatprep.subr.bf16.mxu1 %v666_v35  ;;  %516 = vmatpush2.bf16.msra.mxu0 %v674_v41 }
  0x2d   :  { %517 = vmatprep.subr.bf16.mxu0 %v685_v1 }
  0x2f   :  { %618 = vmatpush3.bf16.msra.mxu1 %v667_v37 }
  0x30   :  { %619 = vmatprep.subr.bf16.mxu1 %v669_v38  ;;  %518 = vmatpush2.bf16.msra.mxu0 %v677_v46 }
  0x31   :  { %519 = vmatprep.subr.bf16.mxu0 %v685_v1 }
  0x33   :  { %620 = vmatpush3.bf16.msra.mxu1 %v670_v44 }
  0x34   :  { %621 = vmatprep.subr.bf16.mxu1 %v672_v45  ;;  %520 = vmatpush2.bf16.msra.mxu0 %v680_v49 }
  0x37   :  { %622 = vmatpush3.bf16.msra.mxu1 %v673_v47  ;;  %522 = vmatmul.mubr.bf16.vlgmr.msra.gmra.mxu0 %v541_v52 }
  0x38   :  { %623 = vmatprep.subr.bf16.mxu1 %v675_v48 }
  0x3b   :  { %624 = vmatpush3.bf16.msra.mxu1 %v676_v50 }
  0x3c   :  { %625 = vmatprep.subr.bf16.mxu1 %v678_v51 }
  0x3f   :  { %626 = vmatpush3.bf16.msra.mxu1 %v679_v53 }
  0x42   :  { %482 = vmatmul.mubr.bf16.vlgmr.msra.gmra.mxu1 %v539_v54 }
  0xe2   :  { %v605_v55 = vpop.f32.mrf.mxu1 }
  0xe4   :  { %v606_v56 = vpop.f32.mrf.mxu1 }
  0xe5   :  { %v607_v61 = vadd.f32 %v606_v56, %v605_v55 }
  0xe6   :  { %v608_v57 = vpop.f32.mrf.mxu1 }
  0xe7   :  { %v444_v3 = vadd.f32 %v607_v61, %v536_v63 }
  0xe8   :  { %v609_v58 = vpop.f32.mrf.mxu1 }
  0xf7   :  { %v523_v59 = vpop.f32.mrf.mxu0 }
  0xf9   :  { %v525_v60 = vpop.f32.mrf.mxu0 }
  0xfb   :  { %v526_v62 = vpop.f32.mrf.mxu0 }
  0xfd   :  { %v527_v1 = vpop.f32.mrf.mxu0 }
 0x102   :  { %v627_v0 = vpop.f32.mrf.mxu1 }
 0x104   :  { %v628_v2 = vpop.f32.mrf.mxu1 }
 0x105   :  { %v629_v4 = vadd.f32 %v628_v2, %v627_v0 }
 0x106   :  { %v630_v5 = vpop.f32.mrf.mxu1 }
 0x107   :  { %v484_v6 = vadd.f32 %v629_v4, %v444_v3 }
 0x108   :  { %v631_v7 = vpop.f32.mrf.mxu1 }
 0x109   :  { %v524_v8 = vadd.f32 %v523_v59, %v484_v6 }
 0x10b   :  { %v529_v9 = vmax.f32 %v524_v8, 0.0 }
 0x10d   :  { %v530_v10 = vpack.c.bf16 %v529_v9, %v529_v9 }
 0x10f   :  { %531 = vst [vmem:[%s872_s3] sm:$0xf] %v530_v10 }

// kernel: dfanet_forward.62
= control target key start
LH: loop header
LB: loop body
LE: loop exit
PB: predicated region body
PF: predicated region fallthrough
CT: control target
= control target key end

     0   :  { %v389_v1 = vmov 0.0   ;;  %vm390_vm0 = vmmov 0   ;;  %v391_v5 = vmov 0   ;;  %v43_v12 = vlaneseq  ;;  %s479_s0 = inlined_call_operand.vmem [shape: bf16[4,96], index: 0, kind: input, shape index: {}]   ;;  %s480_s1 = inlined_call_operand.vmem [shape: bf16[96,384], index: 1, kind: input, shape index: {}]   ;;  %s481_s2 = inlined_call_operand.vmem [shape: f32[1,384], index: 2, kind: input, shape index: {}]   ;;  %s482_s3 = inlined_call_operand.vmem [shape: bf16[4,384], index: 3, kind: output, shape index: {}]  }
   0x1   :  { %v365_v0 = vld [vmem:[%s480_s1 + $0x7c] ss:$12 sps:$4 sm:$0xff]   ;;  %345 = vmatprep.subr.bf16.mxu1 %v389_v1  ;;  %v367_v2 = vld [vmem:[%s480_s1 + $0x80] ss:$12 sps:$4 sm:$0xff]   ;;  %357 = vmatprep.mubr.msk.bf16.mxu1 %vm390_vm0, %v389_v1  ;;  %v368_v3 = vld [vmem:[%s480_s1 + $0x78] ss:$12 sps:$4 sm:$0xff]  }
   0x2   :  { %172 = vmatprep.subr.bf16.mxu0 %v365_v0  ;;  %346 = vmatpush3.bf16.msra.mxu1 %v367_v2  ;;  %v369_v4 = vld [vmem:[%s480_s1 + $0x64] ss:$12 sps:$4 sm:$0xff]   ;;  %v371_v6 = vld [vmem:[%s480_s1 + $0x68] ss:$12 sps:$4 sm:$0xff]   ;;  %v372_v7 = vld [vmem:[%s480_s1 + $0x60] ss:$12 sps:$4 sm:$0xff]  }
   0x3   :  { %200 = vmatprep.mubr.bf16.mxu0 %v391_v5  ;;  %173 = vmatpush1.bf16.msra.mxu0 %v368_v3  ;;  %v373_v8 = vld [vmem:[%s480_s1 + $0x4c] ss:$12 sps:$4 sm:$0xff]   ;;  %v375_v9 = vld [vmem:[%s480_s1 + $0x50] ss:$12 sps:$4 sm:$0xff]   ;;  %v376_v10 = vld [vmem:[%s480_s1 + $0x48] ss:$12 sps:$4 sm:$0xff]  }
   0x4   :  { %347 = vmatprep.subr.bf16.mxu1 %v389_v1  ;;  %174 = vmatprep.subr.bf16.mxu0 %v369_v4  ;;  %v377_v11 = vld [vmem:[%s480_s1 + $0x34] ss:$12 sps:$4 sm:$0xff]   ;;  %v392_v13 = vmov 1983009808   ;;  %v379_v15 = vld [vmem:[%s480_s1 + $0x38] ss:$12 sps:$4 sm:$0xff]  }
   0x5   :  { %v62_v14 = vunpack.c.l.s4 %v392_v13  ;;  %v380_v16 = vld [vmem:[%s480_s1 + $0x30] ss:$12 sps:$4 sm:$0xff]   ;;  %v44_v18 = vshrl.u32 %v43_v12, 7  ;;  %v383_v20 = vld [vmem:[%s480_s1 + $0x20] ss:$12 sps:$4 sm:$0xff]   ;;  %vm164_vm1 = vcmask 785408  }
   0x6   :  { %348 = vmatpush3.bf16.msra.mxu1 %v371_v6  ;;  %v381_v17 = vld [vmem:[%s480_s1 + $0x1c] ss:$12 sps:$4 sm:$0xff]   ;;  %v15_v21 = vld [vmem:[%s479_s0] sm:$0x3]  ;;  %v16_v22 = vld [vmem:[%s479_s0 + $0x2] sm:$0x3] }
   0x7   :  { %175 = vmatpush1.bf16.msra.mxu0 %v372_v7  ;;  %349 = vmatprep.subr.bf16.mxu1 %v389_v1  ;;  %v63_v19 = vunpack.c.0.s8 %v62_v14  ;;  %v384_v23 = vld [vmem:[%s480_s1 + $0x18] ss:$12 sps:$4 sm:$0xff]   ;;  %v60_v25 = vcombine.low %v15_v21, %v16_v22  ;;  %v387_v27 = vld [vmem:[%s480_s1 + $0x8] ss:$12 sps:$4 sm:$0xff]   ;;  %v388_v28 = vld [vmem:[%s480_s1] ss:$12 sps:$4 sm:$0xff]  }
   0x8   :  { %176 = vmatprep.subr.bf16.mxu0 %v373_v8  ;;  %v385_v24 = vld [vmem:[%s480_s1 + $0x4] ss:$12 sps:$4 sm:$0xff]   ;;  %v53_v30 = vsub.s32 2, %v44_v18  ;;  %v41_v31 = vld [vmem:[%s481_s2] sm:$0x7]  ;;  %v45_v32 = vsub.s32 0, %v44_v18 }
   0x9   :  { %v66_v26 = vsub.s32 %v63_v19, %v44_v18  ;;  %v49_v33 = vsub.s32 1, %v44_v18 }
   0xa   :  { %350 = vmatpush3.bf16.msra.mxu1 %v375_v9  ;;  %v54_v34 = vrot.slane %v41_v31, %v53_v30  ;;  %v46_v36 = vrot.slane %v41_v31, %v45_v32 }
   0xb   :  { %177 = vmatpush1.bf16.msra.mxu0 %v376_v10  ;;  %351 = vmatprep.subr.bf16.mxu1 %v389_v1  ;;  %v67_v29 = vrot.slane %v60_v25, %v66_v26  ;;  %v50_v37 = vrot.slane %v41_v31, %v49_v33 }
   0xc   :  { %178 = vmatprep.subr.bf16.mxu0 %v377_v11 }
   0xe   :  { %352 = vmatpush3.bf16.msra.mxu1 %v379_v15 }
   0xf   :  { %179 = vmatpush1.bf16.msra.mxu0 %v380_v16  ;;  %353 = vmatprep.subr.bf16.mxu1 %v389_v1 }
  0x10   :  { %180 = vmatprep.subr.bf16.mxu0 %v381_v17 }
  0x12   :  { %354 = vmatpush3.bf16.msra.mxu1 %v383_v20 }
  0x13   :  { %181 = vmatpush1.bf16.msra.mxu0 %v384_v23  ;;  %355 = vmatprep.subr.bf16.mxu1 %v389_v1 }
  0x14   :  { %182 = vmatprep.subr.bf16.mxu0 %v385_v24 }
  0x16   :  { %356 = vmatpush3.bf16.msra.mxu1 %v387_v27 }
  0x17   :  { %183 = vmatpush1.bf16.msra.mxu0 %v388_v28 }
  0x19   :  { %358 = vmatmul.mubr.msk.bf16.vlgmr.msra.gmra.mxu1 %vm164_vm1, %v67_v29 }
  0x1a   :  { %335 = vmatmul.mubr.msk.bf16.vlgmr.msra.gmra.mxu0 %vm164_vm1, %v67_v29 }
  0xd9   :  { %v243_v35 = vpop.f32.mrf.mxu1 }
  0xda   :  { %v244_v38 = vadd.f32 %v243_v35, %v54_v34  ;;  %v202_v39 = vpop.f32.mrf.mxu0 }
  0xdb   :  { %v359_v40 = vpop.f32.mrf.mxu1  ;;  %v203_v43 = vadd.f32 %v202_v39, %v46_v36 }
  0xdc   :  { %v251_v41 = vpack.c.bf16 %v244_v38, %v244_v38  ;;  %v204_v42 = vpop.f32.mrf.mxu0 }
  0xdd   :  { %v205_v44 = vadd.f32 %v204_v42, %v50_v37  ;;  %v246_v45 = vpop.f32.mrf.mxu1 }
  0xde   :  { %v206_v46 = vpop.f32.mrf.mxu0  ;;  %v269_v47 = vrot.slane %v251_v41, %v66_v26 }
  0xdf   :  { %v337_v48 = vpack.c.bf16 %v205_v44, %v203_v43  ;;  %v360_v49 = vpop.f32.mrf.mxu1 }
  0xe0   :  { %v207_v50 = vpop.f32.mrf.mxu0 }
  0xe1   :  { %v262_v51 = vrot.slane %v337_v48, %v66_v26 }
  0xe3   :  { %v270_v52 = vcombine.low %v262_v51, %v269_v47 }
  0xe5   :  { %274 = vst [vmem:[#allocation2] sm:$0x3f] %v270_v52 }
  0xec   :  { %v294_v53 = vld [vmem:[#allocation2] sm:$0x3f] }
  0xed   :  { %295 = vst [vmem:[%s482_s3] sm:$0x3f] %v294_v53 }

// kernel: dfanet_forward.63
= control target key start
LH: loop header
LB: loop body
LE: loop exit
PB: predicated region body
PF: predicated region fallthrough
CT: control target
= control target key end

     0   :  { %s498_s9 = smov 0   ;;  %s500_s10 = smov 0   ;;  %s534_s0 = inlined_call_operand.vmem [shape: bf16[8,2], index: 0, kind: input, shape index: {}]   ;;  %s535_s1 = inlined_call_operand.vmem [shape: bf16[2,2,384], index: 1, kind: input, shape index: {}]   ;;  %s536_s2 = inlined_call_operand.vmem [shape: bf16[2,8,384], index: 2, kind: output, shape index: {}]  }
   0x1   :  { %s502_s11 = smov 0  }
   0x2 LB: > { %s24_s12 = sadd.s32 1, %s473_s10  ;;  %p405_p0 = scmp.ge.s32.totalorder %s477_s11, 1  ;;  %s477_s11 = sphi %s502_s11, %s12_s11   ;;  %s473_s10 = sphi %s500_s10, %s538_s10   ;;  %s469_s9 = sphi %s498_s9, %s537_s9  }
   0x3   : > { %p26_p1 = scmp.ge.s32.totalorder %s24_s12, 2  ;;  %p132_p2 = scmp.lt.s32.totalorder %s477_s11, 3 }
   0x5   : > { %s540_s12 = smov (%p26_p1, %s24_s12), 0  ;;  %p133_p3 = pnand %p405_p0, %p132_p2 }
   0x6   : > { %p162_p4 = scmp.lt.s32.totalorder (!%p133_p3), %s469_s9, 1 }
   0x7   : > { %136 = sbr.rel (%p133_p3) target bundleno = 226 (0xe2), region = 28 }
   0xc   : > { %v195_v0 = vlaneseq  ;;  %v479_v1 = vmov 1966171168   ;;  %v480_v3 = vmov 0.0   ;;  %s542_s9 = smov (!%p162_p4, %s469_s9), 1  ;;  %v481_v5 = vmov 0  }
   0xd   : > { %v193_v2 = vunpack.c.l.s4 %v479_v1  ;;  %419 = vmatprep.subr.bf16.mxu1 %v480_v3  ;;  %253 = vmatprep.mubr.bf16.mxu0 %v481_v5  ;;  %vm482_vm0 = vmmov 0   ;;  %s425_s13 = smul.u32 3, %s542_s9  ;;  %vm211_vm1 = vcmask 1040384   ;;  %v181_v15 = vld [vmem:[%s534_s0] sm:$0xf]  ;;  %vm207_vm2 = vcmask 15360  }
   0xe   : > { %v196_v4 = vshrl.u32 %v195_v0, 7  ;;  %421 = vmatprep.mubr.msk.bf16.mxu1 %vm482_vm0, %v480_v3  ;;  %s426_s19 = smul.u32 12, %s542_s9 }
   0xf   : > { %v194_v6 = vunpack.c.0.s8 %v193_v2  ;;  %s168_s16 = scalar_lea.vmem %s535_s1, %s425_s13 }
  0x10   : > { %v407_v8 = vld.sshfl [vmem:[%s168_s16] sm:$0x13 pattern:$0x75316420]  ;;  %s178_s22 = scalar_lea.vmem %s536_s2, %s426_s19 }
  0x11   : > { %v197_v7 = vsub.s32 %v194_v6, %v196_v4  ;;  %v191_v9 = vcombine.high %v407_v8, %v407_v8 }
  0x13   : > { %v198_v10 = vrot.slane %v407_v8, %v197_v7  ;;  %v205_v11 = vrot.slane %v191_v9, %v197_v7 }
  0x15   : > { %v213_v12 = vsel %vm211_vm1, %v198_v10, 0  ;;  %v206_v13 = vcombine.high %v198_v10, %v198_v10  ;;  %408 = vmatprep.subr.msk.bf16.mxu0 %vm211_vm1, %v205_v11 }
  0x16   : > { %236 = vmatpush1.bf16.msra.mxu0 %v213_v12 }
  0x17   : > { %v219_v14 = vsel %vm211_vm1, %v206_v13, 0 }
  0x18   : > { %420 = vmatpush3.bf16.msra.mxu1 %v219_v14 }
  0x19   : > { %409 = vmatmul.mubr.msk.bf16.vlgmr.msra.gmra.mxu0 %vm207_vm2, %v181_v15 }
  0x1b   : > { %422 = vmatmul.mubr.msk.bf16.vlgmr.msra.gmra.mxu1 %vm207_vm2, %v181_v15 }
  0xd9   : > { %v255_v16 = vpop.f32.mrf.mxu0 }
  0xdb   : > { %v296_v17 = vpop.f32.mrf.mxu1  ;;  %v257_v19 = vpop.f32.mrf.mxu0 }
  0xdc   : > { %v416_v18 = vpack.c.bf16 %v296_v17, %v296_v17  ;;  %v415_v21 = vpack.c.bf16 %v257_v19, %v255_v16 }
  0xdd   : > { %v423_v20 = vpop.f32.mrf.mxu1  ;;  %v259_v22 = vpop.f32.mrf.mxu0 }
  0xde   : > { %316 = vst [vmem:[%s178_s22 + $0x8] sm:$0xf] %v416_v18  ;;  %315 = vst [vmem:[%s178_s22] sm:$0xff] %v415_v21 }
  0xdf   : > { %v299_v23 = vpop.f32.mrf.mxu1  ;;  %v260_v24 = vpop.f32.mrf.mxu0 }
  0xe1   : > { %v424_v25 = vpop.f32.mrf.mxu1 }
  0xe2 PF: > { %s12_s11 = sadd.s32 1, %s477_s11   ;;  %s537_s9 = smov %s473_s10 }
  0xe3   : > { %p9_p5 = scmp.ge.s32.totalorder %s12_s11, 4   ;;  %s538_s10 = smov %s540_s12 }
  0xe5   :  { %11 = sbr.rel (!%p9_p5) target bundleno = 2 (0x2), region = 58 }

// kernel: dfanet_forward.64
= control target key start
LH: loop header
LB: loop body
LE: loop exit
PB: predicated region body
PF: predicated region fallthrough
CT: control target
= control target key end

     0   :  { %vm372_vm0 = vcmask 523264   ;;  %s913_s1 = inlined_call_operand.vmem [shape: bf16[576,128], index: 1, kind: input, shape index: {}]   ;;  %s914_s0 = inlined_call_operand.vmem [shape: bf16[32,576], index: 0, kind: input, shape index: {}]   ;;  %s915_s2 = inlined_call_operand.vmem [shape: f32[1,128], index: 2, kind: input, shape index: {}]   ;;  %s916_s3 = inlined_call_operand.vmem [shape: bf16[32,128], index: 3, kind: output, shape index: {}]  }
   0x1   :  { %v696_v0 = vld [vmem:[%s913_s1 + $0x78] sm:$0xff]   ;;  %v700_v4 = vld [vmem:[%s913_s1 + $0x70] sm:$0xff]   ;;  %v704_v8 = vld [vmem:[%s913_s1 + $0x68] sm:$0xff]  }
   0x2   :  { %v697_v1 = vld [vmem:[%s913_s1 + $0xf8] sm:$0xff]   ;;  %622 = vmatprep.subr.bf16.mxu0 %v696_v0  ;;  %v701_v5 = vld [vmem:[%s913_s1 + $0xf0] sm:$0xff]   ;;  %v705_v9 = vld [vmem:[%s913_s1 + $0xe8] sm:$0xff]  }
   0x3   :  { %v698_v2 = vld [vmem:[%s913_s1 + $0x38] sm:$0xff]   ;;  %650 = vmatprep.subr.bf16.mxu1 %v697_v1  ;;  %v702_v6 = vld [vmem:[%s913_s1 + $0x30] sm:$0xff]   ;;  %v706_v10 = vld [vmem:[%s913_s1 + $0x28] sm:$0xff]  }
   0x4   :  { %v699_v3 = vld [vmem:[%s913_s1 + $0xb8] sm:$0xff]   ;;  %623 = vmatpush3.bf16.msra.mxu0 %v698_v2  ;;  %v703_v7 = vld [vmem:[%s913_s1 + $0xb0] sm:$0xff]   ;;  %v707_v11 = vld [vmem:[%s913_s1 + $0xa8] sm:$0xff]  }
   0x5   :  { %651 = vmatpush3.bf16.msra.mxu1 %v699_v3  ;;  %624 = vmatprep.subr.bf16.mxu0 %v700_v4  ;;  %v708_v12 = vld [vmem:[%s913_s1 + $0x60] sm:$0xff]   ;;  %v712_v16 = vld [vmem:[%s913_s1 + $0x58] sm:$0xff]   ;;  %v716_v20 = vld [vmem:[%s913_s1 + $0x50] sm:$0xff]  }
   0x6   :  { %652 = vmatprep.subr.bf16.mxu1 %v701_v5  ;;  %v709_v13 = vld [vmem:[%s913_s1 + $0xe0] sm:$0xff]   ;;  %v713_v17 = vld [vmem:[%s913_s1 + $0xd8] sm:$0xff]   ;;  %v717_v21 = vld [vmem:[%s913_s1 + $0xd0] sm:$0xff]  }
   0x7   :  { %v710_v14 = vld [vmem:[%s913_s1 + $0x20] sm:$0xff]   ;;  %v714_v18 = vld [vmem:[%s913_s1 + $0x18] sm:$0xff]   ;;  %v718_v22 = vld [vmem:[%s913_s1 + $0x10] sm:$0xff]  }
   0x8   :  { %625 = vmatpush3.bf16.msra.mxu0 %v702_v6  ;;  %v711_v15 = vld [vmem:[%s913_s1 + $0xa0] sm:$0xff]   ;;  %v715_v19 = vld [vmem:[%s913_s1 + $0x98] sm:$0xff]   ;;  %v719_v23 = vld [vmem:[%s913_s1 + $0x90] sm:$0xff]  }
   0x9   :  { %653 = vmatpush3.bf16.msra.mxu1 %v703_v7  ;;  %626 = vmatprep.subr.bf16.mxu0 %v704_v8  ;;  %v720_v24 = vld [vmem:[%s913_s1 + $0x48] sm:$0xff]   ;;  %v724_v28 = vld [vmem:[%s913_s1 + $0x40] sm:$0xff]   ;;  %v734_v36 = vld [vmem:[%s913_s1 + $0x118] sm:$0xff]  }
   0xa   :  { %654 = vmatprep.subr.bf16.mxu1 %v705_v9  ;;  %v721_v25 = vld [vmem:[%s913_s1 + $0xc8] sm:$0xff]   ;;  %v725_v29 = vld [vmem:[%s913_s1 + $0xc0] sm:$0xff]   ;;  %v735_v37 = vld [vmem:[%s913_s1 + $0x110] sm:$0xff]  }
   0xb   :  { %v722_v26 = vld [vmem:[%s913_s1 + $0x8] sm:$0xff]   ;;  %v726_v30 = vld [vmem:[%s913_s1] sm:$0xff]  }
   0xc   :  { %627 = vmatpush3.bf16.msra.mxu0 %v706_v10  ;;  %v723_v27 = vld [vmem:[%s913_s1 + $0x88] sm:$0xff]   ;;  %v727_v31 = vld [vmem:[%s913_s1 + $0x80] sm:$0xff]  }
   0xd   :  { %655 = vmatpush3.bf16.msra.mxu1 %v707_v11  ;;  %628 = vmatprep.subr.bf16.mxu0 %v708_v12  ;;  %v728_v32 = vld [vmem:[%s914_s0] ss:$20 sps:$4 sm:$0xff]   ;;  %v730_v33 = vld [vmem:[%s914_s0 + $0x4] ss:$20 sps:$4 sm:$0xff]   ;;  %v731_v34 = vld [vmem:[%s914_s0 + $0x8] ss:$20 sps:$4 sm:$0xff]  }
   0xe   :  { %656 = vmatprep.subr.bf16.mxu1 %v709_v13  ;;  %v733_v35 = vld [vmem:[%s914_s0 + $0xc] ss:$20 sps:$4 sm:$0xff]   ;;  %411 = vmatprep.mubr.bf16.mxu0 %v730_v33  ;;  %v738_v39 = vld [vmem:[%s914_s0 + $0x34] ss:$20 sps:$4 sm:$0xff]   ;;  %v741_v42 = vld [vmem:[%s914_s0 + $0x30] ss:$20 sps:$4 sm:$0xff]  }
   0xf   :  { %460 = vmatprep.mubr.bf16.mxu1 %v733_v35  ;;  %v736_v38 = vld [vmem:[%s914_s0 + $0x2c] ss:$20 sps:$4 sm:$0xff]   ;;  %v740_v40 = vld [vmem:[%s914_s0 + $0x28] ss:$20 sps:$4 sm:$0xff]   ;;  %v744_v43 = vld [vmem:[%s914_s0 + $0x10] ss:$20 sps:$4 sm:$0xff]  }
  0x10   :  { %629 = vmatpush3.bf16.msra.mxu0 %v710_v14  ;;  %v742_v41 = vld [vmem:[%s913_s1 + $0x108] sm:$0xff]   ;;  %v743_v44 = vld [vmem:[%s913_s1 + $0x100] sm:$0xff]  }
  0x11   :  { %657 = vmatpush3.bf16.msra.mxu1 %v711_v15  ;;  %630 = vmatprep.subr.bf16.mxu0 %v712_v16  ;;  %v745_v45 = vld [vmem:[%s914_s0 + $0x38] ss:$20 sps:$4 sm:$0xff]   ;;  %v554_v59 = vld [vmem:[%s915_s2] ss:$0 sm:$0xff] }
  0x12   :  { %658 = vmatprep.subr.bf16.mxu1 %v713_v17 }
  0x14   :  { %631 = vmatpush3.bf16.msra.mxu0 %v714_v18 }
  0x15   :  { %659 = vmatpush3.bf16.msra.mxu1 %v715_v19  ;;  %632 = vmatprep.subr.bf16.mxu0 %v716_v20 }
  0x16   :  { %660 = vmatprep.subr.bf16.mxu1 %v717_v21 }
  0x18   :  { %633 = vmatpush3.bf16.msra.mxu0 %v718_v22 }
  0x19   :  { %661 = vmatpush3.bf16.msra.mxu1 %v719_v23  ;;  %634 = vmatprep.subr.bf16.mxu0 %v720_v24 }
  0x1a   :  { %662 = vmatprep.subr.bf16.mxu1 %v721_v25 }
  0x1c   :  { %635 = vmatpush3.bf16.msra.mxu0 %v722_v26 }
  0x1d   :  { %663 = vmatpush3.bf16.msra.mxu1 %v723_v27  ;;  %636 = vmatprep.subr.bf16.mxu0 %v724_v28 }
  0x1e   :  { %664 = vmatprep.subr.bf16.mxu1 %v725_v29 }
  0x20   :  { %637 = vmatpush3.bf16.msra.mxu0 %v726_v30 }
  0x21   :  { %665 = vmatpush3.bf16.msra.mxu1 %v727_v31  ;;  %684 = vmatprep.subr.bf16.mxu0 %v734_v36 }
  0x23   :  { %412 = vmatmul.mubr.bf16.vlgmr.msra.gmra.mxu0 %v728_v32 }
  0x24   :  { %461 = vmatmul.mubr.bf16.vlgmr.msra.gmra.mxu1 %v731_v34  ;;  %685 = vmatpush3.bf16.msra.mxu0 %v734_v36 }
  0x25   :  { %686 = vmatprep.subr.bf16.mxu0 %v735_v37  ;;  %419 = vmatprep.mubr.bf16.mxu0 %v736_v38 }
  0x26   :  { %468 = vmatprep.mubr.bf16.mxu1 %v738_v39 }
  0x28   :  { %687 = vmatpush3.bf16.msra.mxu0 %v735_v37 }
  0x29   :  { %688 = vmatprep.subr.bf16.mxu0 %v742_v41 }
  0x2b   :  { %420 = vmatmul.mubr.bf16.gmra.mxu0 %v740_v40 }
  0x2c   :  { %469 = vmatmul.mubr.bf16.gmra.mxu1 %v741_v42  ;;  %692 = vmatprep.mubr.msk.bf16.mxu0 %vm372_vm0, %v744_v43 }
  0x2d   :  { %689 = vmatpush3.bf16.msra.mxu0 %v742_v41 }
  0x2e   :  { %690 = vmatprep.subr.bf16.mxu0 %v743_v44 }
  0x31   :  { %691 = vmatpush3.bf16.msra.mxu0 %v743_v44 }
  0x34   :  { %693 = vmatmul.mubr.msk.bf16.vlgmr.msra.gmra.mxu0 %vm372_vm0, %v745_v45 }
  0xe3   :  { %v638_v46 = vpop.f32.mrf.mxu0 }
  0xe4   :  { %v666_v47 = vpop.f32.mrf.mxu1 }
  0xe5   :  { %v639_v48 = vpop.f32.mrf.mxu0 }
  0xe6   :  { %v667_v49 = vpop.f32.mrf.mxu1  ;;  %v640_v60 = vadd.f32 %v639_v48, %v638_v46 }
  0xe7   :  { %v641_v50 = vpop.f32.mrf.mxu0  ;;  %v668_v6 = vadd.f32 %v667_v49, %v666_v47 }
  0xe8   :  { %v669_v51 = vpop.f32.mrf.mxu1  ;;  %v414_v5 = vadd.f32 %v640_v60, %v554_v59 }
  0xe9   :  { %v642_v52 = vpop.f32.mrf.mxu0 }
  0xea   :  { %v670_v53 = vpop.f32.mrf.mxu1  ;;  %v643_v1 = vadd.f32 %v642_v52, %v641_v50  ;;  %v463_v16 = vadd.f32 %v668_v6, %v414_v5 }
  0xeb   :  { %v644_v54 = vpop.f32.mrf.mxu0  ;;  %v671_v14 = vadd.f32 %v670_v53, %v669_v51 }
  0xec   :  { %v672_v55 = vpop.f32.mrf.mxu1  ;;  %v417_v11 = vadd.f32 %v643_v1, %v554_v59 }
  0xed   :  { %v645_v56 = vpop.f32.mrf.mxu0 }
  0xee   :  { %v646_v57 = vadd.f32 %v645_v56, %v644_v54  ;;  %v673_v58 = vpop.f32.mrf.mxu1  ;;  %v466_v20 = vadd.f32 %v671_v14, %v417_v11 }
  0xef   :  { %v674_v61 = vadd.f32 %v673_v58, %v672_v55  ;;  %v647_v62 = vpop.f32.mrf.mxu0 }
  0xf0   :  { %v422_v63 = vadd.f32 %v646_v57, %v554_v59  ;;  %v675_v0 = vpop.f32.mrf.mxu1 }
  0xf1   :  { %v648_v2 = vpop.f32.mrf.mxu0 }
  0xf2   :  { %v649_v3 = vadd.f32 %v648_v2, %v647_v62  ;;  %v676_v4 = vpop.f32.mrf.mxu1  ;;  %v471_v7 = vadd.f32 %v674_v61, %v422_v63 }
  0xf3   :  { %v677_v9 = vadd.f32 %v676_v4, %v675_v0 }
  0xf4   :  { %v425_v8 = vadd.f32 %v649_v3, %v554_v59  ;;  %v694_v10 = vpop.f32.mrf.mxu0 }
  0xf5   :  { %v520_v15 = vadd.f32 %v694_v10, %v471_v7 }
  0xf6   :  { %v511_v12 = vpop.f32.mrf.mxu0  ;;  %v474_v13 = vadd.f32 %v677_v9, %v425_v8 }
  0xf7   :  { %v512_v18 = vadd.f32 %v511_v12, %v463_v16  ;;  %v528_v22 = vmax.f32 %v520_v15, 0.0 }
  0xf8   :  { %v695_v17 = vpop.f32.mrf.mxu0 }
  0xf9   :  { %v523_v19 = vadd.f32 %v695_v17, %v474_v13  ;;  %v526_v25 = vmax.f32 %v512_v18, 0.0 }
  0xfa   :  { %v514_v21 = vpop.f32.mrf.mxu0 }
  0xfb   :  { %v529_v23 = vmax.f32 %v523_v19, 0.0  ;;  %v515_v24 = vadd.f32 %v514_v21, %v466_v20 }
  0xfd   :  { %v619_v26 = vpack.c.bf16 %v529_v23, %v528_v22  ;;  %v527_v27 = vmax.f32 %v515_v24, 0.0 }
  0xff   :  { %621 = vst [vmem:[%s916_s3 + $0x8] sm:$0xff] %v619_v26   ;;  %v614_v28 = vpack.c.bf16 %v527_v27, %v526_v25 }
 0x101   :  { %615 = vst [vmem:[%s916_s3] sm:$0xff] %v614_v28  }

// kernel: dfanet_forward.70
= control target key start
LH: loop header
LB: loop body
LE: loop exit
PB: predicated region body
PF: predicated region fallthrough
CT: control target
= control target key end

     0   :  { %s229_s9 = smov 0   ;;  %s257_s0 = inlined_call_operand.vmem [shape: bf16[2,1,48], index: 0, kind: input, shape index: {}]   ;;  %s258_s1 = inlined_call_operand.vmem [shape: bf16[2,1,48], index: 1, kind: input, shape index: {}]   ;;  %s259_s2 = inlined_call_operand.vmem [shape: bf16[2,1,48], index: 2, kind: output, shape index: {}]  }
   0x1 LB: > { %s210_s10 = sadd.s32 4294967295, %s231_s9   ;;  %p214_p0 = scmp.ge.s32.totalorder %s231_s9, 1  ;;  %s231_s9 = sphi %s229_s9, %s12_s9  }
   0x2   : > { %p118_p1 = scmp.lt.s32.totalorder %s231_s9, 3 }
   0x4   : > { %p119_p2 = pnand %p214_p0, %p118_p1 }
   0x5   : > { %p139_p3 = scmp.lt.s32.totalorder (!%p119_p2), %s210_s10, 1 }
   0x6   : > { %122 = sbr.rel (%p119_p2) target bundleno = 19 (0x13), region = 28 }
   0xb   : > { %s261_s10 = smov (!%p139_p3, %s210_s10), 1  ;;  %vm151_vm0 = vcmask 385024   ;;  %vm152_vm1 = vsmask.f32 256 }
   0xc   : > { %s141_s13 = scalar_lea.vmem %s257_s0, %s261_s10  ;;  %s144_s16 = scalar_lea.vmem %s258_s1, %s261_s10  ;;  %vm153_vm2 = vmand %vm151_vm0, %vm152_vm1 }
   0xd   : > { %s147_s19 = scalar_lea.vmem %s259_s2, %s261_s10  ;;  %v148_v0 = vld [vmem:[%s141_s13] sm:$0x1] }
   0xe   : > { %v149_v1 = vld [vmem:[%s144_s16] sm:$0x1] }
   0xf   : > { %v150_v2 = vmul.bf16 %v149_v1, %v148_v0  ;;  %v154_v3 = vld [vmem:[%s147_s19] sm:$0x1] }
  0x11   : > { %v155_v4 = vsel %vm153_vm2, %v150_v2, %v154_v3 }
  0x12   : > { %156 = vst [vmem:[%s147_s19] sm:$0x1] %v155_v4 }
  0x13 PF: > { %s12_s9 = sadd.s32 1, %s231_s9  }
  0x14   : > { %p9_p4 = scmp.ge.s32.totalorder %s12_s9, 4  }
  0x16   :  { %11 = sbr.rel (!%p9_p4) target bundleno = 1 (0x1), region = 61 }

// kernel: dfanet_forward.65
= control target key start
LH: loop header
LB: loop body
LE: loop exit
PB: predicated region body
PF: predicated region fallthrough
CT: control target
= control target key end

     0   :  { %v431_v0 = vmov 0   ;;  %vm253_vm0 = vcmask 392192   ;;  %s556_s1 = inlined_call_operand.vmem [shape: bf16[432,128], index: 1, kind: input, shape index: {}]   ;;  %s557_s0 = inlined_call_operand.vmem [shape: bf16[8,432], index: 0, kind: input, shape index: {}]   ;;  %s558_s2 = inlined_call_operand.vmem [shape: f32[1,128], index: 2, kind: input, shape index: {}]   ;;  %s559_s3 = inlined_call_operand.vmem [shape: bf16[8,128], index: 3, kind: output, shape index: {}]  }
   0x1   :  { %297 = vmatprep.subr.bf16.mxu1 %v431_v0  ;;  %v400_v1 = vld [vmem:[%s556_s1 + $0x78] sm:$0xff]   ;;  %v403_v4 = vld [vmem:[%s556_s1 + $0x70] sm:$0xff]   ;;  %v406_v7 = vld [vmem:[%s556_s1 + $0x68] sm:$0xff]  }
   0x2   :  { %v401_v2 = vld [vmem:[%s556_s1 + $0xb8] sm:$0xff]   ;;  %377 = vmatprep.subr.bf16.mxu0 %v400_v1  ;;  %v404_v5 = vld [vmem:[%s556_s1 + $0xb0] sm:$0xff]   ;;  %v407_v8 = vld [vmem:[%s556_s1 + $0xa8] sm:$0xff]  }
   0x3   :  { %v402_v3 = vld [vmem:[%s556_s1 + $0x38] sm:$0xff]   ;;  %298 = vmatpush1.bf16.msra.mxu1 %v401_v2  ;;  %v405_v6 = vld [vmem:[%s556_s1 + $0x30] sm:$0xff]   ;;  %v408_v9 = vld [vmem:[%s556_s1 + $0x28] sm:$0xff]  }
   0x4   :  { %378 = vmatpush3.bf16.msra.mxu0 %v402_v3  ;;  %299 = vmatprep.subr.bf16.mxu1 %v431_v0  ;;  %v409_v10 = vld [vmem:[%s556_s1 + $0x60] sm:$0xff]   ;;  %v412_v13 = vld [vmem:[%s556_s1 + $0x58] sm:$0xff]   ;;  %v415_v16 = vld [vmem:[%s556_s1 + $0x50] sm:$0xff]  }
   0x5   :  { %379 = vmatprep.subr.bf16.mxu0 %v403_v4  ;;  %v410_v11 = vld [vmem:[%s556_s1 + $0xa0] sm:$0xff]   ;;  %v413_v14 = vld [vmem:[%s556_s1 + $0x98] sm:$0xff]   ;;  %v416_v17 = vld [vmem:[%s556_s1 + $0x90] sm:$0xff]  }
   0x6   :  { %v411_v12 = vld [vmem:[%s556_s1 + $0x20] sm:$0xff]   ;;  %v414_v15 = vld [vmem:[%s556_s1 + $0x18] sm:$0xff]   ;;  %v417_v18 = vld [vmem:[%s556_s1 + $0x10] sm:$0xff]  }
   0x7   :  { %300 = vmatpush1.bf16.msra.mxu1 %v404_v5  ;;  %v418_v19 = vld [vmem:[%s556_s1 + $0x48] sm:$0xff]   ;;  %v15_v22 = vld [vmem:[%s557_s0] sm:$0xff]  ;;  %v426_v30 = vld [vmem:[%s556_s1 + $0xd0] sm:$0xff]  }
   0x8   :  { %380 = vmatpush3.bf16.msra.mxu0 %v405_v6  ;;  %301 = vmatprep.subr.bf16.mxu1 %v431_v0  ;;  %v419_v20 = vld [vmem:[%s556_s1 + $0x88] sm:$0xff]   ;;  %v421_v23 = vld [vmem:[%s556_s1 + $0x40] sm:$0xff]   ;;  %v346_v24 = vcombine.high %v15_v22, %v15_v22  ;;  %v345_v29 = vcombine.low %v15_v22, %v15_v22 }
   0x9   :  { %381 = vmatprep.subr.bf16.mxu0 %v406_v7  ;;  %v420_v21 = vld [vmem:[%s556_s1 + $0x8] sm:$0xff]   ;;  %v422_v25 = vld [vmem:[%s556_s1 + $0x80] sm:$0xff]  }
   0xa   :  { %289 = vmatprep.mubr.bf16.mxu0 %v346_v24  ;;  %v16_v26 = vld [vmem:[%s557_s0 + $0x8] sm:$0xff]  ;;  %v423_v27 = vld [vmem:[%s556_s1] sm:$0xff]  }
   0xb   :  { %302 = vmatpush1.bf16.msra.mxu1 %v407_v8  ;;  %v348_v28 = vcombine.high %v16_v26, %v16_v26  ;;  %v427_v31 = vld [vmem:[%s556_s1 + $0xc8] sm:$0xff]   ;;  %v428_v32 = vld [vmem:[%s556_s1 + $0xc0] sm:$0xff]   ;;  %v347_v33 = vcombine.low %v16_v26, %v16_v26 }
   0xc   :  { %382 = vmatpush3.bf16.msra.mxu0 %v408_v9  ;;  %303 = vmatprep.subr.bf16.mxu1 %v431_v0  ;;  %v344_v39 = vld [vmem:[%s558_s2] ss:$0 sm:$0xff] }
   0xd   :  { %383 = vmatprep.subr.bf16.mxu0 %v409_v10  ;;  %376 = vmatprep.mubr.msk.bf16.mxu1 %vm253_vm0, %v348_v28 }
   0xf   :  { %304 = vmatpush1.bf16.msra.mxu1 %v410_v11 }
  0x10   :  { %384 = vmatpush3.bf16.msra.mxu0 %v411_v12  ;;  %305 = vmatprep.subr.bf16.mxu1 %v431_v0 }
  0x11   :  { %385 = vmatprep.subr.bf16.mxu0 %v412_v13 }
  0x13   :  { %306 = vmatpush1.bf16.msra.mxu1 %v413_v14 }
  0x14   :  { %386 = vmatpush3.bf16.msra.mxu0 %v414_v15  ;;  %307 = vmatprep.subr.bf16.mxu1 %v431_v0 }
  0x15   :  { %387 = vmatprep.subr.bf16.mxu0 %v415_v16 }
  0x17   :  { %308 = vmatpush1.bf16.msra.mxu1 %v416_v17 }
  0x18   :  { %388 = vmatpush3.bf16.msra.mxu0 %v417_v18  ;;  %309 = vmatprep.subr.bf16.mxu1 %v431_v0 }
  0x19   :  { %389 = vmatprep.subr.bf16.mxu0 %v418_v19 }
  0x1b   :  { %310 = vmatpush1.bf16.msra.mxu1 %v419_v20 }
  0x1c   :  { %390 = vmatpush3.bf16.msra.mxu0 %v420_v21  ;;  %311 = vmatprep.subr.bf16.mxu1 %v431_v0 }
  0x1d   :  { %391 = vmatprep.subr.bf16.mxu0 %v421_v23 }
  0x1f   :  { %312 = vmatpush1.bf16.msra.mxu1 %v422_v25 }
  0x20   :  { %392 = vmatpush3.bf16.msra.mxu0 %v423_v27  ;;  %323 = vmatprep.subr.bf16.mxu1 %v431_v0 }
  0x23   :  { %290 = vmatmul.mubr.bf16.vlgmr.msra.gmra.mxu0 %v345_v29  ;;  %324 = vmatpush2.bf16.msra.mxu1 %v426_v30 }
  0x24   :  { %325 = vmatprep.subr.bf16.mxu1 %v431_v0 }
  0x27   :  { %326 = vmatpush2.bf16.msra.mxu1 %v427_v31 }
  0x28   :  { %327 = vmatprep.subr.bf16.mxu1 %v431_v0 }
  0x2b   :  { %328 = vmatpush2.bf16.msra.mxu1 %v428_v32 }
  0x2e   :  { %330 = vmatmul.mubr.bf16.vlgmr.msra.gmra.mxu1 %v347_v33 }
  0xe3   :  { %v393_v34 = vpop.f32.mrf.mxu0 }
  0xe5   :  { %v394_v35 = vpop.f32.mrf.mxu0 }
  0xe6   :  { %v395_v37 = vadd.f32 %v394_v35, %v393_v34 }
  0xe7   :  { %v396_v36 = vpop.f32.mrf.mxu0 }
  0xe8   :  { %v292_v40 = vadd.f32 %v395_v37, %v344_v39 }
  0xe9   :  { %v397_v38 = vpop.f32.mrf.mxu0 }
  0xee   :  { %v331_v41 = vpop.f32.mrf.mxu1 }
  0xef   :  { %v332_v42 = vadd.f32 %v331_v41, %v292_v40 }
  0xf0   :  { %v333_v43 = vpop.f32.mrf.mxu1 }
  0xf1   :  { %v337_v44 = vmax.f32 %v332_v42, 0.0 }
  0xf2   :  { %v334_v45 = vpop.f32.mrf.mxu1 }
  0xf3   :  { %v338_v46 = vpack.c.bf16 %v337_v44, %v337_v44 }
  0xf4   :  { %v335_v47 = vpop.f32.mrf.mxu1 }
  0xf5   :  { %339 = vst [vmem:[%s559_s3] sm:$0xf] %v338_v46 }

// kernel: dfanet_forward.67
= control target key start
LH: loop header
LB: loop body
LE: loop exit
PB: predicated region body
PF: predicated region fallthrough
CT: control target
= control target key end

     0   :  { %s334_s11 = smov 0   ;;  %s336_s12 = smov 0   ;;  %s367_s0 = inlined_call_operand.<no memory space> [shape: bf16[1,1], index: 0, kind: input, shape index: {}]   ;;  %s368_s1 = inlined_call_operand.vmem [shape: bf16[2,1,48], index: 1, kind: input, shape index: {}]   ;;  %s369_s2 = inlined_call_operand.vmem [shape: bf16[2,1,48], index: 2, kind: output, shape index: {}]  }
   0x1   :  { %v7_v0 = vstv %s367_s0  ;;  %s338_s13 = smov 0  }
   0x2   :  { %8 = vst [vmem:[#allocation2] sm:$0x1] %v7_v0 }
   0x3 LB: > { %s26_s0 = sadd.s32 1, %s308_s12  ;;  %p260_p0 = scmp.ge.s32.totalorder %s312_s13, 1  ;;  %s312_s13 = sphi %s338_s13, %s14_s13   ;;  %s308_s12 = sphi %s336_s12, %s371_s12   ;;  %s304_s11 = sphi %s334_s11, %s370_s11  }
   0x4   : > { %p28_p1 = scmp.ge.s32.totalorder %s26_s0, 2  ;;  %p131_p2 = scmp.lt.s32.totalorder %s312_s13, 3 }
   0x6   : > { %s373_s0 = smov (%p28_p1, %s26_s0), 0  ;;  %p132_p3 = pnand %p260_p0, %p131_p2 }
   0x7   : > { %p155_p4 = scmp.lt.s32.totalorder (!%p132_p3), %s304_s11, 1 }
   0x8   : > { %135 = sbr.rel (%p132_p3) target bundleno = 148 (0x94), region = 28 }
   0xd   : > { %v167_v1 = vld [vmem:[#allocation2] sm:$0x1]  ;;  %v314_v2 = vmov 0   ;;  %v315_v4 = vmov 269488144   ;;  %v179_v6 = vlaneseq  ;;  %s375_s11 = smov (!%p155_p4, %s304_s11), 1 }
   0xe   : > { %289 = vset.pattern.permute.xlu0 %v314_v2  ;;  %v169_v3 = vunpack.c.l.bf16 %v167_v1  ;;  %v177_v5 = vunpack.c.l.s4 %v315_v4  ;;  %s160_s16 = scalar_lea.vmem %s368_s1, %s375_s11  ;;  %vm185_vm0 = vcmask 385024   ;;  %vm186_vm1 = vsmask.f32 256  ;;  %s166_s19 = scalar_lea.vmem %s369_s2, %s375_s11 }
   0xf   : > { %v180_v8 = vshrl.u32 %v179_v6, 7  ;;  %v168_v9 = vld [vmem:[%s160_s16] sm:$0x1]  ;;  %vm187_vm2 = vmand %vm185_vm0, %vm186_vm1 }
  0x10   : > { %173 = vperm.xlu0 %289, %v169_v3   ;;  %v178_v7 = vunpack.c.0.s8 %v177_v5  ;;  %v170_v11 = vunpack.c.l.bf16 %v168_v9  ;;  %v188_v15 = vld [vmem:[%s166_s19] sm:$0x1] }
  0x12   : > { %v181_v10 = vsub.s32 %v178_v7, %v180_v8 }
  0x8b   : > { %v174_v12 = vpop.permute.xlu0 %173 }
  0x8c   : > { %v182_v13 = vrot.slane %v174_v12, %v181_v10 }
  0x8e   : > { %v183_v14 = vmul.f32 %v182_v13, %v170_v11 }
  0x90   : > { %v184_v16 = vpack.c.bf16 %v183_v14, %v183_v14 }
  0x92   : > { %v189_v17 = vsel %vm187_vm2, %v184_v16, %v188_v15 }
  0x93   : > { %190 = vst [vmem:[%s166_s19] sm:$0x1] %v189_v17 }
  0x94 PF: > { %s14_s13 = sadd.s32 1, %s312_s13   ;;  %s370_s11 = smov %s308_s12 }
  0x95   : > { %p11_p5 = scmp.ge.s32.totalorder %s14_s13, 4   ;;  %s371_s12 = smov %s373_s0 }
  0x97   :  { %13 = sbr.rel (!%p11_p5) target bundleno = 3 (0x3), region = 58 }

// kernel: dfanet_forward.66
= control target key start
LH: loop header
LB: loop body
LE: loop exit
PB: predicated region body
PF: predicated region fallthrough
CT: control target
= control target key end

     0   :  { %v807_v2 = vmov 0   ;;  %v127_v16 = vlaneseq  ;;  %v808_v24 = vmov 1966171168   ;;  %vm461_vm0 = vcmask 654336   ;;  %s1011_s0 = inlined_call_operand.vmem [shape: bf16[2,720], index: 0, kind: input, shape index: {}]   ;;  %s1012_s1 = inlined_call_operand.vmem [shape: bf16[720,128], index: 1, kind: input, shape index: {}]   ;;  %s1013_s2 = inlined_call_operand.vmem [shape: f32[1,128], index: 2, kind: input, shape index: {}]   ;;  %s1014_s3 = inlined_call_operand.vmem [shape: bf16[2,128], index: 3, kind: output, shape index: {}]  }
   0x1   :  { %v756_v0 = vld [vmem:[%s1012_s1 + $0x78] sm:$0xff]   ;;  %545 = vmatprep.subr.bf16.mxu0 %v807_v2  ;;  %v758_v3 = vld [vmem:[%s1012_s1 + $0x70] sm:$0xff]   ;;  %v760_v5 = vld [vmem:[%s1012_s1 + $0x68] sm:$0xff]   ;;  %v125_v25 = vunpack.c.l.s4 %v808_v24 }
   0x2   :  { %v757_v1 = vld [vmem:[%s1012_s1 + $0x38] sm:$0xff]   ;;  %710 = vmatprep.subr.bf16.mxu1 %v756_v0  ;;  %v759_v4 = vld [vmem:[%s1012_s1 + $0x30] sm:$0xff]   ;;  %v761_v6 = vld [vmem:[%s1012_s1 + $0x28] sm:$0xff]   ;;  %v128_v22 = vshrl.u32 %v127_v16, 7 }
   0x3   :  { %711 = vmatpush3.bf16.msra.mxu1 %v757_v1  ;;  %v762_v7 = vld [vmem:[%s1012_s1 + $0x60] sm:$0xff]   ;;  %v764_v8 = vld [vmem:[%s1012_s1 + $0x138] sm:$0xff]   ;;  %v767_v10 = vld [vmem:[%s1012_s1 + $0x130] sm:$0xff]   ;;  %v126_v27 = vunpack.c.0.s8 %v125_v25 }
   0x4   :  { %712 = vmatprep.subr.bf16.mxu1 %v758_v3  ;;  %v763_v9 = vld [vmem:[%s1012_s1 + $0x20] sm:$0xff]   ;;  %546 = vmatpush1.bf16.msra.mxu0 %v764_v8  ;;  %v765_v11 = vld [vmem:[%s1012_s1 + $0x58] sm:$0xff]   ;;  %v770_v12 = vld [vmem:[%s1012_s1 + $0x128] sm:$0xff]  }
   0x5   :  { %547 = vmatprep.subr.bf16.mxu0 %v807_v2  ;;  %v766_v13 = vld [vmem:[%s1012_s1 + $0x18] sm:$0xff]   ;;  %v768_v14 = vld [vmem:[%s1012_s1 + $0x50] sm:$0xff]   ;;  %v773_v15 = vld [vmem:[%s1012_s1 + $0x120] sm:$0xff]   ;;  %v907_v30 = vsub.s32 %v126_v27, %v128_v22 }
   0x6   :  { %v769_v17 = vld [vmem:[%s1012_s1 + $0x10] sm:$0xff]   ;;  %v771_v18 = vld [vmem:[%s1012_s1 + $0x48] sm:$0xff]   ;;  %v774_v20 = vld [vmem:[%s1012_s1 + $0x40] sm:$0xff]  }
   0x7   :  { %713 = vmatpush3.bf16.msra.mxu1 %v759_v4  ;;  %v772_v19 = vld [vmem:[%s1012_s1 + $0x8] sm:$0xff]   ;;  %v776_v21 = vld [vmem:[%s1012_s1 + $0x118] sm:$0xff]   ;;  %v783_v28 = vld [vmem:[%s1012_s1 + $0x110] sm:$0xff]  }
   0x8   :  { %714 = vmatprep.subr.bf16.mxu1 %v760_v5  ;;  %548 = vmatpush1.bf16.msra.mxu0 %v767_v10  ;;  %v777_v23 = vld [vmem:[%s1011_s0] ss:$6 sps:$4 sm:$0xff]   ;;  %v779_v26 = vld [vmem:[%s1011_s0 + $0xc] ss:$6 sps:$4 sm:$0xff]   ;;  %v781_v31 = vld [vmem:[%s1012_s1 + $0xf8] sm:$0xff]  }
   0x9   :  { %549 = vmatprep.subr.bf16.mxu0 %v807_v2  ;;  %v775_v29 = vld [vmem:[%s1012_s1] sm:$0xff]   ;;  %v130_v32 = vrot.slane %v777_v23, %v907_v30  ;;  %v144_v33 = vrot.slane %v779_v26, %v907_v30  ;;  %v786_v34 = vld [vmem:[%s1012_s1 + $0x108] sm:$0xff]   ;;  %v782_v37 = vld [vmem:[%s1012_s1 + $0xb8] sm:$0xff]  }
   0xa   :  { %v789_v40 = vld [vmem:[%s1012_s1 + $0x100] sm:$0xff]   ;;  %v784_v41 = vld [vmem:[%s1012_s1 + $0xf0] sm:$0xff]   ;;  %v787_v45 = vld [vmem:[%s1012_s1 + $0xe8] sm:$0xff]  }
   0xb   :  { %715 = vmatpush3.bf16.msra.mxu1 %v761_v6  ;;  %v153_v35 = vcombine.high %v130_v32, %v144_v33  ;;  %v152_v36 = vcombine.low %v130_v32, %v144_v33  ;;  %v785_v43 = vld [vmem:[%s1012_s1 + $0xb0] sm:$0xff]   ;;  %v792_v44 = vld [vmem:[%s1012_s1 + $0x160] sm:$0xff]   ;;  %v788_v46 = vld [vmem:[%s1012_s1 + $0xa8] sm:$0xff]  }
   0xc   :  { %716 = vmatprep.subr.bf16.mxu1 %v762_v7  ;;  %550 = vmatpush1.bf16.msra.mxu0 %v770_v12  ;;  %v795_v47 = vld [vmem:[%s1012_s1 + $0x158] sm:$0xff]   ;;  %v790_v48 = vld [vmem:[%s1012_s1 + $0xe0] sm:$0xff]   ;;  %v798_v50 = vld [vmem:[%s1012_s1 + $0x150] sm:$0xff]  }
   0xd   :  { %551 = vmatprep.subr.bf16.mxu0 %v807_v2  ;;  %v176_v38 = vrot.slane %v153_v35, %v907_v30  ;;  %v923_v39 = vrot.slane %v152_v36, %v907_v30  ;;  %v791_v49 = vld [vmem:[%s1012_s1 + $0xa0] sm:$0xff]   ;;  %v793_v51 = vld [vmem:[%s1012_s1 + $0xd8] sm:$0xff]   ;;  %v806_v53 = vld [vmem:[%s1011_s0 + $0x10] ss:$6 sps:$4 sm:$0x33]  }
   0xe   :  { %v805_v52 = vld [vmem:[%s1011_s0 + $0x4] ss:$6 sps:$4 sm:$0x33]   ;;  %v794_v55 = vld [vmem:[%s1012_s1 + $0x98] sm:$0xff]   ;;  %v151_v57 = vrot.slane %v806_v53, %v907_v30  ;;  %v796_v58 = vld [vmem:[%s1012_s1 + $0xd0] sm:$0xff]  }
   0xf   :  { %717 = vmatpush3.bf16.msra.mxu1 %v763_v9  ;;  %v185_v42 = vcombine.high %v176_v38, %v176_v38  ;;  %497 = vmatprep.mubr.bf16.mxu1 %v176_v38  ;;  %v137_v54 = vrot.slane %v805_v52, %v907_v30  ;;  %v801_v56 = vld [vmem:[%s1012_s1 + $0x148] sm:$0xff]   ;;  %v797_v61 = vld [vmem:[%s1012_s1 + $0x90] sm:$0xff]   ;;  %v804_v62 = vld [vmem:[%s1012_s1 + $0x140] sm:$0xff]   ;;  %v184_v5 = vcombine.high %v923_v39, %v923_v39 }
  0x10   :  { %718 = vmatprep.subr.bf16.mxu1 %v765_v11  ;;  %552 = vmatpush1.bf16.msra.mxu0 %v773_v15  ;;  %v799_v0 = vld [vmem:[%s1012_s1 + $0xc8] sm:$0xff]   ;;  %v802_v4 = vld [vmem:[%s1012_s1 + $0xc0] sm:$0xff]  }
  0x11   :  { %553 = vmatprep.subr.bf16.mxu0 %v807_v2  ;;  %v155_v59 = vcombine.high %v137_v54, %v151_v57  ;;  %v154_v60 = vcombine.low %v137_v54, %v151_v57  ;;  %v800_v3 = vld [vmem:[%s1012_s1 + $0x88] sm:$0xff]   ;;  %v661_v15 = vld [vmem:[%s1013_s2] ss:$0 sm:$0xff] }
  0x13   :  { %719 = vmatpush3.bf16.msra.mxu1 %v766_v13  ;;  %v183_v63 = vrot.slane %v155_v59, %v907_v30  ;;  %v169_v1 = vrot.slane %v154_v60, %v907_v30 }
  0x14   :  { %720 = vmatprep.subr.bf16.mxu1 %v768_v14  ;;  %554 = vmatpush1.bf16.msra.mxu0 %v776_v21 }
  0x15   :  { %555 = vmatprep.subr.bf16.mxu0 %v807_v2  ;;  %707 = vmatprep.mubr.msk.bf16.mxu0 %vm461_vm0, %v183_v63 }
  0x17   :  { %721 = vmatpush3.bf16.msra.mxu1 %v769_v17 }
  0x18   :  { %722 = vmatprep.subr.bf16.mxu1 %v771_v18  ;;  %556 = vmatpush1.bf16.msra.mxu0 %v783_v28 }
  0x19   :  { %557 = vmatprep.subr.bf16.mxu0 %v807_v2 }
  0x1b   :  { %723 = vmatpush3.bf16.msra.mxu1 %v772_v19 }
  0x1c   :  { %724 = vmatprep.subr.bf16.mxu1 %v774_v20  ;;  %558 = vmatpush1.bf16.msra.mxu0 %v786_v34 }
  0x1d   :  { %559 = vmatprep.subr.bf16.mxu0 %v807_v2 }
  0x1f   :  { %725 = vmatpush3.bf16.msra.mxu1 %v775_v29 }
  0x20   :  { %732 = vmatprep.subr.bf16.mxu1 %v781_v31  ;;  %560 = vmatpush1.bf16.msra.mxu0 %v789_v40 }
  0x21   :  { %567 = vmatprep.subr.bf16.mxu0 %v807_v2 }
  0x22   :  { %498 = vmatmul.mubr.bf16.vlgmr.msra.gmra.mxu1 %v923_v39 }
  0x23   :  { %733 = vmatpush3.bf16.msra.mxu1 %v782_v37  ;;  %537 = vmatprep.mubr.bf16.mxu1 %v185_v42 }
  0x24   :  { %734 = vmatprep.subr.bf16.mxu1 %v784_v41  ;;  %568 = vmatpush2.bf16.msra.mxu0 %v792_v44 }
  0x25   :  { %569 = vmatprep.subr.bf16.mxu0 %v807_v2 }
  0x27   :  { %735 = vmatpush3.bf16.msra.mxu1 %v785_v43 }
  0x28   :  { %736 = vmatprep.subr.bf16.mxu1 %v787_v45  ;;  %570 = vmatpush2.bf16.msra.mxu0 %v795_v47 }
  0x29   :  { %571 = vmatprep.subr.bf16.mxu0 %v807_v2 }
  0x2b   :  { %737 = vmatpush3.bf16.msra.mxu1 %v788_v46 }
  0x2c   :  { %738 = vmatprep.subr.bf16.mxu1 %v790_v48  ;;  %572 = vmatpush2.bf16.msra.mxu0 %v798_v50 }
  0x2d   :  { %573 = vmatprep.subr.bf16.mxu0 %v807_v2 }
  0x2f   :  { %739 = vmatpush3.bf16.msra.mxu1 %v791_v49 }
  0x30   :  { %740 = vmatprep.subr.bf16.mxu1 %v793_v51  ;;  %574 = vmatpush2.bf16.msra.mxu0 %v801_v56 }
  0x31   :  { %575 = vmatprep.subr.bf16.mxu0 %v807_v2  ;;  %v803_v2 = vld [vmem:[%s1012_s1 + $0x80] sm:$0xff]  }
  0x33   :  { %741 = vmatpush3.bf16.msra.mxu1 %v794_v55 }
  0x34   :  { %742 = vmatprep.subr.bf16.mxu1 %v796_v58  ;;  %576 = vmatpush2.bf16.msra.mxu0 %v804_v62 }
  0x37   :  { %743 = vmatpush3.bf16.msra.mxu1 %v797_v61  ;;  %578 = vmatmul.mubr.bf16.vlgmr.msra.gmra.mxu0 %v169_v1 }
  0x38   :  { %744 = vmatprep.subr.bf16.mxu1 %v799_v0 }
  0x3b   :  { %745 = vmatpush3.bf16.msra.mxu1 %v800_v3 }
  0x3c   :  { %746 = vmatprep.subr.bf16.mxu1 %v802_v4 }
  0x3f   :  { %747 = vmatpush3.bf16.msra.mxu1 %v803_v2 }
  0x42   :  { %538 = vmatmul.mubr.bf16.vlgmr.msra.gmra.mxu1 %v184_v5 }
  0xe2   :  { %v726_v6 = vpop.f32.mrf.mxu1 }
  0xe4   :  { %v727_v7 = vpop.f32.mrf.mxu1 }
  0xe5   :  { %v728_v14 = vadd.f32 %v727_v7, %v726_v6 }
  0xe6   :  { %v729_v8 = vpop.f32.mrf.mxu1 }
  0xe7   :  { %v500_v18 = vadd.f32 %v728_v14, %v661_v15 }
  0xe8   :  { %v730_v9 = vpop.f32.mrf.mxu1 }
  0xf7   :  { %v579_v10 = vpop.f32.mrf.mxu0 }
  0xf9   :  { %v581_v11 = vpop.f32.mrf.mxu0 }
  0xfb   :  { %v582_v12 = vpop.f32.mrf.mxu0 }
  0xfd   :  { %v583_v13 = vpop.f32.mrf.mxu0 }
 0x102   :  { %v748_v16 = vpop.f32.mrf.mxu1 }
 0x104   :  { %v749_v17 = vpop.f32.mrf.mxu1 }
 0x105   :  { %v750_v19 = vadd.f32 %v749_v17, %v748_v16 }
 0x106   :  { %v751_v20 = vpop.f32.mrf.mxu1 }
 0x107   :  { %v540_v21 = vadd.f32 %v750_v19, %v500_v18 }
 0x108   :  { %v752_v22 = vpop.f32.mrf.mxu1 }
 0x109   :  { %v580_v23 = vadd.f32 %v579_v10, %v540_v21 }
 0x10b   :  { %v585_v24 = vmax.f32 %v580_v23, 0.0 }
 0x10d   :  { %v586_v25 = vpack.c.bf16 %v585_v24, %v585_v24 }
 0x10f   :  { %v594_v26 = vrot.slane %v586_v25, %v907_v30 }
 0x111   :  { %708 = vst.sshfl [vmem:[#allocation2] sm:$0x1 pattern:$0x73625140] %v594_v26 }
 0x118   :  { %v638_v27 = vld [vmem:[#allocation2] sm:$0x1] }
 0x119   :  { %639 = vst [vmem:[%s1014_s3] sm:$0x1] %v638_v27 }

// kernel: dfanet_forward.85
= control target key start
LH: loop header
LB: loop body
LE: loop exit
PB: predicated region body
PF: predicated region fallthrough
CT: control target
= control target key end

     0   :  { %v23_v1 = vlaneseq  ;;  %v205_v3 = vmov 0   ;;  %v206_v9 = vmov 1966171168   ;;  %vm71_vm0 = vcmask 130048   ;;  %s251_s0 = inlined_call_operand.vmem [shape: bf16[2,16], index: 0, kind: input, shape index: {}]   ;;  %s252_s1 = inlined_call_operand.vmem [shape: bf16[16,256], index: 1, kind: input, shape index: {}]   ;;  %s253_s2 = inlined_call_operand.vmem [shape: f32[1,256], index: 2, kind: input, shape index: {}]   ;;  %s254_s3 = inlined_call_operand.vmem [shape: bf16[2,256], index: 3, kind: output, shape index: {}]  }
   0x1   :  { %v202_v0 = vld [vmem:[%s252_s1 + $0x4] ss:$8 sps:$4 sm:$0xff]   ;;  %v204_v2 = vld [vmem:[%s252_s1] ss:$8 sps:$4 sm:$0xff]   ;;  %107 = vmatprep.mubr.bf16.mxu0 %v205_v3  ;;  %v40_v10 = vunpack.c.l.s4 %v206_v9 }
   0x2   :  { %89 = vmatprep.subr.bf16.mxu0 %v202_v0  ;;  %v15_v4 = vld [vmem:[%s251_s0] sm:$0x1]  ;;  %v16_v5 = vld [vmem:[%s251_s0 + $0x1] sm:$0x1]  ;;  %v17_v6 = vld [vmem:[%s251_s0 + $0x2] sm:$0x1] }
   0x3   :  { %90 = vmatpush1.bf16.msra.mxu0 %v204_v2  ;;  %v18_v7 = vld [vmem:[%s251_s0 + $0x3] sm:$0x1]  ;;  %v24_v8 = vshrl.u32 %v23_v1, 7  ;;  %v37_v11 = vcombine.low %v15_v4, %v16_v5  ;;  %v41_v13 = vunpack.c.0.s8 %v40_v10  ;;  %v21_v21 = vld [vmem:[%s253_s2] sm:$0x3] }
   0x4   :  { %v38_v12 = vcombine.low %v17_v6, %v18_v7 }
   0x5   :  { %v44_v14 = vsub.s32 %v41_v13, %v24_v8  ;;  %v25_v19 = vsub.s32 0, %v24_v8  ;;  %v29_v20 = vsub.s32 1, %v24_v8 }
   0x7   :  { %v45_v15 = vrot.slane %v37_v11, %v44_v14  ;;  %v52_v16 = vrot.slane %v38_v12, %v44_v14  ;;  %v26_v22 = vrot.slane %v21_v21, %v25_v19  ;;  %v30_v23 = vrot.slane %v21_v21, %v29_v20 }
   0x9   :  { %v53_v17 = vcombine.low %v45_v15, %v52_v16 }
   0xb   :  { %v60_v18 = vrot.slane %v53_v17, %v44_v14 }
   0xd   :  { %196 = vmatmul.mubr.msk.bf16.vlgmr.msra.gmra.mxu0 %vm71_vm0, %v60_v18 }
  0xcd   :  { %v109_v24 = vpop.f32.mrf.mxu0 }
  0xce   :  { %v110_v26 = vadd.f32 %v109_v24, %v26_v22 }
  0xcf   :  { %v111_v25 = vpop.f32.mrf.mxu0 }
  0xd0   :  { %v112_v27 = vadd.f32 %v111_v25, %v30_v23 }
  0xd1   :  { %v113_v28 = vpop.f32.mrf.mxu0 }
  0xd2   :  { %v197_v29 = vpack.c.bf16 %v112_v27, %v110_v26 }
  0xd3   :  { %v114_v30 = vpop.f32.mrf.mxu0 }
  0xd4   :  { %v127_v31 = vrot.slane %v197_v29, %v44_v14 }
  0xd6   :  { %198 = vst.sshfl [vmem:[#allocation2] sm:$0x5 pattern:$0x73625140] %v127_v31 }
  0xdd   :  { %v171_v32 = vld [vmem:[#allocation2] sm:$0x3] }
  0xde   :  { %172 = vst [vmem:[%s254_s3] sm:$0x3] %v171_v32 }

// kernel: dfanet_forward.86
= control target key start
LH: loop header
LB: loop body
LE: loop exit
PB: predicated region body
PF: predicated region fallthrough
CT: control target
= control target key end

     0   :  { %s407_s9 = smov 0   ;;  %s409_s10 = smov 0   ;;  %s443_s0 = inlined_call_operand.vmem [shape: bf16[16,1], index: 0, kind: input, shape index: {}]   ;;  %s444_s1 = inlined_call_operand.vmem [shape: bf16[2,1,256], index: 1, kind: input, shape index: {}]   ;;  %s445_s2 = inlined_call_operand.vmem [shape: bf16[2,16,256], index: 2, kind: output, shape index: {}]  }
   0x1   :  { %s411_s11 = smov 0  }
   0x2 LB: > { %s24_s12 = sadd.s32 1, %s385_s10  ;;  %p321_p0 = scmp.ge.s32.totalorder %s389_s11, 1  ;;  %s389_s11 = sphi %s411_s11, %s12_s11   ;;  %s385_s10 = sphi %s409_s10, %s447_s10   ;;  %s381_s9 = sphi %s407_s9, %s446_s9  }
   0x3   : > { %p26_p1 = scmp.ge.s32.totalorder %s24_s12, 2  ;;  %p132_p2 = scmp.lt.s32.totalorder %s389_s11, 3 }
   0x5   : > { %s449_s12 = smov (%p26_p1, %s24_s12), 0  ;;  %p133_p3 = pnand %p321_p0, %p132_p2 }
   0x6   : > { %p162_p4 = scmp.lt.s32.totalorder (!%p133_p3), %s381_s9, 1 }
   0x7   : > { %136 = sbr.rel (%p133_p3) target bundleno = 148 (0x94), region = 28 }
   0xc   : > { %v333_v0 = vld [vmem:[%s443_s0] sm:$0xff]   ;;  %v391_v1 = vmov 0   ;;  %s451_s9 = smov (!%p162_p4, %s381_s9), 1  ;;  %v197_v5 = vlaneseq }
   0xd   : > { %361 = vset.pattern.permute.xlu0 %v391_v1  ;;  %v334_v2 = vunpack.c.l.bf16 %v333_v0  ;;  %v335_v3 = vunpack.c.h.bf16 %v333_v0  ;;  %s322_s15 = sshll.u32 %s451_s9, 1  ;;  %s329_s19 = sshll.u32 %s451_s9, 4 }
   0xe   : > { %s168_s18 = scalar_lea.vmem %s444_s1, %s322_s15  ;;  %v198_v6 = vshrl.u32 %v197_v5, 7  ;;  %s178_s22 = scalar_lea.vmem %s445_s2, %s329_s19 }
   0xf   : > { %v362_v4 = vpack.i.bf16 %v335_v3, %v334_v2  ;;  %v182_v7 = vld [vmem:[%s168_s18] sm:$0x3] }
  0x10   : > { %v199_v8 = vsub.s32 0, %v198_v6  ;;  %v203_v9 = vsub.s32 2, %v198_v6  ;;  %v185_v10 = vunpack.c.l.bf16 %v182_v7 }
  0x11   : > { %363 = vperm.xlu0 %361, %v362_v4  }
  0x12   : > { %v200_v11 = vrot.slane %v185_v10, %v199_v8  ;;  %v204_v12 = vrot.slane %v185_v10, %v203_v9 }
  0x14   : > { %v210_v13 = vrot.slane %v200_v11, %v199_v8  ;;  %v214_v14 = vrot.slane %v204_v12, %v199_v8 }
  0x8c   : > { %v364_v15 = vpop.permute.xlu0 %363 }
  0x8d   : > { %v366_v16 = vunpack.i.h.bf16 %v364_v15  ;;  %v365_v17 = vunpack.i.l.bf16 %v364_v15 }
  0x8f   : > { %v215_v18 = vmul.f32 %v365_v17, %v210_v13  ;;  %v216_v19 = vmul.f32 %v365_v17, %v214_v14  ;;  %v217_v20 = vmul.f32 %v366_v16, %v210_v13  ;;  %v218_v21 = vmul.f32 %v366_v16, %v214_v14 }
  0x91   : > { %v330_v22 = vpack.c.bf16 %v216_v19, %v215_v18  ;;  %v331_v23 = vpack.c.bf16 %v218_v21, %v217_v20 }
  0x93   : > { %231 = vst [vmem:[%s178_s22] sm:$0xff] %v330_v22  ;;  %232 = vst [vmem:[%s178_s22 + $0x8] sm:$0xff] %v331_v23 }
  0x94 PF: > { %s12_s11 = sadd.s32 1, %s389_s11   ;;  %s446_s9 = smov %s385_s10 }
  0x95   : > { %p9_p5 = scmp.ge.s32.totalorder %s12_s11, 4   ;;  %s447_s10 = smov %s449_s12 }
  0x97   :  { %11 = sbr.rel (!%p9_p5) target bundleno = 2 (0x2), region = 58 }

// kernel: dfanet_forward.75
= control target key start
LH: loop header
LB: loop body
LE: loop exit
PB: predicated region body
PF: predicated region fallthrough
CT: control target
= control target key end

     0   :  { %vm44_vm0 = vcmask 130048   ;;  %s199_s1 = inlined_call_operand.vmem [shape: bf16[16,128], index: 1, kind: input, shape index: {}]   ;;  %s200_s0 = inlined_call_operand.vmem [shape: bf16[32,16], index: 0, kind: input, shape index: {}]   ;;  %s201_s2 = inlined_call_operand.vmem [shape: f32[1,128], index: 2, kind: input, shape index: {}]   ;;  %s202_s3 = inlined_call_operand.vmem [shape: bf16[32,128], index: 3, kind: output, shape index: {}]  }
   0x1   :  { %v158_v0 = vld [vmem:[%s199_s1] sm:$0xff]   ;;  %v160_v2 = vld [vmem:[%s200_s0 + $0x8] sm:$0xff]  }
   0x2   :  { %v159_v1 = vld [vmem:[%s200_s0] sm:$0xff]   ;;  %152 = vmatprep.subr.bf16.mxu0 %v158_v0 }
   0x3   :  { %153 = vmatpush3.bf16.msra.mxu0 %v158_v0  ;;  %154 = vmatprep.mubr.msk.bf16.mxu0 %vm44_vm0, %v159_v1  ;;  %v124_v4 = vld [vmem:[%s201_s2] ss:$0 sm:$0xff] }
   0x6   :  { %155 = vmatmul.mubr.msk.bf16.vlgmr.msra.gmra.mxu0 %vm44_vm0, %v160_v2 }
  0xc6   :  { %v156_v3 = vpop.f32.mrf.mxu0 }
  0xc7   :  { %v94_v7 = vadd.f32 %v156_v3, %v124_v4 }
  0xc8   :  { %v85_v5 = vpop.f32.mrf.mxu0 }
  0xc9   :  { %v86_v10 = vadd.f32 %v124_v4, %v85_v5 }
  0xca   :  { %v157_v6 = vpop.f32.mrf.mxu0 }
  0xcb   :  { %v97_v8 = vadd.f32 %v157_v6, %v124_v4 }
  0xcc   :  { %v88_v9 = vpop.f32.mrf.mxu0 }
  0xcd   :  { %v146_v11 = vpack.c.bf16 %v97_v8, %v94_v7  ;;  %v89_v12 = vadd.f32 %v124_v4, %v88_v9 }
  0xcf   :  { %148 = vst [vmem:[%s202_s3 + $0x8] sm:$0xff] %v146_v11   ;;  %v141_v13 = vpack.c.bf16 %v89_v12, %v86_v10 }
  0xd1   :  { %142 = vst [vmem:[%s202_s3] sm:$0xff] %v141_v13  }

// kernel: dfanet_forward.76
= control target key start
LH: loop header
LB: loop body
LE: loop exit
PB: predicated region body
PF: predicated region fallthrough
CT: control target
= control target key end

     0   :  { %v158_v1 = vmov 0   ;;  %vm76_vm0 = vcmask 523264   ;;  %v26_v10 = vlaneseq  ;;  %s212_s1 = inlined_call_operand.vmem [shape: bf16[64,256], index: 1, kind: input, shape index: {}]   ;;  %s213_s0 = inlined_call_operand.vmem [shape: bf16[8,64], index: 0, kind: input, shape index: {}]   ;;  %s214_s2 = inlined_call_operand.vmem [shape: f32[1,256], index: 2, kind: input, shape index: {}]   ;;  %s215_s3 = inlined_call_operand.vmem [shape: bf16[8,256], index: 3, kind: output, shape index: {}]  }
   0x1   :  { %v146_v0 = vld [vmem:[%s212_s1 + $0x34] ss:$8 sps:$4 sm:$0xff]   ;;  %112 = vmatprep.mubr.bf16.mxu0 %v158_v1  ;;  %v148_v2 = vld [vmem:[%s212_s1 + $0x30] ss:$8 sps:$4 sm:$0xff]   ;;  %v149_v3 = vld [vmem:[%s212_s1 + $0x24] ss:$8 sps:$4 sm:$0xff]  }
   0x2   :  { %88 = vmatprep.subr.bf16.mxu0 %v146_v0  ;;  %v151_v4 = vld [vmem:[%s212_s1 + $0x20] ss:$8 sps:$4 sm:$0xff]   ;;  %v152_v5 = vld [vmem:[%s212_s1 + $0x14] ss:$8 sps:$4 sm:$0xff]   ;;  %v154_v6 = vld [vmem:[%s212_s1 + $0x10] ss:$8 sps:$4 sm:$0xff]  }
   0x3   :  { %89 = vmatpush1.bf16.msra.mxu0 %v148_v2  ;;  %v155_v7 = vld [vmem:[%s212_s1 + $0x4] ss:$8 sps:$4 sm:$0xff]   ;;  %v157_v8 = vld [vmem:[%s212_s1] ss:$8 sps:$4 sm:$0xff]   ;;  %v27_v11 = vshrl.u32 %v26_v10, 7 }
   0x4   :  { %90 = vmatprep.subr.bf16.mxu0 %v149_v3  ;;  %v15_v9 = vld [vmem:[%s213_s0] sm:$0xf] }
   0x5   :  { %v28_v12 = vsub.s32 0, %v27_v11  ;;  %v32_v13 = vsub.s32 1, %v27_v11  ;;  %v24_v14 = vld [vmem:[%s214_s2] sm:$0x3] }
   0x7   :  { %91 = vmatpush1.bf16.msra.mxu0 %v151_v4  ;;  %v29_v15 = vrot.slane %v24_v14, %v28_v12  ;;  %v33_v16 = vrot.slane %v24_v14, %v32_v13 }
   0x8   :  { %92 = vmatprep.subr.bf16.mxu0 %v152_v5 }
   0xb   :  { %93 = vmatpush1.bf16.msra.mxu0 %v154_v6 }
   0xc   :  { %94 = vmatprep.subr.bf16.mxu0 %v155_v7 }
   0xf   :  { %95 = vmatpush1.bf16.msra.mxu0 %v157_v8 }
  0x12   :  { %142 = vmatmul.mubr.msk.bf16.vlgmr.msra.gmra.mxu0 %vm76_vm0, %v15_v9 }
  0xd2   :  { %v114_v17 = vpop.f32.mrf.mxu0 }
  0xd3   :  { %v115_v19 = vadd.f32 %v114_v17, %v29_v15 }
  0xd4   :  { %v116_v18 = vpop.f32.mrf.mxu0 }
  0xd5   :  { %v117_v20 = vadd.f32 %v116_v18, %v33_v16 }
  0xd6   :  { %v118_v21 = vpop.f32.mrf.mxu0 }
  0xd7   :  { %v144_v22 = vpack.c.bf16 %v117_v20, %v115_v19 }
  0xd8   :  { %v119_v23 = vpop.f32.mrf.mxu0 }
  0xd9   :  { %129 = vst [vmem:[%s215_s3] sm:$0xff] %v144_v22 }

// kernel: dfanet_forward.81
= control target key start
LH: loop header
LB: loop body
LE: loop exit
PB: predicated region body
PF: predicated region fallthrough
CT: control target
= control target key end

     0   :  { %v121_v0 = vmov 0.0   ;;  %vm122_vm0 = vmmov 0   ;;  %vm47_vm1 = vcmask 392192   ;;  %s161_s1 = inlined_call_operand.vmem [shape: bf16[48,128], index: 1, kind: input, shape index: {}]   ;;  %s162_s0 = inlined_call_operand.vmem [shape: bf16[8,48], index: 0, kind: input, shape index: {}]   ;;  %s163_s2 = inlined_call_operand.vmem [shape: f32[1,128], index: 2, kind: input, shape index: {}]   ;;  %s164_s3 = inlined_call_operand.vmem [shape: bf16[8,128], index: 3, kind: output, shape index: {}]  }
   0x1   :  { %106 = vmatprep.subr.bf16.mxu0 %v121_v0  ;;  %v118_v1 = vld [vmem:[%s161_s1 + $0x10] sm:$0xff]   ;;  %112 = vmatprep.mubr.msk.bf16.mxu0 %vm122_vm0, %v121_v0  ;;  %v119_v2 = vld [vmem:[%s161_s1 + $0x8] sm:$0xff]   ;;  %v120_v3 = vld [vmem:[%s161_s1] sm:$0xff]  }
   0x2   :  { %107 = vmatpush3.bf16.msra.mxu0 %v118_v1  ;;  %v15_v4 = vld [vmem:[%s162_s0] sm:$0xf] }
   0x3   :  { %108 = vmatprep.subr.bf16.mxu0 %v121_v0  ;;  %v97_v5 = vld [vmem:[%s163_s2] ss:$0 sm:$0xff] }
   0x6   :  { %109 = vmatpush3.bf16.msra.mxu0 %v119_v2 }
   0x7   :  { %110 = vmatprep.subr.bf16.mxu0 %v121_v0 }
   0xa   :  { %111 = vmatpush3.bf16.msra.mxu0 %v120_v3 }
   0xd   :  { %113 = vmatmul.mubr.msk.bf16.vlgmr.msra.gmra.mxu0 %vm47_vm1, %v15_v4 }
  0xcd   :  { %v85_v6 = vpop.f32.mrf.mxu0 }
  0xce   :  { %v86_v7 = vadd.f32 %v97_v5, %v85_v6 }
  0xcf   :  { %v114_v8 = vpop.f32.mrf.mxu0 }
  0xd0   :  { %v91_v9 = vpack.c.bf16 %v86_v7, %v86_v7 }
  0xd1   :  { %v88_v10 = vpop.f32.mrf.mxu0 }
  0xd2   :  { %92 = vst [vmem:[%s164_s3] sm:$0xf] %v91_v9 }
  0xd3   :  { %v115_v11 = vpop.f32.mrf.mxu0 }

// kernel: dfanet_forward.77
= control target key start
LH: loop header
LB: loop body
LE: loop exit
PB: predicated region body
PF: predicated region fallthrough
CT: control target
= control target key end

     0   :  { %s443_s9 = smov 0   ;;  %s445_s10 = smov 0   ;;  %s479_s0 = inlined_call_operand.vmem [shape: bf16[16,4], index: 0, kind: input, shape index: {}]   ;;  %s480_s1 = inlined_call_operand.vmem [shape: bf16[2,4,256], index: 1, kind: input, shape index: {}]   ;;  %s481_s2 = inlined_call_operand.vmem [shape: bf16[2,16,256], index: 2, kind: output, shape index: {}]  }
   0x1   :  { %s447_s11 = smov 0  }
   0x2 LB: > { %s24_s12 = sadd.s32 1, %s421_s10  ;;  %p360_p0 = scmp.ge.s32.totalorder %s425_s11, 1  ;;  %s425_s11 = sphi %s447_s11, %s12_s11   ;;  %s421_s10 = sphi %s445_s10, %s483_s10   ;;  %s417_s9 = sphi %s443_s9, %s482_s9  }
   0x3   : > { %p26_p1 = scmp.ge.s32.totalorder %s24_s12, 2  ;;  %p133_p2 = scmp.lt.s32.totalorder %s425_s11, 3 }
   0x5   : > { %s485_s12 = smov (%p26_p1, %s24_s12), 0  ;;  %p134_p3 = pnand %p360_p0, %p133_p2 }
   0x6   : > { %p164_p4 = scmp.lt.s32.totalorder (!%p134_p3), %s417_s9, 1 }
   0x7   : > { %137 = sbr.rel (%p134_p3) target bundleno = 224 (0xe0), region = 28 }
   0xc   : > { %v427_v0 = vmov 0   ;;  %s487_s9 = smov (!%p164_p4, %s417_s9), 1  ;;  %vm205_vm0 = vcmask 1041408   ;;  %v402_v4 = vld [vmem:[%s479_s0] sm:$0xff]   ;;  %vm201_vm1 = vcmask 31744  }
   0xd   : > { %244 = vmatprep.mubr.bf16.mxu0 %v427_v0  ;;  %s373_s13 = sshll.u32 %s487_s9, 2  ;;  %s374_s19 = sshll.u32 %s487_s9, 4 }
   0xe   : > { %s171_s16 = scalar_lea.vmem %s480_s1, %s373_s13  ;;  %s181_s22 = scalar_lea.vmem %s481_s2, %s374_s19 }
   0xf   : > { %v366_v1 = vld.sshfl [vmem:[%s171_s16] sm:$0x33 pattern:$0x76325410] }
  0x10   : > { %v200_v2 = vcombine.high %v366_v1, %v366_v1  ;;  %v207_v3 = vsel %vm205_vm0, %v366_v1, 0 }
  0x12   : > { %367 = vmatprep.subr.msk.bf16.mxu0 %vm205_vm0, %v200_v2 }
  0x13   : > { %227 = vmatpush1.bf16.msra.mxu0 %v207_v3 }
  0x16   : > { %368 = vmatmul.mubr.msk.bf16.vlgmr.msra.gmra.mxu0 %vm201_vm1, %v402_v4 }
  0xd6   : > { %v246_v5 = vpop.f32.mrf.mxu0 }
  0xd8   : > { %v248_v6 = vpop.f32.mrf.mxu0 }
  0xd9   : > { %v375_v7 = vpack.c.bf16 %v248_v6, %v246_v5 }
  0xda   : > { %v250_v8 = vpop.f32.mrf.mxu0 }
  0xdb   : > { %267 = vst [vmem:[%s181_s22] sm:$0xff] %v375_v7 }
  0xdc   : > { %v252_v9 = vpop.f32.mrf.mxu0 }
  0xdd   : > { %v376_v10 = vpack.c.bf16 %v252_v9, %v250_v8 }
  0xdf   : > { %268 = vst [vmem:[%s181_s22 + $0x8] sm:$0xff] %v376_v10 }
  0xe0 PF: > { %s12_s11 = sadd.s32 1, %s425_s11   ;;  %s482_s9 = smov %s421_s10 }
  0xe1   : > { %p9_p5 = scmp.ge.s32.totalorder %s12_s11, 4   ;;  %s483_s10 = smov %s485_s12 }
  0xe3   :  { %11 = sbr.rel (!%p9_p5) target bundleno = 2 (0x2), region = 58 }

// kernel: dfanet_forward.82
= control target key start
LH: loop header
LB: loop body
LE: loop exit
PB: predicated region body
PF: predicated region fallthrough
CT: control target
= control target key end

     0   :  { %v23_v1 = vlaneseq  ;;  %v181_v3 = vmov 0   ;;  %v182_v6 = vmov 1983009808   ;;  %vm63_vm0 = vcmask 261120   ;;  %s227_s0 = inlined_call_operand.vmem [shape: bf16[4,32], index: 0, kind: input, shape index: {}]   ;;  %s228_s1 = inlined_call_operand.vmem [shape: bf16[32,256], index: 1, kind: input, shape index: {}]   ;;  %s229_s2 = inlined_call_operand.vmem [shape: f32[1,256], index: 2, kind: input, shape index: {}]   ;;  %s230_s3 = inlined_call_operand.vmem [shape: bf16[4,256], index: 3, kind: output, shape index: {}]  }
   0x1   :  { %v175_v0 = vld [vmem:[%s228_s1 + $0x14] ss:$8 sps:$4 sm:$0xff]   ;;  %v177_v2 = vld [vmem:[%s228_s1 + $0x10] ss:$8 sps:$4 sm:$0xff]   ;;  %99 = vmatprep.mubr.bf16.mxu0 %v181_v3  ;;  %v178_v4 = vld [vmem:[%s228_s1 + $0x4] ss:$8 sps:$4 sm:$0xff]   ;;  %v37_v7 = vunpack.c.l.s4 %v182_v6 }
   0x2   :  { %79 = vmatprep.subr.bf16.mxu0 %v175_v0  ;;  %v15_v5 = vld [vmem:[%s227_s0] sm:$0x3]  ;;  %v16_v9 = vld [vmem:[%s227_s0 + $0x2] sm:$0x3]  ;;  %v24_v10 = vshrl.u32 %v23_v1, 7 }
   0x3   :  { %80 = vmatpush1.bf16.msra.mxu0 %v177_v2  ;;  %v180_v8 = vld [vmem:[%s228_s1] ss:$8 sps:$4 sm:$0xff]   ;;  %v35_v11 = vcombine.low %v15_v5, %v16_v9  ;;  %v38_v12 = vunpack.c.0.s8 %v37_v7 }
   0x4   :  { %81 = vmatprep.subr.bf16.mxu0 %v178_v4  ;;  %v25_v15 = vsub.s32 0, %v24_v10  ;;  %v29_v16 = vsub.s32 1, %v24_v10  ;;  %v21_v17 = vld [vmem:[%s229_s2] sm:$0x3] }
   0x5   :  { %v41_v13 = vsub.s32 %v38_v12, %v24_v10 }
   0x6   :  { %v26_v18 = vrot.slane %v21_v17, %v25_v15  ;;  %v30_v19 = vrot.slane %v21_v17, %v29_v16 }
   0x7   :  { %82 = vmatpush1.bf16.msra.mxu0 %v180_v8  ;;  %v42_v14 = vrot.slane %v35_v11, %v41_v13 }
   0xa   :  { %170 = vmatmul.mubr.msk.bf16.vlgmr.msra.gmra.mxu0 %vm63_vm0, %v42_v14 }
  0xca   :  { %v101_v20 = vpop.f32.mrf.mxu0 }
  0xcb   :  { %v102_v22 = vadd.f32 %v101_v20, %v26_v18 }
  0xcc   :  { %v103_v21 = vpop.f32.mrf.mxu0 }
  0xcd   :  { %v104_v23 = vadd.f32 %v103_v21, %v30_v19 }
  0xce   :  { %v105_v24 = vpop.f32.mrf.mxu0 }
  0xcf   :  { %v171_v25 = vpack.c.bf16 %v104_v23, %v102_v22 }
  0xd0   :  { %v106_v26 = vpop.f32.mrf.mxu0 }
  0xd1   :  { %172 = vst.sshfl [vmem:[#allocation2] sm:$0x33 pattern:$0x76325410] %v171_v25 }
  0xd8   :  { %v143_v27 = vld [vmem:[#allocation2] sm:$0xf] }
  0xd9   :  { %144 = vst [vmem:[%s230_s3] sm:$0xf] %v143_v27 }

// kernel: dfanet_forward.83
= control target key start
LH: loop header
LB: loop body
LE: loop exit
PB: predicated region body
PF: predicated region fallthrough
CT: control target
= control target key end

     0   :  { %s451_s9 = smov 0   ;;  %s453_s10 = smov 0   ;;  %s487_s0 = inlined_call_operand.vmem [shape: bf16[16,2], index: 0, kind: input, shape index: {}]   ;;  %s488_s1 = inlined_call_operand.vmem [shape: bf16[2,2,256], index: 1, kind: input, shape index: {}]   ;;  %s489_s2 = inlined_call_operand.vmem [shape: bf16[2,16,256], index: 2, kind: output, shape index: {}]  }
   0x1   :  { %s455_s11 = smov 0  }
   0x2 LB: > { %s24_s12 = sadd.s32 1, %s428_s10  ;;  %p368_p0 = scmp.ge.s32.totalorder %s432_s11, 1  ;;  %s432_s11 = sphi %s455_s11, %s12_s11   ;;  %s428_s10 = sphi %s453_s10, %s491_s10   ;;  %s424_s9 = sphi %s451_s9, %s490_s9  }
   0x3   : > { %p26_p1 = scmp.ge.s32.totalorder %s24_s12, 2  ;;  %p132_p2 = scmp.lt.s32.totalorder %s432_s11, 3 }
   0x5   : > { %s493_s12 = smov (%p26_p1, %s24_s12), 0  ;;  %p133_p3 = pnand %p368_p0, %p132_p2 }
   0x6   : > { %p162_p4 = scmp.lt.s32.totalorder (!%p133_p3), %s424_s9, 1 }
   0x7   : > { %136 = sbr.rel (%p133_p3) target bundleno = 227 (0xe3), region = 28 }
   0xc   : > { %v201_v0 = vlaneseq  ;;  %v434_v1 = vmov 1966171168   ;;  %v435_v3 = vmov 0   ;;  %s495_s9 = smov (!%p162_p4, %s424_s9), 1  ;;  %vm216_vm0 = vcmask 1040384   ;;  %v409_v12 = vld [vmem:[%s487_s0] sm:$0xff]  }
   0xd   : > { %v199_v2 = vunpack.c.l.s4 %v434_v1  ;;  %255 = vmatprep.mubr.bf16.mxu0 %v435_v3  ;;  %s369_s13 = sshll.u32 %s495_s9, 1  ;;  %vm212_vm1 = vcmask 15360   ;;  %s380_s19 = sshll.u32 %s495_s9, 4 }
   0xe   : > { %v202_v4 = vshrl.u32 %v201_v0, 7  ;;  %s168_s16 = scalar_lea.vmem %s488_s1, %s369_s13  ;;  %s178_s22 = scalar_lea.vmem %s489_s2, %s380_s19 }
   0xf   : > { %v200_v5 = vunpack.c.0.s8 %v199_v2  ;;  %v373_v7 = vld.sshfl [vmem:[%s168_s16] sm:$0x11 pattern:$0x75316420] }
  0x10   : > { %v197_v8 = vcombine.high %v373_v7, %v373_v7 }
  0x11   : > { %v203_v6 = vsub.s32 %v200_v5, %v202_v4 }
  0x13   : > { %v204_v9 = vrot.slane %v373_v7, %v203_v6  ;;  %v211_v10 = vrot.slane %v197_v8, %v203_v6 }
  0x15   : > { %v218_v11 = vsel %vm216_vm0, %v204_v9, 0  ;;  %374 = vmatprep.subr.msk.bf16.mxu0 %vm216_vm0, %v211_v10 }
  0x16   : > { %238 = vmatpush1.bf16.msra.mxu0 %v218_v11 }
  0x19   : > { %375 = vmatmul.mubr.msk.bf16.vlgmr.msra.gmra.mxu0 %vm212_vm1, %v409_v12 }
  0xd9   : > { %v257_v13 = vpop.f32.mrf.mxu0 }
  0xdb   : > { %v259_v14 = vpop.f32.mrf.mxu0 }
  0xdc   : > { %v381_v15 = vpack.c.bf16 %v259_v14, %v257_v13 }
  0xdd   : > { %v261_v16 = vpop.f32.mrf.mxu0 }
  0xde   : > { %278 = vst [vmem:[%s178_s22] sm:$0xff] %v381_v15 }
  0xdf   : > { %v263_v17 = vpop.f32.mrf.mxu0 }
  0xe0   : > { %v382_v18 = vpack.c.bf16 %v263_v17, %v261_v16 }
  0xe2   : > { %279 = vst [vmem:[%s178_s22 + $0x8] sm:$0xff] %v382_v18 }
  0xe3 PF: > { %s12_s11 = sadd.s32 1, %s432_s11   ;;  %s490_s9 = smov %s428_s10 }
  0xe4   : > { %p9_p5 = scmp.ge.s32.totalorder %s12_s11, 4   ;;  %s491_s10 = smov %s493_s12 }
  0xe6   :  { %11 = sbr.rel (!%p9_p5) target bundleno = 2 (0x2), region = 58 }

// kernel: dfanet_forward.72
= control target key start
LH: loop header
LB: loop body
LE: loop exit
PB: predicated region body
PF: predicated region fallthrough
CT: control target
= control target key end

     0   :  { %vm86_vm0 = vcmask 130048   ;;  %s509_s1 = inlined_call_operand.vmem [shape: bf16[16,128], index: 1, kind: input, shape index: {}]   ;;  %s510_s0 = inlined_call_operand.vmem [shape: bf16[128,16], index: 0, kind: input, shape index: {}]   ;;  %s511_s2 = inlined_call_operand.vmem [shape: f32[1,128], index: 2, kind: input, shape index: {}]   ;;  %s512_s3 = inlined_call_operand.vmem [shape: bf16[128,128], index: 3, kind: output, shape index: {}]  }
   0x1   :  { %v418_v0 = vld [vmem:[%s509_s1] sm:$0xff]   ;;  %v421_v3 = vld [vmem:[%s510_s0 + $0x8] sm:$0xff]   ;;  %v423_v5 = vld [vmem:[%s510_s0 + $0x10] sm:$0xff]  }
   0x2   :  { %v419_v1 = vld [vmem:[%s510_s0] sm:$0xff]   ;;  %398 = vmatprep.subr.bf16.mxu0 %v418_v0  ;;  %416 = vmatprep.subr.bf16.mxu1 %v418_v0  ;;  %v422_v4 = vld [vmem:[%s510_s0 + $0x28] sm:$0xff]   ;;  %v424_v6 = vld [vmem:[%s510_s0 + $0x30] sm:$0xff]  }
   0x3   :  { %v420_v2 = vld [vmem:[%s510_s0 + $0x20] sm:$0xff]   ;;  %399 = vmatpush3.bf16.msra.mxu0 %v418_v0  ;;  %417 = vmatpush3.bf16.msra.mxu1 %v418_v0  ;;  %v425_v7 = vld [vmem:[%s510_s0 + $0x18] sm:$0xff]  }
   0x4   :  { %400 = vmatprep.mubr.msk.bf16.mxu0 %vm86_vm0, %v419_v1  ;;  %408 = vmatprep.mubr.msk.bf16.mxu1 %vm86_vm0, %v420_v2  ;;  %v426_v8 = vld [vmem:[%s510_s0 + $0x38] sm:$0xff]   ;;  %v292_v11 = vld [vmem:[%s511_s2] ss:$0 sm:$0xff] }
   0x6   :  { %401 = vmatmul.mubr.msk.bf16.vlgmr.msra.gmra.mxu0 %vm86_vm0, %v421_v3  ;;  %409 = vmatmul.mubr.msk.bf16.vlgmr.msra.gmra.mxu1 %vm86_vm0, %v422_v4 }
   0x7   :  { %404 = vmatprep.mubr.msk.bf16.mxu0 %vm86_vm0, %v423_v5  ;;  %412 = vmatprep.mubr.msk.bf16.mxu1 %vm86_vm0, %v424_v6 }
   0xe   :  { %405 = vmatmul.mubr.msk.bf16.gmra.mxu0 %vm86_vm0, %v425_v7  ;;  %413 = vmatmul.mubr.msk.bf16.gmra.mxu1 %vm86_vm0, %v426_v8 }
  0xc6   :  { %v402_v9 = vpop.f32.mrf.mxu0  ;;  %v410_v10 = vpop.f32.mrf.mxu1 }
  0xc7   :  { %v154_v16 = vadd.f32 %v402_v9, %v292_v11  ;;  %v186_v17 = vadd.f32 %v410_v10, %v292_v11 }
  0xc8   :  { %v145_v12 = vpop.f32.mrf.mxu0  ;;  %v177_v13 = vpop.f32.mrf.mxu1 }
  0xc9   :  { %v146_v20 = vadd.f32 %v292_v11, %v145_v12  ;;  %v178_v21 = vadd.f32 %v292_v11, %v177_v13 }
  0xca   :  { %v403_v14 = vpop.f32.mrf.mxu0  ;;  %v411_v15 = vpop.f32.mrf.mxu1 }
  0xcb   :  { %v157_v18 = vadd.f32 %v403_v14, %v292_v11  ;;  %v189_v19 = vadd.f32 %v411_v15, %v292_v11 }
  0xcc   :  { %v148_v22 = vpop.f32.mrf.mxu0  ;;  %v180_v23 = vpop.f32.mrf.mxu1 }
  0xcd   :  { %v350_v24 = vpack.c.bf16 %v157_v18, %v154_v16  ;;  %v370_v25 = vpack.c.bf16 %v189_v19, %v186_v17  ;;  %v149_v26 = vadd.f32 %v292_v11, %v148_v22  ;;  %v181_v27 = vadd.f32 %v292_v11, %v180_v23 }
  0xce   :  { %v406_v28 = vpop.f32.mrf.mxu0  ;;  %v414_v29 = vpop.f32.mrf.mxu1 }
  0xcf   :  { %382 = vst [vmem:[%s512_s3 + $0x8] sm:$0xff] %v350_v24   ;;  %386 = vst [vmem:[%s512_s3 + $0x28] sm:$0xff] %v370_v25   ;;  %v345_v30 = vpack.c.bf16 %v149_v26, %v146_v20  ;;  %v365_v31 = vpack.c.bf16 %v181_v27, %v178_v21  ;;  %v170_v36 = vadd.f32 %v406_v28, %v292_v11 }
  0xd0   :  { %v161_v32 = vpop.f32.mrf.mxu0  ;;  %v193_v33 = vpop.f32.mrf.mxu1  ;;  %v202_v37 = vadd.f32 %v414_v29, %v292_v11 }
  0xd1   :  { %346 = vst [vmem:[%s512_s3] sm:$0xff] %v345_v30   ;;  %385 = vst [vmem:[%s512_s3 + $0x20] sm:$0xff] %v365_v31   ;;  %v162_v40 = vadd.f32 %v292_v11, %v161_v32  ;;  %v194_v41 = vadd.f32 %v292_v11, %v193_v33 }
  0xd2   :  { %v407_v34 = vpop.f32.mrf.mxu0  ;;  %v415_v35 = vpop.f32.mrf.mxu1 }
  0xd3   :  { %v173_v38 = vadd.f32 %v407_v34, %v292_v11  ;;  %v205_v39 = vadd.f32 %v415_v35, %v292_v11 }
  0xd4   :  { %v164_v42 = vpop.f32.mrf.mxu0  ;;  %v196_v43 = vpop.f32.mrf.mxu1 }
  0xd5   :  { %v360_v44 = vpack.c.bf16 %v173_v38, %v170_v36  ;;  %v380_v45 = vpack.c.bf16 %v205_v39, %v202_v37  ;;  %v165_v46 = vadd.f32 %v292_v11, %v164_v42  ;;  %v197_v47 = vadd.f32 %v292_v11, %v196_v43 }
  0xd7   :  { %384 = vst [vmem:[%s512_s3 + $0x18] sm:$0xff] %v360_v44   ;;  %388 = vst [vmem:[%s512_s3 + $0x38] sm:$0xff] %v380_v45   ;;  %v355_v48 = vpack.c.bf16 %v165_v46, %v162_v40  ;;  %v375_v49 = vpack.c.bf16 %v197_v47, %v194_v41 }
  0xd9   :  { %383 = vst [vmem:[%s512_s3 + $0x10] sm:$0xff] %v355_v48   ;;  %387 = vst [vmem:[%s512_s3 + $0x30] sm:$0xff] %v375_v49  }

// kernel: dfanet_forward.74
= control target key start
LH: loop header
LB: loop body
LE: loop exit
PB: predicated region body
PF: predicated region fallthrough
CT: control target
= control target key end

     0   :  { %s442_s9 = smov 0   ;;  %s444_s10 = smov 0   ;;  %s478_s0 = inlined_call_operand.vmem [shape: bf16[16,8], index: 0, kind: input, shape index: {}]   ;;  %s479_s1 = inlined_call_operand.vmem [shape: bf16[2,8,256], index: 1, kind: input, shape index: {}]   ;;  %s480_s2 = inlined_call_operand.vmem [shape: bf16[2,16,256], index: 2, kind: output, shape index: {}]  }
   0x1   :  { %s446_s11 = smov 0  }
   0x2 LB: > { %s24_s12 = sadd.s32 1, %s420_s10  ;;  %p356_p0 = scmp.ge.s32.totalorder %s424_s11, 1  ;;  %s424_s11 = sphi %s446_s11, %s12_s11   ;;  %s420_s10 = sphi %s444_s10, %s482_s10   ;;  %s416_s9 = sphi %s442_s9, %s481_s9  }
   0x3   : > { %p26_p1 = scmp.ge.s32.totalorder %s24_s12, 2  ;;  %p133_p2 = scmp.lt.s32.totalorder %s424_s11, 3 }
   0x5   : > { %s484_s12 = smov (%p26_p1, %s24_s12), 0  ;;  %p134_p3 = pnand %p356_p0, %p133_p2 }
   0x6   : > { %p164_p4 = scmp.lt.s32.totalorder (!%p134_p3), %s416_s9, 1 }
   0x7   : > { %137 = sbr.rel (%p134_p3) target bundleno = 224 (0xe0), region = 28 }
   0xc   : > { %v426_v0 = vmov 0   ;;  %s486_s9 = smov (!%p164_p4, %s416_s9), 1  ;;  %vm201_vm0 = vcmask 1043456   ;;  %v401_v5 = vld [vmem:[%s478_s0] sm:$0xff]   ;;  %vm197_vm1 = vcmask 64512  }
   0xd   : > { %240 = vmatprep.mubr.bf16.mxu0 %v426_v0  ;;  %s370_s13 = sshll.u32 %s486_s9, 3  ;;  %s371_s19 = sshll.u32 %s486_s9, 4 }
   0xe   : > { %s171_s16 = scalar_lea.vmem %s479_s1, %s370_s13  ;;  %s181_s22 = scalar_lea.vmem %s480_s2, %s371_s19 }
   0xf   : > { %v186_v1 = vld [vmem:[%s171_s16] sm:$0xff] }
  0x10   : > { %v363_v2 = vcombine.high %v186_v1, %v186_v1  ;;  %v362_v3 = vcombine.low %v186_v1, %v186_v1 }
  0x12   : > { %364 = vmatprep.subr.msk.bf16.mxu0 %vm201_vm0, %v363_v2  ;;  %v203_v4 = vsel %vm201_vm0, %v362_v3, 0 }
  0x13   : > { %223 = vmatpush1.bf16.msra.mxu0 %v203_v4 }
  0x16   : > { %365 = vmatmul.mubr.msk.bf16.vlgmr.msra.gmra.mxu0 %vm197_vm1, %v401_v5 }
  0xd6   : > { %v242_v6 = vpop.f32.mrf.mxu0 }
  0xd8   : > { %v244_v7 = vpop.f32.mrf.mxu0 }
  0xd9   : > { %v372_v8 = vpack.c.bf16 %v244_v7, %v242_v6 }
  0xda   : > { %v246_v9 = vpop.f32.mrf.mxu0 }
  0xdb   : > { %263 = vst [vmem:[%s181_s22] sm:$0xff] %v372_v8 }
  0xdc   : > { %v248_v10 = vpop.f32.mrf.mxu0 }
  0xdd   : > { %v373_v11 = vpack.c.bf16 %v248_v10, %v246_v9 }
  0xdf   : > { %264 = vst [vmem:[%s181_s22 + $0x8] sm:$0xff] %v373_v11 }
  0xe0 PF: > { %s12_s11 = sadd.s32 1, %s424_s11   ;;  %s481_s9 = smov %s420_s10 }
  0xe1   : > { %p9_p5 = scmp.ge.s32.totalorder %s12_s11, 4   ;;  %s482_s10 = smov %s484_s12 }
  0xe3   :  { %11 = sbr.rel (!%p9_p5) target bundleno = 2 (0x2), region = 58 }

// kernel: dfanet_forward.78
= control target key start
LH: loop header
LB: loop body
LE: loop exit
PB: predicated region body
PF: predicated region fallthrough
CT: control target
= control target key end

     0   :  { %vm60_vm0 = vcmask 392192   ;;  %s231_s1 = inlined_call_operand.vmem [shape: bf16[48,128], index: 1, kind: input, shape index: {}]   ;;  %s232_s0 = inlined_call_operand.vmem [shape: bf16[32,48], index: 0, kind: input, shape index: {}]   ;;  %s233_s2 = inlined_call_operand.vmem [shape: f32[1,128], index: 2, kind: input, shape index: {}]   ;;  %s234_s3 = inlined_call_operand.vmem [shape: bf16[32,128], index: 3, kind: output, shape index: {}]  }
   0x1   :  { %v182_v0 = vld [vmem:[%s231_s1 + $0x10] sm:$0xff]   ;;  %v183_v1 = vld [vmem:[%s231_s1 + $0x8] sm:$0xff]   ;;  %v185_v2 = vld [vmem:[%s232_s0] sm:$0xff]  }
   0x2   :  { %172 = vmatprep.subr.bf16.mxu0 %v182_v0  ;;  %v184_v3 = vld [vmem:[%s231_s1] sm:$0xff]   ;;  %178 = vmatprep.mubr.msk.bf16.mxu0 %vm60_vm0, %v185_v2  ;;  %v186_v4 = vld [vmem:[%s232_s0 + $0x8] sm:$0xff]  }
   0x3   :  { %173 = vmatpush3.bf16.msra.mxu0 %v182_v0  ;;  %v140_v6 = vld [vmem:[%s233_s2] ss:$0 sm:$0xff] }
   0x4   :  { %174 = vmatprep.subr.bf16.mxu0 %v183_v1 }
   0x7   :  { %175 = vmatpush3.bf16.msra.mxu0 %v183_v1 }
   0x8   :  { %176 = vmatprep.subr.bf16.mxu0 %v184_v3 }
   0xb   :  { %177 = vmatpush3.bf16.msra.mxu0 %v184_v3 }
   0xe   :  { %179 = vmatmul.mubr.msk.bf16.vlgmr.msra.gmra.mxu0 %vm60_vm0, %v186_v4 }
  0xce   :  { %v180_v5 = vpop.f32.mrf.mxu0 }
  0xcf   :  { %v110_v9 = vadd.f32 %v180_v5, %v140_v6 }
  0xd0   :  { %v101_v7 = vpop.f32.mrf.mxu0 }
  0xd1   :  { %v102_v12 = vadd.f32 %v140_v6, %v101_v7 }
  0xd2   :  { %v181_v8 = vpop.f32.mrf.mxu0 }
  0xd3   :  { %v113_v10 = vadd.f32 %v181_v8, %v140_v6 }
  0xd4   :  { %v104_v11 = vpop.f32.mrf.mxu0 }
  0xd5   :  { %v164_v13 = vpack.c.bf16 %v113_v10, %v110_v9  ;;  %v105_v14 = vadd.f32 %v140_v6, %v104_v11 }
  0xd7   :  { %166 = vst [vmem:[%s234_s3 + $0x8] sm:$0xff] %v164_v13   ;;  %v159_v15 = vpack.c.bf16 %v105_v14, %v102_v12 }
  0xd9   :  { %160 = vst [vmem:[%s234_s3] sm:$0xff] %v159_v15  }

// kernel: dfanet_forward.73
= control target key start
LH: loop header
LB: loop body
LE: loop exit
PB: predicated region body
PF: predicated region fallthrough
CT: control target
= control target key end

     0   :  { %v239_v1 = vmov 0   ;;  %v35_v18 = vlaneseq  ;;  %s320_s1 = inlined_call_operand.vmem [shape: bf16[128,256], index: 1, kind: input, shape index: {}]   ;;  %s321_s0 = inlined_call_operand.vmem [shape: bf16[16,128], index: 0, kind: input, shape index: {}]   ;;  %s322_s2 = inlined_call_operand.vmem [shape: f32[1,256], index: 2, kind: input, shape index: {}]   ;;  %s323_s3 = inlined_call_operand.vmem [shape: bf16[16,256], index: 3, kind: output, shape index: {}]  }
   0x1   :  { %v214_v0 = vld [vmem:[%s320_s1 + $0x74] ss:$8 sps:$4 sm:$0xff]   ;;  %163 = vmatprep.mubr.bf16.mxu0 %v239_v1  ;;  %v216_v2 = vld [vmem:[%s320_s1 + $0x70] ss:$8 sps:$4 sm:$0xff]   ;;  %v217_v3 = vld [vmem:[%s320_s1 + $0x64] ss:$8 sps:$4 sm:$0xff]  }
   0x2   :  { %131 = vmatprep.subr.bf16.mxu0 %v214_v0  ;;  %v219_v4 = vld [vmem:[%s320_s1 + $0x60] ss:$8 sps:$4 sm:$0xff]   ;;  %v220_v5 = vld [vmem:[%s320_s1 + $0x54] ss:$8 sps:$4 sm:$0xff]   ;;  %v222_v6 = vld [vmem:[%s320_s1 + $0x50] ss:$8 sps:$4 sm:$0xff]  }
   0x3   :  { %132 = vmatpush1.bf16.msra.mxu0 %v216_v2  ;;  %v223_v7 = vld [vmem:[%s320_s1 + $0x44] ss:$8 sps:$4 sm:$0xff]   ;;  %v225_v8 = vld [vmem:[%s320_s1 + $0x40] ss:$8 sps:$4 sm:$0xff]   ;;  %v226_v9 = vld [vmem:[%s320_s1 + $0x34] ss:$8 sps:$4 sm:$0xff]  }
   0x4   :  { %133 = vmatprep.subr.bf16.mxu0 %v217_v3  ;;  %v228_v10 = vld [vmem:[%s320_s1 + $0x30] ss:$8 sps:$4 sm:$0xff]   ;;  %v229_v11 = vld [vmem:[%s320_s1 + $0x24] ss:$8 sps:$4 sm:$0xff]   ;;  %v231_v12 = vld [vmem:[%s320_s1 + $0x20] ss:$8 sps:$4 sm:$0xff]  }
   0x5   :  { %v232_v13 = vld [vmem:[%s320_s1 + $0x14] ss:$8 sps:$4 sm:$0xff]   ;;  %v234_v14 = vld [vmem:[%s320_s1 + $0x10] ss:$8 sps:$4 sm:$0xff]   ;;  %v235_v15 = vld [vmem:[%s320_s1 + $0x4] ss:$8 sps:$4 sm:$0xff]  }
   0x6   :  { %v237_v16 = vld [vmem:[%s320_s1] ss:$8 sps:$4 sm:$0xff]   ;;  %v36_v19 = vshrl.u32 %v35_v18, 7 }
   0x7   :  { %134 = vmatpush1.bf16.msra.mxu0 %v219_v4  ;;  %v238_v17 = vld [vmem:[%s321_s0] sm:$0xff]  }
   0x8   :  { %135 = vmatprep.subr.bf16.mxu0 %v220_v5  ;;  %v37_v20 = vsub.s32 0, %v36_v19  ;;  %v41_v21 = vsub.s32 1, %v36_v19  ;;  %v33_v22 = vld [vmem:[%s322_s2] sm:$0x3] }
   0xa   :  { %v38_v23 = vrot.slane %v33_v22, %v37_v20  ;;  %v42_v24 = vrot.slane %v33_v22, %v41_v21 }
   0xb   :  { %136 = vmatpush1.bf16.msra.mxu0 %v222_v6 }
   0xc   :  { %137 = vmatprep.subr.bf16.mxu0 %v223_v7 }
   0xf   :  { %138 = vmatpush1.bf16.msra.mxu0 %v225_v8 }
  0x10   :  { %139 = vmatprep.subr.bf16.mxu0 %v226_v9 }
  0x13   :  { %140 = vmatpush1.bf16.msra.mxu0 %v228_v10 }
  0x14   :  { %141 = vmatprep.subr.bf16.mxu0 %v229_v11 }
  0x17   :  { %142 = vmatpush1.bf16.msra.mxu0 %v231_v12 }
  0x18   :  { %143 = vmatprep.subr.bf16.mxu0 %v232_v13 }
  0x1b   :  { %144 = vmatpush1.bf16.msra.mxu0 %v234_v14 }
  0x1c   :  { %145 = vmatprep.subr.bf16.mxu0 %v235_v15 }
  0x1f   :  { %146 = vmatpush1.bf16.msra.mxu0 %v237_v16 }
  0x22   :  { %164 = vmatmul.mubr.bf16.vlgmr.msra.gmra.mxu0 %v238_v17 }
  0xe2   :  { %v165_v25 = vpop.f32.mrf.mxu0 }
  0xe3   :  { %v166_v27 = vadd.f32 %v165_v25, %v38_v23 }
  0xe4   :  { %v167_v26 = vpop.f32.mrf.mxu0 }
  0xe5   :  { %v168_v28 = vadd.f32 %v167_v26, %v42_v24 }
  0xe6   :  { %v169_v29 = vpop.f32.mrf.mxu0 }
  0xe7   :  { %v211_v30 = vpack.c.bf16 %v168_v28, %v166_v27  ;;  %v170_v32 = vadd.f32 %v169_v29, %v38_v23 }
  0xe8   :  { %v171_v31 = vpop.f32.mrf.mxu0 }
  0xe9   :  { %186 = vst [vmem:[%s323_s3] sm:$0xff] %v211_v30  ;;  %v172_v33 = vadd.f32 %v171_v31, %v42_v24 }
  0xeb   :  { %v212_v34 = vpack.c.bf16 %v172_v33, %v170_v32 }
  0xed   :  { %187 = vst [vmem:[%s323_s3 + $0x8] sm:$0xff] %v212_v34 }

// kernel: dfanet_forward.71
= control target key start
LH: loop header
LB: loop body
LE: loop exit
PB: predicated region body
PF: predicated region fallthrough
CT: control target
= control target key end

     0   :  { %vm254_vm0 = vcmask 130048   ;;  %s1799_s1 = inlined_call_operand.vmem [shape: bf16[16,128], index: 1, kind: input, shape index: {}]   ;;  %s1800_s0 = inlined_call_operand.vmem [shape: bf16[512,16], index: 0, kind: input, shape index: {}]   ;;  %s1801_s2 = inlined_call_operand.vmem [shape: f32[1,128], index: 2, kind: input, shape index: {}]   ;;  %s1802_s3 = inlined_call_operand.vmem [shape: bf16[512,128], index: 3, kind: output, shape index: {}]  }
   0x1   :  { %v1450_v0 = vld [vmem:[%s1799_s1] sm:$0xff]   ;;  %v1453_v3 = vld [vmem:[%s1800_s0 + $0x8] sm:$0xff]   ;;  %v1455_v5 = vld [vmem:[%s1800_s0 + $0x10] sm:$0xff]  }
   0x2   :  { %v1451_v1 = vld [vmem:[%s1800_s0] sm:$0xff]   ;;  %1382 = vmatprep.subr.bf16.mxu0 %v1450_v0  ;;  %1448 = vmatprep.subr.bf16.mxu1 %v1450_v0  ;;  %v1454_v4 = vld [vmem:[%s1800_s0 + $0x88] sm:$0xff]   ;;  %v1456_v6 = vld [vmem:[%s1800_s0 + $0x90] sm:$0xff]  }
   0x3   :  { %v1452_v2 = vld [vmem:[%s1800_s0 + $0x80] sm:$0xff]   ;;  %1383 = vmatpush3.bf16.msra.mxu0 %v1450_v0  ;;  %1449 = vmatpush3.bf16.msra.mxu1 %v1450_v0  ;;  %v1457_v7 = vld [vmem:[%s1800_s0 + $0x18] sm:$0xff]   ;;  %v1461_v11 = vld [vmem:[%s1800_s0 + $0x28] sm:$0xff]  }
   0x4   :  { %1384 = vmatprep.mubr.msk.bf16.mxu0 %vm254_vm0, %v1451_v1  ;;  %1416 = vmatprep.mubr.msk.bf16.mxu1 %vm254_vm0, %v1452_v2  ;;  %v1458_v8 = vld [vmem:[%s1800_s0 + $0x98] sm:$0xff]   ;;  %v1459_v9 = vld [vmem:[%s1800_s0 + $0x20] sm:$0xff]   ;;  %v1462_v12 = vld [vmem:[%s1800_s0 + $0xa8] sm:$0xff]  }
   0x5   :  { %v1460_v10 = vld [vmem:[%s1800_s0 + $0xa0] sm:$0xff]   ;;  %v1463_v13 = vld [vmem:[%s1800_s0 + $0x30] sm:$0xff]   ;;  %v1465_v15 = vld [vmem:[%s1800_s0 + $0x38] sm:$0xff]  }
   0x6   :  { %1385 = vmatmul.mubr.msk.bf16.vlgmr.msra.gmra.mxu0 %vm254_vm0, %v1453_v3  ;;  %1417 = vmatmul.mubr.msk.bf16.vlgmr.msra.gmra.mxu1 %vm254_vm0, %v1454_v4  ;;  %v1464_v14 = vld [vmem:[%s1800_s0 + $0xb0] sm:$0xff]   ;;  %v1466_v16 = vld [vmem:[%s1800_s0 + $0xb8] sm:$0xff]   ;;  %v1467_v17 = vld [vmem:[%s1800_s0 + $0x40] sm:$0xff]  }
   0x7   :  { %1388 = vmatprep.mubr.msk.bf16.mxu0 %vm254_vm0, %v1455_v5  ;;  %1420 = vmatprep.mubr.msk.bf16.mxu1 %vm254_vm0, %v1456_v6  ;;  %v1468_v18 = vld [vmem:[%s1800_s0 + $0xc0] sm:$0xff]   ;;  %v1469_v19 = vld [vmem:[%s1800_s0 + $0x48] sm:$0xff]   ;;  %v1471_v21 = vld [vmem:[%s1800_s0 + $0x50] sm:$0xff]  }
   0x8   :  { %v1470_v20 = vld [vmem:[%s1800_s0 + $0xc8] sm:$0xff]   ;;  %v1472_v22 = vld [vmem:[%s1800_s0 + $0xd0] sm:$0xff]   ;;  %v1473_v23 = vld [vmem:[%s1800_s0 + $0x58] sm:$0xff]  }
   0x9   :  { %v1474_v24 = vld [vmem:[%s1800_s0 + $0xd8] sm:$0xff]   ;;  %v1475_v25 = vld [vmem:[%s1800_s0 + $0x60] sm:$0xff]   ;;  %v1477_v27 = vld [vmem:[%s1800_s0 + $0x68] sm:$0xff]  }
   0xa   :  { %v1476_v26 = vld [vmem:[%s1800_s0 + $0xe0] sm:$0xff]   ;;  %v1478_v28 = vld [vmem:[%s1800_s0 + $0xe8] sm:$0xff]   ;;  %v1479_v29 = vld [vmem:[%s1800_s0 + $0x70] sm:$0xff]  }
   0xb   :  { %v1480_v30 = vld [vmem:[%s1800_s0 + $0xf0] sm:$0xff]   ;;  %v1481_v31 = vld [vmem:[%s1800_s0 + $0x78] sm:$0xff]   ;;  %v1637_v35 = vld [vmem:[%s1801_s2] ss:$0 sm:$0xff] }
   0xc   :  { %v1482_v32 = vld [vmem:[%s1800_s0 + $0xf8] sm:$0xff]  }
   0xe   :  { %1389 = vmatmul.mubr.msk.bf16.gmra.mxu0 %vm254_vm0, %v1457_v7  ;;  %1421 = vmatmul.mubr.msk.bf16.gmra.mxu1 %vm254_vm0, %v1458_v8 }
   0xf   :  { %1392 = vmatprep.mubr.msk.bf16.mxu0 %vm254_vm0, %v1459_v9  ;;  %1424 = vmatprep.mubr.msk.bf16.mxu1 %vm254_vm0, %v1460_v10 }
  0x16   :  { %1393 = vmatmul.mubr.msk.bf16.gmra.mxu0 %vm254_vm0, %v1461_v11  ;;  %1425 = vmatmul.mubr.msk.bf16.gmra.mxu1 %vm254_vm0, %v1462_v12 }
  0x17   :  { %1396 = vmatprep.mubr.msk.bf16.mxu0 %vm254_vm0, %v1463_v13  ;;  %1428 = vmatprep.mubr.msk.bf16.mxu1 %vm254_vm0, %v1464_v14 }
  0x1e   :  { %1397 = vmatmul.mubr.msk.bf16.gmra.mxu0 %vm254_vm0, %v1465_v15  ;;  %1429 = vmatmul.mubr.msk.bf16.gmra.mxu1 %vm254_vm0, %v1466_v16 }
  0x1f   :  { %1400 = vmatprep.mubr.msk.bf16.mxu0 %vm254_vm0, %v1467_v17  ;;  %1432 = vmatprep.mubr.msk.bf16.mxu1 %vm254_vm0, %v1468_v18 }
  0x26   :  { %1401 = vmatmul.mubr.msk.bf16.gmra.mxu0 %vm254_vm0, %v1469_v19  ;;  %1433 = vmatmul.mubr.msk.bf16.gmra.mxu1 %vm254_vm0, %v1470_v20 }
  0x27   :  { %1404 = vmatprep.mubr.msk.bf16.mxu0 %vm254_vm0, %v1471_v21  ;;  %1436 = vmatprep.mubr.msk.bf16.mxu1 %vm254_vm0, %v1472_v22 }
  0x2e   :  { %1405 = vmatmul.mubr.msk.bf16.gmra.mxu0 %vm254_vm0, %v1473_v23  ;;  %1437 = vmatmul.mubr.msk.bf16.gmra.mxu1 %vm254_vm0, %v1474_v24 }
  0x2f   :  { %1408 = vmatprep.mubr.msk.bf16.mxu0 %vm254_vm0, %v1475_v25  ;;  %1440 = vmatprep.mubr.msk.bf16.mxu1 %vm254_vm0, %v1476_v26 }
  0x36   :  { %1409 = vmatmul.mubr.msk.bf16.gmra.mxu0 %vm254_vm0, %v1477_v27  ;;  %1441 = vmatmul.mubr.msk.bf16.gmra.mxu1 %vm254_vm0, %v1478_v28 }
  0x37   :  { %1412 = vmatprep.mubr.msk.bf16.mxu0 %vm254_vm0, %v1479_v29  ;;  %1444 = vmatprep.mubr.msk.bf16.mxu1 %vm254_vm0, %v1480_v30 }
  0x3e   :  { %1413 = vmatmul.mubr.msk.bf16.gmra.mxu0 %vm254_vm0, %v1481_v31  ;;  %1445 = vmatmul.mubr.msk.bf16.gmra.mxu1 %vm254_vm0, %v1482_v32 }
  0xc6   :  { %v1386_v33 = vpop.f32.mrf.mxu0  ;;  %v1418_v34 = vpop.f32.mrf.mxu1 }
  0xc7   :  { %v394_v40 = vadd.f32 %v1386_v33, %v1637_v35  ;;  %v522_v41 = vadd.f32 %v1418_v34, %v1637_v35 }
  0xc8   :  { %v385_v36 = vpop.f32.mrf.mxu0  ;;  %v513_v37 = vpop.f32.mrf.mxu1 }
  0xc9   :  { %v386_v44 = vadd.f32 %v1637_v35, %v385_v36  ;;  %v514_v45 = vadd.f32 %v1637_v35, %v513_v37 }
  0xca   :  { %v1387_v38 = vpop.f32.mrf.mxu0  ;;  %v1419_v39 = vpop.f32.mrf.mxu1 }
  0xcb   :  { %v397_v42 = vadd.f32 %v1387_v38, %v1637_v35  ;;  %v525_v43 = vadd.f32 %v1419_v39, %v1637_v35 }
  0xcc   :  { %v388_v46 = vpop.f32.mrf.mxu0  ;;  %v516_v47 = vpop.f32.mrf.mxu1 }
  0xcd   :  { %v1166_v48 = vpack.c.bf16 %v397_v42, %v394_v40  ;;  %v1246_v49 = vpack.c.bf16 %v525_v43, %v522_v41  ;;  %v389_v50 = vadd.f32 %v1637_v35, %v388_v46  ;;  %v517_v51 = vadd.f32 %v1637_v35, %v516_v47 }
  0xce   :  { %v1390_v52 = vpop.f32.mrf.mxu0  ;;  %v1422_v53 = vpop.f32.mrf.mxu1 }
  0xcf   :  { %1318 = vst [vmem:[%s1802_s3 + $0x8] sm:$0xff] %v1166_v48   ;;  %1334 = vst [vmem:[%s1802_s3 + $0x88] sm:$0xff] %v1246_v49   ;;  %v1161_v54 = vpack.c.bf16 %v389_v50, %v386_v44  ;;  %v1241_v55 = vpack.c.bf16 %v517_v51, %v514_v45  ;;  %v410_v60 = vadd.f32 %v1390_v52, %v1637_v35 }
  0xd0   :  { %v401_v56 = vpop.f32.mrf.mxu0  ;;  %v529_v57 = vpop.f32.mrf.mxu1  ;;  %v538_v61 = vadd.f32 %v1422_v53, %v1637_v35 }
  0xd1   :  { %1162 = vst [vmem:[%s1802_s3] sm:$0xff] %v1161_v54   ;;  %1333 = vst [vmem:[%s1802_s3 + $0x80] sm:$0xff] %v1241_v55   ;;  %v402_v0 = vadd.f32 %v1637_v35, %v401_v56  ;;  %v530_v1 = vadd.f32 %v1637_v35, %v529_v57 }
  0xd2   :  { %v1391_v58 = vpop.f32.mrf.mxu0  ;;  %v1423_v59 = vpop.f32.mrf.mxu1 }
  0xd3   :  { %v413_v62 = vadd.f32 %v1391_v58, %v1637_v35  ;;  %v541_v63 = vadd.f32 %v1423_v59, %v1637_v35 }
  0xd4   :  { %v404_v2 = vpop.f32.mrf.mxu0  ;;  %v532_v3 = vpop.f32.mrf.mxu1 }
  0xd5   :  { %v1176_v4 = vpack.c.bf16 %v413_v62, %v410_v60  ;;  %v1256_v5 = vpack.c.bf16 %v541_v63, %v538_v61  ;;  %v405_v6 = vadd.f32 %v1637_v35, %v404_v2  ;;  %v533_v7 = vadd.f32 %v1637_v35, %v532_v3 }
  0xd6   :  { %v1394_v8 = vpop.f32.mrf.mxu0  ;;  %v1426_v9 = vpop.f32.mrf.mxu1 }
  0xd7   :  { %1320 = vst [vmem:[%s1802_s3 + $0x18] sm:$0xff] %v1176_v4   ;;  %1336 = vst [vmem:[%s1802_s3 + $0x98] sm:$0xff] %v1256_v5   ;;  %v1171_v10 = vpack.c.bf16 %v405_v6, %v402_v0  ;;  %v1251_v11 = vpack.c.bf16 %v533_v7, %v530_v1  ;;  %v426_v16 = vadd.f32 %v1394_v8, %v1637_v35 }
  0xd8   :  { %v417_v12 = vpop.f32.mrf.mxu0  ;;  %v545_v13 = vpop.f32.mrf.mxu1  ;;  %v554_v17 = vadd.f32 %v1426_v9, %v1637_v35 }
  0xd9   :  { %1319 = vst [vmem:[%s1802_s3 + $0x10] sm:$0xff] %v1171_v10   ;;  %1335 = vst [vmem:[%s1802_s3 + $0x90] sm:$0xff] %v1251_v11   ;;  %v418_v20 = vadd.f32 %v1637_v35, %v417_v12  ;;  %v546_v21 = vadd.f32 %v1637_v35, %v545_v13 }
  0xda   :  { %v1395_v14 = vpop.f32.mrf.mxu0  ;;  %v1427_v15 = vpop.f32.mrf.mxu1 }
  0xdb   :  { %v429_v18 = vadd.f32 %v1395_v14, %v1637_v35  ;;  %v557_v19 = vadd.f32 %v1427_v15, %v1637_v35 }
  0xdc   :  { %v420_v22 = vpop.f32.mrf.mxu0  ;;  %v548_v23 = vpop.f32.mrf.mxu1 }
  0xdd   :  { %v1186_v24 = vpack.c.bf16 %v429_v18, %v426_v16  ;;  %v1266_v25 = vpack.c.bf16 %v557_v19, %v554_v17  ;;  %v421_v26 = vadd.f32 %v1637_v35, %v420_v22  ;;  %v549_v27 = vadd.f32 %v1637_v35, %v548_v23 }
  0xde   :  { %v1398_v28 = vpop.f32.mrf.mxu0  ;;  %v1430_v29 = vpop.f32.mrf.mxu1 }
  0xdf   :  { %1322 = vst [vmem:[%s1802_s3 + $0x28] sm:$0xff] %v1186_v24   ;;  %1338 = vst [vmem:[%s1802_s3 + $0xa8] sm:$0xff] %v1266_v25   ;;  %v1181_v30 = vpack.c.bf16 %v421_v26, %v418_v20  ;;  %v1261_v31 = vpack.c.bf16 %v549_v27, %v546_v21  ;;  %v442_v37 = vadd.f32 %v1398_v28, %v1637_v35 }
  0xe0   :  { %v433_v32 = vpop.f32.mrf.mxu0  ;;  %v561_v33 = vpop.f32.mrf.mxu1  ;;  %v570_v38 = vadd.f32 %v1430_v29, %v1637_v35 }
  0xe1   :  { %1321 = vst [vmem:[%s1802_s3 + $0x20] sm:$0xff] %v1181_v30   ;;  %1337 = vst [vmem:[%s1802_s3 + $0xa0] sm:$0xff] %v1261_v31   ;;  %v434_v41 = vadd.f32 %v1637_v35, %v433_v32  ;;  %v562_v42 = vadd.f32 %v1637_v35, %v561_v33 }
  0xe2   :  { %v1399_v34 = vpop.f32.mrf.mxu0  ;;  %v1431_v36 = vpop.f32.mrf.mxu1 }
  0xe3   :  { %v445_v39 = vadd.f32 %v1399_v34, %v1637_v35  ;;  %v573_v40 = vadd.f32 %v1431_v36, %v1637_v35 }
  0xe4   :  { %v436_v43 = vpop.f32.mrf.mxu0  ;;  %v564_v44 = vpop.f32.mrf.mxu1 }
  0xe5   :  { %v1196_v45 = vpack.c.bf16 %v445_v39, %v442_v37  ;;  %v1276_v46 = vpack.c.bf16 %v573_v40, %v570_v38  ;;  %v437_v47 = vadd.f32 %v1637_v35, %v436_v43  ;;  %v565_v48 = vadd.f32 %v1637_v35, %v564_v44 }
  0xe6   :  { %v1402_v49 = vpop.f32.mrf.mxu0  ;;  %v1434_v50 = vpop.f32.mrf.mxu1 }
  0xe7   :  { %1324 = vst [vmem:[%s1802_s3 + $0x38] sm:$0xff] %v1196_v45   ;;  %1340 = vst [vmem:[%s1802_s3 + $0xb8] sm:$0xff] %v1276_v46   ;;  %v1191_v51 = vpack.c.bf16 %v437_v47, %v434_v41  ;;  %v1271_v52 = vpack.c.bf16 %v565_v48, %v562_v42  ;;  %v458_v57 = vadd.f32 %v1402_v49, %v1637_v35 }
  0xe8   :  { %v449_v53 = vpop.f32.mrf.mxu0  ;;  %v577_v54 = vpop.f32.mrf.mxu1  ;;  %v586_v58 = vadd.f32 %v1434_v50, %v1637_v35 }
  0xe9   :  { %1323 = vst [vmem:[%s1802_s3 + $0x30] sm:$0xff] %v1191_v51   ;;  %1339 = vst [vmem:[%s1802_s3 + $0xb0] sm:$0xff] %v1271_v52   ;;  %v450_v61 = vadd.f32 %v1637_v35, %v449_v53  ;;  %v578_v62 = vadd.f32 %v1637_v35, %v577_v54 }
  0xea   :  { %v1403_v55 = vpop.f32.mrf.mxu0  ;;  %v1435_v56 = vpop.f32.mrf.mxu1 }
  0xeb   :  { %v461_v59 = vadd.f32 %v1403_v55, %v1637_v35  ;;  %v589_v60 = vadd.f32 %v1435_v56, %v1637_v35 }
  0xec   :  { %v452_v63 = vpop.f32.mrf.mxu0  ;;  %v580_v0 = vpop.f32.mrf.mxu1 }
  0xed   :  { %v1206_v1 = vpack.c.bf16 %v461_v59, %v458_v57  ;;  %v1286_v2 = vpack.c.bf16 %v589_v60, %v586_v58  ;;  %v453_v3 = vadd.f32 %v1637_v35, %v452_v63  ;;  %v581_v4 = vadd.f32 %v1637_v35, %v580_v0 }
  0xee   :  { %v1406_v5 = vpop.f32.mrf.mxu0  ;;  %v1438_v6 = vpop.f32.mrf.mxu1 }
  0xef   :  { %1326 = vst [vmem:[%s1802_s3 + $0x48] sm:$0xff] %v1206_v1   ;;  %1342 = vst [vmem:[%s1802_s3 + $0xc8] sm:$0xff] %v1286_v2   ;;  %v1201_v7 = vpack.c.bf16 %v453_v3, %v450_v61  ;;  %v1281_v8 = vpack.c.bf16 %v581_v4, %v578_v62  ;;  %v474_v13 = vadd.f32 %v1406_v5, %v1637_v35 }
  0xf0   :  { %v465_v9 = vpop.f32.mrf.mxu0  ;;  %v593_v10 = vpop.f32.mrf.mxu1  ;;  %v602_v14 = vadd.f32 %v1438_v6, %v1637_v35 }
  0xf1   :  { %1325 = vst [vmem:[%s1802_s3 + $0x40] sm:$0xff] %v1201_v7   ;;  %1341 = vst [vmem:[%s1802_s3 + $0xc0] sm:$0xff] %v1281_v8   ;;  %v466_v17 = vadd.f32 %v1637_v35, %v465_v9  ;;  %v594_v18 = vadd.f32 %v1637_v35, %v593_v10 }
  0xf2   :  { %v1407_v11 = vpop.f32.mrf.mxu0  ;;  %v1439_v12 = vpop.f32.mrf.mxu1 }
  0xf3   :  { %v477_v15 = vadd.f32 %v1407_v11, %v1637_v35  ;;  %v605_v16 = vadd.f32 %v1439_v12, %v1637_v35 }
  0xf4   :  { %v468_v19 = vpop.f32.mrf.mxu0  ;;  %v596_v20 = vpop.f32.mrf.mxu1 }
  0xf5   :  { %v1216_v21 = vpack.c.bf16 %v477_v15, %v474_v13  ;;  %v1296_v22 = vpack.c.bf16 %v605_v16, %v602_v14  ;;  %v469_v23 = vadd.f32 %v1637_v35, %v468_v19  ;;  %v597_v24 = vadd.f32 %v1637_v35, %v596_v20 }
  0xf6   :  { %v1410_v25 = vpop.f32.mrf.mxu0  ;;  %v1442_v26 = vpop.f32.mrf.mxu1 }
  0xf7   :  { %1328 = vst [vmem:[%s1802_s3 + $0x58] sm:$0xff] %v1216_v21   ;;  %1344 = vst [vmem:[%s1802_s3 + $0xd8] sm:$0xff] %v1296_v22   ;;  %v1211_v27 = vpack.c.bf16 %v469_v23, %v466_v17  ;;  %v1291_v28 = vpack.c.bf16 %v597_v24, %v594_v18  ;;  %v490_v33 = vadd.f32 %v1410_v25, %v1637_v35 }
  0xf8   :  { %v481_v29 = vpop.f32.mrf.mxu0  ;;  %v609_v30 = vpop.f32.mrf.mxu1  ;;  %v618_v34 = vadd.f32 %v1442_v26, %v1637_v35 }
  0xf9   :  { %1327 = vst [vmem:[%s1802_s3 + $0x50] sm:$0xff] %v1211_v27   ;;  %1343 = vst [vmem:[%s1802_s3 + $0xd0] sm:$0xff] %v1291_v28   ;;  %v482_v38 = vadd.f32 %v1637_v35, %v481_v29  ;;  %v610_v39 = vadd.f32 %v1637_v35, %v609_v30 }
  0xfa   :  { %v1411_v31 = vpop.f32.mrf.mxu0  ;;  %v1443_v32 = vpop.f32.mrf.mxu1 }
  0xfb   :  { %v493_v36 = vadd.f32 %v1411_v31, %v1637_v35  ;;  %v621_v37 = vadd.f32 %v1443_v32, %v1637_v35 }
  0xfc   :  { %v484_v40 = vpop.f32.mrf.mxu0  ;;  %v612_v41 = vpop.f32.mrf.mxu1 }
  0xfd   :  { %v1226_v42 = vpack.c.bf16 %v493_v36, %v490_v33  ;;  %v1306_v43 = vpack.c.bf16 %v621_v37, %v618_v34  ;;  %v485_v44 = vadd.f32 %v1637_v35, %v484_v40  ;;  %v613_v45 = vadd.f32 %v1637_v35, %v612_v41 }
  0xfe   :  { %v1414_v46 = vpop.f32.mrf.mxu0  ;;  %v1446_v47 = vpop.f32.mrf.mxu1 }
  0xff   :  { %1330 = vst [vmem:[%s1802_s3 + $0x68] sm:$0xff] %v1226_v42   ;;  %1346 = vst [vmem:[%s1802_s3 + $0xe8] sm:$0xff] %v1306_v43   ;;  %v1221_v48 = vpack.c.bf16 %v485_v44, %v482_v38  ;;  %v1301_v49 = vpack.c.bf16 %v613_v45, %v610_v39  ;;  %v506_v54 = vadd.f32 %v1414_v46, %v1637_v35 }
 0x100   :  { %v497_v50 = vpop.f32.mrf.mxu0  ;;  %v625_v51 = vpop.f32.mrf.mxu1  ;;  %v634_v55 = vadd.f32 %v1446_v47, %v1637_v35 }
 0x101   :  { %1329 = vst [vmem:[%s1802_s3 + $0x60] sm:$0xff] %v1221_v48   ;;  %1345 = vst [vmem:[%s1802_s3 + $0xe0] sm:$0xff] %v1301_v49   ;;  %v498_v58 = vadd.f32 %v1637_v35, %v497_v50  ;;  %v626_v59 = vadd.f32 %v1637_v35, %v625_v51 }
 0x102   :  { %v1415_v52 = vpop.f32.mrf.mxu0  ;;  %v1447_v53 = vpop.f32.mrf.mxu1 }
 0x103   :  { %v509_v56 = vadd.f32 %v1415_v52, %v1637_v35  ;;  %v637_v57 = vadd.f32 %v1447_v53, %v1637_v35 }
 0x104   :  { %v500_v60 = vpop.f32.mrf.mxu0  ;;  %v628_v61 = vpop.f32.mrf.mxu1 }
 0x105   :  { %v1236_v62 = vpack.c.bf16 %v509_v56, %v506_v54  ;;  %v1316_v63 = vpack.c.bf16 %v637_v57, %v634_v55  ;;  %v501_v0 = vadd.f32 %v1637_v35, %v500_v60  ;;  %v629_v1 = vadd.f32 %v1637_v35, %v628_v61 }
 0x107   :  { %1332 = vst [vmem:[%s1802_s3 + $0x78] sm:$0xff] %v1236_v62   ;;  %1348 = vst [vmem:[%s1802_s3 + $0xf8] sm:$0xff] %v1316_v63   ;;  %v1231_v2 = vpack.c.bf16 %v501_v0, %v498_v58  ;;  %v1311_v3 = vpack.c.bf16 %v629_v1, %v626_v59 }
 0x109   :  { %1331 = vst [vmem:[%s1802_s3 + $0x70] sm:$0xff] %v1231_v2   ;;  %1347 = vst [vmem:[%s1802_s3 + $0xf0] sm:$0xff] %v1311_v3  }

// kernel: dfanet_forward.87
= control target key start
LH: loop header
LB: loop body
LE: loop exit
PB: predicated region body
PF: predicated region fallthrough
CT: control target
= control target key end

     0   :  { %s2300_s27 = smov 0   ;;  %s2523_s0 = inlined_call_operand.vmem [shape: bf16[512,16], index: 0, kind: input, shape index: {}]   ;;  %s2524_s1 = inlined_call_operand.vmem [shape: bf16[512,16], index: 1, kind: input, shape index: {}]   ;;  %s2525_s2 = inlined_call_operand.vmem [shape: bf16[512,16], index: 2, kind: input, shape index: {}]   ;;  %s2526_s3 = inlined_call_operand.vmem [shape: bf16[512,16], index: 3, kind: input, shape index: {}]   ;;  %s2527_s4 = inlined_call_operand.vmem [shape: bf16[512,16], index: 4, kind: input, shape index: {}]   ;;  %s2528_s5 = inlined_call_operand.vmem [shape: bf16[512,16], index: 5, kind: input, shape index: {}]   ;;  %s2529_s6 = inlined_call_operand.vmem [shape: bf16[16,128], index: 6, kind: input, shape index: {}]   ;;  %s2530_s7 = inlined_call_operand.vmem [shape: f32[1,128], index: 7, kind: input, shape index: {}]   ;;  %s2531_s8 = inlined_call_operand.vmem [shape: bf16[512,128], index: 8, kind: output, shape index: {}]  }
   0x1 LB: > { %s1513_s28 = sadd.s32 4294967295, %s2253_s27   ;;  %p1517_p0 = scmp.ge.s32.totalorder %s2253_s27, 1  ;;  %s2253_s27 = sphi %s2300_s27, %s18_s27  }
   0x2   : > { %p318_p1 = scmp.lt.s32.totalorder %s2253_s27, 3 }
   0x4   : > { %p319_p2 = pnand %p1517_p0, %p318_p1 }
   0x5   : > { %s1518_s9 = sshll.u32 (!%p319_p2), %s1513_s28, 5 }
   0x6   : > { %322 = sbr.rel (%p319_p2) target bundleno = 327 (0x147), region = 52  ;;  %p378_p3 = scmp.lt.s32.totalorder (!%p319_p2), %s1518_s9, 63 }
   0xb   : > { %v2246_v0 = vld [vmem:[%s2529_s6] sm:$0xff]   ;;  %s2533_s9 = smov (!%p378_p3, %s1518_s9), 63  ;;  %vm1027_vm0 = vcmask 130048  }
   0xc   : > { %2202 = vmatprep.subr.bf16.mxu0 %v2246_v0  ;;  %2236 = vmatprep.subr.bf16.mxu1 %v2246_v0  ;;  %s2311_s10 = sshll.u32 %s2533_s9, 2 }
   0xd   : > { %2203 = vmatpush3.bf16.msra.mxu0 %v2246_v0  ;;  %2237 = vmatpush3.bf16.msra.mxu1 %v2246_v0  ;;  %s2317_s13 = scalar_lea.vmem %s2523_s0, %s2311_s10  ;;  %s2323_s16 = scalar_lea.vmem %s2524_s1, %s2311_s10 }
   0xe   : > { %s2329_s19 = scalar_lea.vmem %s2525_s2, %s2311_s10  ;;  %s2335_s22 = scalar_lea.vmem %s2526_s3, %s2311_s10  ;;  %v1617_v1 = vld [vmem:[%s2317_s13] sm:$0xff]   ;;  %v2080_v41 = vld [vmem:[%s2317_s13 + $0x8] sm:$0xff]  }
   0xf   : > { %v1681_v2 = vld [vmem:[%s2323_s16] sm:$0xff]   ;;  %s2343_s25 = scalar_lea.vmem %s2527_s4, %s2311_s10  ;;  %s2349_s29 = scalar_lea.vmem %s2528_s5, %s2311_s10  ;;  %v1618_v3 = vunpack.c.l.bf16 %v1617_v1  ;;  %v1619_v4 = vunpack.c.h.bf16 %v1617_v1  ;;  %v2095_v42 = vld [vmem:[%s2323_s16 + $0x8] sm:$0xff]   ;;  %v1622_v52 = vunpack.c.l.bf16 %v2080_v41  ;;  %v1623_v53 = vunpack.c.h.bf16 %v2080_v41  ;;  %v2081_v41 = vld [vmem:[%s2317_s13 + $0x10] sm:$0xff]  }
  0x10   : > { %v1682_v5 = vunpack.c.l.bf16 %v1681_v2  ;;  %v1683_v6 = vunpack.c.h.bf16 %v1681_v2  ;;  %v1745_v7 = vld [vmem:[%s2329_s19] sm:$0xff]   ;;  %v2110_v51 = vld [vmem:[%s2329_s19 + $0x8] sm:$0xff]   ;;  %v1686_v54 = vunpack.c.l.bf16 %v2095_v42  ;;  %v1687_v55 = vunpack.c.h.bf16 %v2095_v42 }
  0x11   : > { %v1809_v8 = vld [vmem:[%s2335_s22] sm:$0xff]   ;;  %v1746_v10 = vunpack.c.l.bf16 %v1745_v7  ;;  %v1747_v11 = vunpack.c.h.bf16 %v1745_v7  ;;  %v2125_v60 = vld [vmem:[%s2335_s22 + $0x8] sm:$0xff]   ;;  %v1750_v63 = vunpack.c.l.bf16 %v2110_v51  ;;  %v1751_v0 = vunpack.c.h.bf16 %v2110_v51  ;;  %v2111_v51 = vld [vmem:[%s2329_s19 + $0x10] sm:$0xff]  }
  0x12   : > { %v2087_v9 = vld [vmem:[%s2317_s13 + $0x40] sm:$0xff]   ;;  %v1810_v12 = vunpack.c.l.bf16 %v1809_v8  ;;  %v1811_v13 = vunpack.c.h.bf16 %v1809_v8  ;;  %v548_v17 = vadd.f32 %v1682_v5, %v1618_v3  ;;  %v549_v18 = vadd.f32 %v1683_v6, %v1619_v4  ;;  %v2140_v1 = vld [vmem:[%s2343_s25 + $0x8] sm:$0xff]  }
  0x13   : > { %v1873_v14 = vld [vmem:[%s2343_s25] sm:$0xff]   ;;  %v1650_v25 = vunpack.c.l.bf16 %v2087_v9  ;;  %v1651_v26 = vunpack.c.h.bf16 %v2087_v9  ;;  %v550_v61 = vadd.f32 %v1686_v54, %v1622_v52  ;;  %v551_v62 = vadd.f32 %v1687_v55, %v1623_v53  ;;  %v2155_v6 = vld [vmem:[%s2349_s29 + $0x8] sm:$0xff]   ;;  %v2126_v52 = vld [vmem:[%s2335_s22 + $0x10] sm:$0xff]  }
  0x14   : > { %v1937_v15 = vld [vmem:[%s2349_s29] sm:$0xff]   ;;  %v1874_v19 = vunpack.c.l.bf16 %v1873_v14  ;;  %v1875_v20 = vunpack.c.h.bf16 %v1873_v14  ;;  %v644_v27 = vadd.f32 %v1746_v10, %v548_v17  ;;  %v645_v28 = vadd.f32 %v1747_v11, %v549_v18  ;;  %v2088_v11 = vld [vmem:[%s2317_s13 + $0x48] sm:$0xff]  }
  0x15   : > { %v2102_v16 = vld [vmem:[%s2323_s16 + $0x40] sm:$0xff]   ;;  %v1938_v23 = vunpack.c.l.bf16 %v1937_v15  ;;  %v1939_v24 = vunpack.c.h.bf16 %v1937_v15  ;;  %v646_v7 = vadd.f32 %v1750_v63, %v550_v61  ;;  %v647_v8 = vadd.f32 %v1751_v0, %v551_v62  ;;  %v2141_v61 = vld [vmem:[%s2343_s25 + $0x10] sm:$0xff]  }
  0x16   : > { %v2117_v21 = vld [vmem:[%s2329_s19 + $0x40] sm:$0xff]   ;;  %v1714_v29 = vunpack.c.l.bf16 %v2102_v16  ;;  %v1715_v30 = vunpack.c.h.bf16 %v2102_v16  ;;  %v740_v37 = vadd.f32 %v1810_v12, %v644_v27  ;;  %v741_v38 = vadd.f32 %v1811_v13, %v645_v28  ;;  %v2103_v16 = vld [vmem:[%s2323_s16 + $0x48] sm:$0xff]   ;;  %v2156_v62 = vld [vmem:[%s2349_s29 + $0x10] sm:$0xff]  }
  0x17   : > { %v2132_v22 = vld [vmem:[%s2335_s22 + $0x40] sm:$0xff]   ;;  %v1778_v33 = vunpack.c.l.bf16 %v2117_v21  ;;  %v1779_v34 = vunpack.c.h.bf16 %v2117_v21  ;;  %v1814_v9 = vunpack.c.l.bf16 %v2125_v60  ;;  %v1815_v10 = vunpack.c.h.bf16 %v2125_v60  ;;  %v2118_v21 = vld [vmem:[%s2329_s19 + $0x48] sm:$0xff]  }
  0x18   : > { %v2147_v31 = vld [vmem:[%s2343_s25 + $0x40] sm:$0xff]   ;;  %v1842_v35 = vunpack.c.l.bf16 %v2132_v22  ;;  %v1843_v36 = vunpack.c.h.bf16 %v2132_v22  ;;  %v564_v39 = vadd.f32 %v1714_v29, %v1650_v25  ;;  %v565_v40 = vadd.f32 %v1715_v30, %v1651_v26  ;;  %v2133_v26 = vld [vmem:[%s2335_s22 + $0x48] sm:$0xff]  }
  0x19   : > { %v2162_v32 = vld [vmem:[%s2349_s29 + $0x40] sm:$0xff]   ;;  %v1906_v43 = vunpack.c.l.bf16 %v2147_v31  ;;  %v1907_v44 = vunpack.c.h.bf16 %v2147_v31  ;;  %v836_v47 = vadd.f32 %v1874_v19, %v740_v37  ;;  %v837_v48 = vadd.f32 %v1875_v20, %v741_v38  ;;  %v2148_v31 = vld [vmem:[%s2343_s25 + $0x48] sm:$0xff]  }
  0x1a   : > { %v1970_v45 = vunpack.c.l.bf16 %v2162_v32  ;;  %v1971_v46 = vunpack.c.h.bf16 %v2162_v32  ;;  %v660_v49 = vadd.f32 %v1778_v33, %v564_v39  ;;  %v661_v50 = vadd.f32 %v1779_v34, %v565_v40 }
  0x1b   : > { %v932_v56 = vadd.f32 %v1938_v23, %v836_v47  ;;  %v933_v57 = vadd.f32 %v1939_v24, %v837_v48  ;;  %v1878_v15 = vunpack.c.l.bf16 %v2140_v1  ;;  %v742_v17 = vadd.f32 %v1814_v9, %v646_v7  ;;  %v2089_v7 = vld [vmem:[%s2317_s13 + $0x50] sm:$0xff]  }
  0x1c   : > { %v756_v58 = vadd.f32 %v1842_v35, %v660_v49  ;;  %v757_v59 = vadd.f32 %v1843_v36, %v661_v50  ;;  %v743_v18 = vadd.f32 %v1815_v10, %v647_v8  ;;  %v1879_v19 = vunpack.c.h.bf16 %v2140_v1  ;;  %v2163_v36 = vld [vmem:[%s2349_s29 + $0x48] sm:$0xff]   ;;  %v2104_v8 = vld [vmem:[%s2323_s16 + $0x50] sm:$0xff]  }
  0x1d   : > { %v964_v2 = vmax.f32 %v932_v56, 0.0  ;;  %v965_v3 = vmax.f32 %v933_v57, 0.0  ;;  %v1942_v20 = vunpack.c.l.bf16 %v2155_v6  ;;  %v1943_v24 = vunpack.c.h.bf16 %v2155_v6 }
  0x1e   : > { %v852_v4 = vadd.f32 %v1906_v43, %v756_v58  ;;  %v853_v5 = vadd.f32 %v1907_v44, %v757_v59  ;;  %v1654_v25 = vunpack.c.l.bf16 %v2088_v11  ;;  %v838_v27 = vadd.f32 %v1878_v15, %v742_v17  ;;  %v2119_v17 = vld [vmem:[%s2329_s19 + $0x50] sm:$0xff]  }
  0x1f   : > { %v996_v12 = vpack.c.bf16 %v965_v3, %v964_v2  ;;  %v839_v28 = vadd.f32 %v1879_v19, %v743_v18  ;;  %v1655_v29 = vunpack.c.h.bf16 %v2088_v11  ;;  %v1718_v30 = vunpack.c.l.bf16 %v2103_v16 }
  0x20   : > { %v948_v13 = vadd.f32 %v1970_v45, %v852_v4  ;;  %v949_v14 = vadd.f32 %v1971_v46, %v853_v5  ;;  %v1719_v33 = vunpack.c.h.bf16 %v2103_v16  ;;  %v1782_v34 = vunpack.c.l.bf16 %v2118_v21  ;;  %v2096_v46 = vld [vmem:[%s2323_s16 + $0x10] sm:$0xff]  }
  0x21   : > { %2204 = vmatprep.mubr.msk.bf16.mxu0 %vm1027_vm0, %v996_v12  ;;  %v1783_v35 = vunpack.c.h.bf16 %v2118_v21  ;;  %v934_v37 = vadd.f32 %v1942_v20, %v838_v27  ;;  %v935_v38 = vadd.f32 %v1943_v24, %v839_v28  ;;  %v566_v39 = vadd.f32 %v1718_v30, %v1654_v25  ;;  %v2149_v27 = vld [vmem:[%s2343_s25 + $0x50] sm:$0xff]  }
  0x22   : > { %v980_v22 = vmax.f32 %v948_v13, 0.0  ;;  %v981_v23 = vmax.f32 %v949_v14, 0.0  ;;  %v1846_v40 = vunpack.c.l.bf16 %v2133_v26  ;;  %v567_v42 = vadd.f32 %v1719_v33, %v1655_v29 }
  0x23   : > { %v1847_v43 = vunpack.c.h.bf16 %v2133_v26  ;;  %v1910_v44 = vunpack.c.l.bf16 %v2148_v31  ;;  %v1911_v45 = vunpack.c.h.bf16 %v2148_v31  ;;  %v966_v47 = vmax.f32 %v934_v37, 0.0  ;;  %v2082_v37 = vld [vmem:[%s2317_s13 + $0x18] sm:$0xff]  }
  0x24   : > { %v1004_v32 = vpack.c.bf16 %v981_v23, %v980_v22  ;;  %v967_v48 = vmax.f32 %v935_v38, 0.0  ;;  %v662_v49 = vadd.f32 %v1782_v34, %v566_v39  ;;  %v1974_v50 = vunpack.c.l.bf16 %v2163_v36  ;;  %v2134_v22 = vld [vmem:[%s2335_s22 + $0x50] sm:$0xff]  }
  0x25   : > { %v663_v53 = vadd.f32 %v1783_v35, %v567_v42  ;;  %v1975_v54 = vunpack.c.h.bf16 %v2163_v36  ;;  %v1626_v55 = vunpack.c.l.bf16 %v2081_v41  ;;  %v1627_v56 = vunpack.c.h.bf16 %v2081_v41  ;;  %v2164_v36 = vld [vmem:[%s2349_s29 + $0x50] sm:$0xff]  }
  0x26   : > { %2220 = vmatprep.mubr.msk.bf16.mxu1 %vm1027_vm0, %v1004_v32  ;;  %v997_v57 = vpack.c.bf16 %v967_v48, %v966_v47  ;;  %v758_v58 = vadd.f32 %v1846_v40, %v662_v49  ;;  %v1690_v59 = vunpack.c.l.bf16 %v2096_v46  ;;  %v1691_v60 = vunpack.c.h.bf16 %v2096_v46  ;;  %v2097_v46 = vld [vmem:[%s2323_s16 + $0x18] sm:$0xff]  }
  0x27   : > { %v759_v63 = vadd.f32 %v1847_v43, %v663_v53  ;;  %v1754_v0 = vunpack.c.l.bf16 %v2111_v51  ;;  %v1755_v1 = vunpack.c.h.bf16 %v2111_v51  ;;  %v1818_v2 = vunpack.c.l.bf16 %v2126_v52  ;;  %v2112_v47 = vld [vmem:[%s2329_s19 + $0x18] sm:$0xff]  }
  0x28   : > { %2205 = vmatmul.mubr.msk.bf16.vlgmr.msra.gmra.mxu0 %vm1027_vm0, %v997_v57  ;;  %v854_v3 = vadd.f32 %v1910_v44, %v758_v58  ;;  %v552_v4 = vadd.f32 %v1690_v59, %v1626_v55  ;;  %v553_v5 = vadd.f32 %v1691_v60, %v1627_v56  ;;  %v1819_v6 = vunpack.c.h.bf16 %v2126_v52  ;;  %v2127_v52 = vld [vmem:[%s2335_s22 + $0x18] sm:$0xff]  }
  0x29   : > { %v855_v9 = vadd.f32 %v1911_v45, %v759_v63  ;;  %v1882_v10 = vunpack.c.l.bf16 %v2141_v61  ;;  %v1883_v11 = vunpack.c.h.bf16 %v2141_v61  ;;  %v1946_v12 = vunpack.c.l.bf16 %v2156_v62  ;;  %v2142_v61 = vld [vmem:[%s2343_s25 + $0x18] sm:$0xff]  }
  0x2a   : > { %v950_v13 = vadd.f32 %v1974_v50, %v854_v3  ;;  %v648_v14 = vadd.f32 %v1754_v0, %v552_v4  ;;  %v649_v15 = vadd.f32 %v1755_v1, %v553_v5  ;;  %v1947_v16 = vunpack.c.h.bf16 %v2156_v62  ;;  %v2157_v62 = vld [vmem:[%s2349_s29 + $0x18] sm:$0xff]  }
  0x2b   : > { %v951_v18 = vadd.f32 %v1975_v54, %v855_v9  ;;  %v1658_v19 = vunpack.c.l.bf16 %v2089_v7  ;;  %v1659_v20 = vunpack.c.h.bf16 %v2089_v7  ;;  %v1722_v21 = vunpack.c.l.bf16 %v2104_v8  ;;  %v2090_v7 = vld [vmem:[%s2317_s13 + $0x58] sm:$0xff]  }
  0x2c   : > { %v982_v23 = vmax.f32 %v950_v13, 0.0  ;;  %v744_v24 = vadd.f32 %v1818_v2, %v648_v14  ;;  %v745_v25 = vadd.f32 %v1819_v6, %v649_v15  ;;  %v1723_v26 = vunpack.c.h.bf16 %v2104_v8  ;;  %v2105_v8 = vld [vmem:[%s2323_s16 + $0x58] sm:$0xff]  }
  0x2d   : > { %v983_v28 = vmax.f32 %v951_v18, 0.0  ;;  %v568_v29 = vadd.f32 %v1722_v21, %v1658_v19  ;;  %v1786_v30 = vunpack.c.l.bf16 %v2119_v17  ;;  %v1787_v31 = vunpack.c.h.bf16 %v2119_v17  ;;  %v2120_v13 = vld [vmem:[%s2329_s19 + $0x58] sm:$0xff]  }
  0x2e   : > { %v840_v32 = vadd.f32 %v1882_v10, %v744_v24  ;;  %v841_v33 = vadd.f32 %v1883_v11, %v745_v25  ;;  %v569_v34 = vadd.f32 %v1723_v26, %v1659_v20  ;;  %v1850_v35 = vunpack.c.l.bf16 %v2134_v22  ;;  %v2135_v18 = vld [vmem:[%s2335_s22 + $0x58] sm:$0xff]  }
  0x2f   : > { %v1005_v38 = vpack.c.bf16 %v983_v28, %v982_v23  ;;  %v664_v39 = vadd.f32 %v1786_v30, %v568_v29  ;;  %v1851_v40 = vunpack.c.h.bf16 %v2134_v22  ;;  %v1914_v41 = vunpack.c.l.bf16 %v2149_v27  ;;  %v2165_v28 = vld [vmem:[%s2349_s29 + $0x58] sm:$0xff]  }
  0x30   : > { %v936_v42 = vadd.f32 %v1946_v12, %v840_v32  ;;  %v937_v43 = vadd.f32 %v1947_v16, %v841_v33  ;;  %v665_v44 = vadd.f32 %v1787_v31, %v569_v34  ;;  %v1915_v45 = vunpack.c.h.bf16 %v2149_v27  ;;  %v2150_v27 = vld [vmem:[%s2343_s25 + $0x58] sm:$0xff]  }
  0x31   : > { %2221 = vmatmul.mubr.msk.bf16.vlgmr.msra.gmra.mxu1 %vm1027_vm0, %v1005_v38  ;;  %v760_v48 = vadd.f32 %v1850_v35, %v664_v39  ;;  %v1978_v49 = vunpack.c.l.bf16 %v2164_v36  ;;  %v1979_v50 = vunpack.c.h.bf16 %v2164_v36  ;;  %v1630_v51 = vunpack.c.l.bf16 %v2082_v37  ;;  %v2098_v38 = vld [vmem:[%s2323_s16 + $0x20] sm:$0xff]  }
  0x32   : > { %v968_v53 = vmax.f32 %v936_v42, 0.0  ;;  %v969_v54 = vmax.f32 %v937_v43, 0.0  ;;  %v761_v55 = vadd.f32 %v1851_v40, %v665_v44  ;;  %v1631_v56 = vunpack.c.h.bf16 %v2082_v37  ;;  %v2083_v37 = vld [vmem:[%s2317_s13 + $0x20] sm:$0xff]  }
  0x33   : > { %v856_v57 = vadd.f32 %v1914_v41, %v760_v48  ;;  %v1694_v58 = vunpack.c.l.bf16 %v2097_v46  ;;  %v1695_v59 = vunpack.c.h.bf16 %v2097_v46  ;;  %v1758_v60 = vunpack.c.l.bf16 %v2112_v47 }
  0x34   : > { %v998_v63 = vpack.c.bf16 %v969_v54, %v968_v53  ;;  %v857_v0 = vadd.f32 %v1915_v45, %v761_v55  ;;  %v1759_v1 = vunpack.c.h.bf16 %v2112_v47  ;;  %v1822_v2 = vunpack.c.l.bf16 %v2127_v52  ;;  %v2113_v47 = vld [vmem:[%s2329_s19 + $0x20] sm:$0xff]  }
  0x35   : > { %v952_v3 = vadd.f32 %v1978_v49, %v856_v57  ;;  %v554_v4 = vadd.f32 %v1694_v58, %v1630_v51  ;;  %v555_v5 = vadd.f32 %v1695_v59, %v1631_v56  ;;  %v1823_v6 = vunpack.c.h.bf16 %v2127_v52  ;;  %v2128_v52 = vld [vmem:[%s2335_s22 + $0x20] sm:$0xff]  }
  0x36   : > { %2208 = vmatprep.mubr.msk.bf16.mxu0 %vm1027_vm0, %v998_v63  ;;  %v953_v9 = vadd.f32 %v1979_v50, %v857_v0  ;;  %v1886_v10 = vunpack.c.l.bf16 %v2142_v61  ;;  %v1887_v11 = vunpack.c.h.bf16 %v2142_v61  ;;  %v1950_v12 = vunpack.c.l.bf16 %v2157_v62  ;;  %v2143_v57 = vld [vmem:[%s2343_s25 + $0x20] sm:$0xff]  }
  0x37   : > { %v984_v14 = vmax.f32 %v952_v3, 0.0  ;;  %v650_v15 = vadd.f32 %v1758_v60, %v554_v4  ;;  %v651_v16 = vadd.f32 %v1759_v1, %v555_v5  ;;  %v1951_v17 = vunpack.c.h.bf16 %v2157_v62  ;;  %v2158_v62 = vld [vmem:[%s2349_s29 + $0x20] sm:$0xff]  }
  0x38   : > { %v985_v19 = vmax.f32 %v953_v9, 0.0  ;;  %v1662_v20 = vunpack.c.l.bf16 %v2090_v7  ;;  %v1663_v21 = vunpack.c.h.bf16 %v2090_v7  ;;  %v1726_v22 = vunpack.c.l.bf16 %v2105_v8  ;;  %v2091_v3 = vld [vmem:[%s2317_s13 + $0x60] sm:$0xff]  }
  0x39   : > { %v746_v23 = vadd.f32 %v1822_v2, %v650_v15  ;;  %v747_v24 = vadd.f32 %v1823_v6, %v651_v16  ;;  %v1727_v25 = vunpack.c.h.bf16 %v2105_v8  ;;  %v1790_v26 = vunpack.c.l.bf16 %v2120_v13  ;;  %v2106_v8 = vld [vmem:[%s2323_s16 + $0x60] sm:$0xff]  }
  0x3a   : > { %v1006_v29 = vpack.c.bf16 %v985_v19, %v984_v14  ;;  %v570_v30 = vadd.f32 %v1726_v22, %v1662_v20  ;;  %v1791_v31 = vunpack.c.h.bf16 %v2120_v13  ;;  %v1854_v32 = vunpack.c.l.bf16 %v2135_v18  ;;  %v2121_v13 = vld [vmem:[%s2329_s19 + $0x60] sm:$0xff]  }
  0x3b   : > { %v842_v33 = vadd.f32 %v1886_v10, %v746_v23  ;;  %v843_v34 = vadd.f32 %v1887_v11, %v747_v24  ;;  %v571_v35 = vadd.f32 %v1727_v25, %v1663_v21  ;;  %v1855_v36 = vunpack.c.h.bf16 %v2135_v18  ;;  %v2136_v18 = vld [vmem:[%s2335_s22 + $0x60] sm:$0xff]  }
  0x3c   : > { %2224 = vmatprep.mubr.msk.bf16.mxu1 %vm1027_vm0, %v1006_v29  ;;  %v666_v39 = vadd.f32 %v1790_v26, %v570_v30  ;;  %v1918_v40 = vunpack.c.l.bf16 %v2150_v27  ;;  %v1919_v41 = vunpack.c.h.bf16 %v2150_v27  ;;  %v1982_v42 = vunpack.c.l.bf16 %v2165_v28  ;;  %v2151_v23 = vld [vmem:[%s2343_s25 + $0x60] sm:$0xff]  }
  0x3d   : > { %v938_v43 = vadd.f32 %v1950_v12, %v842_v33  ;;  %v939_v44 = vadd.f32 %v1951_v17, %v843_v34  ;;  %v667_v45 = vadd.f32 %v1791_v31, %v571_v35  ;;  %v1983_v46 = vunpack.c.h.bf16 %v2165_v28  ;;  %v2166_v28 = vld [vmem:[%s2349_s29 + $0x60] sm:$0xff]   ;;  %v2084_v33 = vld [vmem:[%s2317_s13 + $0x28] sm:$0xff]  }
  0x3e   : > { %v762_v48 = vadd.f32 %v1854_v32, %v666_v39  ;;  %v1634_v49 = vunpack.c.l.bf16 %v2083_v37  ;;  %v1635_v50 = vunpack.c.h.bf16 %v2083_v37  ;;  %v1698_v51 = vunpack.c.l.bf16 %v2098_v38 }
  0x3f   : > { %v970_v53 = vmax.f32 %v938_v43, 0.0  ;;  %v971_v54 = vmax.f32 %v939_v44, 0.0  ;;  %v763_v55 = vadd.f32 %v1855_v36, %v667_v45  ;;  %v1699_v56 = vunpack.c.h.bf16 %v2098_v38  ;;  %v2099_v38 = vld [vmem:[%s2323_s16 + $0x28] sm:$0xff]  }
  0x40   : > { %v858_v58 = vadd.f32 %v1918_v40, %v762_v48  ;;  %v556_v59 = vadd.f32 %v1698_v51, %v1634_v49  ;;  %v1762_v60 = vunpack.c.l.bf16 %v2113_v47  ;;  %v1763_v61 = vunpack.c.h.bf16 %v2113_v47  ;;  %v2114_v43 = vld [vmem:[%s2329_s19 + $0x28] sm:$0xff]  }
  0x41   : > { %v999_v63 = vpack.c.bf16 %v971_v54, %v970_v53  ;;  %v859_v0 = vadd.f32 %v1919_v41, %v763_v55  ;;  %v557_v1 = vadd.f32 %v1699_v56, %v1635_v50  ;;  %v1826_v2 = vunpack.c.l.bf16 %v2128_v52  ;;  %v2129_v48 = vld [vmem:[%s2335_s22 + $0x28] sm:$0xff]  }
  0x42   : > { %v954_v4 = vadd.f32 %v1982_v42, %v858_v58  ;;  %v652_v5 = vadd.f32 %v1762_v60, %v556_v59  ;;  %v1827_v6 = vunpack.c.h.bf16 %v2128_v52  ;;  %v1890_v7 = vunpack.c.l.bf16 %v2143_v57  ;;  %v2144_v53 = vld [vmem:[%s2343_s25 + $0x28] sm:$0xff]  }
  0x43   : > { %2209 = vmatmul.mubr.msk.bf16.gmra.mxu0 %vm1027_vm0, %v999_v63  ;;  %v955_v9 = vadd.f32 %v1983_v46, %v859_v0  ;;  %v653_v10 = vadd.f32 %v1763_v61, %v557_v1  ;;  %v1891_v11 = vunpack.c.h.bf16 %v2143_v57  ;;  %v1954_v12 = vunpack.c.l.bf16 %v2158_v62  ;;  %v2159_v58 = vld [vmem:[%s2349_s29 + $0x28] sm:$0xff]  }
  0x44   : > { %v986_v14 = vmax.f32 %v954_v4, 0.0  ;;  %v748_v15 = vadd.f32 %v1826_v2, %v652_v5  ;;  %v1955_v16 = vunpack.c.h.bf16 %v2158_v62  ;;  %v1666_v17 = vunpack.c.l.bf16 %v2091_v3  ;;  %v2092_v63 = vld [vmem:[%s2317_s13 + $0x68] sm:$0xff]  }
  0x45   : > { %v987_v19 = vmax.f32 %v955_v9, 0.0  ;;  %v749_v20 = vadd.f32 %v1827_v6, %v653_v10  ;;  %v1667_v21 = vunpack.c.h.bf16 %v2091_v3  ;;  %v1730_v22 = vunpack.c.l.bf16 %v2106_v8  ;;  %v2107_v4 = vld [vmem:[%s2323_s16 + $0x68] sm:$0xff]  }
  0x46   : > { %v844_v24 = vadd.f32 %v1890_v7, %v748_v15  ;;  %v1731_v25 = vunpack.c.h.bf16 %v2106_v8  ;;  %v1794_v26 = vunpack.c.l.bf16 %v2121_v13  ;;  %v1795_v27 = vunpack.c.h.bf16 %v2121_v13  ;;  %v2122_v9 = vld [vmem:[%s2329_s19 + $0x68] sm:$0xff]  }
  0x47   : > { %v1007_v29 = vpack.c.bf16 %v987_v19, %v986_v14  ;;  %v845_v30 = vadd.f32 %v1891_v11, %v749_v20  ;;  %v572_v31 = vadd.f32 %v1730_v22, %v1666_v17  ;;  %v1858_v32 = vunpack.c.l.bf16 %v2136_v18  ;;  %v2137_v14 = vld [vmem:[%s2335_s22 + $0x68] sm:$0xff]  }
  0x48   : > { %v940_v34 = vadd.f32 %v1954_v12, %v844_v24  ;;  %v573_v35 = vadd.f32 %v1731_v25, %v1667_v21  ;;  %v1859_v36 = vunpack.c.h.bf16 %v2136_v18  ;;  %v1922_v37 = vunpack.c.l.bf16 %v2151_v23 }
  0x49   : > { %2225 = vmatmul.mubr.msk.bf16.gmra.mxu1 %vm1027_vm0, %v1007_v29  ;;  %v941_v39 = vadd.f32 %v1955_v16, %v845_v30  ;;  %v668_v40 = vadd.f32 %v1794_v26, %v572_v31  ;;  %v1923_v41 = vunpack.c.h.bf16 %v2151_v23  ;;  %v1986_v42 = vunpack.c.l.bf16 %v2166_v28  ;;  %v2152_v23 = vld [vmem:[%s2343_s25 + $0x68] sm:$0xff]  }
  0x4a   : > { %v972_v44 = vmax.f32 %v940_v34, 0.0  ;;  %v669_v45 = vadd.f32 %v1795_v27, %v573_v35  ;;  %v1987_v46 = vunpack.c.h.bf16 %v2166_v28  ;;  %v1638_v47 = vunpack.c.l.bf16 %v2084_v33  ;;  %v2167_v28 = vld [vmem:[%s2349_s29 + $0x68] sm:$0xff]  }
  0x4b   : > { %v973_v49 = vmax.f32 %v941_v39, 0.0  ;;  %v764_v50 = vadd.f32 %v1858_v32, %v668_v40  ;;  %v1639_v51 = vunpack.c.h.bf16 %v2084_v33  ;;  %v1702_v52 = vunpack.c.l.bf16 %v2099_v38  ;;  %v2085_v33 = vld [vmem:[%s2317_s13 + $0x30] sm:$0xff]  }
  0x4c   : > { %v765_v54 = vadd.f32 %v1859_v36, %v669_v45  ;;  %v1703_v55 = vunpack.c.h.bf16 %v2099_v38  ;;  %v1766_v56 = vunpack.c.l.bf16 %v2114_v43  ;;  %v1767_v57 = vunpack.c.h.bf16 %v2114_v43  ;;  %v2100_v38 = vld [vmem:[%s2323_s16 + $0x30] sm:$0xff]  }
  0x4d   : > { %v1000_v59 = vpack.c.bf16 %v973_v49, %v972_v44  ;;  %v860_v60 = vadd.f32 %v1922_v37, %v764_v50  ;;  %v558_v61 = vadd.f32 %v1702_v52, %v1638_v47  ;;  %v1830_v62 = vunpack.c.l.bf16 %v2129_v48  ;;  %v2115_v43 = vld [vmem:[%s2329_s19 + $0x30] sm:$0xff]  }
  0x4e   : > { %v861_v0 = vadd.f32 %v1923_v41, %v765_v54  ;;  %v559_v1 = vadd.f32 %v1703_v55, %v1639_v51  ;;  %v1831_v2 = vunpack.c.h.bf16 %v2129_v48  ;;  %v1894_v3 = vunpack.c.l.bf16 %v2144_v53  ;;  %v2130_v44 = vld [vmem:[%s2335_s22 + $0x30] sm:$0xff]  }
  0x4f   : > { %2212 = vmatprep.mubr.msk.bf16.mxu0 %vm1027_vm0, %v1000_v59  ;;  %v956_v5 = vadd.f32 %v1986_v42, %v860_v60  ;;  %v654_v6 = vadd.f32 %v1766_v56, %v558_v61  ;;  %v1895_v7 = vunpack.c.h.bf16 %v2144_v53  ;;  %v1958_v8 = vunpack.c.l.bf16 %v2159_v58  ;;  %v2145_v53 = vld [vmem:[%s2343_s25 + $0x30] sm:$0xff]  }
  0x50   : > { %v957_v10 = vadd.f32 %v1987_v46, %v861_v0  ;;  %v655_v11 = vadd.f32 %v1767_v57, %v559_v1  ;;  %v1959_v12 = vunpack.c.h.bf16 %v2159_v58  ;;  %v1670_v13 = vunpack.c.l.bf16 %v2092_v63  ;;  %v2160_v58 = vld [vmem:[%s2349_s29 + $0x30] sm:$0xff]  }
  0x51   : > { %v988_v15 = vmax.f32 %v956_v5, 0.0  ;;  %v750_v16 = vadd.f32 %v1830_v62, %v654_v6  ;;  %v1671_v17 = vunpack.c.h.bf16 %v2092_v63  ;;  %v1734_v18 = vunpack.c.l.bf16 %v2107_v4  ;;  %v2093_v63 = vld [vmem:[%s2317_s13 + $0x70] sm:$0xff]  }
  0x52   : > { %v989_v19 = vmax.f32 %v957_v10, 0.0  ;;  %v751_v20 = vadd.f32 %v1831_v2, %v655_v11  ;;  %v1735_v21 = vunpack.c.h.bf16 %v2107_v4  ;;  %v1798_v22 = vunpack.c.l.bf16 %v2122_v9  ;;  %v2108_v4 = vld [vmem:[%s2323_s16 + $0x70] sm:$0xff]  }
  0x53   : > { %v846_v24 = vadd.f32 %v1894_v3, %v750_v16  ;;  %v574_v25 = vadd.f32 %v1734_v18, %v1670_v13  ;;  %v1799_v26 = vunpack.c.h.bf16 %v2122_v9  ;;  %v1862_v27 = vunpack.c.l.bf16 %v2137_v14  ;;  %v2123_v9 = vld [vmem:[%s2329_s19 + $0x70] sm:$0xff]  }
  0x54   : > { %v1008_v29 = vpack.c.bf16 %v989_v19, %v988_v15  ;;  %v847_v30 = vadd.f32 %v1895_v7, %v751_v20  ;;  %v575_v31 = vadd.f32 %v1735_v21, %v1671_v17  ;;  %v1863_v32 = vunpack.c.h.bf16 %v2137_v14  ;;  %v2138_v10 = vld [vmem:[%s2335_s22 + $0x70] sm:$0xff]  }
  0x55   : > { %v942_v34 = vadd.f32 %v1958_v8, %v846_v24  ;;  %v670_v35 = vadd.f32 %v1798_v22, %v574_v25  ;;  %v1926_v36 = vunpack.c.l.bf16 %v2152_v23  ;;  %v1927_v37 = vunpack.c.h.bf16 %v2152_v23  ;;  %v2153_v19 = vld [vmem:[%s2343_s25 + $0x70] sm:$0xff]  }
  0x56   : > { %2228 = vmatprep.mubr.msk.bf16.mxu1 %vm1027_vm0, %v1008_v29  ;;  %v943_v39 = vadd.f32 %v1959_v12, %v847_v30  ;;  %v671_v40 = vadd.f32 %v1799_v26, %v575_v31  ;;  %v1990_v41 = vunpack.c.l.bf16 %v2167_v28  ;;  %v1991_v42 = vunpack.c.h.bf16 %v2167_v28  ;;  %v2168_v24 = vld [vmem:[%s2349_s29 + $0x70] sm:$0xff]   ;;  %v2086_v29 = vld [vmem:[%s2317_s13 + $0x38] sm:$0xff]  }
  0x57   : > { %v974_v45 = vmax.f32 %v942_v34, 0.0  ;;  %v766_v46 = vadd.f32 %v1862_v27, %v670_v35  ;;  %v1642_v47 = vunpack.c.l.bf16 %v2085_v33  ;;  %v1643_v48 = vunpack.c.h.bf16 %v2085_v33  ;;  %v2101_v34 = vld [vmem:[%s2323_s16 + $0x38] sm:$0xff]  }
  0x58   : > { %v975_v49 = vmax.f32 %v943_v39, 0.0  ;;  %v767_v50 = vadd.f32 %v1863_v32, %v671_v40  ;;  %v1706_v51 = vunpack.c.l.bf16 %v2100_v38  ;;  %v1707_v52 = vunpack.c.h.bf16 %v2100_v38  ;;  %v2116_v39 = vld [vmem:[%s2329_s19 + $0x38] sm:$0xff]  }
  0x59   : > { %v862_v54 = vadd.f32 %v1926_v36, %v766_v46  ;;  %v1770_v55 = vunpack.c.l.bf16 %v2115_v43  ;;  %v1771_v56 = vunpack.c.h.bf16 %v2115_v43  ;;  %v1834_v57 = vunpack.c.l.bf16 %v2130_v44 }
  0x5a   : > { %v1001_v59 = vpack.c.bf16 %v975_v49, %v974_v45  ;;  %v863_v60 = vadd.f32 %v1927_v37, %v767_v50  ;;  %v560_v61 = vadd.f32 %v1706_v51, %v1642_v47  ;;  %v561_v62 = vadd.f32 %v1707_v52, %v1643_v48  ;;  %v2146_v49 = vld [vmem:[%s2343_s25 + $0x38] sm:$0xff]  }
  0x5b   : > { %v958_v0 = vadd.f32 %v1990_v41, %v862_v54  ;;  %v1835_v1 = vunpack.c.h.bf16 %v2130_v44  ;;  %v1898_v2 = vunpack.c.l.bf16 %v2145_v53  ;;  %v1899_v3 = vunpack.c.h.bf16 %v2145_v53  ;;  %v2131_v44 = vld [vmem:[%s2335_s22 + $0x38] sm:$0xff]  }
  0x5c   : > { %2213 = vmatmul.mubr.msk.bf16.gmra.mxu0 %vm1027_vm0, %v1001_v59  ;;  %v959_v5 = vadd.f32 %v1991_v42, %v863_v60  ;;  %v656_v6 = vadd.f32 %v1770_v55, %v560_v61  ;;  %v657_v7 = vadd.f32 %v1771_v56, %v561_v62  ;;  %v1962_v8 = vunpack.c.l.bf16 %v2160_v58  ;;  %v2161_v54 = vld [vmem:[%s2349_s29 + $0x38] sm:$0xff]  }
  0x5d   : > { %v990_v11 = vmax.f32 %v958_v0, 0.0  ;;  %v1963_v12 = vunpack.c.h.bf16 %v2160_v58  ;;  %v1674_v13 = vunpack.c.l.bf16 %v2093_v63  ;;  %v1675_v14 = vunpack.c.h.bf16 %v2093_v63  ;;  %v2094_v59 = vld [vmem:[%s2317_s13 + $0x78] sm:$0xff]   ;;  %s2472_s13 = scalar_lea.vmem %s2531_s8, %s2311_s10 }
  0x5e   : > { %v991_v15 = vmax.f32 %v959_v5, 0.0  ;;  %v752_v16 = vadd.f32 %v1834_v57, %v656_v6  ;;  %v753_v17 = vadd.f32 %v1835_v1, %v657_v7  ;;  %v1738_v18 = vunpack.c.l.bf16 %v2108_v4  ;;  %v2109_v0 = vld [vmem:[%s2323_s16 + $0x78] sm:$0xff]  }
  0x5f   : > { %v1739_v20 = vunpack.c.h.bf16 %v2108_v4  ;;  %v1802_v21 = vunpack.c.l.bf16 %v2123_v9  ;;  %v1803_v22 = vunpack.c.h.bf16 %v2123_v9  ;;  %v1866_v23 = vunpack.c.l.bf16 %v2138_v10  ;;  %v2124_v5 = vld [vmem:[%s2329_s19 + $0x78] sm:$0xff]  }
  0x60   : > { %v1009_v25 = vpack.c.bf16 %v991_v15, %v990_v11  ;;  %v848_v26 = vadd.f32 %v1898_v2, %v752_v16  ;;  %v849_v27 = vadd.f32 %v1899_v3, %v753_v17  ;;  %v576_v28 = vadd.f32 %v1738_v18, %v1674_v13 }
  0x61   : > { %v577_v30 = vadd.f32 %v1739_v20, %v1675_v14  ;;  %v1867_v31 = vunpack.c.h.bf16 %v2138_v10  ;;  %v1930_v32 = vunpack.c.l.bf16 %v2153_v19  ;;  %v1931_v33 = vunpack.c.h.bf16 %v2153_v19  ;;  %v2139_v10 = vld [vmem:[%s2335_s22 + $0x78] sm:$0xff]  }
  0x62   : > { %2229 = vmatmul.mubr.msk.bf16.gmra.mxu1 %vm1027_vm0, %v1009_v25  ;;  %v944_v35 = vadd.f32 %v1962_v8, %v848_v26  ;;  %v945_v36 = vadd.f32 %v1963_v12, %v849_v27  ;;  %v672_v37 = vadd.f32 %v1802_v21, %v576_v28  ;;  %v1994_v38 = vunpack.c.l.bf16 %v2168_v24  ;;  %v2154_v19 = vld [vmem:[%s2343_s25 + $0x78] sm:$0xff]  }
  0x63   : > { %v673_v40 = vadd.f32 %v1803_v22, %v577_v30  ;;  %v1995_v41 = vunpack.c.h.bf16 %v2168_v24  ;;  %v1646_v42 = vunpack.c.l.bf16 %v2086_v29  ;;  %v1647_v43 = vunpack.c.h.bf16 %v2086_v29  ;;  %v2169_v28 = vld [vmem:[%s2349_s29 + $0x78] sm:$0xff]  }
  0x64   : > { %v976_v45 = vmax.f32 %v944_v35, 0.0  ;;  %v977_v46 = vmax.f32 %v945_v36, 0.0  ;;  %v768_v47 = vadd.f32 %v1866_v23, %v672_v37  ;;  %v1710_v48 = vunpack.c.l.bf16 %v2101_v34 }
  0x65   : > { %v769_v50 = vadd.f32 %v1867_v31, %v673_v40  ;;  %v1711_v51 = vunpack.c.h.bf16 %v2101_v34  ;;  %v1774_v52 = vunpack.c.l.bf16 %v2116_v39  ;;  %v1775_v53 = vunpack.c.h.bf16 %v2116_v39 }
  0x66   : > { %v1002_v55 = vpack.c.bf16 %v977_v46, %v976_v45  ;;  %v864_v56 = vadd.f32 %v1930_v32, %v768_v47  ;;  %v562_v57 = vadd.f32 %v1710_v48, %v1646_v42  ;;  %v1838_v58 = vunpack.c.l.bf16 %v2131_v44 }
  0x67   : > { %v865_v60 = vadd.f32 %v1931_v33, %v769_v50  ;;  %v563_v61 = vadd.f32 %v1711_v51, %v1647_v43  ;;  %v1839_v62 = vunpack.c.h.bf16 %v2131_v44  ;;  %v1902_v63 = vunpack.c.l.bf16 %v2146_v49  ;;  %v2464_v50 = vld [vmem:[%s2530_s7] ss:$0 sm:$0xff] }
  0x68   : > { %2216 = vmatprep.mubr.msk.bf16.mxu0 %vm1027_vm0, %v1002_v55  ;;  %v960_v1 = vadd.f32 %v1994_v38, %v864_v56  ;;  %v658_v2 = vadd.f32 %v1774_v52, %v562_v57  ;;  %v1903_v3 = vunpack.c.h.bf16 %v2146_v49  ;;  %v1966_v4 = vunpack.c.l.bf16 %v2161_v54 }
  0x69   : > { %v961_v6 = vadd.f32 %v1995_v41, %v865_v60  ;;  %v659_v7 = vadd.f32 %v1775_v53, %v563_v61  ;;  %v1967_v8 = vunpack.c.h.bf16 %v2161_v54  ;;  %v1678_v9 = vunpack.c.l.bf16 %v2094_v59 }
  0x6a   : > { %v992_v11 = vmax.f32 %v960_v1, 0.0  ;;  %v754_v12 = vadd.f32 %v1838_v58, %v658_v2  ;;  %v1679_v13 = vunpack.c.h.bf16 %v2094_v59  ;;  %v1742_v14 = vunpack.c.l.bf16 %v2109_v0 }
  0x6b   : > { %v993_v15 = vmax.f32 %v961_v6, 0.0  ;;  %v755_v16 = vadd.f32 %v1839_v62, %v659_v7  ;;  %v1743_v17 = vunpack.c.h.bf16 %v2109_v0  ;;  %v1806_v18 = vunpack.c.l.bf16 %v2124_v5 }
  0x6c   : > { %v850_v20 = vadd.f32 %v1902_v63, %v754_v12  ;;  %v578_v21 = vadd.f32 %v1742_v14, %v1678_v9  ;;  %v1807_v22 = vunpack.c.h.bf16 %v2124_v5  ;;  %v1870_v23 = vunpack.c.l.bf16 %v2139_v10 }
  0x6d   : > { %v1010_v24 = vpack.c.bf16 %v993_v15, %v992_v11  ;;  %v851_v25 = vadd.f32 %v1903_v3, %v755_v16  ;;  %v579_v26 = vadd.f32 %v1743_v17, %v1679_v13  ;;  %v1871_v27 = vunpack.c.h.bf16 %v2139_v10 }
  0x6e   : > { %v946_v29 = vadd.f32 %v1966_v4, %v850_v20  ;;  %v674_v30 = vadd.f32 %v1806_v18, %v578_v21  ;;  %v1934_v31 = vunpack.c.l.bf16 %v2154_v19  ;;  %v1935_v34 = vunpack.c.h.bf16 %v2154_v19 }
  0x6f   : > { %2232 = vmatprep.mubr.msk.bf16.mxu1 %vm1027_vm0, %v1010_v24  ;;  %v947_v32 = vadd.f32 %v1967_v8, %v851_v25  ;;  %v675_v33 = vadd.f32 %v1807_v22, %v579_v26  ;;  %v1998_v37 = vunpack.c.l.bf16 %v2169_v28  ;;  %v1999_v40 = vunpack.c.h.bf16 %v2169_v28 }
  0x70   : > { %v978_v35 = vmax.f32 %v946_v29, 0.0  ;;  %v770_v36 = vadd.f32 %v1870_v23, %v674_v30 }
  0x71   : > { %v979_v38 = vmax.f32 %v947_v32, 0.0  ;;  %v771_v39 = vadd.f32 %v1871_v27, %v675_v33 }
  0x72   : > { %v866_v41 = vadd.f32 %v1934_v31, %v770_v36 }
  0x73   : > { %v1003_v42 = vpack.c.bf16 %v979_v38, %v978_v35  ;;  %v867_v43 = vadd.f32 %v1935_v34, %v771_v39 }
  0x74   : > { %v962_v44 = vadd.f32 %v1998_v37, %v866_v41 }
  0x75   : > { %2217 = vmatmul.mubr.msk.bf16.gmra.mxu0 %vm1027_vm0, %v1003_v42  ;;  %v963_v45 = vadd.f32 %v1999_v40, %v867_v43 }
  0x76   : > { %v994_v46 = vmax.f32 %v962_v44, 0.0 }
  0x77   : > { %v995_v47 = vmax.f32 %v963_v45, 0.0 }
  0x79   : > { %v1011_v48 = vpack.c.bf16 %v995_v47, %v994_v46 }
  0x7b   : > { %2233 = vmatmul.mubr.msk.bf16.gmra.mxu1 %vm1027_vm0, %v1011_v48 }
  0xe8   : > { %v2206_v49 = vpop.f32.mrf.mxu0 }
  0xe9   : > { %v1119_v53 = vadd.f32 %v2206_v49, %v2464_v50 }
  0xea   : > { %v1110_v51 = vpop.f32.mrf.mxu0 }
  0xeb   : > { %v1111_v56 = vadd.f32 %v2464_v50, %v1110_v51 }
  0xec   : > { %v2207_v52 = vpop.f32.mrf.mxu0 }
  0xed   : > { %v1122_v54 = vadd.f32 %v2207_v52, %v2464_v50 }
  0xee   : > { %v1113_v55 = vpop.f32.mrf.mxu0 }
  0xef   : > { %v2008_v57 = vpack.c.bf16 %v1122_v54, %v1119_v53  ;;  %v1114_v58 = vadd.f32 %v2464_v50, %v1113_v55 }
  0xf1   : > { %v2222_v59 = vpop.f32.mrf.mxu1  ;;  %2170 = vst [vmem:[%s2472_s13 + $0x8] sm:$0xff] %v2008_v57   ;;  %v2003_v60 = vpack.c.bf16 %v1114_v58, %v1111_v56 }
  0xf2   : > { %v1183_v63 = vadd.f32 %v2222_v59, %v2464_v50 }
  0xf3   : > { %v1174_v61 = vpop.f32.mrf.mxu1  ;;  %2004 = vst [vmem:[%s2472_s13] sm:$0xff] %v2003_v60  }
  0xf4   : > { %v1175_v2 = vadd.f32 %v2464_v50, %v1174_v61 }
  0xf5   : > { %v2223_v62 = vpop.f32.mrf.mxu1 }
  0xf6   : > { %v1186_v0 = vadd.f32 %v2223_v62, %v2464_v50 }
  0xf7   : > { %v1177_v1 = vpop.f32.mrf.mxu1 }
  0xf8   : > { %v2048_v3 = vpack.c.bf16 %v1186_v0, %v1183_v63  ;;  %v1178_v4 = vadd.f32 %v2464_v50, %v1177_v1 }
  0xfa   : > { %2178 = vst [vmem:[%s2472_s13 + $0x48] sm:$0xff] %v2048_v3   ;;  %v2043_v5 = vpack.c.bf16 %v1178_v4, %v1175_v2 }
  0xfc   : > { %2177 = vst [vmem:[%s2472_s13 + $0x40] sm:$0xff] %v2043_v5  }
 0x103   : > { %v2210_v6 = vpop.f32.mrf.mxu0 }
 0x104   : > { %v1135_v9 = vadd.f32 %v2210_v6, %v2464_v50 }
 0x105   : > { %v1126_v7 = vpop.f32.mrf.mxu0 }
 0x106   : > { %v1127_v13 = vadd.f32 %v2464_v50, %v1126_v7 }
 0x107   : > { %v2211_v8 = vpop.f32.mrf.mxu0 }
 0x108   : > { %v1138_v10 = vadd.f32 %v2211_v8, %v2464_v50 }
 0x109   : > { %v2226_v11 = vpop.f32.mrf.mxu1  ;;  %v1129_v12 = vpop.f32.mrf.mxu0 }
 0x10a   : > { %v2018_v14 = vpack.c.bf16 %v1138_v10, %v1135_v9  ;;  %v1130_v15 = vadd.f32 %v2464_v50, %v1129_v12  ;;  %v1199_v19 = vadd.f32 %v2226_v11, %v2464_v50 }
 0x10b   : > { %v1190_v16 = vpop.f32.mrf.mxu1 }
 0x10c   : > { %2172 = vst [vmem:[%s2472_s13 + $0x18] sm:$0xff] %v2018_v14   ;;  %v2013_v17 = vpack.c.bf16 %v1130_v15, %v1127_v13  ;;  %v1191_v22 = vadd.f32 %v2464_v50, %v1190_v16 }
 0x10d   : > { %v2227_v18 = vpop.f32.mrf.mxu1 }
 0x10e   : > { %v1202_v20 = vadd.f32 %v2227_v18, %v2464_v50  ;;  %2171 = vst [vmem:[%s2472_s13 + $0x10] sm:$0xff] %v2013_v17  }
 0x10f   : > { %v1193_v21 = vpop.f32.mrf.mxu1 }
 0x110   : > { %v2058_v23 = vpack.c.bf16 %v1202_v20, %v1199_v19  ;;  %v1194_v24 = vadd.f32 %v2464_v50, %v1193_v21 }
 0x112   : > { %2180 = vst [vmem:[%s2472_s13 + $0x58] sm:$0xff] %v2058_v23   ;;  %v2053_v25 = vpack.c.bf16 %v1194_v24, %v1191_v22 }
 0x114   : > { %2179 = vst [vmem:[%s2472_s13 + $0x50] sm:$0xff] %v2053_v25  }
 0x11c   : > { %v2214_v26 = vpop.f32.mrf.mxu0 }
 0x11d   : > { %v1151_v29 = vadd.f32 %v2214_v26, %v2464_v50 }
 0x11e   : > { %v1142_v27 = vpop.f32.mrf.mxu0 }
 0x11f   : > { %v1143_v33 = vadd.f32 %v2464_v50, %v1142_v27 }
 0x120   : > { %v2215_v28 = vpop.f32.mrf.mxu0 }
 0x121   : > { %v1154_v30 = vadd.f32 %v2215_v28, %v2464_v50 }
 0x122   : > { %v2230_v31 = vpop.f32.mrf.mxu1  ;;  %v1145_v32 = vpop.f32.mrf.mxu0 }
 0x123   : > { %v2028_v34 = vpack.c.bf16 %v1154_v30, %v1151_v29  ;;  %v1146_v35 = vadd.f32 %v2464_v50, %v1145_v32  ;;  %v1215_v39 = vadd.f32 %v2230_v31, %v2464_v50 }
 0x124   : > { %v1206_v36 = vpop.f32.mrf.mxu1 }
 0x125   : > { %2174 = vst [vmem:[%s2472_s13 + $0x28] sm:$0xff] %v2028_v34   ;;  %v2023_v37 = vpack.c.bf16 %v1146_v35, %v1143_v33  ;;  %v1207_v42 = vadd.f32 %v2464_v50, %v1206_v36 }
 0x126   : > { %v2231_v38 = vpop.f32.mrf.mxu1 }
 0x127   : > { %v1218_v40 = vadd.f32 %v2231_v38, %v2464_v50  ;;  %2173 = vst [vmem:[%s2472_s13 + $0x20] sm:$0xff] %v2023_v37  }
 0x128   : > { %v1209_v41 = vpop.f32.mrf.mxu1 }
 0x129   : > { %v2068_v43 = vpack.c.bf16 %v1218_v40, %v1215_v39  ;;  %v1210_v44 = vadd.f32 %v2464_v50, %v1209_v41 }
 0x12b   : > { %2182 = vst [vmem:[%s2472_s13 + $0x68] sm:$0xff] %v2068_v43   ;;  %v2063_v45 = vpack.c.bf16 %v1210_v44, %v1207_v42 }
 0x12d   : > { %2181 = vst [vmem:[%s2472_s13 + $0x60] sm:$0xff] %v2063_v45  }
 0x135   : > { %v2218_v46 = vpop.f32.mrf.mxu0 }
 0x136   : > { %v1167_v49 = vadd.f32 %v2218_v46, %v2464_v50 }
 0x137   : > { %v1158_v47 = vpop.f32.mrf.mxu0 }
 0x138   : > { %v1159_v54 = vadd.f32 %v2464_v50, %v1158_v47 }
 0x139   : > { %v2219_v48 = vpop.f32.mrf.mxu0 }
 0x13a   : > { %v1170_v51 = vadd.f32 %v2219_v48, %v2464_v50 }
 0x13b   : > { %v2234_v52 = vpop.f32.mrf.mxu1  ;;  %v1161_v53 = vpop.f32.mrf.mxu0 }
 0x13c   : > { %v2038_v55 = vpack.c.bf16 %v1170_v51, %v1167_v49  ;;  %v1162_v56 = vadd.f32 %v2464_v50, %v1161_v53  ;;  %v1231_v60 = vadd.f32 %v2234_v52, %v2464_v50 }
 0x13d   : > { %v1222_v57 = vpop.f32.mrf.mxu1 }
 0x13e   : > { %2176 = vst [vmem:[%s2472_s13 + $0x38] sm:$0xff] %v2038_v55   ;;  %v2033_v58 = vpack.c.bf16 %v1162_v56, %v1159_v54  ;;  %v1223_v63 = vadd.f32 %v2464_v50, %v1222_v57 }
 0x13f   : > { %v2235_v59 = vpop.f32.mrf.mxu1 }
 0x140   : > { %v1234_v61 = vadd.f32 %v2235_v59, %v2464_v50  ;;  %2175 = vst [vmem:[%s2472_s13 + $0x30] sm:$0xff] %v2033_v58  }
 0x141   : > { %v1225_v62 = vpop.f32.mrf.mxu1 }
 0x142   : > { %v2078_v0 = vpack.c.bf16 %v1234_v61, %v1231_v60  ;;  %v1226_v1 = vadd.f32 %v2464_v50, %v1225_v62 }
 0x144   : > { %2184 = vst [vmem:[%s2472_s13 + $0x78] sm:$0xff] %v2078_v0   ;;  %v2073_v2 = vpack.c.bf16 %v1226_v1, %v1223_v63 }
 0x146   : > { %2183 = vst [vmem:[%s2472_s13 + $0x70] sm:$0xff] %v2073_v2  }
 0x147 PF: > { %s18_s27 = sadd.s32 1, %s2253_s27  }
 0x148   : > { %p15_p4 = scmp.ge.s32.totalorder %s18_s27, 4  }
 0x14a   :  { %17 = sbr.rel (!%p15_p4) target bundleno = 1 (0x1), region = 97 }

// kernel: dfanet_forward.89
= control target key start
LH: loop header
LB: loop body
LE: loop exit
PB: predicated region body
PF: predicated region fallthrough
CT: control target
= control target key end

     0   :  { %s1231_s9 = smov 0   ;;  %s1233_s10 = smov 0   ;;  %s1394_s0 = inlined_call_operand.vmem [shape: bf16[64,16], index: 0, kind: input, shape index: {}]   ;;  %s1395_s1 = inlined_call_operand.vmem [shape: bf16[2,16,1216], index: 1, kind: input, shape index: {}]   ;;  %s1396_s2 = inlined_call_operand.vmem [shape: bf16[2,64,1216], index: 2, kind: output, shape index: {}]  }
   0x1   :  { %s1235_s11 = smov 0  }
   0x2 LB: > { %s24_s12 = sadd.s32 1, %s1209_s10  ;;  %p1024_p0 = scmp.ge.s32.totalorder %s1213_s11, 1  ;;  %s1213_s11 = sphi %s1235_s11, %s12_s11   ;;  %s1209_s10 = sphi %s1233_s10, %s1400_s10   ;;  %s1205_s9 = sphi %s1231_s9, %s1399_s9  }
   0x3   : > { %p26_p1 = scmp.ge.s32.totalorder %s24_s12, 2  ;;  %p133_p2 = scmp.lt.s32.totalorder %s1213_s11, 3 }
   0x5   : > { %s1402_s12 = smov (%p26_p1, %s24_s12), 0  ;;  %p134_p3 = pnand %p1024_p0, %p133_p2 }
   0x6   : > { %p164_p4 = scmp.lt.s32.totalorder (!%p134_p3), %s1205_s9, 1 }
   0x7   : > { %137 = sbr.rel (%p134_p3) target bundleno = 295 (0x127), region = 28 }
   0xc   : > { %v1215_v0 = vmov 0   ;;  %s1404_s9 = smov (!%p164_p4, %s1205_s9), 1  ;;  %v1175_v2 = vld [vmem:[%s1394_s0] sm:$0xff]   ;;  %v1176_v3 = vld [vmem:[%s1394_s0 + $0x10] sm:$0xff]   ;;  %vm272_vm0 = vcmask 130048   ;;  %v1183_v11 = vld [vmem:[%s1394_s0 + $0x8] sm:$0xff]  }
   0xd   : > { %317 = vmatprep.mubr.bf16.mxu0 %v1215_v0  ;;  %337 = vmatprep.mubr.bf16.mxu1 %v1215_v0  ;;  %s1145_s13 = smul.u32 80, %s1404_s9  ;;  %v1184_v12 = vld [vmem:[%s1394_s0 + $0x18] sm:$0xff]   ;;  %vm894_vm1 = vcmask 1043456   ;;  %vm895_vm2 = vcmask 523268  }
   0xe   : > { %s1146_s25 = smul.u32 320, %s1404_s9  ;;  %vm1349_vm3 = vmor %vm895_vm2, %vm894_vm1 }
   0xf   : > { %s1257_s16 = scalar_lea.vmem %s1395_s1, %s1145_s13 }
  0x10   : > { %v1172_v1 = vld [vmem:[%s1257_s16 + $0x4] ss:$40 sps:$4 sm:$0xff]   ;;  %v1174_v4 = vld [vmem:[%s1257_s16] ss:$40 sps:$4 sm:$0xff]   ;;  %v1180_v7 = vld [vmem:[%s1257_s16 + $0x10] ss:$40 sps:$4 sm:$0xff]   ;;  %s1323_s28 = scalar_lea.vmem %s1396_s2, %s1146_s25 }
  0x11   : > { %299 = vmatprep.subr.bf16.mxu0 %v1172_v1  ;;  %1143 = vmatprep.subr.bf16.mxu1 %v1172_v1  ;;  %v1177_v5 = vld [vmem:[%s1257_s16 + $0x8] ss:$40 sps:$4 sm:$0xff]   ;;  %v1179_v6 = vld [vmem:[%s1257_s16 + $0xc] ss:$40 sps:$4 sm:$0xff]   ;;  %v1187_v9 = vld [vmem:[%s1257_s16 + $0x1c] ss:$40 sps:$4 sm:$0xff]  }
  0x12   : > { %300 = vmatpush1.bf16.msra.mxu0 %v1174_v4  ;;  %1144 = vmatpush1.bf16.msra.mxu1 %v1174_v4  ;;  %v1182_v8 = vld [vmem:[%s1257_s16 + $0x14] ss:$40 sps:$4 sm:$0xff]   ;;  %v1190_v10 = vld [vmem:[%s1257_s16 + $0x24] ss:$40 sps:$4 sm:$0xff]   ;;  %v1185_v13 = vld [vmem:[%s1257_s16 + $0x18] ss:$40 sps:$4 sm:$0xff]  }
  0x13   : > { %372 = vmatprep.subr.bf16.mxu1 %v1179_v6  ;;  %445 = vmatprep.subr.bf16.mxu0 %v1182_v8  ;;  %v1188_v14 = vld [vmem:[%s1257_s16 + $0x20] ss:$40 sps:$4 sm:$0xff]  }
  0x15   : > { %1041 = vmatmul.mubr.msk.bf16.vlgmr.msra.gmra.mxu0 %vm272_vm0, %v1175_v2  ;;  %1043 = vmatmul.mubr.msk.bf16.vlgmr.msra.gmra.mxu1 %vm272_vm0, %v1176_v3 }
  0x16   : > { %373 = vmatpush1.bf16.msra.mxu1 %v1177_v5  ;;  %446 = vmatpush1.bf16.msra.mxu0 %v1180_v7 }
  0x17   : > { %327 = vmatprep.mubr.bf16.mxu0 %v1215_v0  ;;  %347 = vmatprep.mubr.bf16.mxu1 %v1215_v0 }
  0x18   : > { %518 = vmatprep.subr.bf16.mxu1 %v1187_v9  ;;  %591 = vmatprep.subr.bf16.mxu0 %v1190_v10 }
  0x1d   : > { %1042 = vmatmul.mubr.msk.bf16.gmra.mxu0 %vm272_vm0, %v1183_v11  ;;  %1044 = vmatmul.mubr.msk.bf16.gmra.mxu1 %vm272_vm0, %v1184_v12 }
  0x1e   : > { %390 = vmatprep.mubr.bf16.mxu1 %v1215_v0  ;;  %463 = vmatprep.mubr.bf16.mxu0 %v1215_v0 }
  0x25   : > { %1045 = vmatmul.mubr.msk.bf16.vlgmr.msra.gmra.mxu1 %vm272_vm0, %v1175_v2  ;;  %1049 = vmatmul.mubr.msk.bf16.vlgmr.msra.gmra.mxu0 %vm272_vm0, %v1175_v2 }
  0x26   : > { %519 = vmatpush1.bf16.msra.mxu1 %v1185_v13  ;;  %592 = vmatpush1.bf16.msra.mxu0 %v1188_v14 }
  0x27   : > { %400 = vmatprep.mubr.bf16.mxu1 %v1215_v0  ;;  %473 = vmatprep.mubr.bf16.mxu0 %v1215_v0 }
  0x2d   : > { %1046 = vmatmul.mubr.msk.bf16.gmra.mxu1 %vm272_vm0, %v1183_v11  ;;  %1050 = vmatmul.mubr.msk.bf16.gmra.mxu0 %vm272_vm0, %v1183_v11 }
  0x2e   : > { %410 = vmatprep.mubr.bf16.mxu1 %v1215_v0  ;;  %483 = vmatprep.mubr.bf16.mxu0 %v1215_v0 }
  0x35   : > { %1047 = vmatmul.mubr.msk.bf16.gmra.mxu1 %vm272_vm0, %v1176_v3  ;;  %1051 = vmatmul.mubr.msk.bf16.gmra.mxu0 %vm272_vm0, %v1176_v3 }
  0x36   : > { %420 = vmatprep.mubr.bf16.mxu1 %v1215_v0  ;;  %493 = vmatprep.mubr.bf16.mxu0 %v1215_v0 }
  0x3d   : > { %1048 = vmatmul.mubr.msk.bf16.gmra.mxu1 %vm272_vm0, %v1184_v12  ;;  %1052 = vmatmul.mubr.msk.bf16.gmra.mxu0 %vm272_vm0, %v1184_v12 }
  0x3e   : > { %536 = vmatprep.mubr.bf16.mxu1 %v1215_v0  ;;  %609 = vmatprep.mubr.bf16.mxu0 %v1215_v0 }
  0x45   : > { %1053 = vmatmul.mubr.msk.bf16.vlgmr.msra.gmra.mxu1 %vm272_vm0, %v1175_v2  ;;  %1057 = vmatmul.mubr.msk.bf16.vlgmr.msra.gmra.mxu0 %vm272_vm0, %v1175_v2 }
  0x46   : > { %546 = vmatprep.mubr.bf16.mxu1 %v1215_v0  ;;  %619 = vmatprep.mubr.bf16.mxu0 %v1215_v0 }
  0x4d   : > { %1054 = vmatmul.mubr.msk.bf16.gmra.mxu1 %vm272_vm0, %v1183_v11  ;;  %1058 = vmatmul.mubr.msk.bf16.gmra.mxu0 %vm272_vm0, %v1183_v11 }
  0x4e   : > { %556 = vmatprep.mubr.bf16.mxu1 %v1215_v0  ;;  %629 = vmatprep.mubr.bf16.mxu0 %v1215_v0 }
  0x55   : > { %1055 = vmatmul.mubr.msk.bf16.gmra.mxu1 %vm272_vm0, %v1176_v3  ;;  %1059 = vmatmul.mubr.msk.bf16.gmra.mxu0 %vm272_vm0, %v1176_v3 }
  0x56   : > { %566 = vmatprep.mubr.bf16.mxu1 %v1215_v0  ;;  %639 = vmatprep.mubr.bf16.mxu0 %v1215_v0 }
  0x5d   : > { %1056 = vmatmul.mubr.msk.bf16.gmra.mxu1 %vm272_vm0, %v1184_v12  ;;  %1060 = vmatmul.mubr.msk.bf16.gmra.mxu0 %vm272_vm0, %v1184_v12 }
  0xd5   : > { %v319_v15 = vpop.f32.mrf.mxu0  ;;  %v339_v16 = vpop.f32.mrf.mxu1 }
  0xd7   : > { %v321_v17 = vpop.f32.mrf.mxu0  ;;  %v341_v18 = vpop.f32.mrf.mxu1 }
  0xd8   : > { %v1103_v19 = vpack.c.bf16 %v321_v17, %v319_v15  ;;  %v1123_v20 = vpack.c.bf16 %v341_v18, %v339_v16 }
  0xd9   : > { %v323_v21 = vpop.f32.mrf.mxu0  ;;  %v343_v22 = vpop.f32.mrf.mxu1 }
  0xda   : > { %890 = vst [vmem:[%s1323_s28] sm:$0xff] %v1103_v19  ;;  %913 = vst [vmem:[%s1323_s28 + $0xa0] sm:$0xff] %v1123_v20 }
  0xdb   : > { %v325_v23 = vpop.f32.mrf.mxu0  ;;  %v345_v24 = vpop.f32.mrf.mxu1 }
  0xdc   : > { %v1108_v25 = vpack.c.bf16 %v325_v23, %v323_v21  ;;  %v1128_v26 = vpack.c.bf16 %v345_v24, %v343_v22 }
  0xdd   : > { %v329_v27 = vpop.f32.mrf.mxu0  ;;  %v349_v28 = vpop.f32.mrf.mxu1 }
  0xde   : > { %898 = vst [vmem:[%s1323_s28 + $0x28] sm:$0xff] %v1108_v25  ;;  %918 = vst [vmem:[%s1323_s28 + $0xc8] sm:$0xff] %v1128_v26 }
  0xdf   : > { %v331_v29 = vpop.f32.mrf.mxu0  ;;  %v351_v30 = vpop.f32.mrf.mxu1 }
  0xe0   : > { %v1113_v31 = vpack.c.bf16 %v331_v29, %v329_v27  ;;  %v1133_v32 = vpack.c.bf16 %v351_v30, %v349_v28 }
  0xe1   : > { %v333_v33 = vpop.f32.mrf.mxu0  ;;  %v353_v34 = vpop.f32.mrf.mxu1 }
  0xe2   : > { %903 = vst [vmem:[%s1323_s28 + $0x50] sm:$0xff] %v1113_v31  ;;  %923 = vst [vmem:[%s1323_s28 + $0xf0] sm:$0xff] %v1133_v32 }
  0xe3   : > { %v335_v35 = vpop.f32.mrf.mxu0  ;;  %v355_v36 = vpop.f32.mrf.mxu1 }
  0xe4   : > { %v1118_v37 = vpack.c.bf16 %v335_v35, %v333_v33  ;;  %v1138_v38 = vpack.c.bf16 %v355_v36, %v353_v34 }
  0xe5   : > { %v392_v39 = vpop.f32.mrf.mxu1  ;;  %v465_v40 = vpop.f32.mrf.mxu0 }
  0xe6   : > { %908 = vst [vmem:[%s1323_s28 + $0x78] sm:$0xff] %v1118_v37  ;;  %928 = vst [vmem:[%s1323_s28 + $0x118] sm:$0xff] %v1138_v38 }
  0xe7   : > { %v394_v41 = vpop.f32.mrf.mxu1  ;;  %v467_v42 = vpop.f32.mrf.mxu0 }
  0xe8   : > { %v1104_v43 = vpack.c.bf16 %v394_v41, %v392_v39  ;;  %v1105_v44 = vpack.c.bf16 %v467_v42, %v465_v40 }
  0xe9   : > { %v396_v45 = vpop.f32.mrf.mxu1  ;;  %v469_v46 = vpop.f32.mrf.mxu0 }
  0xea   : > { %891 = vst [vmem:[%s1323_s28 + $0x8] sm:$0xff] %v1104_v43  ;;  %892 = vst [vmem:[%s1323_s28 + $0x10] sm:$0xff] %v1105_v44 }
  0xeb   : > { %v398_v47 = vpop.f32.mrf.mxu1  ;;  %v471_v48 = vpop.f32.mrf.mxu0 }
  0xec   : > { %v1109_v49 = vpack.c.bf16 %v398_v47, %v396_v45  ;;  %v1110_v50 = vpack.c.bf16 %v471_v48, %v469_v46 }
  0xed   : > { %v402_v51 = vpop.f32.mrf.mxu1  ;;  %v475_v52 = vpop.f32.mrf.mxu0 }
  0xee   : > { %899 = vst [vmem:[%s1323_s28 + $0x30] sm:$0xff] %v1109_v49  ;;  %900 = vst [vmem:[%s1323_s28 + $0x38] sm:$0xff] %v1110_v50 }
  0xef   : > { %v404_v53 = vpop.f32.mrf.mxu1  ;;  %v477_v54 = vpop.f32.mrf.mxu0 }
  0xf0   : > { %v1114_v55 = vpack.c.bf16 %v404_v53, %v402_v51  ;;  %v1115_v56 = vpack.c.bf16 %v477_v54, %v475_v52 }
  0xf1   : > { %v406_v57 = vpop.f32.mrf.mxu1  ;;  %v479_v58 = vpop.f32.mrf.mxu0 }
  0xf2   : > { %904 = vst [vmem:[%s1323_s28 + $0x58] sm:$0xff] %v1114_v55  ;;  %905 = vst [vmem:[%s1323_s28 + $0x60] sm:$0xff] %v1115_v56 }
  0xf3   : > { %v408_v59 = vpop.f32.mrf.mxu1  ;;  %v481_v60 = vpop.f32.mrf.mxu0 }
  0xf4   : > { %v1119_v61 = vpack.c.bf16 %v408_v59, %v406_v57  ;;  %v1120_v62 = vpack.c.bf16 %v481_v60, %v479_v58 }
  0xf5   : > { %v412_v63 = vpop.f32.mrf.mxu1  ;;  %v485_v0 = vpop.f32.mrf.mxu0 }
  0xf6   : > { %909 = vst [vmem:[%s1323_s28 + $0x80] sm:$0xff] %v1119_v61  ;;  %910 = vst [vmem:[%s1323_s28 + $0x88] sm:$0xff] %v1120_v62 }
  0xf7   : > { %v414_v1 = vpop.f32.mrf.mxu1  ;;  %v487_v2 = vpop.f32.mrf.mxu0 }
  0xf8   : > { %v1124_v3 = vpack.c.bf16 %v414_v1, %v412_v63  ;;  %v1125_v4 = vpack.c.bf16 %v487_v2, %v485_v0 }
  0xf9   : > { %v416_v5 = vpop.f32.mrf.mxu1  ;;  %v489_v6 = vpop.f32.mrf.mxu0 }
  0xfa   : > { %914 = vst [vmem:[%s1323_s28 + $0xa8] sm:$0xff] %v1124_v3  ;;  %915 = vst [vmem:[%s1323_s28 + $0xb0] sm:$0xff] %v1125_v4 }
  0xfb   : > { %v418_v7 = vpop.f32.mrf.mxu1  ;;  %v491_v8 = vpop.f32.mrf.mxu0 }
  0xfc   : > { %v1129_v9 = vpack.c.bf16 %v418_v7, %v416_v5  ;;  %v1130_v10 = vpack.c.bf16 %v491_v8, %v489_v6 }
  0xfd   : > { %v422_v11 = vpop.f32.mrf.mxu1  ;;  %v495_v12 = vpop.f32.mrf.mxu0 }
  0xfe   : > { %919 = vst [vmem:[%s1323_s28 + $0xd0] sm:$0xff] %v1129_v9  ;;  %920 = vst [vmem:[%s1323_s28 + $0xd8] sm:$0xff] %v1130_v10 }
  0xff   : > { %v424_v13 = vpop.f32.mrf.mxu1  ;;  %v497_v14 = vpop.f32.mrf.mxu0 }
 0x100   : > { %v1134_v15 = vpack.c.bf16 %v424_v13, %v422_v11  ;;  %v1135_v16 = vpack.c.bf16 %v497_v14, %v495_v12 }
 0x101   : > { %v426_v17 = vpop.f32.mrf.mxu1  ;;  %v499_v18 = vpop.f32.mrf.mxu0 }
 0x102   : > { %924 = vst [vmem:[%s1323_s28 + $0xf8] sm:$0xff] %v1134_v15  ;;  %925 = vst [vmem:[%s1323_s28 + $0x100] sm:$0xff] %v1135_v16 }
 0x103   : > { %v428_v19 = vpop.f32.mrf.mxu1  ;;  %v501_v20 = vpop.f32.mrf.mxu0 }
 0x104   : > { %v1139_v21 = vpack.c.bf16 %v428_v19, %v426_v17  ;;  %v1140_v22 = vpack.c.bf16 %v501_v20, %v499_v18 }
 0x105   : > { %v538_v23 = vpop.f32.mrf.mxu1  ;;  %v611_v24 = vpop.f32.mrf.mxu0 }
 0x106   : > { %929 = vst [vmem:[%s1323_s28 + $0x120] sm:$0xff] %v1139_v21  ;;  %930 = vst [vmem:[%s1323_s28 + $0x128] sm:$0xff] %v1140_v22 }
 0x107   : > { %v540_v25 = vpop.f32.mrf.mxu1  ;;  %v613_v26 = vpop.f32.mrf.mxu0 }
 0x108   : > { %v1106_v28 = vpack.c.bf16 %v540_v25, %v538_v23  ;;  %v1107_v29 = vpack.c.bf16 %v613_v26, %v611_v24 }
 0x109   : > { %v542_v30 = vpop.f32.mrf.mxu1  ;;  %v615_v31 = vpop.f32.mrf.mxu0 }
 0x10a   : > { %893 = vst [vmem:[%s1323_s28 + $0x18] sm:$0xff] %v1106_v28  ;;  %897 = vst.msk [vmem:[%s1323_s28 + $0x20] sm:$0xff] %vm1349_vm3, %v1107_v29 }
 0x10b   : > { %v544_v32 = vpop.f32.mrf.mxu1  ;;  %v617_v33 = vpop.f32.mrf.mxu0 }
 0x10c   : > { %v1111_v34 = vpack.c.bf16 %v544_v32, %v542_v30  ;;  %v1112_v35 = vpack.c.bf16 %v617_v33, %v615_v31 }
 0x10d   : > { %v548_v36 = vpop.f32.mrf.mxu1  ;;  %v621_v37 = vpop.f32.mrf.mxu0 }
 0x10e   : > { %901 = vst [vmem:[%s1323_s28 + $0x40] sm:$0xff] %v1111_v34  ;;  %902 = vst.msk [vmem:[%s1323_s28 + $0x48] sm:$0xff] %vm1349_vm3, %v1112_v35 }
 0x10f   : > { %v550_v38 = vpop.f32.mrf.mxu1  ;;  %v623_v39 = vpop.f32.mrf.mxu0 }
 0x110   : > { %v1116_v40 = vpack.c.bf16 %v550_v38, %v548_v36  ;;  %v1117_v41 = vpack.c.bf16 %v623_v39, %v621_v37 }
 0x111   : > { %v552_v42 = vpop.f32.mrf.mxu1  ;;  %v625_v43 = vpop.f32.mrf.mxu0 }
 0x112   : > { %906 = vst [vmem:[%s1323_s28 + $0x68] sm:$0xff] %v1116_v40  ;;  %907 = vst.msk [vmem:[%s1323_s28 + $0x70] sm:$0xff] %vm1349_vm3, %v1117_v41 }
 0x113   : > { %v554_v44 = vpop.f32.mrf.mxu1  ;;  %v627_v45 = vpop.f32.mrf.mxu0 }
 0x114   : > { %v1121_v46 = vpack.c.bf16 %v554_v44, %v552_v42  ;;  %v1122_v47 = vpack.c.bf16 %v627_v45, %v625_v43 }
 0x115   : > { %v558_v48 = vpop.f32.mrf.mxu1  ;;  %v631_v49 = vpop.f32.mrf.mxu0 }
 0x116   : > { %911 = vst [vmem:[%s1323_s28 + $0x90] sm:$0xff] %v1121_v46  ;;  %912 = vst.msk [vmem:[%s1323_s28 + $0x98] sm:$0xff] %vm1349_vm3, %v1122_v47 }
 0x117   : > { %v560_v50 = vpop.f32.mrf.mxu1  ;;  %v633_v51 = vpop.f32.mrf.mxu0 }
 0x118   : > { %v1126_v52 = vpack.c.bf16 %v560_v50, %v558_v48  ;;  %v1127_v53 = vpack.c.bf16 %v633_v51, %v631_v49 }
 0x119   : > { %v562_v54 = vpop.f32.mrf.mxu1  ;;  %v635_v55 = vpop.f32.mrf.mxu0 }
 0x11a   : > { %916 = vst [vmem:[%s1323_s28 + $0xb8] sm:$0xff] %v1126_v52  ;;  %917 = vst.msk [vmem:[%s1323_s28 + $0xc0] sm:$0xff] %vm1349_vm3, %v1127_v53 }
 0x11b   : > { %v564_v56 = vpop.f32.mrf.mxu1  ;;  %v637_v57 = vpop.f32.mrf.mxu0 }
 0x11c   : > { %v1131_v58 = vpack.c.bf16 %v564_v56, %v562_v54  ;;  %v1132_v59 = vpack.c.bf16 %v637_v57, %v635_v55 }
 0x11d   : > { %v568_v60 = vpop.f32.mrf.mxu1  ;;  %v641_v61 = vpop.f32.mrf.mxu0 }
 0x11e   : > { %921 = vst [vmem:[%s1323_s28 + $0xe0] sm:$0xff] %v1131_v58  ;;  %922 = vst.msk [vmem:[%s1323_s28 + $0xe8] sm:$0xff] %vm1349_vm3, %v1132_v59 }
 0x11f   : > { %v570_v62 = vpop.f32.mrf.mxu1  ;;  %v643_v63 = vpop.f32.mrf.mxu0 }
 0x120   : > { %v1136_v0 = vpack.c.bf16 %v570_v62, %v568_v60  ;;  %v1137_v1 = vpack.c.bf16 %v643_v63, %v641_v61 }
 0x121   : > { %v572_v2 = vpop.f32.mrf.mxu1  ;;  %v645_v3 = vpop.f32.mrf.mxu0 }
 0x122   : > { %926 = vst [vmem:[%s1323_s28 + $0x108] sm:$0xff] %v1136_v0  ;;  %927 = vst.msk [vmem:[%s1323_s28 + $0x110] sm:$0xff] %vm1349_vm3, %v1137_v1 }
 0x123   : > { %v574_v4 = vpop.f32.mrf.mxu1  ;;  %v647_v5 = vpop.f32.mrf.mxu0 }
 0x124   : > { %v1141_v6 = vpack.c.bf16 %v574_v4, %v572_v2  ;;  %v1142_v7 = vpack.c.bf16 %v647_v5, %v645_v3 }
 0x126   : > { %931 = vst [vmem:[%s1323_s28 + $0x130] sm:$0xff] %v1141_v6  ;;  %932 = vst.msk [vmem:[%s1323_s28 + $0x138] sm:$0xff] %vm1349_vm3, %v1142_v7 }
 0x127 PF: > { %s12_s11 = sadd.s32 1, %s1213_s11   ;;  %s1399_s9 = smov %s1209_s10 }
 0x128   : > { %p9_p5 = scmp.ge.s32.totalorder %s12_s11, 4   ;;  %s1400_s10 = smov %s1402_s12 }
 0x12a   :  { %11 = sbr.rel (!%p9_p5) target bundleno = 2 (0x2), region = 58 }

// kernel: dfanet_forward.88
= control target key start
LH: loop header
LB: loop body
LE: loop exit
PB: predicated region body
PF: predicated region fallthrough
CT: control target
= control target key end

     0   :  { %v2469_v1 = vmov 0   ;;  %vm1247_vm0 = vcmask 392192   ;;  %s3235_s1 = inlined_call_operand.vmem [shape: bf16[304,1280], index: 1, kind: input, shape index: {}]   ;;  %s3236_s0 = inlined_call_operand.vmem [shape: bf16[32,304], index: 0, kind: input, shape index: {}]   ;;  %s3237_s2 = inlined_call_operand.vmem [shape: f32[1,1280], index: 2, kind: input, shape index: {}]   ;;  %s3238_s3 = inlined_call_operand.vmem [shape: bf16[32,1280], index: 3, kind: output, shape index: {}]  }
   0x1   :  { %v2175_v0 = vld [vmem:[%s3235_s1 + $0x234] ss:$40 sps:$4 sm:$0xff]   ;;  %1339 = vmatprep.mubr.bf16.mxu1 %v2469_v1  ;;  %v2177_v2 = vld [vmem:[%s3235_s1 + $0x5a4] ss:$40 sps:$4 sm:$0xff]   ;;  %v2179_v3 = vld [vmem:[%s3235_s1 + $0x230] ss:$40 sps:$4 sm:$0xff]  }
   0x2   :  { %1254 = vmatprep.subr.bf16.mxu0 %v2175_v0  ;;  %v2180_v4 = vld [vmem:[%s3235_s1 + $0x5a0] ss:$40 sps:$4 sm:$0xff]   ;;  %1317 = vmatprep.subr.bf16.mxu1 %v2177_v2  ;;  %v2181_v5 = vld [vmem:[%s3235_s1 + $0x1e4] ss:$40 sps:$4 sm:$0xff]   ;;  %v2183_v6 = vld [vmem:[%s3235_s1 + $0x554] ss:$40 sps:$4 sm:$0xff]  }
   0x3   :  { %1255 = vmatpush1.bf16.msra.mxu0 %v2179_v3  ;;  %1318 = vmatpush1.bf16.msra.mxu1 %v2180_v4  ;;  %v2185_v7 = vld [vmem:[%s3235_s1 + $0x1e0] ss:$40 sps:$4 sm:$0xff]   ;;  %v2186_v8 = vld [vmem:[%s3235_s1 + $0x550] ss:$40 sps:$4 sm:$0xff]   ;;  %v2187_v9 = vld [vmem:[%s3235_s1 + $0x194] ss:$40 sps:$4 sm:$0xff]  }
   0x4   :  { %1256 = vmatprep.subr.bf16.mxu0 %v2181_v5  ;;  %1319 = vmatprep.subr.bf16.mxu1 %v2183_v6  ;;  %v2189_v10 = vld [vmem:[%s3235_s1 + $0x504] ss:$40 sps:$4 sm:$0xff]   ;;  %v2191_v11 = vld [vmem:[%s3235_s1 + $0x190] ss:$40 sps:$4 sm:$0xff]   ;;  %v2192_v12 = vld [vmem:[%s3235_s1 + $0x500] ss:$40 sps:$4 sm:$0xff]  }
   0x5   :  { %v2193_v13 = vld [vmem:[%s3235_s1 + $0x144] ss:$40 sps:$4 sm:$0xff]   ;;  %v2533_v14 = vld [vmem:[%s3236_s0 + $0x8] ss:$12 sps:$4 sm:$0xff]   ;;  %v2196_v15 = vld [vmem:[%s3235_s1 + $0x238] ss:$40 sps:$4 sm:$0xff]  }
   0x6   :  { %v2198_v16 = vld [vmem:[%s3235_s1 + $0x23c] ss:$40 sps:$4 sm:$0xff]   ;;  %v2199_v17 = vld [vmem:[%s3235_s1 + $0x140] ss:$40 sps:$4 sm:$0xff]   ;;  %v2204_v19 = vld [vmem:[%s3235_s1 + $0x1ec] ss:$40 sps:$4 sm:$0xff]  }
   0x7   :  { %1257 = vmatpush1.bf16.msra.mxu0 %v2185_v7  ;;  %1320 = vmatpush1.bf16.msra.mxu1 %v2186_v8  ;;  %v2200_v18 = vld [vmem:[%s3235_s1 + $0xf4] ss:$40 sps:$4 sm:$0xff]   ;;  %v2202_v20 = vld [vmem:[%s3235_s1 + $0x1e8] ss:$40 sps:$4 sm:$0xff]   ;;  %v2206_v22 = vld [vmem:[%s3235_s1 + $0xa4] ss:$40 sps:$4 sm:$0xff]  }
   0x8   :  { %1258 = vmatprep.subr.bf16.mxu0 %v2187_v9  ;;  %1321 = vmatprep.subr.bf16.mxu1 %v2189_v10  ;;  %v2205_v21 = vld [vmem:[%s3235_s1 + $0xf0] ss:$40 sps:$4 sm:$0xff]   ;;  %v2210_v23 = vld [vmem:[%s3235_s1 + $0x19c] ss:$40 sps:$4 sm:$0xff]   ;;  %v2211_v25 = vld [vmem:[%s3235_s1 + $0xa0] ss:$40 sps:$4 sm:$0xff]  }
   0x9   :  { %v2208_v24 = vld [vmem:[%s3235_s1 + $0x198] ss:$40 sps:$4 sm:$0xff]   ;;  %v2212_v26 = vld [vmem:[%s3235_s1 + $0x54] ss:$40 sps:$4 sm:$0xff]   ;;  %v2214_v28 = vld [vmem:[%s3235_s1 + $0x148] ss:$40 sps:$4 sm:$0xff]  }
   0xa   :  { %v2216_v27 = vld [vmem:[%s3235_s1 + $0x14c] ss:$40 sps:$4 sm:$0xff]   ;;  %v2217_v29 = vld [vmem:[%s3235_s1 + $0x50] ss:$40 sps:$4 sm:$0xff]   ;;  %v2222_v31 = vld [vmem:[%s3235_s1 + $0xfc] ss:$40 sps:$4 sm:$0xff]  }
   0xb   :  { %1259 = vmatpush1.bf16.msra.mxu0 %v2191_v11  ;;  %1322 = vmatpush1.bf16.msra.mxu1 %v2192_v12  ;;  %v2218_v30 = vld [vmem:[%s3235_s1 + $0x4] ss:$40 sps:$4 sm:$0xff]   ;;  %v2220_v32 = vld [vmem:[%s3235_s1 + $0xf8] ss:$40 sps:$4 sm:$0xff]   ;;  %v2224_v34 = vld [vmem:[%s3235_s1 + $0x4b4] ss:$40 sps:$4 sm:$0xff]  }
   0xc   :  { %1260 = vmatprep.subr.bf16.mxu0 %v2193_v13  ;;  %1360 = vmatprep.subr.bf16.mxu1 %v2198_v16  ;;  %v2223_v33 = vld [vmem:[%s3235_s1] ss:$40 sps:$4 sm:$0xff]   ;;  %v2228_v35 = vld [vmem:[%s3235_s1 + $0xac] ss:$40 sps:$4 sm:$0xff]   ;;  %v2229_v37 = vld [vmem:[%s3235_s1 + $0x4b0] ss:$40 sps:$4 sm:$0xff]  }
   0xd   :  { %v2226_v36 = vld [vmem:[%s3235_s1 + $0xa8] ss:$40 sps:$4 sm:$0xff]   ;;  %v2230_v38 = vld [vmem:[%s3235_s1 + $0x464] ss:$40 sps:$4 sm:$0xff]   ;;  %v2232_v40 = vld [vmem:[%s3235_s1 + $0x58] ss:$40 sps:$4 sm:$0xff]  }
   0xe   :  { %2124 = vmatmul.mubr.msk.bf16.vlgmr.msra.gmra.mxu1 %vm1247_vm0, %v2533_v14  ;;  %v2234_v39 = vld [vmem:[%s3235_s1 + $0x5c] ss:$40 sps:$4 sm:$0xff]   ;;  %v2235_v41 = vld [vmem:[%s3235_s1 + $0x460] ss:$40 sps:$4 sm:$0xff]   ;;  %v2240_v43 = vld [vmem:[%s3235_s1 + $0xc] ss:$40 sps:$4 sm:$0xff]  }
   0xf   :  { %1261 = vmatpush1.bf16.msra.mxu0 %v2199_v17  ;;  %1361 = vmatpush1.bf16.msra.mxu1 %v2196_v15  ;;  %v2236_v42 = vld [vmem:[%s3235_s1 + $0x414] ss:$40 sps:$4 sm:$0xff]   ;;  %v2238_v44 = vld [vmem:[%s3235_s1 + $0x8] ss:$40 sps:$4 sm:$0xff]   ;;  %v2242_v46 = vld [vmem:[%s3235_s1 + $0x3c4] ss:$40 sps:$4 sm:$0xff]  }
  0x10   :  { %1262 = vmatprep.subr.bf16.mxu0 %v2200_v18  ;;  %1362 = vmatprep.subr.bf16.mxu1 %v2204_v19  ;;  %v2241_v45 = vld [vmem:[%s3235_s1 + $0x410] ss:$40 sps:$4 sm:$0xff]   ;;  %v2246_v47 = vld [vmem:[%s3235_s1 + $0x4bc] ss:$40 sps:$4 sm:$0xff]   ;;  %v2247_v49 = vld [vmem:[%s3235_s1 + $0x3c0] ss:$40 sps:$4 sm:$0xff]  }
  0x11   :  { %1349 = vmatprep.mubr.bf16.mxu1 %v2469_v1  ;;  %v2244_v48 = vld [vmem:[%s3235_s1 + $0x4b8] ss:$40 sps:$4 sm:$0xff]   ;;  %v2248_v50 = vld [vmem:[%s3235_s1 + $0x374] ss:$40 sps:$4 sm:$0xff]   ;;  %v2649_v51 = vld [vmem:[%s3236_s0 + $0x4] ss:$12 sps:$4 sm:$0xff]  }
  0x12   :  { %v2252_v52 = vld [vmem:[%s3235_s1 + $0x46c] ss:$40 sps:$4 sm:$0xff]   ;;  %1286 = vmatprep.mubr.bf16.mxu0 %v2649_v51  ;;  %v2250_v54 = vld [vmem:[%s3235_s1 + $0x468] ss:$40 sps:$4 sm:$0xff]   ;;  %v2258_v57 = vld [vmem:[%s3235_s1 + $0x41c] ss:$40 sps:$4 sm:$0xff]  }
  0x13   :  { %1263 = vmatpush1.bf16.msra.mxu0 %v2205_v21  ;;  %1363 = vmatpush1.bf16.msra.mxu1 %v2202_v20  ;;  %v2657_v53 = vld [vmem:[%s3236_s0 + $0x20] ss:$12 sps:$4 sm:$0xff]   ;;  %v2253_v55 = vld [vmem:[%s3235_s1 + $0x370] ss:$40 sps:$4 sm:$0xff]   ;;  %v2260_v60 = vld [vmem:[%s3235_s1 + $0x2d4] ss:$40 sps:$4 sm:$0xff]  }
  0x14   :  { %1264 = vmatprep.subr.bf16.mxu0 %v2206_v22  ;;  %1364 = vmatprep.subr.bf16.mxu1 %v2210_v23  ;;  %v2254_v56 = vld [vmem:[%s3235_s1 + $0x324] ss:$40 sps:$4 sm:$0xff]   ;;  %v2256_v58 = vld [vmem:[%s3235_s1 + $0x418] ss:$40 sps:$4 sm:$0xff]   ;;  %v2262_v62 = vld [vmem:[%s3235_s1 + $0x3c8] ss:$40 sps:$4 sm:$0xff]  }
  0x15   :  { %v2259_v59 = vld [vmem:[%s3235_s1 + $0x320] ss:$40 sps:$4 sm:$0xff]   ;;  %v2264_v61 = vld [vmem:[%s3235_s1 + $0x3cc] ss:$40 sps:$4 sm:$0xff]   ;;  %v2265_v63 = vld [vmem:[%s3235_s1 + $0x2d0] ss:$40 sps:$4 sm:$0xff]  }
  0x16   :  { %2125 = vmatmul.mubr.msk.bf16.gmra.mxu1 %vm1247_vm0, %v2657_v53  ;;  %v2266_v0 = vld [vmem:[%s3235_s1 + $0x284] ss:$40 sps:$4 sm:$0xff]   ;;  %v2268_v3 = vld [vmem:[%s3235_s1 + $0x378] ss:$40 sps:$4 sm:$0xff]   ;;  %v2276_v8 = vld [vmem:[%s3235_s1 + $0x328] ss:$40 sps:$4 sm:$0xff]  }
  0x17   :  { %1265 = vmatpush1.bf16.msra.mxu0 %v2211_v25  ;;  %1365 = vmatpush1.bf16.msra.mxu1 %v2208_v24  ;;  %v2270_v2 = vld [vmem:[%s3235_s1 + $0x37c] ss:$40 sps:$4 sm:$0xff]   ;;  %v2271_v4 = vld [vmem:[%s3235_s1 + $0x280] ss:$40 sps:$4 sm:$0xff]   ;;  %v2278_v5 = vld [vmem:[%s3235_s1 + $0x32c] ss:$40 sps:$4 sm:$0xff]  }
  0x18   :  { %1266 = vmatprep.subr.bf16.mxu0 %v2212_v26  ;;  %1366 = vmatprep.subr.bf16.mxu1 %v2216_v27  ;;  %v2284_v6 = vld [vmem:[%s3235_s1 + $0x5ac] ss:$40 sps:$4 sm:$0xff]   ;;  %v2282_v9 = vld [vmem:[%s3235_s1 + $0x5a8] ss:$40 sps:$4 sm:$0xff]   ;;  %v2281_v10 = vld [vmem:[%s3235_s1 + $0x2dc] ss:$40 sps:$4 sm:$0xff]  }
  0x19   :  { %1392 = vmatprep.mubr.bf16.mxu1 %v2649_v51  ;;  %v2714_v7 = vld [vmem:[%s3236_s0] ss:$12 sps:$4 sm:$0xff]   ;;  %v2728_v11 = vld [vmem:[%s3236_s0 + $0x1c] ss:$12 sps:$4 sm:$0xff]   ;;  %v2750_v18 = vld [vmem:[%s3236_s0 + $0x18] ss:$12 sps:$4 sm:$0xff]  }
  0x1a   :  { %v2293_v12 = vld [vmem:[%s3235_s1 + $0x55c] ss:$40 sps:$4 sm:$0xff]   ;;  %v2279_v13 = vld [vmem:[%s3235_s1 + $0x2d8] ss:$40 sps:$4 sm:$0xff]   ;;  %v2290_v16 = vld [vmem:[%s3235_s1 + $0x28c] ss:$40 sps:$4 sm:$0xff]  }
  0x1b   :  { %1267 = vmatpush1.bf16.msra.mxu0 %v2217_v29  ;;  %1367 = vmatpush1.bf16.msra.mxu1 %v2214_v28  ;;  %v2291_v15 = vld [vmem:[%s3235_s1 + $0x558] ss:$40 sps:$4 sm:$0xff]   ;;  %v2296_v17 = vld [vmem:[%s3235_s1 + $0x50c] ss:$40 sps:$4 sm:$0xff]   ;;  %v2288_v19 = vld [vmem:[%s3235_s1 + $0x288] ss:$40 sps:$4 sm:$0xff]  }
  0x1c   :  { %1268 = vmatprep.subr.bf16.mxu0 %v2218_v30  ;;  %1368 = vmatprep.subr.bf16.mxu1 %v2222_v31  ;;  %v2294_v20 = vld [vmem:[%s3235_s1 + $0x508] ss:$40 sps:$4 sm:$0xff]   ;;  %v2299_v21 = vld [vmem:[%s3235_s1 + $0x244] ss:$40 sps:$4 sm:$0xff]   ;;  %v2305_v22 = vld [vmem:[%s3235_s1 + $0x5b4] ss:$40 sps:$4 sm:$0xff]  }
  0x1d   :  { %v2297_v23 = vld [vmem:[%s3235_s1 + $0x240] ss:$40 sps:$4 sm:$0xff]   ;;  %v2302_v24 = vld [vmem:[%s3235_s1 + $0x1f4] ss:$40 sps:$4 sm:$0xff]   ;;  %v2300_v25 = vld [vmem:[%s3235_s1 + $0x1f0] ss:$40 sps:$4 sm:$0xff]  }
  0x1e   :  { %v2303_v26 = vld [vmem:[%s3235_s1 + $0x5b0] ss:$40 sps:$4 sm:$0xff]   ;;  %v2308_v27 = vld [vmem:[%s3235_s1 + $0x1a4] ss:$40 sps:$4 sm:$0xff]   ;;  %v2306_v29 = vld [vmem:[%s3235_s1 + $0x1a0] ss:$40 sps:$4 sm:$0xff]  }
  0x1f   :  { %1269 = vmatpush1.bf16.msra.mxu0 %v2223_v33  ;;  %1369 = vmatpush1.bf16.msra.mxu1 %v2220_v32  ;;  %v2311_v28 = vld [vmem:[%s3235_s1 + $0x564] ss:$40 sps:$4 sm:$0xff]   ;;  %v2309_v30 = vld [vmem:[%s3235_s1 + $0x560] ss:$40 sps:$4 sm:$0xff]   ;;  %v2314_v31 = vld [vmem:[%s3235_s1 + $0x154] ss:$40 sps:$4 sm:$0xff]  }
  0x20   :  { %1270 = vmatprep.subr.bf16.mxu0 %v2224_v34  ;;  %1370 = vmatprep.subr.bf16.mxu1 %v2228_v35  ;;  %v2317_v32 = vld [vmem:[%s3235_s1 + $0x514] ss:$40 sps:$4 sm:$0xff]   ;;  %v2312_v33 = vld [vmem:[%s3235_s1 + $0x150] ss:$40 sps:$4 sm:$0xff]   ;;  %v2320_v35 = vld [vmem:[%s3235_s1 + $0x104] ss:$40 sps:$4 sm:$0xff]  }
  0x21   :  { %v2315_v34 = vld [vmem:[%s3235_s1 + $0x510] ss:$40 sps:$4 sm:$0xff]  }
  0x23   :  { %1271 = vmatpush2.bf16.msra.mxu0 %v2229_v37  ;;  %1371 = vmatpush1.bf16.msra.mxu1 %v2226_v36  ;;  %v2323_v36 = vld [vmem:[%s3235_s1 + $0x24c] ss:$40 sps:$4 sm:$0xff]   ;;  %v2318_v37 = vld [vmem:[%s3235_s1 + $0x100] ss:$40 sps:$4 sm:$0xff]  }
  0x24   :  { %1272 = vmatprep.subr.bf16.mxu0 %v2230_v38  ;;  %1372 = vmatprep.subr.bf16.mxu1 %v2234_v39  ;;  %v2326_v38 = vld [vmem:[%s3235_s1 + $0xb4] ss:$40 sps:$4 sm:$0xff]   ;;  %v2321_v39 = vld [vmem:[%s3235_s1 + $0x248] ss:$40 sps:$4 sm:$0xff]  }
  0x27   :  { %1273 = vmatpush2.bf16.msra.mxu0 %v2235_v41  ;;  %1373 = vmatpush1.bf16.msra.mxu1 %v2232_v40  ;;  %v2324_v40 = vld [vmem:[%s3235_s1 + $0xb0] ss:$40 sps:$4 sm:$0xff]   ;;  %v2329_v41 = vld [vmem:[%s3235_s1 + $0x1fc] ss:$40 sps:$4 sm:$0xff]  }
  0x28   :  { %1274 = vmatprep.subr.bf16.mxu0 %v2236_v42  ;;  %1374 = vmatprep.subr.bf16.mxu1 %v2240_v43  ;;  %v2332_v42 = vld [vmem:[%s3235_s1 + $0x64] ss:$40 sps:$4 sm:$0xff]   ;;  %v2327_v43 = vld [vmem:[%s3235_s1 + $0x1f8] ss:$40 sps:$4 sm:$0xff]  }
  0x2b   :  { %1275 = vmatpush2.bf16.msra.mxu0 %v2241_v45  ;;  %1375 = vmatpush1.bf16.msra.mxu1 %v2238_v44  ;;  %v2330_v44 = vld [vmem:[%s3235_s1 + $0x60] ss:$40 sps:$4 sm:$0xff]   ;;  %v2335_v45 = vld [vmem:[%s3235_s1 + $0x1ac] ss:$40 sps:$4 sm:$0xff]  }
  0x2c   :  { %1276 = vmatprep.subr.bf16.mxu0 %v2242_v46  ;;  %1376 = vmatprep.subr.bf16.mxu1 %v2246_v47  ;;  %v2333_v46 = vld [vmem:[%s3235_s1 + $0x1a8] ss:$40 sps:$4 sm:$0xff]  }
  0x2d   :  { %v2336_v47 = vld [vmem:[%s3235_s1 + $0x10] ss:$40 sps:$4 sm:$0xff]  }
  0x2f   :  { %1277 = vmatpush2.bf16.msra.mxu0 %v2247_v49  ;;  %1377 = vmatpush2.bf16.msra.mxu1 %v2244_v48  ;;  %v2341_v48 = vld [vmem:[%s3235_s1 + $0x15c] ss:$40 sps:$4 sm:$0xff]  }
  0x30   :  { %1278 = vmatprep.subr.bf16.mxu0 %v2248_v50  ;;  %1378 = vmatprep.subr.bf16.mxu1 %v2252_v52  ;;  %v2344_v49 = vld [vmem:[%s3235_s1 + $0x4c4] ss:$40 sps:$4 sm:$0xff]   ;;  %v2339_v50 = vld [vmem:[%s3235_s1 + $0x158] ss:$40 sps:$4 sm:$0xff]  }
  0x31   :  { %v2342_v52 = vld [vmem:[%s3235_s1 + $0x4c0] ss:$40 sps:$4 sm:$0xff]  }
  0x33   :  { %1279 = vmatpush2.bf16.msra.mxu0 %v2253_v55  ;;  %1379 = vmatpush2.bf16.msra.mxu1 %v2250_v54  ;;  %v2347_v54 = vld [vmem:[%s3235_s1 + $0x10c] ss:$40 sps:$4 sm:$0xff]  }
  0x34   :  { %1280 = vmatprep.subr.bf16.mxu0 %v2254_v56  ;;  %1380 = vmatprep.subr.bf16.mxu1 %v2258_v57  ;;  %v2350_v55 = vld [vmem:[%s3235_s1 + $0x474] ss:$40 sps:$4 sm:$0xff]   ;;  %v2345_v56 = vld [vmem:[%s3235_s1 + $0x108] ss:$40 sps:$4 sm:$0xff]  }
  0x35   :  { %v2348_v57 = vld [vmem:[%s3235_s1 + $0x470] ss:$40 sps:$4 sm:$0xff]  }
  0x37   :  { %1281 = vmatpush2.bf16.msra.mxu0 %v2259_v59  ;;  %1381 = vmatpush2.bf16.msra.mxu1 %v2256_v58  ;;  %v2353_v58 = vld [vmem:[%s3235_s1 + $0xbc] ss:$40 sps:$4 sm:$0xff]  }
  0x38   :  { %1282 = vmatprep.subr.bf16.mxu0 %v2260_v60  ;;  %1382 = vmatprep.subr.bf16.mxu1 %v2264_v61  ;;  %v2356_v59 = vld [vmem:[%s3235_s1 + $0x424] ss:$40 sps:$4 sm:$0xff]   ;;  %v2351_v60 = vld [vmem:[%s3235_s1 + $0xb8] ss:$40 sps:$4 sm:$0xff]  }
  0x39   :  { %v2354_v61 = vld [vmem:[%s3235_s1 + $0x420] ss:$40 sps:$4 sm:$0xff]  }
  0x3b   :  { %1283 = vmatpush2.bf16.msra.mxu0 %v2265_v63  ;;  %1383 = vmatpush2.bf16.msra.mxu1 %v2262_v62  ;;  %v2359_v62 = vld [vmem:[%s3235_s1 + $0x6c] ss:$40 sps:$4 sm:$0xff]  }
  0x3c   :  { %1284 = vmatprep.subr.bf16.mxu0 %v2266_v0  ;;  %1384 = vmatprep.subr.bf16.mxu1 %v2270_v2  ;;  %v2362_v63 = vld [vmem:[%s3235_s1 + $0x3d4] ss:$40 sps:$4 sm:$0xff]   ;;  %v2357_v0 = vld [vmem:[%s3235_s1 + $0x68] ss:$40 sps:$4 sm:$0xff]  }
  0x3d   :  { %v2360_v2 = vld [vmem:[%s3235_s1 + $0x3d0] ss:$40 sps:$4 sm:$0xff]  }
  0x3f   :  { %1285 = vmatpush2.bf16.msra.mxu0 %v2271_v4  ;;  %1385 = vmatpush2.bf16.msra.mxu1 %v2268_v3  ;;  %v2365_v3 = vld [vmem:[%s3235_s1 + $0x1c] ss:$40 sps:$4 sm:$0xff]  }
  0x40   :  { %1386 = vmatprep.subr.bf16.mxu1 %v2278_v5  ;;  %1423 = vmatprep.subr.bf16.mxu0 %v2284_v6  ;;  %v2368_v4 = vld [vmem:[%s3235_s1 + $0x384] ss:$40 sps:$4 sm:$0xff]   ;;  %v2363_v5 = vld [vmem:[%s3235_s1 + $0x18] ss:$40 sps:$4 sm:$0xff]  }
  0x41   :  { %v2366_v6 = vld [vmem:[%s3235_s1 + $0x380] ss:$40 sps:$4 sm:$0xff]  }
  0x42   :  { %1287 = vmatmul.mubr.bf16.vlgmr.msra.gmra.mxu0 %v2714_v7 }
  0x43   :  { %1387 = vmatpush2.bf16.msra.mxu1 %v2276_v8  ;;  %1424 = vmatpush1.bf16.msra.mxu0 %v2282_v9  ;;  %v2371_v8 = vld [vmem:[%s3235_s1 + $0x4cc] ss:$40 sps:$4 sm:$0xff]  }
  0x44   :  { %1388 = vmatprep.subr.bf16.mxu1 %v2281_v10  ;;  %1296 = vmatprep.mubr.bf16.mxu0 %v2728_v11  ;;  %v2374_v9 = vld [vmem:[%s3235_s1 + $0x334] ss:$40 sps:$4 sm:$0xff]   ;;  %v2369_v10 = vld [vmem:[%s3235_s1 + $0x4c8] ss:$40 sps:$4 sm:$0xff]  }
  0x45   :  { %1425 = vmatprep.subr.bf16.mxu0 %v2293_v12  ;;  %v2372_v12 = vld [vmem:[%s3235_s1 + $0x330] ss:$40 sps:$4 sm:$0xff]  }
  0x47   :  { %1389 = vmatpush2.bf16.msra.mxu1 %v2279_v13  ;;  %1426 = vmatpush1.bf16.msra.mxu0 %v2291_v15  ;;  %v2377_v13 = vld [vmem:[%s3235_s1 + $0x47c] ss:$40 sps:$4 sm:$0xff]  }
  0x48   :  { %1390 = vmatprep.subr.bf16.mxu1 %v2290_v16  ;;  %1427 = vmatprep.subr.bf16.mxu0 %v2296_v17  ;;  %v2380_v15 = vld [vmem:[%s3235_s1 + $0x2e4] ss:$40 sps:$4 sm:$0xff]   ;;  %v2375_v16 = vld [vmem:[%s3235_s1 + $0x478] ss:$40 sps:$4 sm:$0xff]  }
  0x49   :  { %v2378_v17 = vld [vmem:[%s3235_s1 + $0x2e0] ss:$40 sps:$4 sm:$0xff]  }
  0x4a   :  { %1297 = vmatmul.mubr.bf16.gmra.mxu0 %v2750_v18 }
  0x4b   :  { %1391 = vmatpush2.bf16.msra.mxu1 %v2288_v19  ;;  %1428 = vmatpush1.bf16.msra.mxu0 %v2294_v20  ;;  %v2383_v19 = vld [vmem:[%s3235_s1 + $0x42c] ss:$40 sps:$4 sm:$0xff]  }
  0x4c   :  { %1466 = vmatprep.subr.bf16.mxu1 %v2299_v21  ;;  %1445 = vmatprep.mubr.bf16.mxu0 %v2469_v1  ;;  %v2386_v20 = vld [vmem:[%s3235_s1 + $0x294] ss:$40 sps:$4 sm:$0xff]   ;;  %v2381_v21 = vld [vmem:[%s3235_s1 + $0x428] ss:$40 sps:$4 sm:$0xff]  }
  0x4d   :  { %1529 = vmatprep.subr.bf16.mxu0 %v2305_v22  ;;  %v2384_v22 = vld [vmem:[%s3235_s1 + $0x290] ss:$40 sps:$4 sm:$0xff]  }
  0x4e   :  { %1393 = vmatmul.mubr.bf16.vlgmr.msra.gmra.mxu1 %v2714_v7 }
  0x4f   :  { %1467 = vmatpush1.bf16.msra.mxu1 %v2297_v23  ;;  %1402 = vmatprep.mubr.bf16.mxu1 %v2728_v11  ;;  %v2389_v23 = vld [vmem:[%s3235_s1 + $0x3dc] ss:$40 sps:$4 sm:$0xff]  }
  0x50   :  { %1468 = vmatprep.subr.bf16.mxu1 %v2302_v24  ;;  %v2392_v24 = vld [vmem:[%s3235_s1 + $0x254] ss:$40 sps:$4 sm:$0xff]  }
  0x52   :  { %2126 = vmatmul.mubr.msk.bf16.vlgmr.msra.gmra.mxu0 %vm1247_vm0, %v2533_v14 }
  0x53   :  { %1469 = vmatpush1.bf16.msra.mxu1 %v2300_v25  ;;  %1530 = vmatpush1.bf16.msra.mxu0 %v2303_v26  ;;  %v2387_v25 = vld [vmem:[%s3235_s1 + $0x3d8] ss:$40 sps:$4 sm:$0xff]  }
  0x54   :  { %1470 = vmatprep.subr.bf16.mxu1 %v2308_v27  ;;  %1455 = vmatprep.mubr.bf16.mxu0 %v2469_v1  ;;  %v2390_v26 = vld [vmem:[%s3235_s1 + $0x250] ss:$40 sps:$4 sm:$0xff]   ;;  %v2395_v27 = vld [vmem:[%s3235_s1 + $0x38c] ss:$40 sps:$4 sm:$0xff]  }
  0x55   :  { %1531 = vmatprep.subr.bf16.mxu0 %v2311_v28  ;;  %v2398_v28 = vld [vmem:[%s3235_s1 + $0x204] ss:$40 sps:$4 sm:$0xff]  }
  0x56   :  { %1403 = vmatmul.mubr.bf16.gmra.mxu1 %v2750_v18 }
  0x57   :  { %1471 = vmatpush1.bf16.msra.mxu1 %v2306_v29  ;;  %1532 = vmatpush1.bf16.msra.mxu0 %v2309_v30  ;;  %v2393_v29 = vld [vmem:[%s3235_s1 + $0x388] ss:$40 sps:$4 sm:$0xff]  }
  0x58   :  { %1472 = vmatprep.subr.bf16.mxu1 %v2314_v31  ;;  %1533 = vmatprep.subr.bf16.mxu0 %v2317_v32  ;;  %v2396_v30 = vld [vmem:[%s3235_s1 + $0x200] ss:$40 sps:$4 sm:$0xff]   ;;  %v2401_v31 = vld [vmem:[%s3235_s1 + $0x33c] ss:$40 sps:$4 sm:$0xff]  }
  0x59   :  { %1498 = vmatprep.mubr.bf16.mxu1 %v2649_v51  ;;  %v2404_v32 = vld [vmem:[%s3235_s1 + $0x1b4] ss:$40 sps:$4 sm:$0xff]  }
  0x5a   :  { %2127 = vmatmul.mubr.msk.bf16.gmra.mxu0 %vm1247_vm0, %v2657_v53 }
  0x5b   :  { %1473 = vmatpush1.bf16.msra.mxu1 %v2312_v33  ;;  %1534 = vmatpush1.bf16.msra.mxu0 %v2315_v34  ;;  %v2399_v33 = vld [vmem:[%s3235_s1 + $0x338] ss:$40 sps:$4 sm:$0xff]  }
  0x5c   :  { %1474 = vmatprep.subr.bf16.mxu1 %v2320_v35  ;;  %1551 = vmatprep.mubr.bf16.mxu0 %v2469_v1  ;;  %v2402_v34 = vld [vmem:[%s3235_s1 + $0x1b0] ss:$40 sps:$4 sm:$0xff]   ;;  %v2407_v35 = vld [vmem:[%s3235_s1 + $0x2ec] ss:$40 sps:$4 sm:$0xff]  }
  0x5d   :  { %1572 = vmatprep.subr.bf16.mxu0 %v2323_v36  ;;  %v2410_v36 = vld [vmem:[%s3235_s1 + $0x164] ss:$40 sps:$4 sm:$0xff]  }
  0x5f   :  { %1475 = vmatpush1.bf16.msra.mxu1 %v2318_v37  ;;  %v2405_v37 = vld [vmem:[%s3235_s1 + $0x2e8] ss:$40 sps:$4 sm:$0xff]  }
  0x60   :  { %1476 = vmatprep.subr.bf16.mxu1 %v2326_v38  ;;  %v2408_v38 = vld [vmem:[%s3235_s1 + $0x160] ss:$40 sps:$4 sm:$0xff]  }
  0x62   :  { %2128 = vmatmul.mubr.msk.bf16.vlgmr.msra.gmra.mxu0 %vm1247_vm0, %v2533_v14  ;;  %v2338_v14 = vld [vmem:[%s3235_s1 + $0x14] ss:$40 sps:$4 sm:$0xff]  }
  0x63   :  { %1573 = vmatpush1.bf16.msra.mxu0 %v2321_v39  ;;  %1477 = vmatpush1.bf16.msra.mxu1 %v2324_v40  ;;  %v2413_v39 = vld [vmem:[%s3235_s1 + $0x29c] ss:$40 sps:$4 sm:$0xff]  }
  0x64   :  { %1574 = vmatprep.subr.bf16.mxu0 %v2329_v41  ;;  %1478 = vmatprep.subr.bf16.mxu1 %v2332_v42  ;;  %v2416_v40 = vld [vmem:[%s3235_s1 + $0x114] ss:$40 sps:$4 sm:$0xff]   ;;  %v2411_v41 = vld [vmem:[%s3235_s1 + $0x298] ss:$40 sps:$4 sm:$0xff]  }
  0x65   :  { %1561 = vmatprep.mubr.bf16.mxu0 %v2469_v1  ;;  %v2414_v42 = vld [vmem:[%s3235_s1 + $0x110] ss:$40 sps:$4 sm:$0xff]  }
  0x67   :  { %1575 = vmatpush1.bf16.msra.mxu0 %v2327_v43  ;;  %1479 = vmatpush1.bf16.msra.mxu1 %v2330_v44  ;;  %v2419_v43 = vld [vmem:[%s3235_s1 + $0xc4] ss:$40 sps:$4 sm:$0xff]   ;;  %v2417_v44 = vld [vmem:[%s3235_s1 + $0xc0] ss:$40 sps:$4 sm:$0xff]  }
  0x68   :  { %1576 = vmatprep.subr.bf16.mxu0 %v2335_v45  ;;  %1480 = vmatprep.subr.bf16.mxu1 %v2338_v14  ;;  %v2420_v45 = vld [vmem:[%s3235_s1 + $0x5b8] ss:$40 sps:$4 sm:$0xff]   ;;  %v2425_v14 = vld [vmem:[%s3235_s1 + $0x74] ss:$40 sps:$4 sm:$0xff]  }
  0x6a   :  { %2129 = vmatmul.mubr.msk.bf16.gmra.mxu0 %vm1247_vm0, %v2657_v53 }
  0x6b   :  { %1577 = vmatpush1.bf16.msra.mxu0 %v2333_v46  ;;  %1481 = vmatpush1.bf16.msra.mxu1 %v2336_v47  ;;  %v2428_v46 = vld [vmem:[%s3235_s1 + $0x56c] ss:$40 sps:$4 sm:$0xff]   ;;  %v2423_v47 = vld [vmem:[%s3235_s1 + $0x70] ss:$40 sps:$4 sm:$0xff]  }
  0x6c   :  { %1578 = vmatprep.subr.bf16.mxu0 %v2341_v48  ;;  %1482 = vmatprep.subr.bf16.mxu1 %v2344_v49  ;;  %v2426_v48 = vld [vmem:[%s3235_s1 + $0x568] ss:$40 sps:$4 sm:$0xff]   ;;  %v2431_v49 = vld [vmem:[%s3235_s1 + $0x24] ss:$40 sps:$4 sm:$0xff]  }
  0x6d   :  { %1604 = vmatprep.mubr.bf16.mxu0 %v2649_v51 }
  0x6f   :  { %1579 = vmatpush1.bf16.msra.mxu0 %v2339_v50  ;;  %1483 = vmatpush2.bf16.msra.mxu1 %v2342_v52  ;;  %v2434_v50 = vld [vmem:[%s3235_s1 + $0x51c] ss:$40 sps:$4 sm:$0xff]   ;;  %v2429_v52 = vld [vmem:[%s3235_s1 + $0x20] ss:$40 sps:$4 sm:$0xff]  }
  0x70   :  { %1580 = vmatprep.subr.bf16.mxu0 %v2347_v54  ;;  %1484 = vmatprep.subr.bf16.mxu1 %v2350_v55  ;;  %v2432_v54 = vld [vmem:[%s3235_s1 + $0x518] ss:$40 sps:$4 sm:$0xff]   ;;  %v2437_v55 = vld [vmem:[%s3235_s1 + $0x4d4] ss:$40 sps:$4 sm:$0xff]  }
  0x73   :  { %1581 = vmatpush1.bf16.msra.mxu0 %v2345_v56  ;;  %1485 = vmatpush2.bf16.msra.mxu1 %v2348_v57  ;;  %v2452_v56 = vld [vmem:[%s3235_s1 + $0x5c4] ss:$40 sps:$4 sm:$0xff]   ;;  %v2435_v57 = vld [vmem:[%s3235_s1 + $0x4d0] ss:$40 sps:$4 sm:$0xff]  }
  0x74   :  { %1582 = vmatprep.subr.bf16.mxu0 %v2353_v58  ;;  %1486 = vmatprep.subr.bf16.mxu1 %v2356_v59  ;;  %v2440_v58 = vld [vmem:[%s3235_s1 + $0x484] ss:$40 sps:$4 sm:$0xff]   ;;  %v2438_v59 = vld [vmem:[%s3235_s1 + $0x480] ss:$40 sps:$4 sm:$0xff]  }
  0x77   :  { %1583 = vmatpush1.bf16.msra.mxu0 %v2351_v60  ;;  %1487 = vmatpush2.bf16.msra.mxu1 %v2354_v61  ;;  %v2443_v60 = vld [vmem:[%s3235_s1 + $0x434] ss:$40 sps:$4 sm:$0xff]   ;;  %v2450_v61 = vld [vmem:[%s3235_s1 + $0x5c0] ss:$40 sps:$4 sm:$0xff]  }
  0x78   :  { %1584 = vmatprep.subr.bf16.mxu0 %v2359_v62  ;;  %1488 = vmatprep.subr.bf16.mxu1 %v2362_v63  ;;  %v2458_v62 = vld [vmem:[%s3235_s1 + $0x574] ss:$40 sps:$4 sm:$0xff]  }
  0x79   :  { %v2468_v63 = vld [vmem:[%s3236_s0 + $0x8] ss:$12 sps:$4 sm:$0xff]  }
  0x7b   :  { %1585 = vmatpush1.bf16.msra.mxu0 %v2357_v0  ;;  %1489 = vmatpush2.bf16.msra.mxu1 %v2360_v2  ;;  %v2441_v0 = vld [vmem:[%s3235_s1 + $0x430] ss:$40 sps:$4 sm:$0xff]   ;;  %v2446_v2 = vld [vmem:[%s3235_s1 + $0x3e4] ss:$40 sps:$4 sm:$0xff]  }
  0x7c   :  { %1586 = vmatprep.subr.bf16.mxu0 %v2365_v3  ;;  %1490 = vmatprep.subr.bf16.mxu1 %v2368_v4  ;;  %v2456_v3 = vld [vmem:[%s3235_s1 + $0x570] ss:$40 sps:$4 sm:$0xff]   ;;  %v2464_v4 = vld [vmem:[%s3235_s1 + $0x524] ss:$40 sps:$4 sm:$0xff]  }
  0x7f   :  { %1587 = vmatpush1.bf16.msra.mxu0 %v2363_v5  ;;  %1491 = vmatpush2.bf16.msra.mxu1 %v2366_v6  ;;  %v2444_v5 = vld [vmem:[%s3235_s1 + $0x3e0] ss:$40 sps:$4 sm:$0xff]   ;;  %v2449_v6 = vld [vmem:[%s3235_s1 + $0x394] ss:$40 sps:$4 sm:$0xff]  }
  0x80   :  { %1588 = vmatprep.subr.bf16.mxu0 %v2371_v8  ;;  %1492 = vmatprep.subr.bf16.mxu1 %v2374_v9  ;;  %v2462_v8 = vld [vmem:[%s3235_s1 + $0x520] ss:$40 sps:$4 sm:$0xff]   ;;  %v2447_v9 = vld [vmem:[%s3235_s1 + $0x390] ss:$40 sps:$4 sm:$0xff]  }
  0x83   :  { %1589 = vmatpush2.bf16.msra.mxu0 %v2369_v10  ;;  %1493 = vmatpush2.bf16.msra.mxu1 %v2372_v12  ;;  %v2455_v10 = vld [vmem:[%s3235_s1 + $0x344] ss:$40 sps:$4 sm:$0xff]   ;;  %v2453_v12 = vld [vmem:[%s3235_s1 + $0x340] ss:$40 sps:$4 sm:$0xff]  }
  0x84   :  { %1590 = vmatprep.subr.bf16.mxu0 %v2377_v13  ;;  %1494 = vmatprep.subr.bf16.mxu1 %v2380_v15  ;;  %v2461_v13 = vld [vmem:[%s3235_s1 + $0x2f4] ss:$40 sps:$4 sm:$0xff]   ;;  %v2459_v15 = vld [vmem:[%s3235_s1 + $0x2f0] ss:$40 sps:$4 sm:$0xff]  }
  0x87   :  { %1591 = vmatpush2.bf16.msra.mxu0 %v2375_v16  ;;  %1495 = vmatpush2.bf16.msra.mxu1 %v2378_v17  ;;  %v2467_v16 = vld [vmem:[%s3235_s1 + $0x2a4] ss:$40 sps:$4 sm:$0xff]   ;;  %v2465_v17 = vld [vmem:[%s3235_s1 + $0x2a0] ss:$40 sps:$4 sm:$0xff]  }
  0x88   :  { %1592 = vmatprep.subr.bf16.mxu0 %v2383_v19  ;;  %1496 = vmatprep.subr.bf16.mxu1 %v2386_v20  ;;  %v217_v19 = vlaneseq }
  0x8b   :  { %1593 = vmatpush2.bf16.msra.mxu0 %v2381_v21  ;;  %1497 = vmatpush2.bf16.msra.mxu1 %v2384_v22  ;;  %v3141_v21 = vshrl.u32 %v217_v19, 7 }
  0x8c   :  { %1594 = vmatprep.subr.bf16.mxu0 %v2389_v23  ;;  %1678 = vmatprep.subr.bf16.mxu1 %v2392_v24  ;;  %v3147_v24 = vld [vmem:[%s3237_s2] sm:$0xff] }
  0x8d   :  { %v219_v23 = vsub.s32 0, %v3141_v21 }
  0x8e   :  { %1499 = vmatmul.mubr.bf16.vlgmr.msra.gmra.mxu1 %v2714_v7 }
  0x8f   :  { %1595 = vmatpush2.bf16.msra.mxu0 %v2387_v25  ;;  %1679 = vmatpush1.bf16.msra.mxu1 %v2390_v26 }
  0x90   :  { %1596 = vmatprep.subr.bf16.mxu0 %v2395_v27  ;;  %1680 = vmatprep.subr.bf16.mxu1 %v2398_v28 }
  0x91   :  { %1508 = vmatprep.mubr.bf16.mxu1 %v2728_v11 }
  0x93   :  { %1597 = vmatpush2.bf16.msra.mxu0 %v2393_v29  ;;  %1681 = vmatpush1.bf16.msra.mxu1 %v2396_v30 }
  0x94   :  { %1598 = vmatprep.subr.bf16.mxu0 %v2401_v31  ;;  %1682 = vmatprep.subr.bf16.mxu1 %v2404_v32 }
  0x96   :  { %1509 = vmatmul.mubr.bf16.gmra.mxu1 %v2750_v18 }
  0x97   :  { %1599 = vmatpush2.bf16.msra.mxu0 %v2399_v33  ;;  %1683 = vmatpush1.bf16.msra.mxu1 %v2402_v34 }
  0x98   :  { %1600 = vmatprep.subr.bf16.mxu0 %v2407_v35  ;;  %1684 = vmatprep.subr.bf16.mxu1 %v2410_v36 }
  0x99   :  { %1710 = vmatprep.mubr.bf16.mxu1 %v2649_v51  ;;  %v2422_v51 = vld [vmem:[%s3235_s1 + $0x5bc] ss:$40 sps:$4 sm:$0xff]  }
  0x9b   :  { %1601 = vmatpush2.bf16.msra.mxu0 %v2405_v37  ;;  %1685 = vmatpush1.bf16.msra.mxu1 %v2408_v38 }
  0x9c   :  { %1602 = vmatprep.subr.bf16.mxu0 %v2413_v39  ;;  %1686 = vmatprep.subr.bf16.mxu1 %v2416_v40  ;;  %v227_v39 = vsub.s32 2, %v3141_v21 }
  0x9f   :  { %1603 = vmatpush2.bf16.msra.mxu0 %v2411_v41  ;;  %1687 = vmatpush1.bf16.msra.mxu1 %v2414_v42 }
  0xa0   :  { %1688 = vmatprep.subr.bf16.mxu1 %v2419_v43  ;;  %1635 = vmatprep.subr.bf16.mxu0 %v2422_v51  ;;  %v231_v51 = vsub.s32 3, %v3141_v21 }
  0xa2   :  { %1605 = vmatmul.mubr.bf16.vlgmr.msra.gmra.mxu0 %v2714_v7 }
  0xa3   :  { %1689 = vmatpush1.bf16.msra.mxu1 %v2417_v44  ;;  %1636 = vmatpush1.bf16.msra.mxu0 %v2420_v45 }
  0xa4   :  { %1690 = vmatprep.subr.bf16.mxu1 %v2425_v14  ;;  %1614 = vmatprep.mubr.bf16.mxu0 %v2728_v11 }
  0xa5   :  { %1637 = vmatprep.subr.bf16.mxu0 %v2428_v46 }
  0xa7   :  { %1691 = vmatpush1.bf16.msra.mxu1 %v2423_v47  ;;  %1638 = vmatpush1.bf16.msra.mxu0 %v2426_v48  ;;  %v228_v47 = vrot.slane %v3147_v24, %v227_v39 }
  0xa8   :  { %1692 = vmatprep.subr.bf16.mxu1 %v2431_v49  ;;  %1639 = vmatprep.subr.bf16.mxu0 %v2434_v50 }
  0xaa   :  { %1615 = vmatmul.mubr.bf16.gmra.mxu0 %v2750_v18 }
  0xab   :  { %1693 = vmatpush1.bf16.msra.mxu1 %v2429_v52  ;;  %1640 = vmatpush1.bf16.msra.mxu0 %v2432_v54 }
  0xac   :  { %1694 = vmatprep.subr.bf16.mxu1 %v2437_v55  ;;  %1657 = vmatprep.mubr.bf16.mxu0 %v2469_v1  ;;  %v232_v55 = vrot.slane %v3147_v24, %v231_v51 }
  0xad   :  { %1741 = vmatprep.subr.bf16.mxu0 %v2452_v56 }
  0xaf   :  { %1695 = vmatpush2.bf16.msra.mxu1 %v2435_v57 }
  0xb0   :  { %1696 = vmatprep.subr.bf16.mxu1 %v2440_v58 }
  0xb2   :  { %2130 = vmatmul.mubr.msk.bf16.vlgmr.msra.gmra.mxu0 %vm1247_vm0, %v2468_v63 }
  0xb3   :  { %1697 = vmatpush2.bf16.msra.mxu1 %v2438_v59  ;;  %1667 = vmatprep.mubr.bf16.mxu0 %v2469_v1 }
  0xb4   :  { %1698 = vmatprep.subr.bf16.mxu1 %v2443_v60  ;;  %1742 = vmatpush1.bf16.msra.mxu0 %v2450_v61 }
  0xb5   :  { %1743 = vmatprep.subr.bf16.mxu0 %v2458_v62 }
  0xb7   :  { %1699 = vmatpush2.bf16.msra.mxu1 %v2441_v0 }
  0xb8   :  { %1700 = vmatprep.subr.bf16.mxu1 %v2446_v2  ;;  %1744 = vmatpush1.bf16.msra.mxu0 %v2456_v3 }
  0xb9   :  { %1745 = vmatprep.subr.bf16.mxu0 %v2464_v4 }
  0xba   :  { %2131 = vmatmul.mubr.msk.bf16.gmra.mxu0 %vm1247_vm0, %v2657_v53 }
  0xbb   :  { %1701 = vmatpush2.bf16.msra.mxu1 %v2444_v5  ;;  %1763 = vmatprep.mubr.bf16.mxu0 %v2469_v1 }
  0xbc   :  { %1702 = vmatprep.subr.bf16.mxu1 %v2449_v6  ;;  %1746 = vmatpush1.bf16.msra.mxu0 %v2462_v8 }
  0xbf   :  { %1703 = vmatpush2.bf16.msra.mxu1 %v2447_v9 }
  0xc0   :  { %1704 = vmatprep.subr.bf16.mxu1 %v2455_v10 }
  0xc2   :  { %2132 = vmatmul.mubr.msk.bf16.vlgmr.msra.gmra.mxu0 %vm1247_vm0, %v2468_v63 }
  0xc3   :  { %1705 = vmatpush2.bf16.msra.mxu1 %v2453_v12  ;;  %1773 = vmatprep.mubr.bf16.mxu0 %v2469_v1 }
  0xc4   :  { %1706 = vmatprep.subr.bf16.mxu1 %v2461_v13 }
  0xc7   :  { %1707 = vmatpush2.bf16.msra.mxu1 %v2459_v15 }
  0xc8   :  { %1708 = vmatprep.subr.bf16.mxu1 %v2467_v16 }
  0xca   :  { %2133 = vmatmul.mubr.msk.bf16.gmra.mxu0 %vm1247_vm0, %v2657_v53  ;;  %v223_v53 = vsub.s32 1, %v3141_v21 }
  0xcb   :  { %1709 = vmatpush2.bf16.msra.mxu1 %v2465_v17 }
  0xcc   :  { %v224_v25 = vrot.slane %v3147_v24, %v223_v53 }
  0xce   :  { %1711 = vmatmul.mubr.bf16.vlgmr.msra.gmra.mxu1 %v2714_v7  ;;  %v1341_v1 = vpop.f32.mrf.mxu1 }
  0xcf   :  { %1720 = vmatprep.mubr.bf16.mxu1 %v2728_v11  ;;  %v220_v11 = vrot.slane %v3147_v24, %v219_v23 }
  0xd0   :  { %v1343_v20 = vpop.f32.mrf.mxu1 }
  0xd2   :  { %v1345_v22 = vpop.f32.mrf.mxu1 }
  0xd4   :  { %v1347_v7 = vpop.f32.mrf.mxu1 }
  0xd6   :  { %1721 = vmatmul.mubr.bf16.gmra.mxu1 %v2750_v18  ;;  %v1351_v18 = vpop.f32.mrf.mxu1 }
  0xd8   :  { %v1353_v28 = vpop.f32.mrf.mxu1 }
  0xda   :  { %v1355_v35 = vpop.f32.mrf.mxu1 }
  0xdc   :  { %v1357_v44 = vpop.f32.mrf.mxu1 }
 0x102   :  { %v1288_v26 = vpop.f32.mrf.mxu0 }
 0x103   :  { %v1289_v27 = vadd.f32 %v1288_v26, %v220_v11 }
 0x104   :  { %v1290_v29 = vpop.f32.mrf.mxu0 }
 0x105   :  { %v1291_v30 = vadd.f32 %v1290_v29, %v224_v25  ;;  %v1342_v32 = vadd.f32 %v1341_v1, %v1289_v27 }
 0x106   :  { %v1292_v31 = vpop.f32.mrf.mxu0 }
 0x107   :  { %v1344_v33 = vadd.f32 %v1343_v20, %v1291_v30  ;;  %v1293_v34 = vadd.f32 %v1292_v31, %v220_v11 }
 0x108   :  { %v1294_v36 = vpop.f32.mrf.mxu0 }
 0x109   :  { %v2154_v37 = vpack.c.bf16 %v1344_v33, %v1342_v32  ;;  %v1295_v38 = vadd.f32 %v1294_v36, %v224_v25  ;;  %v1346_v41 = vadd.f32 %v1345_v22, %v1293_v34 }
 0x10a   :  { %v1298_v40 = vpop.f32.mrf.mxu0 }
 0x10b   :  { %1904 = vst [vmem:[%s3238_s3] sm:$0xff] %v2154_v37  ;;  %v1348_v42 = vadd.f32 %v1347_v7, %v1295_v38  ;;  %v1299_v43 = vadd.f32 %v1298_v40, %v220_v11  ;;  %v235_v38 = vsub.s32 4, %v3141_v21  ;;  %v239_v40 = vsub.s32 5, %v3141_v21 }
 0x10c   :  { %v1300_v45 = vpop.f32.mrf.mxu0 }
 0x10d   :  { %v2159_v14 = vpack.c.bf16 %v1348_v42, %v1346_v41  ;;  %v1301_v46 = vadd.f32 %v1300_v45, %v224_v25  ;;  %v1352_v50 = vadd.f32 %v1351_v18, %v1299_v43  ;;  %v236_v41 = vrot.slane %v3147_v24, %v235_v38 }
 0x10e   :  { %v1302_v48 = vpop.f32.mrf.mxu0  ;;  %v1394_v49 = vpop.f32.mrf.mxu1  ;;  %v240_v43 = vrot.slane %v3147_v24, %v239_v40 }
 0x10f   :  { %1909 = vst [vmem:[%s3238_s3 + $0x28] sm:$0xff] %v2159_v14  ;;  %v1354_v52 = vadd.f32 %v1353_v28, %v1301_v46  ;;  %v1303_v54 = vadd.f32 %v1302_v48, %v220_v11  ;;  %v1395_v59 = vadd.f32 %v1394_v49, %v228_v47 }
 0x110   :  { %v1304_v56 = vpop.f32.mrf.mxu0  ;;  %v1396_v57 = vpop.f32.mrf.mxu1 }
 0x111   :  { %v2164_v58 = vpack.c.bf16 %v1354_v52, %v1352_v50  ;;  %v1305_v60 = vadd.f32 %v1304_v56, %v224_v25  ;;  %v1356_v63 = vadd.f32 %v1355_v35, %v1303_v54  ;;  %v1397_v2 = vadd.f32 %v1396_v57, %v232_v55 }
 0x112   :  { %v1398_v61 = vpop.f32.mrf.mxu1  ;;  %v1447_v62 = vpop.f32.mrf.mxu0 }
 0x113   :  { %1914 = vst [vmem:[%s3238_s3 + $0x50] sm:$0xff] %v2164_v58  ;;  %v1358_v0 = vadd.f32 %v1357_v44, %v1305_v60  ;;  %v1448_v6 = vadd.f32 %v1447_v62, %v1395_v59  ;;  %v1399_v12 = vadd.f32 %v1398_v61, %v228_v47 }
 0x114   :  { %v1400_v3 = vpop.f32.mrf.mxu1  ;;  %v1449_v4 = vpop.f32.mrf.mxu0 }
 0x115   :  { %v2169_v5 = vpack.c.bf16 %v1358_v0, %v1356_v63  ;;  %v1450_v8 = vadd.f32 %v1449_v4, %v1397_v2  ;;  %v1401_v13 = vadd.f32 %v1400_v3, %v232_v55 }
 0x116   :  { %v1451_v9 = vpop.f32.mrf.mxu0  ;;  %v1404_v10 = vpop.f32.mrf.mxu1 }
 0x117   :  { %1919 = vst [vmem:[%s3238_s3 + $0x78] sm:$0xff] %v2169_v5  ;;  %v2155_v15 = vpack.c.bf16 %v1450_v8, %v1448_v6  ;;  %v1405_v16 = vadd.f32 %v1404_v10, %v228_v47  ;;  %v1452_v19 = vadd.f32 %v1451_v9, %v1399_v12 }
 0x118   :  { %v1453_v17 = vpop.f32.mrf.mxu0  ;;  %v1406_v1 = vpop.f32.mrf.mxu1 }
 0x119   :  { %1905 = vst [vmem:[%s3238_s3 + $0x8] sm:$0xff] %v2155_v15  ;;  %v1454_v20 = vadd.f32 %v1453_v17, %v1401_v13  ;;  %v1407_v22 = vadd.f32 %v1406_v1, %v232_v55 }
 0x11a   :  { %v1457_v7 = vpop.f32.mrf.mxu0  ;;  %v1408_v11 = vpop.f32.mrf.mxu1 }
 0x11b   :  { %v2160_v18 = vpack.c.bf16 %v1454_v20, %v1452_v19  ;;  %v1458_v25 = vadd.f32 %v1457_v7, %v1405_v16  ;;  %v1409_v26 = vadd.f32 %v1408_v11, %v228_v47  ;;  %v243_v20 = vsub.s32 6, %v3141_v21 }
 0x11c   :  { %v1459_v27 = vpop.f32.mrf.mxu0  ;;  %v1410_v28 = vpop.f32.mrf.mxu1  ;;  %v247_v7 = vsub.s32 7, %v3141_v21 }
 0x11d   :  { %1910 = vst [vmem:[%s3238_s3 + $0x30] sm:$0xff] %v2160_v18  ;;  %v1460_v29 = vadd.f32 %v1459_v27, %v1407_v22  ;;  %v1411_v30 = vadd.f32 %v1410_v28, %v232_v55  ;;  %v244_v18 = vrot.slane %v3147_v24, %v243_v20 }
 0x11e   :  { %v1461_v31 = vpop.f32.mrf.mxu0 }
 0x11f   :  { %v2165_v32 = vpack.c.bf16 %v1460_v29, %v1458_v25  ;;  %v1462_v33 = vadd.f32 %v1461_v31, %v1409_v26  ;;  %v248_v26 = vrot.slane %v3147_v24, %v247_v7 }
 0x120   :  { %v1463_v34 = vpop.f32.mrf.mxu0 }
 0x121   :  { %1915 = vst [vmem:[%s3238_s3 + $0x58] sm:$0xff] %v2165_v32  ;;  %v1464_v35 = vadd.f32 %v1463_v34, %v1411_v30 }
 0x122   :  { %v1553_v37 = vpop.f32.mrf.mxu0 }
 0x123   :  { %v2170_v36 = vpack.c.bf16 %v1464_v35, %v1462_v33 }
 0x124   :  { %v1555_v39 = vpop.f32.mrf.mxu0 }
 0x125   :  { %1920 = vst [vmem:[%s3238_s3 + $0x80] sm:$0xff] %v2170_v36 }
 0x126   :  { %v1557_v42 = vpop.f32.mrf.mxu0 }
 0x128   :  { %v1559_v45 = vpop.f32.mrf.mxu0 }
 0x12a   :  { %v1563_v48 = vpop.f32.mrf.mxu0 }
 0x12c   :  { %v1565_v57 = vpop.f32.mrf.mxu0 }
 0x12e   :  { %v1567_v3 = vpop.f32.mrf.mxu0 }
 0x130   :  { %v1569_v13 = vpop.f32.mrf.mxu0 }
 0x14e   :  { %v1500_v51 = vpop.f32.mrf.mxu1 }
 0x14f   :  { %v1501_v44 = vadd.f32 %v1500_v51, %v236_v41 }
 0x150   :  { %v1502_v14 = vpop.f32.mrf.mxu1 }
 0x151   :  { %v1503_v46 = vadd.f32 %v1502_v14, %v240_v43  ;;  %v1554_v49 = vadd.f32 %v1553_v37, %v1501_v44 }
 0x152   :  { %v1504_v47 = vpop.f32.mrf.mxu1 }
 0x153   :  { %v1556_v50 = vadd.f32 %v1555_v39, %v1503_v46  ;;  %v1505_v52 = vadd.f32 %v1504_v47, %v236_v41 }
 0x154   :  { %v1506_v54 = vpop.f32.mrf.mxu1 }
 0x155   :  { %v2156_v55 = vpack.c.bf16 %v1556_v50, %v1554_v49  ;;  %v1507_v56 = vadd.f32 %v1506_v54, %v240_v43  ;;  %v1558_v59 = vadd.f32 %v1557_v42, %v1505_v52 }
 0x156   :  { %v1510_v58 = vpop.f32.mrf.mxu1 }
 0x157   :  { %1906 = vst [vmem:[%s3238_s3 + $0x10] sm:$0xff] %v2156_v55  ;;  %v1560_v60 = vadd.f32 %v1559_v45, %v1507_v56  ;;  %v1511_v61 = vadd.f32 %v1510_v58, %v236_v41  ;;  %v214_v58 = vld [vmem:[%s3237_s2 + $0x8] sm:$0x3] }
 0x158   :  { %v1512_v62 = vpop.f32.mrf.mxu1 }
 0x159   :  { %v2161_v63 = vpack.c.bf16 %v1560_v60, %v1558_v59  ;;  %v1564_v0 = vadd.f32 %v1563_v48, %v1511_v61  ;;  %v1513_v2 = vadd.f32 %v1512_v62, %v240_v43  ;;  %v252_v60 = vrot.slane %v214_v58, %v219_v23 }
 0x15a   :  { %v1514_v4 = vpop.f32.mrf.mxu1  ;;  %v256_v61 = vrot.slane %v214_v58, %v223_v53 }
 0x15b   :  { %1911 = vst [vmem:[%s3238_s3 + $0x38] sm:$0xff] %v2161_v63  ;;  %v1566_v5 = vadd.f32 %v1565_v57, %v1513_v2  ;;  %v1515_v6 = vadd.f32 %v1514_v4, %v236_v41 }
 0x15c   :  { %v1516_v8 = vpop.f32.mrf.mxu1 }
 0x15d   :  { %v2166_v9 = vpack.c.bf16 %v1566_v5, %v1564_v0  ;;  %v1568_v10 = vadd.f32 %v1567_v3, %v1515_v6  ;;  %v1517_v12 = vadd.f32 %v1516_v8, %v240_v43 }
 0x15f   :  { %1916 = vst [vmem:[%s3238_s3 + $0x60] sm:$0xff] %v2166_v9  ;;  %v1570_v15 = vadd.f32 %v1569_v13, %v1517_v12 }
 0x161   :  { %v2171_v16 = vpack.c.bf16 %v1570_v15, %v1568_v10 }
 0x162   :  { %v1606_v17 = vpop.f32.mrf.mxu0 }
 0x163   :  { %1921 = vst [vmem:[%s3238_s3 + $0x88] sm:$0xff] %v2171_v16  ;;  %v1607_v28 = vadd.f32 %v1606_v17, %v244_v18 }
 0x164   :  { %v1608_v1 = vpop.f32.mrf.mxu0 }
 0x165   :  { %v1609_v30 = vadd.f32 %v1608_v1, %v248_v26 }
 0x166   :  { %v1610_v19 = vpop.f32.mrf.mxu0 }
 0x167   :  { %v1611_v36 = vadd.f32 %v1610_v19, %v244_v18 }
 0x168   :  { %v1612_v22 = vpop.f32.mrf.mxu0 }
 0x169   :  { %v1613_v37 = vadd.f32 %v1612_v22, %v248_v26 }
 0x16a   :  { %v1616_v11 = vpop.f32.mrf.mxu0 }
 0x16b   :  { %v1617_v38 = vadd.f32 %v1616_v11, %v244_v18 }
 0x16c   :  { %v1618_v25 = vpop.f32.mrf.mxu0 }
 0x16d   :  { %v1619_v41 = vadd.f32 %v1618_v25, %v248_v26 }
 0x16e   :  { %v1620_v27 = vpop.f32.mrf.mxu0 }
 0x16f   :  { %v1621_v47 = vadd.f32 %v1620_v27, %v244_v18 }
 0x170   :  { %v1622_v29 = vpop.f32.mrf.mxu0 }
 0x171   :  { %v1623_v48 = vadd.f32 %v1622_v29, %v248_v26 }
 0x172   :  { %v1659_v31 = vpop.f32.mrf.mxu0 }
 0x173   :  { %v1660_v32 = vadd.f32 %v1659_v31, %v1607_v28 }
 0x174   :  { %v1661_v33 = vpop.f32.mrf.mxu0 }
 0x175   :  { %v1662_v34 = vadd.f32 %v1661_v33, %v1609_v30 }
 0x176   :  { %v1663_v35 = vpop.f32.mrf.mxu0 }
 0x177   :  { %v2157_v39 = vpack.c.bf16 %v1662_v34, %v1660_v32  ;;  %v1664_v24 = vadd.f32 %v1663_v35, %v1611_v36 }
 0x178   :  { %v1665_v40 = vpop.f32.mrf.mxu0 }
 0x179   :  { %1907 = vst [vmem:[%s3238_s3 + $0x18] sm:$0xff] %v2157_v39  ;;  %v1666_v42 = vadd.f32 %v1665_v40, %v1613_v37 }
 0x17a   :  { %v1669_v43 = vpop.f32.mrf.mxu0 }
 0x17b   :  { %v2162_v51 = vpack.c.bf16 %v1666_v42, %v1664_v24  ;;  %v1670_v44 = vadd.f32 %v1669_v43, %v1617_v38 }
 0x17c   :  { %v1671_v45 = vpop.f32.mrf.mxu0 }
 0x17d   :  { %1912 = vst [vmem:[%s3238_s3 + $0x40] sm:$0xff] %v2162_v51  ;;  %v1672_v14 = vadd.f32 %v1671_v45, %v1619_v41 }
 0x17e   :  { %v1673_v46 = vpop.f32.mrf.mxu0 }
 0x17f   :  { %v2167_v49 = vpack.c.bf16 %v1672_v14, %v1670_v44  ;;  %v1674_v52 = vadd.f32 %v1673_v46, %v1621_v47 }
 0x180   :  { %v1675_v50 = vpop.f32.mrf.mxu0 }
 0x181   :  { %1917 = vst [vmem:[%s3238_s3 + $0x68] sm:$0xff] %v2167_v49  ;;  %v1676_v54 = vadd.f32 %v1675_v50, %v1623_v48 }
 0x182   :  { %v1765_v55 = vpop.f32.mrf.mxu0 }
 0x183   :  { %v2172_v56 = vpack.c.bf16 %v1676_v54, %v1674_v52 }
 0x184   :  { %v1767_v57 = vpop.f32.mrf.mxu0 }
 0x185   :  { %1922 = vst [vmem:[%s3238_s3 + $0x90] sm:$0xff] %v2172_v56 }
 0x186   :  { %v1769_v59 = vpop.f32.mrf.mxu0 }
 0x188   :  { %v1771_v63 = vpop.f32.mrf.mxu0 }
 0x18a   :  { %v1775_v5 = vpop.f32.mrf.mxu0 }
 0x18c   :  { %v1777_v15 = vpop.f32.mrf.mxu0 }
 0x18e   :  { %v1712_v62 = vpop.f32.mrf.mxu1  ;;  %v1779_v20 = vpop.f32.mrf.mxu0 }
 0x18f   :  { %v1713_v0 = vadd.f32 %v1712_v62, %v252_v60 }
 0x190   :  { %v1714_v2 = vpop.f32.mrf.mxu1  ;;  %v1781_v28 = vpop.f32.mrf.mxu0 }
 0x191   :  { %v1715_v3 = vadd.f32 %v1714_v2, %v256_v61  ;;  %v1766_v6 = vadd.f32 %v1765_v55, %v1713_v0 }
 0x192   :  { %v1716_v4 = vpop.f32.mrf.mxu1 }
 0x193   :  { %v1768_v8 = vadd.f32 %v1767_v57, %v1715_v3  ;;  %v1717_v9 = vadd.f32 %v1716_v4, %v252_v60 }
 0x194   :  { %v1718_v10 = vpop.f32.mrf.mxu1 }
 0x195   :  { %v2158_v12 = vpack.c.bf16 %v1768_v8, %v1766_v6  ;;  %v1719_v13 = vadd.f32 %v1718_v10, %v256_v61  ;;  %v1770_v21 = vadd.f32 %v1769_v59, %v1717_v9 }
 0x196   :  { %v1722_v16 = vpop.f32.mrf.mxu1 }
 0x197   :  { %1908 = vst [vmem:[%s3238_s3 + $0x20] sm:$0xff] %v2158_v12  ;;  %v1772_v23 = vadd.f32 %v1771_v63, %v1719_v13  ;;  %v1723_v53 = vadd.f32 %v1722_v16, %v252_v60 }
 0x198   :  { %v1724_v17 = vpop.f32.mrf.mxu1 }
 0x199   :  { %v2163_v1 = vpack.c.bf16 %v1772_v23, %v1770_v21  ;;  %v1725_v19 = vadd.f32 %v1724_v17, %v256_v61  ;;  %v1776_v7 = vadd.f32 %v1775_v5, %v1723_v53 }
 0x19a   :  { %v1726_v22 = vpop.f32.mrf.mxu1 }
 0x19b   :  { %1913 = vst [vmem:[%s3238_s3 + $0x48] sm:$0xff] %v2163_v1  ;;  %v1778_v11 = vadd.f32 %v1777_v15, %v1725_v19  ;;  %v1727_v18 = vadd.f32 %v1726_v22, %v252_v60 }
 0x19c   :  { %v1728_v25 = vpop.f32.mrf.mxu1 }
 0x19d   :  { %v2168_v26 = vpack.c.bf16 %v1778_v11, %v1776_v7  ;;  %v1729_v27 = vadd.f32 %v1728_v25, %v256_v61  ;;  %v1780_v29 = vadd.f32 %v1779_v20, %v1727_v18 }
 0x19f   :  { %1918 = vst [vmem:[%s3238_s3 + $0x70] sm:$0xff] %v2168_v26  ;;  %v1782_v30 = vadd.f32 %v1781_v28, %v1729_v27 }
 0x1a1   :  { %v2173_v31 = vpack.c.bf16 %v1782_v30, %v1780_v29 }
 0x1a3   :  { %1923 = vst [vmem:[%s3238_s3 + $0x98] sm:$0xff] %v2173_v31 }

</bundles_post_ra>
